<compile_context>
chip_gen: v5e
topology: v5e:2x2
jax: 0.10.0
libtpu: 0.0.40
codegen_flags: <defaults>
</compile_context>

<pallas_src>
import jax
import jax.numpy as jnp
from jax import lax
from jax.experimental import pallas as pl
from jax.experimental.pallas import tpu as pltpu


C0 = 20      # conv0 output channels
C1 = 50      # conv1 output channels
C2P = 512    # conv2 output channels, padded 500 -> 512 (lane-dense h2 store)
C3P = 128    # conv3 output channels, padded 2 -> 128 (lane-dense h3 store)


# ------------------------------ fused kernel --------------------------------

def _fused_kernel_factory(N):
    """Build the fused per-stream kernel for batch size N (static)."""
    M0 = N * 144   # rows of each phase-split conv0 patch matrix (N * 12 * 12)

    def kernel(x0_ref, w0_ref, b0_ref, w1_ref, b1_ref, w2_ref, b2_ref,
               w3_ref, b3_ref, alpha_ref, h2_ref, h3_ref):
        f32 = jnp.float32
        bf16 = jnp.bfloat16

        # ---- conv0 (+bias) on the 4 pooling phases; pool0 = max over phases ----
        w0 = w0_ref[0]                                   # (25, C0) bf16 (per stream)
        b0 = b0_ref[0]                                   # (1, C0)  f32
        y_ph = []
        for p in range(4):
            xp = x0_ref[0, p].astype(bf16)               # (M0, 25)
            y_ph.append(jnp.dot(xp, w0, preferred_element_type=f32))
        # h0 rows ordered (n, io, jo) over the pooled 12x12 grid.
        h0 = jnp.maximum(jnp.maximum(y_ph[0], y_ph[1]),
                         jnp.maximum(y_ph[2], y_ph[3])) + b0        # (M0, C0)

        # ---- conv1 (+bias): in-kernel im2col over the 12x12 grid ----
        w1 = w1_ref[...]                                 # (500, C1) bf16
        b1 = b1_ref[...]                                 # (1, C1)   f32
        patches = []
        for n in range(N):
            h0n = h0[n * 144:(n + 1) * 144, :]           # (144, C0)
            # taps ordered (di, dj); slice row r of a tap maps to conv output
            # position r = i1*12 + j1 (valid for i1, j1 in [0, 8)).
            taps = [h0n[di * 12 + dj: di * 12 + dj + 92, :]
                    for di in range(5) for dj in range(5)]
            patches.append(jnp.concatenate(taps, axis=1))           # (92, 500)
        patch1 = jnp.concatenate(patches, axis=0)                   # (N*92, 500)
        a1 = jnp.dot(patch1.astype(bf16), w1,
                     preferred_element_type=f32) + b1               # (N*92, C1)

        # ---- pool1 (2x2): dense max of 4 shifted row views ----
        # pooled value for (n, io, jo) lives at dense row n*92 + 24*io + 2*jo.
        T = N * 92 - 13
        d = jnp.maximum(jnp.maximum(a1[0:T, :], a1[1:T + 1, :]),
                        jnp.maximum(a1[12:T + 12, :], a1[13:T + 13, :]))

        # ---- gather pooled 4x4 grid + flatten into the conv2 patch (N, 800) ----
        rows2 = []
        for n in range(N):
            img = [d[n * 92 + 24 * io + 2 * jo:
                     n * 92 + 24 * io + 2 * jo + 1, :]              # (1, C1)
                   for io in range(4) for jo in range(4)]
            rows2.append(jnp.concatenate(img, axis=1))              # (1, 800)
        p2 = jnp.concatenate(rows2, axis=0)                         # (N, 800)

        # ---- conv2 (4x4 == fully connected) + PReLU ----
        z2 = jnp.dot(p2.astype(bf16), w2_ref[...],
                     preferred_element_type=f32) + b2_ref[...]      # (N, C2P)
        alpha = alpha_ref[0]                                        # SMEM scalar
        h2 = jnp.where(z2 >= 0.0, z2, alpha * z2)
        h2_ref[0] = h2

        # ---- conv3 (1x1) ----
        h3 = jnp.dot(h2.astype(bf16), w3_ref[...],
                     preferred_element_type=f32) + b3_ref[...]      # (N, C3P)
        h3_ref[0] = h3

    return kernel, M0


# ------------------------------ wrapper (glue) --------------------------------

def _phase_patches(x):
    """conv0 im2col of a single-channel (N, 28, 28) stream, split by pool phase.

    Returns (4, N*144, 25): phase = (pi, pj) of the 2x2 pooling window, rows
    ordered (n, io, jo) over the pooled 12x12 grid, K ordered (di, dj).
    """
    N = x.shape[0]
    cols = [x[:, di:di + 24, dj:dj + 24] for di in range(5) for dj in range(5)]
    p = jnp.stack(cols, axis=-1)                    # (N, 24, 24, 25)
    p = p.reshape(N, 12, 2, 12, 2, 25)
    p = jnp.transpose(p, (2, 4, 0, 1, 3, 5))        # (pi, pj, N, io, jo, K)
    return p.reshape(4, N * 144, 25)


def _conv_mat(w):
    """OIHW weight -> (KH*KW*CIN, COUT) matmul matrix (K ordered (kh, kw, cin))."""
    cout, cin, kh, kw = w.shape
    return jnp.transpose(w, (2, 3, 1, 0)).reshape(kh * kw * cin, cout)


def codis28x28_forward(params, x_a, x_b):
    """x_a, x_b: (N, 1, 28, 28) NCHW, exactly like the PyTorch module."""
    N = x_a.shape[0]
    M0 = N * 144
    f32, bf16 = jnp.float32, jnp.bfloat16

    xa = x_a[:, 0].astype(f32)
    xb = x_b[:, 0].astype(f32)
    x0 = jnp.stack([_phase_patches(xa), _phase_patches(xb)], axis=0)  # (2,4,M0,25)

    # Weights in matmul layout; bf16 MXU inputs; outputs padded lane-dense.
    w0 = jnp.stack([_conv_mat(params["w0a"]),
                    _conv_mat(params["w0b"])], 0).astype(bf16)        # (2, 25, 20)
    b0 = jnp.stack([params["b0a"], params["b0b"]], 0).reshape(2, 1, C0).astype(f32)
    w1 = _conv_mat(params["w1"]).astype(bf16)                          # (500, 50)
    b1 = params["b1"].reshape(1, C1).astype(f32)
    w2 = jnp.zeros((800, C2P), f32).at[:, :500].set(
        _conv_mat(params["w2"])).astype(bf16)                          # (800, 512)
    b2 = jnp.zeros((1, C2P), f32).at[:, :500].set(params["b2"].reshape(1, 500))
    w3 = jnp.zeros((512, C3P), f32).at[:500, :2].set(
        params["w3"].reshape(2, 500).T).astype(bf16)                   # (512, 128)
    b3 = jnp.zeros((1, C3P), f32).at[:, :2].set(params["b3"].reshape(1, 2))
    alpha = jnp.asarray(params["prelu2_alpha"], f32).reshape(1)

    kernel, _ = _fused_kernel_factory(N)

    h2_out, h3_out = pl.pallas_call(
        kernel,
        out_shape=(jax.ShapeDtypeStruct((2, N, C2P), f32),
                   jax.ShapeDtypeStruct((2, N, C3P), f32)),
        grid=(2,),
        in_specs=[
            pl.BlockSpec((1, 4, M0, 25), lambda s: (s, 0, 0, 0)),   # conv0 patches
            pl.BlockSpec((1, 25, C0), lambda s: (s, 0, 0)),          # w0 (per stream)
            pl.BlockSpec((1, 1, C0), lambda s: (s, 0, 0)),           # b0 (per stream)
            pl.BlockSpec((500, C1), lambda s: (0, 0)),               # w1 (shared)
            pl.BlockSpec((1, C1), lambda s: (0, 0)),                 # b1
            pl.BlockSpec((800, C2P), lambda s: (0, 0)),              # w2 (shared)
            pl.BlockSpec((1, C2P), lambda s: (0, 0)),                # b2
            pl.BlockSpec((512, C3P), lambda s: (0, 0)),              # w3 (shared)
            pl.BlockSpec((1, C3P), lambda s: (0, 0)),                # b3
            pl.BlockSpec(memory_space=pltpu.MemorySpace.SMEM),       # prelu alpha
        ],
        out_specs=(pl.BlockSpec((1, N, C2P), lambda s: (s, 0, 0)),
                   pl.BlockSpec((1, N, C3P), lambda s: (s, 0, 0))),
        compiler_params=pltpu.CompilerParams(
            dimension_semantics=("parallel",)),
    )(x0, w0, b0, w1, b1, w2, b2, w3, b3, alpha)

    h3 = h3_out.reshape(2 * N, C3P)[:, :2]                     # (2N, 2)
    h2_a = h2_out[0, :, :500].reshape(N, 500, 1, 1)            # PyTorch NCHW shape
    h2_b = h2_out[1, :, :500].reshape(N, 500, 1, 1)
    return h3, h2_a, h2_b


# ------------------------------- Parameters ----------------------------------

def init_params(key):
    ks = jax.random.split(key, 10)

    def conv_param(kw_, kb_, cout, cin, kh, kw):
        fan_in = cin * kh * kw
        bound = 1.0 / float(fan_in) ** 0.5
        w = jax.random.uniform(kw_, (cout, cin, kh, kw), jnp.float32, -bound, bound)
        b = jax.random.uniform(kb_, (cout,), jnp.float32, -bound, bound)
        return w, b

    p = {}
    p["w0a"], p["b0a"] = conv_param(ks[0], ks[1], 20, 1, 5, 5)
    p["w0b"], p["b0b"] = conv_param(ks[2], ks[3], 20, 1, 5, 5)
    p["w1"], p["b1"] = conv_param(ks[4], ks[5], 50, 20, 5, 5)
    p["w2"], p["b2"] = conv_param(ks[6], ks[7], 500, 50, 4, 4)
    p["w3"], p["b3"] = conv_param(ks[8], ks[9], 2, 500, 1, 1)
    p["prelu2_alpha"] = jnp.array(0.25, jnp.float32)  # nn.PReLU() default
    return p


# ------------------------------ Pure-JAX reference ---------------------------

def _ref_forward(params, x_a, x_b):
    dn = ("NCHW", "OIHW", "NCHW")

    def conv(x, w, b):
        y = lax.conv_general_dilated(x, w, (1, 1), "VALID", dimension_numbers=dn,
                                     precision=lax.Precision.HIGHEST)
        return y + b.reshape(1, -1, 1, 1)

    def pool(x):
        return lax.reduce_window(x, -jnp.inf, lax.max,
                                 (1, 1, 2, 2), (1, 1, 2, 2), "VALID")

    def prelu(x, a):
        return jnp.where(x >= 0, x, a * x)

    h0_a = pool(conv(x_a, params["w0a"], params["b0a"]))
    h0_b = pool(conv(x_b, params["w0b"], params["b0b"]))
    h1_a = pool(conv(h0_a, params["w1"], params["b1"]))
    h1_b = pool(conv(h0_b, params["w1"], params["b1"]))
    h2_a = prelu(conv(h1_a, params["w2"], params["b2"]), params["prelu2_alpha"])
    h2_b = prelu(conv(h1_b, params["w2"], params["b2"]), params["prelu2_alpha"])
    h2 = jnp.concatenate([h2_a, h2_b], axis=0)
    h3 = conv(h2, params["w3"], params["b3"])
    return jnp.squeeze(h3), h2_a, h2_b


# ----------------------------------- Main -------------------------------------

if __name__ == "__main__":
    key = jax.random.PRNGKey(0)
    kp, ka, kb = jax.random.split(key, 3)
    params = init_params(kp)

    N = 2  # small batch; 28x28x1 inputs are fixed by the module architecture
    x_a = jax.random.normal(ka, (N, 1, 28, 28), jnp.float32)
    x_b = jax.random.normal(kb, (N, 1, 28, 28), jnp.float32)

    fwd = jax.jit(codis28x28_forward)
    h3, h2_a, h2_b = jax.block_until_ready(fwd(params, x_a, x_b))

    assert h3.shape == (2 * N, 2)
    assert h2_a.shape == (N, 500, 1, 1)
    assert h2_b.shape == (N, 500, 1, 1)

    r3, r2a, r2b = _ref_forward(params, x_a, x_b)
    assert jnp.allclose(h3, r3, rtol=2e-2, atol=2e-2)
    assert jnp.allclose(h2_a, r2a, rtol=2e-2, atol=2e-2)
    assert jnp.allclose(h2_b, r2b, rtol=2e-2, atol=2e-2)

    print("KERNEL_OK")
</pallas_src>

<mosaic_0001>
module attributes {stable_mosaic.version = 11 : i64} {
  func.func @kernel(%arg0: i32, %arg1: memref<1x4x288x25xf32, #tpu.memory_space<vmem>>, %arg2: memref<1x25x20xbf16, #tpu.memory_space<vmem>>, %arg3: memref<1x1x20xf32, #tpu.memory_space<vmem>>, %arg4: memref<500x50xbf16, #tpu.memory_space<vmem>>, %arg5: memref<1x50xf32, #tpu.memory_space<vmem>>, %arg6: memref<800x512xbf16, #tpu.memory_space<vmem>>, %arg7: memref<1x512xf32, #tpu.memory_space<vmem>>, %arg8: memref<512x128xbf16, #tpu.memory_space<vmem>>, %arg9: memref<1x128xf32, #tpu.memory_space<vmem>>, %arg10: memref<1xf32, #tpu.memory_space<smem>>, %arg11: memref<1x2x512xf32, #tpu.memory_space<vmem>>, %arg12: memref<1x2x128xf32, #tpu.memory_space<vmem>>) attributes {dimension_semantics = [#tpu.dimension_semantics<parallel>], iteration_bounds = array<i64: 2>, scalar_prefetch = 0 : i64, scratch_operands = 0 : i64, tpu.core_type = #tpu.core_type<tc>, window_params = [{transform_indices = @transform_0, window_bounds = array<i64: 1, 4, 288, 25>}, {transform_indices = @transform_1, window_bounds = array<i64: 1, 25, 20>}, {transform_indices = @transform_2, window_bounds = array<i64: 1, 1, 20>}, {pipeline_mode = #tpu.pipeline_mode<synchronous>, transform_indices = @transform_3, window_bounds = array<i64: 500, 50>}, {pipeline_mode = #tpu.pipeline_mode<synchronous>, transform_indices = @transform_4, window_bounds = array<i64: 1, 50>}, {pipeline_mode = #tpu.pipeline_mode<synchronous>, transform_indices = @transform_5, window_bounds = array<i64: 800, 512>}, {pipeline_mode = #tpu.pipeline_mode<synchronous>, transform_indices = @transform_6, window_bounds = array<i64: 1, 512>}, {pipeline_mode = #tpu.pipeline_mode<synchronous>, transform_indices = @transform_7, window_bounds = array<i64: 512, 128>}, {pipeline_mode = #tpu.pipeline_mode<synchronous>, transform_indices = @transform_8, window_bounds = array<i64: 1, 128>}, {transform_indices = @transform_9, window_bounds = array<i64: 1>}, {transform_indices = @transform_10, window_bounds = array<i64: 1, 2, 512>}, {transform_indices = @transform_11, window_bounds = array<i64: 1, 2, 128>}]} {
    %c0 = arith.constant 0 : index
    %c0_0 = arith.constant 0 : index
    %c0_1 = arith.constant 0 : index
    %0 = vector.load %arg2[%c0, %c0_0, %c0_1] : memref<1x25x20xbf16, #tpu.memory_space<vmem>>, vector<1x25x20xbf16>
    %1 = vector.shape_cast %0 : vector<1x25x20xbf16> to vector<25x20xbf16>
    %c0_2 = arith.constant 0 : index
    %c0_3 = arith.constant 0 : index
    %c0_4 = arith.constant 0 : index
    %2 = vector.load %arg3[%c0_2, %c0_3, %c0_4] : memref<1x1x20xf32, #tpu.memory_space<vmem>>, vector<1x1x20xf32>
    %3 = vector.shape_cast %2 : vector<1x1x20xf32> to vector<1x20xf32>
    %c0_5 = arith.constant 0 : index
    %c0_6 = arith.constant 0 : index
    %c0_7 = arith.constant 0 : index
    %c0_8 = arith.constant 0 : index
    %4 = vector.load %arg1[%c0_5, %c0_6, %c0_7, %c0_8] : memref<1x4x288x25xf32, #tpu.memory_space<vmem>>, vector<1x1x288x25xf32>
    %5 = vector.shape_cast %4 : vector<1x1x288x25xf32> to vector<288x25xf32>
    %6 = arith.truncf %5 : vector<288x25xf32> to vector<288x25xbf16>
    %cst = arith.constant dense<0.000000e+00> : vector<288x20xf32>
    %7 = tpu.matmul %6, %1, %cst {dimension_numbers = #tpu.dot_dimension_numbers<[1], [0], [0], [1], [0, 0, 1, 1], [], []>} : vector<288x25xbf16>, vector<25x20xbf16>, vector<288x20xf32> -> vector<288x20xf32>
    %c0_9 = arith.constant 0 : index
    %c1 = arith.constant 1 : index
    %c0_10 = arith.constant 0 : index
    %c0_11 = arith.constant 0 : index
    %8 = vector.load %arg1[%c0_9, %c1, %c0_10, %c0_11] : memref<1x4x288x25xf32, #tpu.memory_space<vmem>>, vector<1x1x288x25xf32>
    %9 = vector.shape_cast %8 : vector<1x1x288x25xf32> to vector<288x25xf32>
    %10 = arith.truncf %9 : vector<288x25xf32> to vector<288x25xbf16>
    %cst_12 = arith.constant dense<0.000000e+00> : vector<288x20xf32>
    %11 = tpu.matmul %10, %1, %cst_12 {dimension_numbers = #tpu.dot_dimension_numbers<[1], [0], [0], [1], [0, 0, 1, 1], [], []>} : vector<288x25xbf16>, vector<25x20xbf16>, vector<288x20xf32> -> vector<288x20xf32>
    %c0_13 = arith.constant 0 : index
    %c2 = arith.constant 2 : index
    %c0_14 = arith.constant 0 : index
    %c0_15 = arith.constant 0 : index
    %12 = vector.load %arg1[%c0_13, %c2, %c0_14, %c0_15] : memref<1x4x288x25xf32, #tpu.memory_space<vmem>>, vector<1x1x288x25xf32>
    %13 = vector.shape_cast %12 : vector<1x1x288x25xf32> to vector<288x25xf32>
    %14 = arith.truncf %13 : vector<288x25xf32> to vector<288x25xbf16>
    %cst_16 = arith.constant dense<0.000000e+00> : vector<288x20xf32>
    %15 = tpu.matmul %14, %1, %cst_16 {dimension_numbers = #tpu.dot_dimension_numbers<[1], [0], [0], [1], [0, 0, 1, 1], [], []>} : vector<288x25xbf16>, vector<25x20xbf16>, vector<288x20xf32> -> vector<288x20xf32>
    %c0_17 = arith.constant 0 : index
    %c3 = arith.constant 3 : index
    %c0_18 = arith.constant 0 : index
    %c0_19 = arith.constant 0 : index
    %16 = vector.load %arg1[%c0_17, %c3, %c0_18, %c0_19] : memref<1x4x288x25xf32, #tpu.memory_space<vmem>>, vector<1x1x288x25xf32>
    %17 = vector.shape_cast %16 : vector<1x1x288x25xf32> to vector<288x25xf32>
    %18 = arith.truncf %17 : vector<288x25xf32> to vector<288x25xbf16>
    %cst_20 = arith.constant dense<0.000000e+00> : vector<288x20xf32>
    %19 = tpu.matmul %18, %1, %cst_20 {dimension_numbers = #tpu.dot_dimension_numbers<[1], [0], [0], [1], [0, 0, 1, 1], [], []>} : vector<288x25xbf16>, vector<25x20xbf16>, vector<288x20xf32> -> vector<288x20xf32>
    %20 = arith.maximumf %7, %11 : vector<288x20xf32>
    %21 = arith.maximumf %15, %19 : vector<288x20xf32>
    %22 = arith.maximumf %20, %21 : vector<288x20xf32>
    %23 = vector.broadcast %3 : vector<1x20xf32> to vector<288x20xf32>
    %24 = arith.addf %22, %23 : vector<288x20xf32>
    %c0_21 = arith.constant 0 : index
    %c0_22 = arith.constant 0 : index
    %25 = vector.load %arg4[%c0_21, %c0_22] : memref<500x50xbf16, #tpu.memory_space<vmem>>, vector<500x50xbf16>
    %c0_23 = arith.constant 0 : index
    %c0_24 = arith.constant 0 : index
    %26 = vector.load %arg5[%c0_23, %c0_24] : memref<1x50xf32, #tpu.memory_space<vmem>>, vector<1x50xf32>
    %27 = vector.extract_strided_slice %24 {offsets = [0, 0], sizes = [144, 20], strides = [1, 1]} : vector<288x20xf32> to vector<144x20xf32>
    %28 = vector.extract_strided_slice %27 {offsets = [0, 0], sizes = [92, 20], strides = [1, 1]} : vector<144x20xf32> to vector<92x20xf32>
    %29 = vector.extract_strided_slice %27 {offsets = [1, 0], sizes = [92, 20], strides = [1, 1]} : vector<144x20xf32> to vector<92x20xf32>
    %30 = vector.extract_strided_slice %27 {offsets = [2, 0], sizes = [92, 20], strides = [1, 1]} : vector<144x20xf32> to vector<92x20xf32>
    %31 = vector.extract_strided_slice %27 {offsets = [3, 0], sizes = [92, 20], strides = [1, 1]} : vector<144x20xf32> to vector<92x20xf32>
    %32 = vector.extract_strided_slice %27 {offsets = [4, 0], sizes = [92, 20], strides = [1, 1]} : vector<144x20xf32> to vector<92x20xf32>
    %33 = vector.extract_strided_slice %27 {offsets = [12, 0], sizes = [92, 20], strides = [1, 1]} : vector<144x20xf32> to vector<92x20xf32>
    %34 = vector.extract_strided_slice %27 {offsets = [13, 0], sizes = [92, 20], strides = [1, 1]} : vector<144x20xf32> to vector<92x20xf32>
    %35 = vector.extract_strided_slice %27 {offsets = [14, 0], sizes = [92, 20], strides = [1, 1]} : vector<144x20xf32> to vector<92x20xf32>
    %36 = vector.extract_strided_slice %27 {offsets = [15, 0], sizes = [92, 20], strides = [1, 1]} : vector<144x20xf32> to vector<92x20xf32>
    %37 = vector.extract_strided_slice %27 {offsets = [16, 0], sizes = [92, 20], strides = [1, 1]} : vector<144x20xf32> to vector<92x20xf32>
    %38 = vector.extract_strided_slice %27 {offsets = [24, 0], sizes = [92, 20], strides = [1, 1]} : vector<144x20xf32> to vector<92x20xf32>
    %39 = vector.extract_strided_slice %27 {offsets = [25, 0], sizes = [92, 20], strides = [1, 1]} : vector<144x20xf32> to vector<92x20xf32>
    %40 = vector.extract_strided_slice %27 {offsets = [26, 0], sizes = [92, 20], strides = [1, 1]} : vector<144x20xf32> to vector<92x20xf32>
    %41 = vector.extract_strided_slice %27 {offsets = [27, 0], sizes = [92, 20], strides = [1, 1]} : vector<144x20xf32> to vector<92x20xf32>
    %42 = vector.extract_strided_slice %27 {offsets = [28, 0], sizes = [92, 20], strides = [1, 1]} : vector<144x20xf32> to vector<92x20xf32>
    %43 = vector.extract_strided_slice %27 {offsets = [36, 0], sizes = [92, 20], strides = [1, 1]} : vector<144x20xf32> to vector<92x20xf32>
    %44 = vector.extract_strided_slice %27 {offsets = [37, 0], sizes = [92, 20], strides = [1, 1]} : vector<144x20xf32> to vector<92x20xf32>
    %45 = vector.extract_strided_slice %27 {offsets = [38, 0], sizes = [92, 20], strides = [1, 1]} : vector<144x20xf32> to vector<92x20xf32>
    %46 = vector.extract_strided_slice %27 {offsets = [39, 0], sizes = [92, 20], strides = [1, 1]} : vector<144x20xf32> to vector<92x20xf32>
    %47 = vector.extract_strided_slice %27 {offsets = [40, 0], sizes = [92, 20], strides = [1, 1]} : vector<144x20xf32> to vector<92x20xf32>
    %48 = vector.extract_strided_slice %27 {offsets = [48, 0], sizes = [92, 20], strides = [1, 1]} : vector<144x20xf32> to vector<92x20xf32>
    %49 = vector.extract_strided_slice %27 {offsets = [49, 0], sizes = [92, 20], strides = [1, 1]} : vector<144x20xf32> to vector<92x20xf32>
    %50 = vector.extract_strided_slice %27 {offsets = [50, 0], sizes = [92, 20], strides = [1, 1]} : vector<144x20xf32> to vector<92x20xf32>
    %51 = vector.extract_strided_slice %27 {offsets = [51, 0], sizes = [92, 20], strides = [1, 1]} : vector<144x20xf32> to vector<92x20xf32>
    %52 = vector.extract_strided_slice %27 {offsets = [52, 0], sizes = [92, 20], strides = [1, 1]} : vector<144x20xf32> to vector<92x20xf32>
    %53 = tpu.concatenate %28, %29, %30, %31, %32, %33, %34, %35, %36, %37, %38, %39, %40, %41, %42, %43 in 1 : vector<92x20xf32>, vector<92x20xf32>, vector<92x20xf32>, vector<92x20xf32>, vector<92x20xf32>, vector<92x20xf32>, vector<92x20xf32>, vector<92x20xf32>, vector<92x20xf32>, vector<92x20xf32>, vector<92x20xf32>, vector<92x20xf32>, vector<92x20xf32>, vector<92x20xf32>, vector<92x20xf32>, vector<92x20xf32> -> vector<92x320xf32>
    %54 = tpu.concatenate %44, %45, %46, %47, %48, %49, %50, %51, %52 in 1 : vector<92x20xf32>, vector<92x20xf32>, vector<92x20xf32>, vector<92x20xf32>, vector<92x20xf32>, vector<92x20xf32>, vector<92x20xf32>, vector<92x20xf32>, vector<92x20xf32> -> vector<92x180xf32>
    %55 = tpu.concatenate %53, %54 in 1 : vector<92x320xf32>, vector<92x180xf32> -> vector<92x500xf32>
    %56 = vector.extract_strided_slice %24 {offsets = [144, 0], sizes = [144, 20], strides = [1, 1]} : vector<288x20xf32> to vector<144x20xf32>
    %57 = vector.extract_strided_slice %56 {offsets = [0, 0], sizes = [92, 20], strides = [1, 1]} : vector<144x20xf32> to vector<92x20xf32>
    %58 = vector.extract_strided_slice %56 {offsets = [1, 0], sizes = [92, 20], strides = [1, 1]} : vector<144x20xf32> to vector<92x20xf32>
    %59 = vector.extract_strided_slice %56 {offsets = [2, 0], sizes = [92, 20], strides = [1, 1]} : vector<144x20xf32> to vector<92x20xf32>
    %60 = vector.extract_strided_slice %56 {offsets = [3, 0], sizes = [92, 20], strides = [1, 1]} : vector<144x20xf32> to vector<92x20xf32>
    %61 = vector.extract_strided_slice %56 {offsets = [4, 0], sizes = [92, 20], strides = [1, 1]} : vector<144x20xf32> to vector<92x20xf32>
    %62 = vector.extract_strided_slice %56 {offsets = [12, 0], sizes = [92, 20], strides = [1, 1]} : vector<144x20xf32> to vector<92x20xf32>
    %63 = vector.extract_strided_slice %56 {offsets = [13, 0], sizes = [92, 20], strides = [1, 1]} : vector<144x20xf32> to vector<92x20xf32>
    %64 = vector.extract_strided_slice %56 {offsets = [14, 0], sizes = [92, 20], strides = [1, 1]} : vector<144x20xf32> to vector<92x20xf32>
    %65 = vector.extract_strided_slice %56 {offsets = [15, 0], sizes = [92, 20], strides = [1, 1]} : vector<144x20xf32> to vector<92x20xf32>
    %66 = vector.extract_strided_slice %56 {offsets = [16, 0], sizes = [92, 20], strides = [1, 1]} : vector<144x20xf32> to vector<92x20xf32>
    %67 = vector.extract_strided_slice %56 {offsets = [24, 0], sizes = [92, 20], strides = [1, 1]} : vector<144x20xf32> to vector<92x20xf32>
    %68 = vector.extract_strided_slice %56 {offsets = [25, 0], sizes = [92, 20], strides = [1, 1]} : vector<144x20xf32> to vector<92x20xf32>
    %69 = vector.extract_strided_slice %56 {offsets = [26, 0], sizes = [92, 20], strides = [1, 1]} : vector<144x20xf32> to vector<92x20xf32>
    %70 = vector.extract_strided_slice %56 {offsets = [27, 0], sizes = [92, 20], strides = [1, 1]} : vector<144x20xf32> to vector<92x20xf32>
    %71 = vector.extract_strided_slice %56 {offsets = [28, 0], sizes = [92, 20], strides = [1, 1]} : vector<144x20xf32> to vector<92x20xf32>
    %72 = vector.extract_strided_slice %56 {offsets = [36, 0], sizes = [92, 20], strides = [1, 1]} : vector<144x20xf32> to vector<92x20xf32>
    %73 = vector.extract_strided_slice %56 {offsets = [37, 0], sizes = [92, 20], strides = [1, 1]} : vector<144x20xf32> to vector<92x20xf32>
    %74 = vector.extract_strided_slice %56 {offsets = [38, 0], sizes = [92, 20], strides = [1, 1]} : vector<144x20xf32> to vector<92x20xf32>
    %75 = vector.extract_strided_slice %56 {offsets = [39, 0], sizes = [92, 20], strides = [1, 1]} : vector<144x20xf32> to vector<92x20xf32>
    %76 = vector.extract_strided_slice %56 {offsets = [40, 0], sizes = [92, 20], strides = [1, 1]} : vector<144x20xf32> to vector<92x20xf32>
    %77 = vector.extract_strided_slice %56 {offsets = [48, 0], sizes = [92, 20], strides = [1, 1]} : vector<144x20xf32> to vector<92x20xf32>
    %78 = vector.extract_strided_slice %56 {offsets = [49, 0], sizes = [92, 20], strides = [1, 1]} : vector<144x20xf32> to vector<92x20xf32>
    %79 = vector.extract_strided_slice %56 {offsets = [50, 0], sizes = [92, 20], strides = [1, 1]} : vector<144x20xf32> to vector<92x20xf32>
    %80 = vector.extract_strided_slice %56 {offsets = [51, 0], sizes = [92, 20], strides = [1, 1]} : vector<144x20xf32> to vector<92x20xf32>
    %81 = vector.extract_strided_slice %56 {offsets = [52, 0], sizes = [92, 20], strides = [1, 1]} : vector<144x20xf32> to vector<92x20xf32>
    %82 = tpu.concatenate %57, %58, %59, %60, %61, %62, %63, %64, %65, %66, %67, %68, %69, %70, %71, %72 in 1 : vector<92x20xf32>, vector<92x20xf32>, vector<92x20xf32>, vector<92x20xf32>, vector<92x20xf32>, vector<92x20xf32>, vector<92x20xf32>, vector<92x20xf32>, vector<92x20xf32>, vector<92x20xf32>, vector<92x20xf32>, vector<92x20xf32>, vector<92x20xf32>, vector<92x20xf32>, vector<92x20xf32>, vector<92x20xf32> -> vector<92x320xf32>
    %83 = tpu.concatenate %73, %74, %75, %76, %77, %78, %79, %80, %81 in 1 : vector<92x20xf32>, vector<92x20xf32>, vector<92x20xf32>, vector<92x20xf32>, vector<92x20xf32>, vector<92x20xf32>, vector<92x20xf32>, vector<92x20xf32>, vector<92x20xf32> -> vector<92x180xf32>
    %84 = tpu.concatenate %82, %83 in 1 : vector<92x320xf32>, vector<92x180xf32> -> vector<92x500xf32>
    %85 = tpu.concatenate %55, %84 in 0 : vector<92x500xf32>, vector<92x500xf32> -> vector<184x500xf32>
    %86 = arith.truncf %85 : vector<184x500xf32> to vector<184x500xbf16>
    %cst_25 = arith.constant dense<0.000000e+00> : vector<184x50xf32>
    %87 = tpu.matmul %86, %25, %cst_25 {dimension_numbers = #tpu.dot_dimension_numbers<[1], [0], [0], [1], [0, 0, 1, 1], [], []>} : vector<184x500xbf16>, vector<500x50xbf16>, vector<184x50xf32> -> vector<184x50xf32>
    %88 = vector.broadcast %26 : vector<1x50xf32> to vector<184x50xf32>
    %89 = arith.addf %87, %88 : vector<184x50xf32>
    %90 = vector.extract_strided_slice %89 {offsets = [0, 0], sizes = [171, 50], strides = [1, 1]} : vector<184x50xf32> to vector<171x50xf32>
    %91 = vector.extract_strided_slice %89 {offsets = [1, 0], sizes = [171, 50], strides = [1, 1]} : vector<184x50xf32> to vector<171x50xf32>
    %92 = arith.maximumf %90, %91 : vector<171x50xf32>
    %93 = vector.extract_strided_slice %89 {offsets = [12, 0], sizes = [171, 50], strides = [1, 1]} : vector<184x50xf32> to vector<171x50xf32>
    %94 = vector.extract_strided_slice %89 {offsets = [13, 0], sizes = [171, 50], strides = [1, 1]} : vector<184x50xf32> to vector<171x50xf32>
    %95 = arith.maximumf %93, %94 : vector<171x50xf32>
    %96 = arith.maximumf %92, %95 : vector<171x50xf32>
    %97 = vector.extract_strided_slice %96 {offsets = [0, 0], sizes = [1, 50], strides = [1, 1]} : vector<171x50xf32> to vector<1x50xf32>
    %98 = vector.extract_strided_slice %96 {offsets = [2, 0], sizes = [1, 50], strides = [1, 1]} : vector<171x50xf32> to vector<1x50xf32>
    %99 = vector.extract_strided_slice %96 {offsets = [4, 0], sizes = [1, 50], strides = [1, 1]} : vector<171x50xf32> to vector<1x50xf32>
    %100 = vector.extract_strided_slice %96 {offsets = [6, 0], sizes = [1, 50], strides = [1, 1]} : vector<171x50xf32> to vector<1x50xf32>
    %101 = vector.extract_strided_slice %96 {offsets = [24, 0], sizes = [1, 50], strides = [1, 1]} : vector<171x50xf32> to vector<1x50xf32>
    %102 = vector.extract_strided_slice %96 {offsets = [26, 0], sizes = [1, 50], strides = [1, 1]} : vector<171x50xf32> to vector<1x50xf32>
    %103 = vector.extract_strided_slice %96 {offsets = [28, 0], sizes = [1, 50], strides = [1, 1]} : vector<171x50xf32> to vector<1x50xf32>
    %104 = vector.extract_strided_slice %96 {offsets = [30, 0], sizes = [1, 50], strides = [1, 1]} : vector<171x50xf32> to vector<1x50xf32>
    %105 = vector.extract_strided_slice %96 {offsets = [48, 0], sizes = [1, 50], strides = [1, 1]} : vector<171x50xf32> to vector<1x50xf32>
    %106 = vector.extract_strided_slice %96 {offsets = [50, 0], sizes = [1, 50], strides = [1, 1]} : vector<171x50xf32> to vector<1x50xf32>
    %107 = vector.extract_strided_slice %96 {offsets = [52, 0], sizes = [1, 50], strides = [1, 1]} : vector<171x50xf32> to vector<1x50xf32>
    %108 = vector.extract_strided_slice %96 {offsets = [54, 0], sizes = [1, 50], strides = [1, 1]} : vector<171x50xf32> to vector<1x50xf32>
    %109 = vector.extract_strided_slice %96 {offsets = [72, 0], sizes = [1, 50], strides = [1, 1]} : vector<171x50xf32> to vector<1x50xf32>
    %110 = vector.extract_strided_slice %96 {offsets = [74, 0], sizes = [1, 50], strides = [1, 1]} : vector<171x50xf32> to vector<1x50xf32>
    %111 = vector.extract_strided_slice %96 {offsets = [76, 0], sizes = [1, 50], strides = [1, 1]} : vector<171x50xf32> to vector<1x50xf32>
    %112 = vector.extract_strided_slice %96 {offsets = [78, 0], sizes = [1, 50], strides = [1, 1]} : vector<171x50xf32> to vector<1x50xf32>
    %113 = tpu.concatenate %97, %98, %99, %100, %101, %102, %103, %104, %105, %106, %107, %108, %109, %110, %111, %112 in 1 : vector<1x50xf32>, vector<1x50xf32>, vector<1x50xf32>, vector<1x50xf32>, vector<1x50xf32>, vector<1x50xf32>, vector<1x50xf32>, vector<1x50xf32>, vector<1x50xf32>, vector<1x50xf32>, vector<1x50xf32>, vector<1x50xf32>, vector<1x50xf32>, vector<1x50xf32>, vector<1x50xf32>, vector<1x50xf32> -> vector<1x800xf32>
    %114 = vector.extract_strided_slice %96 {offsets = [92, 0], sizes = [1, 50], strides = [1, 1]} : vector<171x50xf32> to vector<1x50xf32>
    %115 = vector.extract_strided_slice %96 {offsets = [94, 0], sizes = [1, 50], strides = [1, 1]} : vector<171x50xf32> to vector<1x50xf32>
    %116 = vector.extract_strided_slice %96 {offsets = [96, 0], sizes = [1, 50], strides = [1, 1]} : vector<171x50xf32> to vector<1x50xf32>
    %117 = vector.extract_strided_slice %96 {offsets = [98, 0], sizes = [1, 50], strides = [1, 1]} : vector<171x50xf32> to vector<1x50xf32>
    %118 = vector.extract_strided_slice %96 {offsets = [116, 0], sizes = [1, 50], strides = [1, 1]} : vector<171x50xf32> to vector<1x50xf32>
    %119 = vector.extract_strided_slice %96 {offsets = [118, 0], sizes = [1, 50], strides = [1, 1]} : vector<171x50xf32> to vector<1x50xf32>
    %120 = vector.extract_strided_slice %96 {offsets = [120, 0], sizes = [1, 50], strides = [1, 1]} : vector<171x50xf32> to vector<1x50xf32>
    %121 = vector.extract_strided_slice %96 {offsets = [122, 0], sizes = [1, 50], strides = [1, 1]} : vector<171x50xf32> to vector<1x50xf32>
    %122 = vector.extract_strided_slice %96 {offsets = [140, 0], sizes = [1, 50], strides = [1, 1]} : vector<171x50xf32> to vector<1x50xf32>
    %123 = vector.extract_strided_slice %96 {offsets = [142, 0], sizes = [1, 50], strides = [1, 1]} : vector<171x50xf32> to vector<1x50xf32>
    %124 = vector.extract_strided_slice %96 {offsets = [144, 0], sizes = [1, 50], strides = [1, 1]} : vector<171x50xf32> to vector<1x50xf32>
    %125 = vector.extract_strided_slice %96 {offsets = [146, 0], sizes = [1, 50], strides = [1, 1]} : vector<171x50xf32> to vector<1x50xf32>
    %126 = vector.extract_strided_slice %96 {offsets = [164, 0], sizes = [1, 50], strides = [1, 1]} : vector<171x50xf32> to vector<1x50xf32>
    %127 = vector.extract_strided_slice %96 {offsets = [166, 0], sizes = [1, 50], strides = [1, 1]} : vector<171x50xf32> to vector<1x50xf32>
    %128 = vector.extract_strided_slice %96 {offsets = [168, 0], sizes = [1, 50], strides = [1, 1]} : vector<171x50xf32> to vector<1x50xf32>
    %129 = vector.extract_strided_slice %96 {offsets = [170, 0], sizes = [1, 50], strides = [1, 1]} : vector<171x50xf32> to vector<1x50xf32>
    %130 = tpu.concatenate %114, %115, %116, %117, %118, %119, %120, %121, %122, %123, %124, %125, %126, %127, %128, %129 in 1 : vector<1x50xf32>, vector<1x50xf32>, vector<1x50xf32>, vector<1x50xf32>, vector<1x50xf32>, vector<1x50xf32>, vector<1x50xf32>, vector<1x50xf32>, vector<1x50xf32>, vector<1x50xf32>, vector<1x50xf32>, vector<1x50xf32>, vector<1x50xf32>, vector<1x50xf32>, vector<1x50xf32>, vector<1x50xf32> -> vector<1x800xf32>
    %131 = tpu.concatenate %113, %130 in 0 : vector<1x800xf32>, vector<1x800xf32> -> vector<2x800xf32>
    %132 = arith.truncf %131 : vector<2x800xf32> to vector<2x800xbf16>
    %c0_26 = arith.constant 0 : index
    %c0_27 = arith.constant 0 : index
    %133 = vector.load %arg6[%c0_26, %c0_27] : memref<800x512xbf16, #tpu.memory_space<vmem>>, vector<800x512xbf16>
    %cst_28 = arith.constant dense<0.000000e+00> : vector<2x512xf32>
    %134 = tpu.matmul %132, %133, %cst_28 {dimension_numbers = #tpu.dot_dimension_numbers<[1], [0], [0], [1], [0, 0, 1, 1], [], []>} : vector<2x800xbf16>, vector<800x512xbf16>, vector<2x512xf32> -> vector<2x512xf32>
    %c0_29 = arith.constant 0 : index
    %c0_30 = arith.constant 0 : index
    %135 = vector.load %arg7[%c0_29, %c0_30] : memref<1x512xf32, #tpu.memory_space<vmem>>, vector<1x512xf32>
    %136 = vector.broadcast %135 : vector<1x512xf32> to vector<2x512xf32>
    %137 = arith.addf %134, %136 : vector<2x512xf32>
    %c0_31 = arith.constant 0 : index
    %138 = memref.load %arg10[%c0_31] : memref<1xf32, #tpu.memory_space<smem>>
    %cst_32 = arith.constant 0.000000e+00 : f32
    %139 = vector.broadcast %cst_32 : f32 to vector<2x512xf32>
    %140 = arith.cmpf oge, %137, %139 : vector<2x512xf32>
    %141 = vector.broadcast %138 : f32 to vector<2x512xf32>
    %142 = arith.mulf %141, %137 : vector<2x512xf32>
    %143 = arith.select %140, %137, %142 : vector<2x512xi1>, vector<2x512xf32>
    %c0_33 = arith.constant 0 : index
    %c0_34 = arith.constant 0 : index
    %c0_35 = arith.constant 0 : index
    %144 = vector.load %arg11[%c0_33, %c0_34, %c0_35] : memref<1x2x512xf32, #tpu.memory_space<vmem>>, vector<1x2x512xf32>
    %145 = vector.shape_cast %144 : vector<1x2x512xf32> to vector<2x512xf32>
    %146 = vector.shape_cast %143 : vector<2x512xf32> to vector<1x2x512xf32>
    tpu.vector_store %arg11[%c0_33, %c0_34, %c0_35], %146 {strides = array<i32>} : memref<1x2x512xf32, #tpu.memory_space<vmem>>, vector<1x2x512xf32>,
    %147 = arith.truncf %143 : vector<2x512xf32> to vector<2x512xbf16>
    %c0_36 = arith.constant 0 : index
    %c0_37 = arith.constant 0 : index
    %148 = vector.load %arg8[%c0_36, %c0_37] : memref<512x128xbf16, #tpu.memory_space<vmem>>, vector<512x128xbf16>
    %cst_38 = arith.constant dense<0.000000e+00> : vector<2x128xf32>
    %149 = tpu.matmul %147, %148, %cst_38 {dimension_numbers = #tpu.dot_dimension_numbers<[1], [0], [0], [1], [0, 0, 1, 1], [], []>} : vector<2x512xbf16>, vector<512x128xbf16>, vector<2x128xf32> -> vector<2x128xf32>
    %c0_39 = arith.constant 0 : index
    %c0_40 = arith.constant 0 : index
    %150 = vector.load %arg9[%c0_39, %c0_40] : memref<1x128xf32, #tpu.memory_space<vmem>>, vector<1x128xf32>
    %151 = vector.broadcast %150 : vector<1x128xf32> to vector<2x128xf32>
    %152 = arith.addf %149, %151 : vector<2x128xf32>
    %c0_41 = arith.constant 0 : index
    %c0_42 = arith.constant 0 : index
    %c0_43 = arith.constant 0 : index
    %153 = vector.load %arg12[%c0_41, %c0_42, %c0_43] : memref<1x2x128xf32, #tpu.memory_space<vmem>>, vector<1x2x128xf32>
    %154 = vector.shape_cast %153 : vector<1x2x128xf32> to vector<2x128xf32>
    %155 = vector.shape_cast %152 : vector<2x128xf32> to vector<1x2x128xf32>
    tpu.vector_store %arg12[%c0_41, %c0_42, %c0_43], %155 {strides = array<i32>} : memref<1x2x128xf32, #tpu.memory_space<vmem>>, vector<1x2x128xf32>,
    return
  }
  func.func @transform_0(%arg0: i32) -> (i32, i32, i32, i32) {
    %c0_i32 = arith.constant 0 : i32
    %c0_i32_0 = arith.constant 0 : i32
    %c0_i32_1 = arith.constant 0 : i32
    %c0_i32_2 = arith.constant 0 : i32
    return %arg0, %c0_i32, %c0_i32_0, %c0_i32_1 : i32, i32, i32, i32
  }
  func.func @transform_1(%arg0: i32) -> (i32, i32, i32) {
    %c0_i32 = arith.constant 0 : i32
    %c0_i32_0 = arith.constant 0 : i32
    %c0_i32_1 = arith.constant 0 : i32
    return %arg0, %c0_i32, %c0_i32_0 : i32, i32, i32
  }
  func.func @transform_2(%arg0: i32) -> (i32, i32, i32) {
    %c0_i32 = arith.constant 0 : i32
    %c0_i32_0 = arith.constant 0 : i32
    %c0_i32_1 = arith.constant 0 : i32
    return %arg0, %c0_i32, %c0_i32_0 : i32, i32, i32
  }
  func.func @transform_3(%arg0: i32) -> (i32, i32) {
    %c0_i32 = arith.constant 0 : i32
    %c0_i32_0 = arith.constant 0 : i32
    %c0_i32_1 = arith.constant 0 : i32
    return %c0_i32, %c0_i32_0 : i32, i32
  }
  func.func @transform_4(%arg0: i32) -> (i32, i32) {
    %c0_i32 = arith.constant 0 : i32
    %c0_i32_0 = arith.constant 0 : i32
    %c0_i32_1 = arith.constant 0 : i32
    return %c0_i32, %c0_i32_0 : i32, i32
  }
  func.func @transform_5(%arg0: i32) -> (i32, i32) {
    %c0_i32 = arith.constant 0 : i32
    %c0_i32_0 = arith.constant 0 : i32
    %c0_i32_1 = arith.constant 0 : i32
    return %c0_i32, %c0_i32_0 : i32, i32
  }
  func.func @transform_6(%arg0: i32) -> (i32, i32) {
    %c0_i32 = arith.constant 0 : i32
    %c0_i32_0 = arith.constant 0 : i32
    %c0_i32_1 = arith.constant 0 : i32
    return %c0_i32, %c0_i32_0 : i32, i32
  }
  func.func @transform_7(%arg0: i32) -> (i32, i32) {
    %c0_i32 = arith.constant 0 : i32
    %c0_i32_0 = arith.constant 0 : i32
    %c0_i32_1 = arith.constant 0 : i32
    return %c0_i32, %c0_i32_0 : i32, i32
  }
  func.func @transform_8(%arg0: i32) -> (i32, i32) {
    %c0_i32 = arith.constant 0 : i32
    %c0_i32_0 = arith.constant 0 : i32
    %c0_i32_1 = arith.constant 0 : i32
    return %c0_i32, %c0_i32_0 : i32, i32
  }
  func.func @transform_9(%arg0: i32) -> i32 {
    %c0_i32 = arith.constant 0 : i32
    %c0_i32_0 = arith.constant 0 : i32
    return %c0_i32 : i32
  }
  func.func @transform_10(%arg0: i32) -> (i32, i32, i32) {
    %c0_i32 = arith.constant 0 : i32
    %c0_i32_0 = arith.constant 0 : i32
    %c0_i32_1 = arith.constant 0 : i32
    return %arg0, %c0_i32, %c0_i32_0 : i32, i32, i32
  }
  func.func @transform_11(%arg0: i32) -> (i32, i32, i32) {
    %c0_i32 = arith.constant 0 : i32
    %c0_i32_0 = arith.constant 0 : i32
    %c0_i32_1 = arith.constant 0 : i32
    return %arg0, %c0_i32, %c0_i32_0 : i32, i32, i32
  }
}

</mosaic_0001>

<bundles_post_ra>
// kernel: codis28x28_forward.1
= control target key start
LH: loop header
LB: loop body
LE: loop exit
PB: predicated region body
PF: predicated region fallthrough
CT: control target
= control target key end

     0   :  { %s10473_s19 = smov 0   ;;  %s17107_s0 = inlined_call_operand.vmem [shape: f32[2,4,288,25], index: 0, kind: input, shape index: {}]   ;;  %s17108_s1 = inlined_call_operand.vmem [shape: bf16[2,25,20], index: 1, kind: input, shape index: {}]   ;;  %s17109_s2 = inlined_call_operand.vmem [shape: f32[2,1,20], index: 2, kind: input, shape index: {}]   ;;  %s17110_s3 = inlined_call_operand.vmem [shape: bf16[500,50], index: 3, kind: input, shape index: {}]   ;;  %s17111_s4 = inlined_call_operand.vmem [shape: f32[1,50], index: 4, kind: input, shape index: {}]   ;;  %s17112_s5 = inlined_call_operand.vmem [shape: bf16[800,512], index: 5, kind: input, shape index: {}]   ;;  %s17113_s6 = inlined_call_operand.vmem [shape: f32[1,512], index: 6, kind: input, shape index: {}]   ;;  %s17114_s7 = inlined_call_operand.vmem [shape: bf16[512,128], index: 7, kind: input, shape index: {}]   ;;  %s17115_s8 = inlined_call_operand.vmem [shape: f32[1,128], index: 8, kind: input, shape index: {}]   ;;  %s17116_s9 = inlined_call_operand.<no memory space> [shape: f32[1], index: 9, kind: input, shape index: {}]   ;;  %s17117_s10 = inlined_call_operand.vmem [shape: f32[2,2,512], index: 10, kind: output, shape index: {0}]   ;;  %s17118_s11 = inlined_call_operand.vmem [shape: f32[2,2,128], index: 11, kind: output, shape index: {1}]  }
   0x1   :  { %17 = sst [smem:[#allocation2]] %s17116_s9 }
   0x2 LB: > { %s7430_s20 = sadd.s32 4294967295, %s10380_s19   ;;  %p7434_p0 = scmp.ge.s32.totalorder %s10380_s19, 1  ;;  %s10380_s19 = sphi %s10473_s19, %s23_s19  }
   0x3   : > { %p359_p1 = scmp.lt.s32.totalorder %s10380_s19, 3 }
   0x5   : > { %p360_p2 = pnand %p7434_p0, %p359_p1 }
   0x7   : > { %363 = sbr.rel (%p360_p2) target bundleno = 1876 (0x754), region = 60 }
   0xc   : > { %p411_p3 = scmp.lt.s32.totalorder %s7430_s20, 1  ;;  %vm17348_vm0 = vcmask 1043456   ;;  %vm560_vm1 = vcmask 1044480   ;;  %v10382_v0 = vmov 65535   ;;  %vm504_vm2 = vcmask 203776   ;;  %s10383_s12 = smov 20  }
   0xd   : > { %v561_v1 = vsel %vm17348_vm0, 4294967295, %v10382_v0  ;;  %vm17347_vm3 = vcmask 1046528   ;;  %vm17349_vm4 = vcmask 1045504   ;;  %s17319_s13 = smov 40   ;;  %s10385_s14 = smov 60   ;;  %vm17153_vm5 = vcmask 1042432  }
   0xe   : > { %s18475_s20 = smov (!%p411_p3, %s7430_s20), 1  ;;  %v562_v2 = vsel %vm560_vm1, %v561_v1, 0  ;;  %s10386_s15 = smov 80   ;;  %vm17211_vm6 = vcmask 1041408   ;;  %vm1914_vm7 = vcmask 1040384   ;;  %vm17203_vm8 = vcmask 162816  }
   0xf   : > { %s8968_s9 = smul.u32 1152, %s18475_s20  ;;  %s8699_s21 = sshll.u32 %s18475_s20, 4  ;;  %vm17154_vm9 = vcmask 326656   ;;  %vm17155_vm10 = vcmask 490496   ;;  %vm2293_vm11 = vcmask 654336   ;;  %vm2306_vm12 = vcmask 818176  }
  0x10   : > { %s420_s24 = scalar_lea.vmem %s17108_s1, %s8699_s21  ;;  %s10493_s27 = scalar_lea.vmem %s17109_s2, %s18475_s20  ;;  %vm2319_vm13 = vcmask 982016   ;;  %vm2332_vm14 = vcmask 97280   ;;  %vm2345_vm15 = vcmask 261120  }
  0x11   : > { %v7447_v3 = vld [vmem:[%s420_s24 + $0x8] sm:$0xf]  ;;  %v8702_v4 = vld [vmem:[%s420_s24 + $0x8] sm:$0x10]  ;;  %s10499_s30 = scalar_lea.vmem %s17107_s0, %s8968_s9  ;;  %v8701_v7 = vld [vmem:[%s420_s24] sm:$0xff]  ;;  %s10387_s16 = smov 52  }
  0x12   : > { %v7448_v5 = vor.u32 %v8702_v4, %v7447_v3  ;;  %v473_v8 = vld [vmem:[%s10499_s30 + $0x110] sm:$0xff]  ;;  %v474_v9 = vld [vmem:[%s10499_s30 + $0x118] sm:$0xff]  ;;  %v7467_v10 = vld [vmem:[%s10499_s30 + $0x120] sm:$0xff]  ;;  %s10388_s17 = smov 100   ;;  %s17315_s18 = smov 120  }
  0x13   : > { %v7468_v11 = vld [vmem:[%s10499_s30 + $0x128] sm:$0xff]  ;;  %v7521_v12 = vld [vmem:[%s10499_s30 + $0x240] sm:$0xff]  ;;  %v492_v16 = vpack.c.bf16 %v474_v9, %v473_v8  ;;  %v7469_v20 = vld [vmem:[%s10499_s30 + $0x130] sm:$0xff]  ;;  %s10390_s9 = smov 12   ;;  %s10391_s21 = smov 32  }
  0x14   : > { %v564_v6 = vand.u32 %v7448_v5, %v562_v2  ;;  %v7522_v13 = vld [vmem:[%s10499_s30 + $0x248] sm:$0xff]  ;;  %v439_v14 = vld [vmem:[%s10499_s30] sm:$0xff]  ;;  %v702_v17 = vpack.c.bf16 %v7468_v11, %v7467_v10  ;;  %v7470_v21 = vld [vmem:[%s10499_s30 + $0x138] sm:$0xff]  ;;  %s17311_s22 = smov 72   ;;  %s17133_s23 = smov 92  }
  0x15   : > { %v440_v15 = vld [vmem:[%s10499_s30 + $0x8] sm:$0xff]  ;;  %v910_v18 = vpack.c.bf16 %v7522_v13, %v7521_v12  ;;  %v7575_v22 = vld [vmem:[%s10499_s30 + $0x360] sm:$0xff]  ;;  %v7523_v24 = vld [vmem:[%s10499_s30 + $0x250] sm:$0xff]  ;;  %v703_v28 = vpack.c.bf16 %v7470_v21, %v7469_v20  ;;  %s17131_s24 = smov 112   ;;  %s10395_s25 = smov 4  }
  0x16   : > { %8966 = vmatpush.bf16.msra.mxu3 %v564_v6  ;;  %780 = vmatpush.bf16.msra.mxu1 %v564_v6  ;;  %v475_v19 = vpack.c.bf16 %v440_v15, %v439_v14  ;;  %v7576_v23 = vld [vmem:[%s10499_s30 + $0x368] sm:$0xff]  ;;  %v7524_v25 = vld [vmem:[%s10499_s30 + $0x258] sm:$0xff]  ;;  %v441_v26 = vld [vmem:[%s10499_s30 + $0x10] sm:$0xff]  ;;  %s17317_s28 = smov 24   ;;  %s17499_s29 = smov 112  }
  0x17   : > { %988 = vmatpush.bf16.msra.mxu2 %v564_v6  ;;  %572 = vmatpush.bf16.msra.mxu0 %v564_v6  ;;  %v442_v27 = vld [vmem:[%s10499_s30 + $0x18] sm:$0xff]  ;;  %v1118_v29 = vpack.c.bf16 %v7576_v23, %v7575_v22  ;;  %v911_v30 = vpack.c.bf16 %v7524_v25, %v7523_v24  ;;  %v7471_v32 = vld [vmem:[%s10499_s30 + $0x140] sm:$0xff]  ;;  %v7472_v33 = vld [vmem:[%s10499_s30 + $0x148] sm:$0xff]  ;;  %s17943_s26 = smov 44  }
  0x18   : > { %v476_v31 = vpack.c.bf16 %v442_v27, %v441_v26  ;;  %v7577_v34 = vld [vmem:[%s10499_s30 + $0x370] sm:$0xff]  ;;  %v7578_v35 = vld [vmem:[%s10499_s30 + $0x378] sm:$0xff]  ;;  %v7525_v36 = vld [vmem:[%s10499_s30 + $0x260] sm:$0xff]  ;;  %v704_v40 = vpack.c.bf16 %v7472_v33, %v7471_v32 }
  0x19   : > { %v7526_v37 = vld [vmem:[%s10499_s30 + $0x268] sm:$0xff]  ;;  %v443_v38 = vld [vmem:[%s10499_s30 + $0x20] sm:$0xff]  ;;  %v1119_v41 = vpack.c.bf16 %v7578_v35, %v7577_v34  ;;  %v7473_v44 = vld [vmem:[%s10499_s30 + $0x150] sm:$0xff] }
  0x1a   : > { %8967 = vmatpush.bf16.msra.mxu3 %v8701_v7  ;;  %781 = vmatpush.bf16.msra.mxu1 %v8701_v7  ;;  %v444_v39 = vld [vmem:[%s10499_s30 + $0x28] sm:$0xff]  ;;  %v912_v42 = vpack.c.bf16 %v7526_v37, %v7525_v36  ;;  %v7474_v45 = vld [vmem:[%s10499_s30 + $0x158] sm:$0xff]  ;;  %v7579_v46 = vld [vmem:[%s10499_s30 + $0x380] sm:$0xff] }
  0x1b   : > { %989 = vmatpush.bf16.msra.mxu2 %v8701_v7  ;;  %573 = vmatpush.bf16.msra.mxu0 %v8701_v7  ;;  %v477_v43 = vpack.c.bf16 %v444_v39, %v443_v38  ;;  %v7580_v47 = vld [vmem:[%s10499_s30 + $0x388] sm:$0xff]  ;;  %v7527_v48 = vld [vmem:[%s10499_s30 + $0x270] sm:$0xff]  ;;  %v7528_v49 = vld [vmem:[%s10499_s30 + $0x278] sm:$0xff]  ;;  %v705_v52 = vpack.c.bf16 %v7474_v45, %v7473_v44 }
  0x1c   : > { %v445_v50 = vld [vmem:[%s10499_s30 + $0x30] sm:$0xff]  ;;  %v446_v51 = vld [vmem:[%s10499_s30 + $0x38] sm:$0xff]  ;;  %v1120_v53 = vpack.c.bf16 %v7580_v47, %v7579_v46  ;;  %v913_v54 = vpack.c.bf16 %v7528_v49, %v7527_v48  ;;  %v7475_v56 = vld [vmem:[%s10499_s30 + $0x160] sm:$0xff] }
  0x1d   : > { %7466 = vmatmul.msk.bf16.vlgmr.msra.gmra.mxu3 %vm504_vm2, %v492_v16  ;;  %7503 = vmatmul.msk.bf16.vlgmr.msra.gmra.mxu1 %vm504_vm2, %v702_v17  ;;  %v478_v55 = vpack.c.bf16 %v446_v51, %v445_v50  ;;  %v7476_v57 = vld [vmem:[%s10499_s30 + $0x168] sm:$0xff]  ;;  %v7581_v58 = vld [vmem:[%s10499_s30 + $0x390] sm:$0xff]  ;;  %v7582_v59 = vld [vmem:[%s10499_s30 + $0x398] sm:$0xff] }
  0x1e   : > { %1196 = vmatpush.bf16.msrb.mxu3 %v564_v6  ;;  %7557 = vmatmul.msk.bf16.vlgmr.msra.gmra.mxu2 %vm504_vm2, %v910_v18  ;;  %v7529_v60 = vld [vmem:[%s10499_s30 + $0x280] sm:$0xff]  ;;  %v7530_v61 = vld [vmem:[%s10499_s30 + $0x288] sm:$0xff]  ;;  %v706_v0 = vpack.c.bf16 %v7476_v57, %v7475_v56  ;;  %v1121_v1 = vpack.c.bf16 %v7582_v59, %v7581_v58  ;;  %v7477_v4 = vld [vmem:[%s10499_s30 + $0x170] sm:$0xff] }
  0x1f   : > { %7449 = vmatmul.msk.bf16.vlgmr.msra.gmra.mxu0 %vm504_vm2, %v475_v19  ;;  %v447_v62 = vld [vmem:[%s10499_s30 + $0x40] sm:$0xff]  ;;  %v448_v63 = vld [vmem:[%s10499_s30 + $0x48] sm:$0xff]  ;;  %v914_v2 = vpack.c.bf16 %v7530_v61, %v7529_v60  ;;  %v7478_v5 = vld [vmem:[%s10499_s30 + $0x178] sm:$0xff] }
  0x20   : > { %v479_v3 = vpack.c.bf16 %v448_v63, %v447_v62  ;;  %v7583_v6 = vld [vmem:[%s10499_s30 + $0x3a0] sm:$0xff]  ;;  %v7531_v8 = vld [vmem:[%s10499_s30 + $0x290] sm:$0xff]  ;;  %v7532_v9 = vld [vmem:[%s10499_s30 + $0x298] sm:$0xff]  ;;  %v707_v12 = vpack.c.bf16 %v7478_v5, %v7477_v4 }
  0x21   : > { %v449_v10 = vld [vmem:[%s10499_s30 + $0x50] sm:$0xff]  ;;  %v450_v11 = vld [vmem:[%s10499_s30 + $0x58] sm:$0xff]  ;;  %v915_v14 = vpack.c.bf16 %v7532_v9, %v7531_v8  ;;  %v7479_v16 = vld [vmem:[%s10499_s30 + $0x180] sm:$0xff] }
  0x22   : > { %1197 = vmatpush.bf16.msrb.mxu3 %v8701_v7  ;;  %v7584_v7 = vld [vmem:[%s10499_s30 + $0x3a8] sm:$0xff]  ;;  %v480_v15 = vpack.c.bf16 %v450_v11, %v449_v10  ;;  %v7585_v18 = vld [vmem:[%s10499_s30 + $0x3b0] sm:$0xff]  ;;  %v7586_v19 = vld [vmem:[%s10499_s30 + $0x3b8] sm:$0xff] }
  0x23   : > { %v1122_v13 = vpack.c.bf16 %v7584_v7, %v7583_v6  ;;  %v7480_v17 = vld [vmem:[%s10499_s30 + $0x188] sm:$0xff]  ;;  %v7533_v20 = vld [vmem:[%s10499_s30 + $0x2a0] sm:$0xff]  ;;  %v1123_v25 = vpack.c.bf16 %v7586_v19, %v7585_v18  ;;  %v7535_v32 = vld [vmem:[%s10499_s30 + $0x2b0] sm:$0xff] }
  0x24   : > { %v7534_v21 = vld [vmem:[%s10499_s30 + $0x2a8] sm:$0xff]  ;;  %v451_v22 = vld [vmem:[%s10499_s30 + $0x60] sm:$0xff]  ;;  %v708_v24 = vpack.c.bf16 %v7480_v17, %v7479_v16  ;;  %v7536_v33 = vld [vmem:[%s10499_s30 + $0x2b8] sm:$0xff] }
  0x25   : > { %v452_v23 = vld [vmem:[%s10499_s30 + $0x68] sm:$0xff]  ;;  %v916_v26 = vpack.c.bf16 %v7534_v21, %v7533_v20  ;;  %v453_v34 = vld [vmem:[%s10499_s30 + $0x70] sm:$0xff]  ;;  %v454_v35 = vld [vmem:[%s10499_s30 + $0x78] sm:$0xff]  ;;  %v917_v38 = vpack.c.bf16 %v7536_v33, %v7535_v32 }
  0x26   : > { %v481_v27 = vpack.c.bf16 %v452_v23, %v451_v22  ;;  %v482_v39 = vpack.c.bf16 %v454_v35, %v453_v34  ;;  %v7537_v44 = vld [vmem:[%s10499_s30 + $0x2c0] sm:$0xff]  ;;  %v7538_v45 = vld [vmem:[%s10499_s30 + $0x2c8] sm:$0xff]  ;;  %v7485_v58 = vld [vmem:[%s10499_s30 + $0x1b0] sm:$0xff] }
  0x27   : > { %v455_v46 = vld [vmem:[%s10499_s30 + $0x80] sm:$0xff]  ;;  %v456_v47 = vld [vmem:[%s10499_s30 + $0x88] sm:$0xff]  ;;  %v918_v51 = vpack.c.bf16 %v7538_v45, %v7537_v44  ;;  %v7486_v59 = vld [vmem:[%s10499_s30 + $0x1b8] sm:$0xff] }
  0x28   : > { %v7591_v60 = vld [vmem:[%s10499_s30 + $0x3e0] sm:$0xff]  ;;  %v7592_v61 = vld [vmem:[%s10499_s30 + $0x3e8] sm:$0xff]  ;;  %v7539_v62 = vld [vmem:[%s10499_s30 + $0x2d0] sm:$0xff] }
  0x29   : > { %v7540_v63 = vld [vmem:[%s10499_s30 + $0x2d8] sm:$0xff]  ;;  %v1126_v4 = vpack.c.bf16 %v7592_v61, %v7591_v60  ;;  %v7593_v16 = vld [vmem:[%s10499_s30 + $0x3f0] sm:$0xff]  ;;  %v7541_v18 = vld [vmem:[%s10499_s30 + $0x2e0] sm:$0xff] }
  0x2a   : > { %v919_v7 = vpack.c.bf16 %v7540_v63, %v7539_v62  ;;  %v7594_v17 = vld [vmem:[%s10499_s30 + $0x3f8] sm:$0xff]  ;;  %v7542_v19 = vld [vmem:[%s10499_s30 + $0x2e8] sm:$0xff]  ;;  %v459_v21 = vld [vmem:[%s10499_s30 + $0xa0] sm:$0xff] }
  0x2b   : > { %v460_v22 = vld [vmem:[%s10499_s30 + $0xa8] sm:$0xff]  ;;  %v10643_v35 = vld [vmem:[%s10493_s27] ss:$0 sm:$0xff] }
  0x2d   : > { %7504 = vmatmul.msk.bf16.gmra.mxu1 %vm504_vm2, %v703_v28  ;;  %7611 = vmatmul.msk.bf16.vlgmr.msrb.gmra.mxu3 %vm504_vm2, %v1118_v29  ;;  %v7481_v28 = vld [vmem:[%s10499_s30 + $0x190] sm:$0xff]  ;;  %v7482_v29 = vld [vmem:[%s10499_s30 + $0x198] sm:$0xff] }
  0x2e   : > { %7558 = vmatmul.msk.bf16.gmra.mxu2 %vm504_vm2, %v911_v30  ;;  %v7587_v30 = vld [vmem:[%s10499_s30 + $0x3c0] sm:$0xff]  ;;  %v709_v36 = vpack.c.bf16 %v7482_v29, %v7481_v28 }
  0x2f   : > { %7450 = vmatmul.msk.bf16.gmra.mxu0 %vm504_vm2, %v476_v31  ;;  %v7588_v31 = vld [vmem:[%s10499_s30 + $0x3c8] sm:$0xff] }
  0x30   : > { %v1124_v37 = vpack.c.bf16 %v7588_v31, %v7587_v30  ;;  %v485_v31 = vpack.c.bf16 %v460_v22, %v459_v21 }
  0x3d   : > { %7505 = vmatmul.msk.bf16.gmra.mxu1 %vm504_vm2, %v704_v40  ;;  %7612 = vmatmul.msk.bf16.gmra.mxu3 %vm504_vm2, %v1119_v41  ;;  %v7483_v40 = vld [vmem:[%s10499_s30 + $0x1a0] sm:$0xff]  ;;  %v7484_v41 = vld [vmem:[%s10499_s30 + $0x1a8] sm:$0xff] }
  0x3e   : > { %7559 = vmatmul.msk.bf16.gmra.mxu2 %vm504_vm2, %v912_v42  ;;  %v7589_v42 = vld [vmem:[%s10499_s30 + $0x3d0] sm:$0xff]  ;;  %v710_v48 = vpack.c.bf16 %v7484_v41, %v7483_v40 }
  0x3f   : > { %7451 = vmatmul.msk.bf16.gmra.mxu0 %vm504_vm2, %v477_v43  ;;  %v7590_v43 = vld [vmem:[%s10499_s30 + $0x3d8] sm:$0xff] }
  0x40   : > { %v1125_v49 = vpack.c.bf16 %v7590_v43, %v7589_v42 }
  0x4d   : > { %7506 = vmatmul.msk.bf16.gmra.mxu1 %vm504_vm2, %v705_v52  ;;  %7613 = vmatmul.msk.bf16.gmra.mxu3 %vm504_vm2, %v1120_v53  ;;  %v483_v52 = vpack.c.bf16 %v456_v47, %v455_v46  ;;  %v7489_v46 = vld [vmem:[%s10499_s30 + $0x1d0] sm:$0xff]  ;;  %v7490_v47 = vld [vmem:[%s10499_s30 + $0x1d8] sm:$0xff] }
  0x4e   : > { %7560 = vmatmul.msk.bf16.gmra.mxu2 %vm504_vm2, %v913_v54 }
  0x4f   : > { %7452 = vmatmul.msk.bf16.gmra.mxu0 %vm504_vm2, %v478_v55 }
  0x5d   : > { %7507 = vmatmul.msk.bf16.gmra.mxu1 %vm504_vm2, %v706_v0  ;;  %7614 = vmatmul.msk.bf16.gmra.mxu3 %vm504_vm2, %v1121_v1  ;;  %v457_v1 = vld [vmem:[%s10499_s30 + $0x90] sm:$0xff] }
  0x5e   : > { %7561 = vmatmul.msk.bf16.gmra.mxu2 %vm504_vm2, %v914_v2  ;;  %v458_v2 = vld [vmem:[%s10499_s30 + $0x98] sm:$0xff] }
  0x5f   : > { %7453 = vmatmul.msk.bf16.gmra.mxu0 %vm504_vm2, %v479_v3  ;;  %v711_v3 = vpack.c.bf16 %v7486_v59, %v7485_v58  ;;  %v484_v8 = vpack.c.bf16 %v458_v2, %v457_v1  ;;  %v713_v58 = vpack.c.bf16 %v7490_v47, %v7489_v46  ;;  %v461_v1 = vld [vmem:[%s10499_s30 + $0xb0] sm:$0xff]  ;;  %v462_v2 = vld [vmem:[%s10499_s30 + $0xb8] sm:$0xff]  ;;  %v463_v47 = vld [vmem:[%s10499_s30 + $0xc0] sm:$0xff] }
  0x6d   : > { %7508 = vmatmul.msk.bf16.gmra.mxu1 %vm504_vm2, %v707_v12  ;;  %7615 = vmatmul.msk.bf16.gmra.mxu3 %vm504_vm2, %v1122_v13 }
  0x6e   : > { %7562 = vmatmul.msk.bf16.gmra.mxu2 %vm504_vm2, %v915_v14  ;;  %v7487_v14 = vld [vmem:[%s10499_s30 + $0x1c0] sm:$0xff] }
  0x6f   : > { %7454 = vmatmul.msk.bf16.gmra.mxu0 %vm504_vm2, %v480_v15  ;;  %v7488_v15 = vld [vmem:[%s10499_s30 + $0x1c8] sm:$0xff] }
  0x7d   : > { %7509 = vmatmul.msk.bf16.gmra.mxu1 %vm504_vm2, %v708_v24  ;;  %7616 = vmatmul.msk.bf16.gmra.mxu3 %vm504_vm2, %v1123_v25  ;;  %v712_v24 = vpack.c.bf16 %v7488_v15, %v7487_v14  ;;  %v1127_v25 = vpack.c.bf16 %v7594_v17, %v7593_v16 }
  0x7e   : > { %7563 = vmatmul.msk.bf16.gmra.mxu2 %vm504_vm2, %v916_v26 }
  0x7f   : > { %7455 = vmatmul.msk.bf16.gmra.mxu0 %vm504_vm2, %v481_v27  ;;  %v920_v27 = vpack.c.bf16 %v7542_v19, %v7541_v18 }
  0x8d   : > { %7510 = vmatmul.msk.bf16.gmra.mxu1 %vm504_vm2, %v709_v36  ;;  %7617 = vmatmul.msk.bf16.gmra.mxu3 %vm504_vm2, %v1124_v37 }
  0x8e   : > { %7564 = vmatmul.msk.bf16.gmra.mxu2 %vm504_vm2, %v917_v38 }
  0x8f   : > { %7456 = vmatmul.msk.bf16.gmra.mxu0 %vm504_vm2, %v482_v39 }
  0x9a   : > { %v783_v50 = vpop.f32.mrf.mxu1 }
  0x9c   : > { %v575_v53 = vpop.f32.mrf.mxu0 }
  0x9d   : > { %7511 = vmatmul.msk.bf16.gmra.mxu1 %vm504_vm2, %v710_v48  ;;  %7618 = vmatmul.msk.bf16.gmra.mxu3 %vm504_vm2, %v1125_v49  ;;  %v1289_v28 = vmax.f32 %v575_v53, %v783_v50  ;;  %v7595_v48 = vld [vmem:[%s10499_s30 + $0x400] sm:$0xff]  ;;  %v7596_v49 = vld [vmem:[%s10499_s30 + $0x408] sm:$0xff] }
  0x9e   : > { %7565 = vmatmul.msk.bf16.gmra.mxu2 %vm504_vm2, %v918_v51  ;;  %v1128_v62 = vpack.c.bf16 %v7596_v49, %v7595_v48  ;;  %v464_v48 = vld [vmem:[%s10499_s30 + $0xc8] sm:$0xff] }
  0x9f   : > { %7457 = vmatmul.msk.bf16.gmra.mxu0 %vm504_vm2, %v483_v52 }
  0xa0   : > { %v10609_v54 = vpop.f32.mrf.mxu3 }
  0xa1   : > { %17438 = vst [vmem:[#allocation3_spill] sm:$0xff] %v10609_v54  ;;  %v991_v55 = vpop.f32.mrf.mxu2 }
  0xa2   : > { %v785_v56 = vpop.f32.mrf.mxu1 }
  0xa4   : > { %v577_v57 = vpop.f32.mrf.mxu0 }
  0xa5   : > { %v1290_v29 = vmax.f32 %v577_v57, %v785_v56  ;;  %v7544_v56 = vld [vmem:[%s10499_s30 + $0x2f8] sm:$0xff] }
  0xa8   : > { %v10617_v0 = vpop.f32.mrf.mxu3 }
  0xa9   : > { %17439 = vst [vmem:[#allocation4_spill] sm:$0xff] %v10617_v0  ;;  %v993_v5 = vpop.f32.mrf.mxu2 }
  0xaa   : > { %v788_v6 = vpop.f32.mrf.mxu1 }
  0xac   : > { %v580_v9 = vpop.f32.mrf.mxu0 }
  0xad   : > { %7512 = vmatmul.msk.bf16.gmra.mxu1 %vm504_vm2, %v711_v3  ;;  %7619 = vmatmul.msk.bf16.gmra.mxu3 %vm504_vm2, %v1126_v4  ;;  %v1291_v37 = vmax.f32 %v580_v9, %v788_v6 }
  0xae   : > { %7566 = vmatmul.msk.bf16.gmra.mxu2 %vm504_vm2, %v919_v7  ;;  %v486_v7 = vpack.c.bf16 %v462_v2, %v461_v1 }
  0xaf   : > { %7458 = vmatmul.msk.bf16.gmra.mxu0 %vm504_vm2, %v484_v8 }
  0xb0   : > { %v1199_v10 = vpop.f32.mrf.mxu3 }
  0xb1   : > { %v996_v11 = vpop.f32.mrf.mxu2  ;;  %v1325_v30 = vmax.f32 %v991_v55, %v1199_v10  ;;  %v7543_v55 = vld [vmem:[%s10499_s30 + $0x2f0] sm:$0xff] }
  0xb2   : > { %v10625_v12 = vpop.f32.mrf.mxu1  ;;  %v921_v4 = vpack.c.bf16 %v7544_v56, %v7543_v55 }
  0xb3   : > { %v1361_v36 = vmax.f32 %v1289_v28, %v1325_v30  ;;  %v7597_v28 = vld [vmem:[%s10499_s30 + $0x410] sm:$0xff] }
  0xb4   : > { %v10627_v13 = vpop.f32.mrf.mxu0 }
  0xb5   : > { %v10650_v42 = vadd.f32 %v10643_v35, %v1361_v36  ;;  %v7546_v36 = vld [vmem:[%s10499_s30 + $0x308] sm:$0xff] }
  0xb7   : > { %v1513_v52 = vrot.slane %v10650_v42, 1  ;;  %v1691_v1 = vrot.slane %v10650_v42, 4 }
  0xb8   : > { %v1201_v20 = vpop.f32.mrf.mxu3 }
  0xb9   : > { %v1326_v23 = vmax.f32 %v993_v5, %v1201_v20  ;;  %v998_v26 = vpop.f32.mrf.mxu2  ;;  %v1292_v5 = vmax.f32 %v10627_v13, %v10625_v12 }
  0xba   : > { %v793_v34 = vpop.f32.mrf.mxu1 }
  0xbb   : > { %v1362_v33 = vmax.f32 %v1290_v29, %v1326_v23  ;;  %v7491_v23 = vld [vmem:[%s10499_s30 + $0x1e0] sm:$0xff]  ;;  %v7598_v29 = vld [vmem:[%s10499_s30 + $0x418] sm:$0xff] }
  0xbc   : > { %v10637_v32 = vpop.f32.mrf.mxu0 }
  0xbd   : > { %7513 = vmatmul.msk.bf16.gmra.mxu1 %vm504_vm2, %v712_v24  ;;  %7620 = vmatmul.msk.bf16.gmra.mxu3 %vm504_vm2, %v1127_v25  ;;  %v10647_v39 = vadd.f32 %v10643_v35, %v1362_v33  ;;  %v1293_v10 = vmax.f32 %v10637_v32, %v793_v34  ;;  %v7545_v34 = vld [vmem:[%s10499_s30 + $0x300] sm:$0xff] }
  0xbe   : > { %7567 = vmatmul.msk.bf16.gmra.mxu2 %vm504_vm2, %v920_v27  ;;  %v7492_v27 = vld [vmem:[%s10499_s30 + $0x1e8] sm:$0xff]  ;;  %v922_v55 = vpack.c.bf16 %v7546_v36, %v7545_v34 }
  0xbf   : > { %7459 = vmatmul.msk.bf16.gmra.mxu0 %vm504_vm2, %v485_v31  ;;  %v1514_v45 = vrot.slane %v10647_v39, 1  ;;  %v1574_v9 = vrot.slane %v10647_v39, 2  ;;  %v1633_v25 = vrot.slane %v10647_v39, 3  ;;  %v1632_v31 = vrot.slane %v10650_v42, 3 }
  0xc0   : > { %v1204_v38 = vpop.f32.mrf.mxu3 }
  0xc1   : > { %v1327_v40 = vmax.f32 %v996_v11, %v1204_v38  ;;  %v1001_v41 = vpop.f32.mrf.mxu2  ;;  %v1515_v60 = vsel %vm17347_vm3, %v1513_v52, %v1514_v45  ;;  %v1573_v11 = vrot.slane %v10650_v42, 2  ;;  %v714_v38 = vpack.c.bf16 %v7492_v27, %v7491_v23  ;;  %v7600_v27 = vld [vmem:[%s10499_s30 + $0x428] sm:$0xff] }
  0xc2   : > { %v10662_v51 = vpop.f32.mrf.mxu1 }
  0xc3   : > { %v1363_v43 = vmax.f32 %v1291_v37, %v1327_v40  ;;  %v1575_v18 = vsel %vm17349_vm4, %v1573_v11, %v1574_v9  ;;  %v1129_v40 = vpack.c.bf16 %v7598_v29, %v7597_v28 }
  0xc4   : > { %v10660_v50 = vpop.f32.mrf.mxu0 }
  0xc5   : > { %v10653_v44 = vadd.f32 %v10643_v35, %v1363_v43  ;;  %v1294_v30 = vmax.f32 %v10660_v50, %v10662_v51  ;;  %v1634_v43 = vsel %vm560_vm1, %v1632_v31, %v1633_v25  ;;  %v7547_v31 = vld [vmem:[%s10499_s30 + $0x310] sm:$0xff] }
  0xc7   : > { %v17123_v53 = vrot.slane %v10653_v44, 1  ;;  %v1576_v6 = vrot.slane %v10653_v44, 2  ;;  %v1635_v22 = vrot.slane %v10653_v44, 3  ;;  %v1694_v51 = vrot.slane %v10653_v44, 4 }
  0xc8   : > { %v1206_v57 = vpop.f32.mrf.mxu3 }
  0xc9   : > { %v1328_v59 = vmax.f32 %v998_v26, %v1206_v57  ;;  %v1517_v61 = vsel %vm17347_vm3, %v1514_v45, %v17123_v53  ;;  %v1003_v63 = vpop.f32.mrf.mxu2  ;;  %v1577_v12 = vsel %vm17349_vm4, %v1574_v9, %v1576_v6  ;;  %v1636_v32 = vsel %vm560_vm1, %v1633_v25, %v1635_v22  ;;  %v7494_v25 = vld [vmem:[%s10499_s30 + $0x1f8] sm:$0xff] }
  0xca   : > { %v9005_v3 = vpack.i.bf16 %v1517_v61, %v1515_v60  ;;  %v10691_v16 = vpop.f32.mrf.mxu1  ;;  %v9010_v19 = vpack.i.bf16 %v1577_v12, %v1575_v18  ;;  %v9015_v49 = vpack.i.bf16 %v1636_v32, %v1634_v43  ;;  %v1692_v60 = vrot.slane %v10647_v39, 4  ;;  %v7493_v18 = vld [vmem:[%s10499_s30 + $0x1f0] sm:$0xff]  ;;  %v7548_v32 = vld [vmem:[%s10499_s30 + $0x318] sm:$0xff] }
  0xcb   : > { %v1364_v8 = vmax.f32 %v1292_v5, %v1328_v59  ;;  %v487_v59 = vpack.c.bf16 %v464_v48, %v463_v47 }
  0xcc   : > { %9006 = vrot.lane.b32.xlu0 %v9005_v3, %s10383_s12  ;;  %v10686_v14 = vpop.f32.mrf.mxu0  ;;  %v10737_v2 = vsel %vm17348_vm0, %v1692_v60, %v1694_v51 }
  0xcd   : > { %7514 = vmatmul.msk.bf16.gmra.mxu1 %vm504_vm2, %v713_v58  ;;  %7621 = vmatmul.msk.bf16.gmra.mxu3 %vm504_vm2, %v1128_v62  ;;  %v10689_v15 = vadd.f32 %v10643_v35, %v1364_v8  ;;  %v1295_v3 = vmax.f32 %v10686_v14, %v10691_v16  ;;  %v1693_v8 = vsel %vm17348_vm0, %v1691_v1, %v1692_v60 }
  0xce   : > { %7568 = vmatmul.msk.bf16.gmra.mxu2 %vm504_vm2, %v921_v4 }
  0xcf   : > { %7460 = vmatmul.msk.bf16.gmra.mxu0 %vm504_vm2, %v486_v7  ;;  %v1578_v26 = vrot.slane %v10689_v15, 2  ;;  %v1696_v11 = vrot.slane %v10689_v15, 4  ;;  %v9025_v36 = vpack.i.bf16 %v10689_v15, %v10653_v44 }
  0xd0   : > { %v1209_v13 = vpop.f32.mrf.mxu3 }
  0xd1   : > { %v1329_v17 = vmax.f32 %v1001_v41, %v1209_v13  ;;  %v1006_v20 = vpop.f32.mrf.mxu2  ;;  %v1579_v45 = vsel %vm17349_vm4, %v1576_v6, %v1578_v26  ;;  %v9020_v13 = vpack.i.bf16 %v10737_v2, %v1693_v8 }
  0xd2   : > { %v800_v56 = vpop.f32.mrf.mxu1 }
  0xd3   : > { %v1365_v21 = vmax.f32 %v1293_v10, %v1329_v17 }
  0xd4   : > { %9011 = vrot.lane.b32.xlu0 %v9010_v19, %s17319_s13  ;;  %v10723_v52 = vpop.f32.mrf.mxu0 }
  0xd5   : > { %v10698_v24 = vadd.f32 %v10643_v35, %v1365_v21  ;;  %v1296_v29 = vmax.f32 %v10723_v52, %v800_v56  ;;  %v466_v56 = vld [vmem:[%s10499_s30 + $0xd8] sm:$0xff] }
  0xd7   : > { %v1580_v33 = vrot.slane %v10698_v24, 2  ;;  %v1639_v58 = vrot.slane %v10698_v24, 3  ;;  %v1698_v5 = vrot.slane %v10698_v24, 4 }
  0xd8   : > { %v1211_v37 = vpop.f32.mrf.mxu3 }
  0xd9   : > { %v1330_v41 = vmax.f32 %v1003_v63, %v1211_v37  ;;  %v10717_v46 = vsel %vm17349_vm4, %v1578_v26, %v1580_v33  ;;  %v1008_v61 = vpop.f32.mrf.mxu2  ;;  %v1637_v63 = vrot.slane %v10689_v15, 3  ;;  %v1699_v17 = vsel %vm17348_vm0, %v1696_v11, %v1698_v5  ;;  %v7599_v26 = vld [vmem:[%s10499_s30 + $0x420] sm:$0xff] }
  0xda   : > { %v9060_v50 = vpack.i.bf16 %v10717_v46, %v1579_v45  ;;  %v10769_v21 = vpop.f32.mrf.mxu1  ;;  %v715_v37 = vpack.c.bf16 %v7494_v25, %v7493_v18  ;;  %v7495_v18 = vld [vmem:[%s10499_s30 + $0x200] sm:$0xff]  ;;  %v7601_v25 = vld [vmem:[%s10499_s30 + $0x430] sm:$0xff] }
  0xdb   : > { %v1366_v57 = vmax.f32 %v1294_v30, %v1330_v41  ;;  %v10745_v4 = vsel %vm560_vm1, %v1637_v63, %v1639_v58  ;;  %v1638_v10 = vsel %vm560_vm1, %v1635_v22, %v1637_v63  ;;  %v1697_v41 = vsel %vm17348_vm0, %v1694_v51, %v1696_v11 }
  0xdc   : > { %9016 = vrot.lane.b32.xlu0 %v9015_v49, %s10385_s14  ;;  %9061 = vrot.lane.b32.xlu1 %v9060_v50, %s17319_s13  ;;  %v9065_v14 = vpack.i.bf16 %v10745_v4, %v1638_v10  ;;  %v10764_v19 = vpop.f32.mrf.mxu0  ;;  %v9070_v47 = vpack.i.bf16 %v1699_v17, %v1697_v41  ;;  %v923_v50 = vpack.c.bf16 %v7548_v32, %v7547_v31  ;;  %v1794_v11 = vrot.slane %v10689_v15, 5 }
  0xdd   : > { %v10730_v62 = vadd.f32 %v10643_v35, %v1366_v57  ;;  %7515 = vmatmul.msk.bf16.gmra.mxu1 %vm504_vm2, %v714_v38  ;;  %7622 = vmatmul.msk.bf16.gmra.mxu3 %vm504_vm2, %v1129_v40  ;;  %v1130_v38 = vpack.c.bf16 %v7600_v27, %v7599_v26  ;;  %v7602_v26 = vld [vmem:[%s10499_s30 + $0x438] sm:$0xff]  ;;  %v7549_v27 = vld [vmem:[%s10499_s30 + $0x320] sm:$0xff] }
  0xde   : > { %7569 = vmatmul.msk.bf16.gmra.mxu2 %vm504_vm2, %v922_v55  ;;  %v465_v55 = vld [vmem:[%s10499_s30 + $0xd0] sm:$0xff] }
  0xdf   : > { %7461 = vmatmul.msk.bf16.gmra.mxu0 %vm504_vm2, %v487_v59  ;;  %v1700_v6 = vrot.slane %v10730_v62, 4  ;;  %v1582_v23 = vrot.slane %v10730_v62, 2  ;;  %v488_v51 = vpack.c.bf16 %v466_v56, %v465_v55  ;;  %v1856_v55 = vrot.slane %v10689_v15, 6 }
  0xe0   : > { %v1214_v7 = vpop.f32.mrf.mxu3  ;;  %v17128_v0 = vrot.slane %v10730_v62, 7 }
  0xe1   : > { %v1331_v9 = vmax.f32 %v1006_v20, %v1214_v7  ;;  %v10756_v12 = vsel %vm17348_vm0, %v1698_v5, %v1700_v6  ;;  %v10778_v28 = vpop.f32.mrf.mxu2  ;;  %v10790_v43 = vsel %vm17349_vm4, %v1580_v33, %v1582_v23  ;;  %v10805_v33 = vrot.slane %v10730_v62, 3 }
  0xe2   : > { %v10767_v20 = vpack.i.bf16 %v10756_v12, %v1699_v17 }
  0xe3   : > { %v1367_v16 = vmax.f32 %v1295_v3, %v1331_v9  ;;  %v9075_v3 = vpack.i.bf16 %v10730_v62, %v10698_v24  ;;  %v10833_v5 = vsel %vm560_vm1, %v1639_v58, %v10805_v33  ;;  %v9030_v58 = vpack.i.bf16 %v1697_v41, %v10737_v2 }
  0xe4   : > { %9021 = vrot.lane.b32.xlu0 %v9020_v13, %s10386_s15  ;;  %9066 = vrot.lane.b32.xlu1 %v9065_v14, %s10385_s14  ;;  %v10818_v60 = vpop.f32.mrf.mxu0  ;;  %v1792_v14 = vrot.slane %v10653_v44, 5 }
  0xe5   : > { %v10772_v22 = vadd.f32 %v10643_v35, %v1367_v16  ;;  %v1791_v16 = vrot.slane %v10647_v39, 5 }
  0xe6   : > { %v1795_v2 = vsel %vm17153_vm5, %v1792_v14, %v1794_v11 }
  0xe7   : > { %17440 = vst [vmem:[#allocation5_spill] sm:$0xff] %v10772_v22  ;;  %v1584_v30 = vrot.slane %v10772_v22, 2  ;;  %v10798_v49 = vrot.slane %v10772_v22, 3  ;;  %v10849_v13 = vrot.slane %v10772_v22, 4  ;;  %v1793_v31 = vsel %vm17153_vm5, %v1791_v16, %v1792_v14 }
  0xe8   : > { %v1216_v34 = vpop.f32.mrf.mxu3  ;;  %v1524_v54 = vrot.slane %v10772_v22, 1 }
  0xe9   : > { %v1332_v40 = vmax.f32 %v1008_v61, %v1216_v34  ;;  %v10793_v45 = vsel %vm17349_vm4, %v1582_v23, %v1584_v30  ;;  %v10816_v59 = vsel %vm560_vm1, %v10805_v33, %v10798_v49  ;;  %v10821_v61 = vpop.f32.mrf.mxu1  ;;  %v10835_v7 = vpop.f32.mrf.mxu2  ;;  %v10861_v17 = vsel %vm17348_vm0, %v1700_v6, %v10849_v13  ;;  %v7496_v23 = vld [vmem:[%s10499_s30 + $0x208] sm:$0xff] }
  0xea   : > { %v9130_v48 = vpack.i.bf16 %v10793_v45, %v10790_v43  ;;  %v9135_v9 = vpack.i.bf16 %v10816_v59, %v10833_v5  ;;  %v10877_v6 = vpack.i.bf16 %v10861_v17, %v10756_v12  ;;  %v17125_v12 = vrot.slane %v10730_v62, 5 }
  0xeb   : > { %v1368_v52 = vmax.f32 %v1296_v29, %v1332_v40  ;;  %v7550_v29 = vld [vmem:[%s10499_s30 + $0x328] sm:$0xff]  ;;  %v1131_v40 = vpack.c.bf16 %v7602_v26, %v7601_v25  ;;  %v17124_v26 = vrot.slane %v10689_v15, 7 }
  0xec   : > { %9026 = vrot.lane.b32.xlu0 %v9025_v36, %s10387_s16  ;;  %9071 = vrot.lane.b32.xlu1 %v9070_v47, %s10386_s15  ;;  %v10872_v32 = vpop.f32.mrf.mxu0  ;;  %v9035_v36 = vpack.i.bf16 %v1795_v2, %v1793_v31  ;;  %v924_v47 = vpack.c.bf16 %v7550_v29, %v7549_v27  ;;  %v17121_v27 = vrot.slane %v10730_v62, 6 }
  0xed   : > { %v10808_v57 = vadd.f32 %v10643_v35, %v1368_v52  ;;  %9131 = vrot.lane.b32.xlu2 %v9130_v48, %s17319_s13  ;;  %7516 = vmatmul.msk.bf16.gmra.mxu1 %vm504_vm2, %v715_v37  ;;  %v716_v37 = vpack.c.bf16 %v7496_v23, %v7495_v18  ;;  %v467_v48 = vld [vmem:[%s10499_s30 + $0xe0] sm:$0xff] }
  0xee   : > { %7623 = vmatmul.msk.bf16.gmra.mxu3 %vm504_vm2, %v1130_v38  ;;  %7570 = vmatmul.msk.bf16.gmra.mxu2 %vm504_vm2, %v923_v50  ;;  %v468_v50 = vld [vmem:[%s10499_s30 + $0xe8] sm:$0xff] }
  0xef   : > { %17441 = vst [vmem:[#allocation6_spill] sm:$0xff] %v10808_v57  ;;  %v17120_v63 = vrot.slane %v10808_v57, 2  ;;  %7462 = vmatmul.msk.bf16.gmra.mxu0 %vm504_vm2, %v488_v51  ;;  %v17119_v34 = vrot.slane %v10808_v57, 3  ;;  %v489_v56 = vpack.c.bf16 %v468_v50, %v467_v48  ;;  %v1854_v51 = vrot.slane %v10653_v44, 6 }
  0xf0   : > { %v10825_v1 = vpop.f32.mrf.mxu3  ;;  %v9150_v25 = vpack.i.bf16 %v10808_v57, %v10772_v22  ;;  %v1915_v50 = vrot.slane %v10647_v39, 7 }
  0xf1   : > { %v10840_v8 = vsel %vm17349_vm4, %v1584_v30, %v17120_v63  ;;  %v10879_v38 = vpop.f32.mrf.mxu1  ;;  %v10881_v41 = vpop.f32.mrf.mxu2  ;;  %v10889_v52 = vsel %vm560_vm1, %v10798_v49, %v17119_v34  ;;  %v1857_v14 = vsel %vm17211_vm6, %v1854_v51, %v1856_v55 }
  0xf4   : > { %9031 = vrot.lane.b32.xlu0 %v9030_v58, %s10388_s17  ;;  %9076 = vrot.lane.b32.xlu1 %v9075_v3, %s10387_s16  ;;  %v1853_v58 = vrot.slane %v10647_v39, 6 }
  0xf5   : > { %9136 = vrot.lane.b32.xlu2 %v9135_v9, %s10385_s14  ;;  %v1796_v9 = vrot.slane %v10698_v24, 5 }
  0xf6   : > { %v1855_v18 = vsel %vm17211_vm6, %v1853_v58, %v1854_v51  ;;  %v7497_v58 = vld [vmem:[%s10499_s30 + $0x210] sm:$0xff] }
  0xf7   : > { %v1799_v16 = vsel %vm17153_vm5, %v1796_v9, %v17125_v12  ;;  %v1797_v23 = vsel %vm17153_vm5, %v1794_v11, %v1796_v9  ;;  %v9040_v29 = vpack.i.bf16 %v1857_v14, %v1855_v18  ;;  %v7498_v14 = vld [vmem:[%s10499_s30 + $0x218] sm:$0xff] }
  0xf8   : > { %v10869_v30 = vpop.f32.mrf.mxu3  ;;  %v9085_v31 = vpack.i.bf16 %v1799_v16, %v1797_v23  ;;  %v7603_v16 = vld [vmem:[%s10499_s30 + $0x440] sm:$0xff]  ;;  %v717_v53 = vpack.c.bf16 %v7498_v14, %v7497_v58  ;;  %v470_v12 = vld [vmem:[%s10499_s30 + $0xf8] sm:$0xff]  ;;  %v17445_v58 = vrot.slane %v10689_v15, 7 }
  0xf9   : > { %v810_v11 = vpop.f32.mrf.mxu1  ;;  %v1018_v48 = vpop.f32.mrf.mxu2 }
  0xfc   : > { %9036 = vrot.lane.b32.xlu0 %v9035_v36, %s17315_s18  ;;  %9081 = vrot.lane.b32.xlu1 %v10767_v20, %s10388_s17  ;;  %v602_v36 = vpop.f32.mrf.mxu0 }
  0xfd   : > { %9141 = vrot.lane.b32.xlu2 %v10877_v6, %s10386_s15  ;;  %7517 = vmatmul.msk.bf16.gmra.mxu1 %vm504_vm2, %v716_v37  ;;  %v17122_v37 = vrot.slane %v10808_v57, 4  ;;  %v1300_v10 = vmax.f32 %v602_v36, %v810_v11  ;;  %v1920_v36 = vrot.slane %v10698_v24, 7 }
  0xfe   : > { %7624 = vmatmul.msk.bf16.gmra.mxu3 %vm504_vm2, %v1131_v40  ;;  %7571 = vmatmul.msk.bf16.gmra.mxu2 %vm504_vm2, %v924_v47  ;;  %v1916_v40 = vrot.slane %v10653_v44, 7  ;;  %v1858_v47 = vrot.slane %v10698_v24, 6 }
  0xff   : > { %7463 = vmatmul.msk.bf16.gmra.mxu0 %vm504_vm2, %v489_v56  ;;  %v10936_v9 = vsel %vm17348_vm0, %v10849_v13, %v17122_v37  ;;  %v1921_v14 = vsel %vm1914_vm7, %v17445_v58, %v1920_v36 }
 0x100   : > { %v10911_v2 = vpop.f32.mrf.mxu3  ;;  %v1919_v56 = vsel %vm1914_vm7, %v1916_v40, %v17124_v26  ;;  %v1861_v51 = vsel %vm17211_vm6, %v1858_v47, %v17121_v27  ;;  %v1917_v18 = vsel %vm1914_vm7, %v1915_v50, %v1916_v40  ;;  %v1859_v23 = vsel %vm17211_vm6, %v1856_v55, %v1858_v47  ;;  %v469_v50 = vld [vmem:[%s10499_s30 + $0xf0] sm:$0xff] }
 0x101   : > { %v9045_v3 = vpack.i.bf16 %v1919_v56, %v1917_v18  ;;  %v9090_v63 = vpack.i.bf16 %v1861_v51, %v1859_v23  ;;  %v10948_v37 = vpack.i.bf16 %v10936_v9, %v10861_v17  ;;  %v10951_v40 = vrot.slane %v10772_v22, 5  ;;  %v813_v11 = vpop.f32.mrf.mxu1 }
 0x102   : > { %v17127_v55 = vrot.slane %v10808_v57, 5  ;;  %v490_v56 = vpack.c.bf16 %v470_v12, %v469_v50  ;;  %v17443_v12 = vrot.slane %v10730_v62, 5  ;;  %v9050_v18 = vpack.i.bf16 %v10698_v24, %v10689_v15 }
 0x103   : > { %17442 = vst [vmem:[#allocation7_spill] sm:$0xff] %v10951_v40  ;;  %v1518_v50 = vrot.slane %v10689_v15, 1 }
 0x104   : > { %9041 = vrot.lane.b32.xlu0 %v9040_v29, %s10390_s9  ;;  %9086 = vrot.lane.b32.xlu1 %v9085_v31, %s17315_s18  ;;  %v7551_v29 = vld [vmem:[%s10499_s30 + $0x330] sm:$0xff]  ;;  %v7552_v31 = vld [vmem:[%s10499_s30 + $0x338] sm:$0xff]  ;;  %v605_v17 = vpop.f32.mrf.mxu0 }
 0x105   : > { %9151 = vrot.lane.b32.xlu2 %v9150_v25, %s10387_s16  ;;  %v7604_v25 = vld [vmem:[%s10499_s30 + $0x448] sm:$0xff]  ;;  %v925_v47 = vpack.c.bf16 %v7552_v31, %v7551_v29  ;;  %v1297_v29 = vmax.f32 %v10764_v19, %v10769_v21  ;;  %v1333_v31 = vmax.f32 %v10778_v28, %v10825_v1  ;;  %v7499_v1 = vld [vmem:[%s10499_s30 + $0x220] sm:$0xff] }
 0x106   : > { %v1132_v26 = vpack.c.bf16 %v7604_v25, %v7603_v16  ;;  %v1520_v25 = vrot.slane %v10698_v24, 1 }
 0x108   : > { %v1226_v34 = vpop.f32.mrf.mxu3  ;;  %v1521_v28 = vsel %vm17347_vm3, %v1518_v50, %v1520_v25 }
 0x109   : > { %v1336_v27 = vmax.f32 %v1018_v48, %v1226_v34  ;;  %v1021_v48 = vpop.f32.mrf.mxu2 }
 0x10b   : > { %v1372_v34 = vmax.f32 %v1300_v10, %v1336_v27  ;;  %v1301_v10 = vmax.f32 %v605_v17, %v813_v11  ;;  %v17126_v17 = vrot.slane %v10808_v57, 6  ;;  %v1369_v11 = vmax.f32 %v1297_v29, %v1333_v31 }
 0x10c   : > { %9046 = vrot.lane.b32.xlu0 %v9045_v3, %s10391_s21  ;;  %9091 = vrot.lane.b32.xlu1 %v9090_v63, %s10390_s9  ;;  %v1801_v3 = vsel %vm17153_vm5, %v17443_v12, %v10951_v40  ;;  %v1803_v63 = vsel %vm17153_vm5, %v10951_v40, %v17127_v55  ;;  %v7553_v12 = vld [vmem:[%s10499_s30 + $0x340] sm:$0xff]  ;;  %v1522_v29 = vrot.slane %v10730_v62, 1  ;;  %v11045_v40 = vrot.slane %v10772_v22, 7 }
 0x10d   : > { %9156 = vrot.lane.b32.xlu2 %v10948_v37, %s10388_s17  ;;  %7518 = vmatmul.msk.bf16.gmra.mxu1 %vm504_vm2, %v717_v53  ;;  %v1923_v53 = vsel %vm1914_vm7, %v1920_v36, %v17128_v0  ;;  %v10978_v27 = vadd.f32 %v10643_v35, %v1372_v34  ;;  %v9160_v16 = vpack.i.bf16 %v1803_v63, %v1801_v3  ;;  %v7500_v34 = vld [vmem:[%s10499_s30 + $0x228] sm:$0xff]  ;;  %v7605_v36 = vld [vmem:[%s10499_s30 + $0x450] sm:$0xff]  ;;  %v471_v55 = vld [vmem:[%s10499_s30 + $0x100] sm:$0xff] }
 0x10e   : > { %7625 = vmatmul.msk.bf16.gmra.mxu3 %vm504_vm2, %v1132_v26  ;;  %7572 = vmatmul.msk.bf16.gmra.mxu2 %vm504_vm2, %v925_v47  ;;  %v9095_v23 = vpack.i.bf16 %v1923_v53, %v1921_v14  ;;  %v7554_v3 = vld [vmem:[%s10499_s30 + $0x348] sm:$0xff]  ;;  %v11023_v14 = vpop.f32.mrf.mxu1  ;;  %17451 = vst [vmem:[#allocation12_spill] sm:$0xff] %v11045_v40 }
 0x10f   : > { %7464 = vmatmul.msk.bf16.gmra.mxu0 %vm504_vm2, %v490_v56  ;;  %17444 = vst [vmem:[#allocation8_spill] sm:$0xff] %v10978_v27  ;;  %v10994_v56 = vrot.slane %v10772_v22, 6  ;;  %v11002_v21 = vrot.slane %v10978_v27, 3  ;;  %v472_v0 = vld [vmem:[%s10499_s30 + $0x108] sm:$0xff] }
 0x110   : > { %v1229_v26 = vpop.f32.mrf.mxu3 }
 0x111   : > { %v1337_v51 = vmax.f32 %v1021_v48, %v1229_v26  ;;  %17446 = vst [vmem:[#allocation9_spill] sm:$0xff] %v10994_v56  ;;  %v7606_v48 = vld [vmem:[%s10499_s30 + $0x458] sm:$0xff]  ;;  %v17449_v26 = vrot.slane %v10730_v62, 6  ;;  %v1865_v58 = vsel %vm17211_vm6, %v10994_v56, %v17126_v17  ;;  %v926_v17 = vpack.c.bf16 %v7554_v3, %v7553_v12 }
 0x112   : > { %v1525_v12 = vsel %vm17347_vm3, %v1522_v29, %v1524_v54  ;;  %v17452_v3 = vrot.slane %v10730_v62, 7 }
 0x113   : > { %v1373_v47 = vmax.f32 %v1301_v10, %v1337_v51  ;;  %v17448_v10 = vrot.slane %v10653_v44, 1  ;;  %v1863_v51 = vsel %vm17211_vm6, %v17449_v26, %v10994_v56  ;;  %v1133_v26 = vpack.c.bf16 %v7606_v48, %v7605_v36 }
 0x114   : > { %9051 = vrot.lane.b32.xlu0 %v9050_v18, %s17311_s22  ;;  %9096 = vrot.lane.b32.xlu1 %v9095_v23, %s10391_s21  ;;  %v718_v18 = vpack.c.bf16 %v7500_v34, %v7499_v1  ;;  %v607_v23 = vpop.f32.mrf.mxu0  ;;  %v11039_v34 = vadd.f32 %v10643_v35, %v1369_v11  ;;  %v17138_v36 = vrot.slane %v10808_v57, 7  ;;  %v1298_v48 = vmax.f32 %v10818_v60, %v10821_v61  ;;  %v7556_v1 = vld [vmem:[%s10499_s30 + $0x358] sm:$0xff] }
 0x115   : > { %v10998_v19 = vadd.f32 %v10643_v35, %v1373_v47  ;;  %9161 = vrot.lane.b32.xlu2 %v9160_v16, %s17315_s18  ;;  %v1519_v53 = vsel %vm17347_vm3, %v17448_v10, %v1518_v50  ;;  %v1023_v47 = vpop.f32.mrf.mxu2  ;;  %v9120_v10 = vpack.i.bf16 %v10772_v22, %v10730_v62  ;;  %v1526_v61 = vrot.slane %v10808_v57, 1 }
 0x116   : > { %v9055_v16 = vpack.i.bf16 %v1521_v28, %v1519_v53  ;;  %17450 = vst [vmem:[#allocation11_spill] sm:$0xff] %v11039_v34  ;;  %v9165_v53 = vpack.i.bf16 %v1865_v58, %v1863_v51  ;;  %v1706_v11 = vrot.slane %v11039_v34, 4  ;;  %v1925_v51 = vsel %vm1914_vm7, %v17452_v3, %v11045_v40  ;;  %v7501_v3 = vld [vmem:[%s10499_s30 + $0x230] sm:$0xff] }
 0x117   : > { %17447 = vst [vmem:[#allocation10_spill] sm:$0xff] %v10998_v19  ;;  %v17129_v63 = vrot.slane %v10998_v19, 3  ;;  %v1927_v60 = vsel %vm1914_vm7, %v11045_v40, %v17138_v36  ;;  %v17483_v22 = vrot.slane %v10978_v27, 6 }
 0x118   : > { %v1231_v50 = vpop.f32.mrf.mxu3 }
 0x119   : > { %v11030_v31 = vsel %vm560_vm1, %v11002_v21, %v17129_v63  ;;  %v491_v63 = vpack.c.bf16 %v472_v0, %v471_v55  ;;  %v1334_v0 = vmax.f32 %v10835_v7, %v10869_v30  ;;  %v1523_v55 = vsel %vm17347_vm3, %v1520_v25, %v1522_v29 }
 0x11a   : > { %v17453_v7 = vrot.slane %v10808_v57, 4  ;;  %v9100_v25 = vpack.i.bf16 %v1523_v55, %v1521_v28  ;;  %v11083_v28 = vsel %vm17347_vm3, %v1524_v54, %v1526_v61  ;;  %v9105_v54 = vpack.i.bf16 %v10790_v43, %v10717_v46 }
 0x11c   : > { %9056 = vrot.lane.b32.xlu0 %v9055_v16, %s10383_s12  ;;  %9121 = vrot.lane.b32.xlu1 %v9120_v10, %s17311_s22  ;;  %v11074_v30 = vsel %vm17348_vm0, %v17453_v7, %v1706_v11  ;;  %v818_v16 = vpop.f32.mrf.mxu1  ;;  %v610_v29 = vpop.f32.mrf.mxu0  ;;  %v7608_v7 = vld [vmem:[%s10499_s30 + $0x468] sm:$0xff] }
 0x11d   : > { %9166 = vrot.lane.b32.xlu2 %v9165_v53, %s10390_s9  ;;  %7519 = vmatmul.msk.bf16.gmra.mxu1 %vm504_vm2, %v718_v18  ;;  %v11078_v58 = vpack.i.bf16 %v11074_v30, %v10936_v9  ;;  %v9170_v18 = vpack.i.bf16 %v1927_v60, %v1925_v51  ;;  %v1026_v10 = vpop.f32.mrf.mxu2  ;;  %v1338_v9 = vmax.f32 %v1023_v47, %v1231_v50  ;;  %v7502_v51 = vld [vmem:[%s10499_s30 + $0x238] sm:$0xff]  ;;  %v7607_v60 = vld [vmem:[%s10499_s30 + $0x460] sm:$0xff] }
 0x11e   : > { %7626 = vmatmul.msk.bf16.gmra.mxu3 %vm504_vm2, %v1133_v26  ;;  %7573 = vmatmul.msk.bf16.gmra.mxu2 %vm504_vm2, %v926_v17  ;;  %v1370_v17 = vmax.f32 %v1298_v48, %v1334_v0  ;;  %v1302_v53 = vmax.f32 %v607_v23, %v11023_v14  ;;  %v1303_v0 = vmax.f32 %v610_v29, %v818_v16 }
 0x11f   : > { %7465 = vmatmul.msk.bf16.gmra.mxu0 %vm504_vm2, %v491_v63  ;;  %v9125_v63 = vpack.i.bf16 %v1525_v12, %v1523_v55  ;;  %v9175_v47 = vpack.i.bf16 %v11083_v28, %v1525_v12  ;;  %v9200_v23 = vpack.i.bf16 %v11039_v34, %v10808_v57  ;;  %v1134_v16 = vpack.c.bf16 %v7608_v7, %v7607_v60  ;;  %v7609_v60 = vld [vmem:[%s10499_s30 + $0x470] sm:$0xff]  ;;  %v7610_v7 = vld [vmem:[%s10499_s30 + $0x478] sm:$0xff] }
 0x120   : > { %v1234_v26 = vpop.f32.mrf.mxu3  ;;  %v11088_v55 = vadd.f32 %v10643_v35, %v1370_v17  ;;  %v1374_v50 = vmax.f32 %v1302_v53, %v1338_v9  ;;  %v1528_v17 = vrot.slane %v11039_v34, 1  ;;  %v1588_v53 = vrot.slane %v11039_v34, 2 }
 0x121   : > { %v1339_v48 = vmax.f32 %v1026_v10, %v1234_v26 }
 0x122   : > { %17454 = vst [vmem:[#allocation13_spill] sm:$0xff] %v11088_v55  ;;  %v11106_v46 = vadd.f32 %v10643_v35, %v1374_v50  ;;  %v11115_v12 = vsel %vm17347_vm3, %v1526_v61, %v1528_v17  ;;  %v9110_v61 = vpack.i.bf16 %v10833_v5, %v10745_v4  ;;  %v17459_v5 = vrot.slane %v10808_v57, 2 }
 0x123   : > { %v1375_v14 = vmax.f32 %v1303_v0, %v1339_v48  ;;  %v1590_v48 = vrot.slane %v11088_v55, 2  ;;  %v17457_v0 = vpack.i.bf16 %v10840_v8, %v10793_v45  ;;  %v1135_v50 = vpack.c.bf16 %v7610_v7, %v7609_v60  ;;  %v8705_v7 = vld [vmem:[%s17110_s3 + $0x10] sm:$0xff] }
 0x124   : > { %9101 = vrot.lane.b32.xlu0 %v9100_v25, %s17133_s23  ;;  %9126 = vrot.lane.b32.xlu1 %v9125_v63, %s10383_s12  ;;  %v7555_v25 = vld [vmem:[%s10499_s30 + $0x350] sm:$0xff]  ;;  %v719_v63 = vpack.c.bf16 %v7502_v51, %v7501_v3  ;;  %17455 = vst [vmem:[#allocation14_spill] sm:$0xff] %v11106_v46  ;;  %v17136_v26 = vrot.slane %v11106_v46, 6  ;;  %v8710_v3 = vld [vmem:[%s17110_s3 + $0x38] sm:$0xff]  ;;  %v1589_v51 = vsel %vm17349_vm4, %v17459_v5, %v1588_v53  ;;  %s17313_s30 = smov 44  }
 0x125   : > { %9171 = vrot.lane.b32.xlu2 %v9170_v18, %s10391_s21  ;;  %v1530_v18 = vrot.slane %v11088_v55, 1  ;;  %v927_v29 = vpack.c.bf16 %v7556_v1, %v7555_v25  ;;  %v11109_v43 = vadd.f32 %v10643_v35, %v1375_v14  ;;  %v11153_v45 = vsel %vm17349_vm4, %v1588_v53, %v1590_v48  ;;  %4741 = vmatpush.bf16.msrb.mxu0 %v8710_v3 }
 0x126   : > { %v17460_v14 = vpack.i.bf16 %v10889_v52, %v10816_v59  ;;  %v1708_v53 = vrot.slane %v11088_v55, 4  ;;  %v1299_v60 = vmax.f32 %v10872_v32, %v10879_v38  ;;  %v8704_v38 = vld [vmem:[%s17110_s3 + $0x8] sm:$0xff] }
 0x127   : > { %17456 = vst [vmem:[#allocation15_spill] sm:$0xff] %v11109_v43  ;;  %v11120_v1 = vsel %vm17347_vm3, %v1528_v17, %v1530_v18  ;;  %v17135_v9 = vrot.slane %v11109_v43, 6 }
 0x128   : > { %v9255_v10 = vpack.i.bf16 %v11120_v1, %v11115_v12 }
 0x129   : > { %v11145_v4 = vsel %vm17211_vm6, %v17136_v26, %v17135_v9 }
 0x12a   : > { %17458 = vst [vmem:[#allocation16_spill] sm:$0xff] %v11145_v4 }
 0x12c   : > { %9106 = vrot.lane.b32.xlu0 %v9105_v54, %s17131_s24  ;;  %9176 = vrot.lane.b32.xlu1 %v9175_v47, %s17133_s23  ;;  %v9260_v54 = vpack.i.bf16 %v11153_v45, %v1589_v51  ;;  %v8709_v47 = vld [vmem:[%s17110_s3 + $0x30] sm:$0xff] }
 0x12d   : > { %9201 = vrot.lane.b32.xlu2 %v9200_v23, %s17311_s22  ;;  %7520 = vmatmul.msk.bf16.gmra.mxu1 %vm504_vm2, %v719_v63  ;;  %v1647_v23 = vrot.slane %v11039_v34, 3  ;;  %v1649_v63 = vrot.slane %v11088_v55, 3 }
 0x12e   : > { %7627 = vmatmul.msk.bf16.gmra.mxu3 %vm504_vm2, %v1134_v16  ;;  %7574 = vmatmul.msk.bf16.gmra.mxu2 %vm504_vm2, %v927_v29  ;;  %v8708_v16 = vld [vmem:[%s17110_s3 + $0x28] sm:$0xff] }
 0x12f   : > { %4742 = vmatpush.bf16.msrb.mxu0 %v8709_v47  ;;  %v11184_v29 = vsel %vm560_vm1, %v1647_v23, %v1649_v63  ;;  %v9210_v47 = vpack.i.bf16 %v1589_v51, %v10840_v8  ;;  %v9205_v51 = vpack.i.bf16 %v11115_v12, %v11083_v28  ;;  %v11258_v12 = vpop.f32.mrf.mxu0 }
 0x130   : > { %17464 = vst [vmem:[#allocation19_spill] sm:$0xff] %v11258_v12 }
 0x133   : > { %4743 = vmatpush.bf16.msrb.mxu0 %v8708_v16 }
 0x134   : > { %9111 = vrot.lane.b32.xlu0 %v9110_v61, %s10395_s25  ;;  %9181 = vrot.lane.b32.xlu1 %v17457_v0, %s17131_s24  ;;  %v8706_v0 = vld [vmem:[%s17110_s3 + $0x18] sm:$0xff] }
 0x135   : > { %9256 = vrot.lane.b32.xlu2 %v9255_v10, %s17133_s23  ;;  %v8707_v10 = vld [vmem:[%s17110_s3 + $0x20] sm:$0xff]  ;;  %s17488_s23 = smov 92  }
 0x137   : > { %4744 = vmatpush.bf16.msrb.mxu0 %v8707_v10 }
 0x13b   : > { %4745 = vmatpush.bf16.msrb.mxu0 %v8706_v0 }
 0x13c   : > { %9116 = vrot.lane.b32.xlu0 %v10767_v20, %s17317_s28  ;;  %9186 = vrot.lane.b32.xlu1 %v17460_v14, %s10395_s25  ;;  %v17461_v20 = vrot.slane %v10808_v57, 3  ;;  %v8703_v14 = vld [vmem:[%s17110_s3] sm:$0xff] }
 0x13d   : > { %9261 = vrot.lane.b32.xlu2 %v9260_v54, %s17131_s24  ;;  %v9195_v54 = vpack.i.bf16 %v10889_v52, %v10798_v49  ;;  %s10398_s24 = smov 64  }
 0x13e   : > { %7628 = vmatmul.msk.bf16.gmra.mxu3 %vm504_vm2, %v1135_v50  ;;  %v11176_v17 = vpop.permute.xlu0 %9006  ;;  %v1648_v59 = vsel %vm560_vm1, %v17461_v20, %v1647_v23  ;;  %vm17327_vm2 = vcmask 424960  }
 0x13f   : > { %v9265_v61 = vpack.i.bf16 %v11184_v29, %v1648_v59  ;;  %4746 = vmatpush.bf16.msrb.mxu0 %v8705_v7 }
 0x143   : > { %4747 = vmatpush.bf16.msrb.mxu0 %v8704_v38 }
 0x144   : > { %9146 = vrot.lane.b32.xlu0 %v10877_v6, %s17313_s30  ;;  %9191 = vrot.lane.b32.xlu1 %v10948_v37, %s17317_s28  ;;  %v1335_v6 = vmax.f32 %v10881_v41, %v10911_v2  ;;  %v1709_v37 = vsel %vm17348_vm0, %v1706_v11, %v1708_v53  ;;  %v11235_v11 = vpop.f32.mrf.mxu1 }
 0x145   : > { %9266 = vrot.lane.b32.xlu2 %v9265_v61, %s10395_s25  ;;  %v11217_v50 = vpack.i.bf16 %v1709_v37, %v11074_v30  ;;  %17463 = vst [vmem:[#allocation18_spill] sm:$0xff] %v11235_v11  ;;  %v9215_v30 = vpack.i.bf16 %v1648_v59, %v10889_v52 }
 0x146   : > { %v11199_v3 = vpop.permute.xlu0 %9011  ;;  %v1371_v32 = vmax.f32 %v1299_v60, %v1335_v6  ;;  %v9230_v6 = vpack.i.bf16 %v11088_v55, %v11039_v34 }
 0x147   : > { %v11201_v5 = vpop.permute.xlu2 %9131  ;;  %4748 = vmatpush.bf16.msrb.mxu0 %v8703_v14  ;;  %v1804_v14 = vrot.slane %v11039_v34, 5  ;;  %v9014_v25 = vunpack.i.h.bf16 %v11199_v3  ;;  %v9013_v26 = vunpack.i.l.bf16 %v11199_v3 }
 0x148   : > { %v11233_v2 = vadd.f32 %v10643_v35, %v1371_v32 }
 0x14a   : > { %17462 = vst [vmem:[#allocation17_spill] sm:$0xff] %v11233_v2  ;;  %v1532_v23 = vrot.slane %v11233_v2, 1  ;;  %v17140_v10 = vrot.slane %v11233_v2, 2  ;;  %v17139_v32 = vrot.slane %v11233_v2, 3 }
 0x14c   : > { %9196 = vrot.lane.b32.xlu1 %v9195_v54, %s10386_s15  ;;  %9211 = vrot.lane.b32.xlu0 %v9210_v47, %s17319_s13  ;;  %v11256_v28 = vsel %vm17347_vm3, %v1530_v18, %v1532_v23  ;;  %v11260_v20 = vpop.f32.mrf.mxu1  ;;  %v11293_v54 = vpop.f32.mrf.mxu0 }
 0x14d   : > { %9271 = vrot.lane.b32.xlu2 %v11217_v50, %s17317_s28  ;;  %17465 = vst [vmem:[#allocation20_spill] sm:$0xff] %v11260_v20  ;;  %v9285_v59 = vpack.i.bf16 %v11256_v28, %v11120_v1  ;;  %v11282_v1 = vsel %vm17349_vm4, %v1590_v48, %v17140_v10  ;;  %v11302_v48 = vrot.slane %v10978_v27, 1 }
 0x14e   : > { %v11226_v41 = vpop.permute.xlu0 %9016  ;;  %v11228_v49 = vpop.permute.xlu1 %9061  ;;  %v9290_v7 = vpack.i.bf16 %v11282_v1, %v11153_v45  ;;  %17466 = vst [vmem:[#allocation21_spill] sm:$0xff] %v11293_v54  ;;  %v8718_v45 = vld [vmem:[%s17110_s3 + $0x78] sm:$0xff] }
 0x14f   : > { %v11230_v8 = vpop.permute.xlu2 %9136  ;;  %4809 = vmatpush.bf16.msrb.mxu1 %v8718_v45  ;;  %v9019_v45 = vunpack.i.h.bf16 %v11226_v41 }
 0x154   : > { %9216 = vrot.lane.b32.xlu0 %v9215_v30, %s10385_s14  ;;  %9206 = vrot.lane.b32.xlu1 %v9205_v51, %s10383_s12  ;;  %v11320_v51 = vsel %vm560_vm1, %v1649_v63, %v17139_v32  ;;  %v11344_v32 = vrot.slane %v10978_v27, 2  ;;  %v11353_v40 = vpop.f32.mrf.mxu0 }
 0x155   : > { %9276 = vrot.lane.b32.xlu2 %v9265_v61, %s10386_s15  ;;  %v17137_v61 = vrot.slane %v11233_v2, 4  ;;  %17468 = vst [vmem:[#allocation23_spill] sm:$0xff] %v11353_v40 }
 0x156   : > { %v11247_v35 = vpop.permute.xlu0 %9021  ;;  %v11249_v16 = vpop.permute.xlu1 %9066 }
 0x157   : > { %v11251_v52 = vpop.permute.xlu2 %9141  ;;  %v9024_v36 = vunpack.i.h.bf16 %v11247_v35  ;;  %v9023_v3 = vunpack.i.l.bf16 %v11247_v35 }
 0x15c   : > { %9221 = vrot.lane.b32.xlu0 %v11078_v58, %s10386_s15  ;;  %9226 = vrot.lane.b32.xlu1 %v11078_v58, %s17313_s30  ;;  %v11287_v58 = vsel %vm17348_vm0, %v1708_v53, %v17137_v61  ;;  %v11304_v53 = vpop.f32.mrf.mxu1  ;;  %v9018_v61 = vunpack.i.l.bf16 %v11226_v41 }
 0x15d   : > { %9286 = vrot.lane.b32.xlu2 %v9285_v59, %s10383_s12  ;;  %v11296_v47 = vpack.i.bf16 %v11287_v58, %v1709_v37  ;;  %17467 = vst [vmem:[#allocation22_spill] sm:$0xff] %v11304_v53  ;;  %v9009_v59 = vunpack.i.h.bf16 %v11176_v17 }
 0x15e   : > { %v11271_v18 = vpop.permute.xlu0 %9026  ;;  %v11273_v0 = vpop.permute.xlu1 %9071 }
 0x15f   : > { %v11275_v60 = vpop.permute.xlu2 %9151  ;;  %v2256_v10 = vsel %vm17203_vm8, %v10647_v39, %v9009_v59  ;;  %v17469_v39 = vrot.slane %v10808_v57, 5 }
 0x160   : > { %v2269_v56 = vsel %vm17154_vm9, %v2256_v10, %v9014_v25  ;;  %v17470_v10 = vrot.slane %v11088_v55, 5 }
 0x161   : > { %v2282_v59 = vsel %vm17155_vm10, %v2269_v56, %v9019_v45 }
 0x164   : > { %9231 = vrot.lane.b32.xlu0 %v9230_v6, %s10387_s16  ;;  %9291 = vrot.lane.b32.xlu1 %v9290_v7, %s17319_s13  ;;  %v9008_v6 = vunpack.i.l.bf16 %v11176_v17  ;;  %v11327_v7 = vsel %vm17347_vm3, %v1532_v23, %v11302_v48  ;;  %v9295_v17 = vpack.i.bf16 %v11320_v51, %v11184_v29  ;;  %v8717_v23 = vld [vmem:[%s17110_s3 + $0x70] sm:$0xff] }
 0x165   : > { %9306 = vrot.lane.b32.xlu2 %v11296_v47, %s17313_s30  ;;  %v9315_v63 = vpack.i.bf16 %v11302_v48, %v11327_v7  ;;  %4810 = vmatpush.bf16.msrb.mxu1 %v8717_v23  ;;  %v2295_v23 = vsel %vm2293_vm11, %v2282_v59, %v9024_v36  ;;  %v8715_v59 = vld [vmem:[%s17110_s3 + $0x60] sm:$0xff] }
 0x166   : > { %v9032_v37 = vpop.permute.xlu0 %9031  ;;  %v11311_v38 = vpop.permute.xlu1 %9076  ;;  %v2255_v41 = vsel %vm17203_vm8, %v10650_v42, %v9008_v6  ;;  %v1805_v42 = vsel %vm17153_vm5, %v17469_v39, %v1804_v14  ;;  %v1807_v6 = vsel %vm17153_vm5, %v1804_v14, %v17470_v10  ;;  %v17472_v39 = vrot.slane %v11233_v2, 2 }
 0x167   : > { %v11313_v30 = vpop.permute.xlu2 %9156  ;;  %v9034_v9 = vunpack.i.h.bf16 %v9032_v37  ;;  %v9033_v29 = vunpack.i.l.bf16 %v9032_v37  ;;  %v2268_v35 = vsel %vm17154_vm9, %v2255_v41, %v9013_v26  ;;  %v1866_v10 = vrot.slane %v11039_v34, 6 }
 0x168   : > { %v2281_v37 = vsel %vm17155_vm10, %v2268_v35, %v9018_v61  ;;  %v11387_v14 = vsel %vm17349_vm4, %v17472_v39, %v11344_v32 }
 0x169   : > { %v2308_v45 = vsel %vm2306_vm12, %v2295_v23, %v9034_v9  ;;  %v9240_v9 = vpack.i.bf16 %v1807_v6, %v1805_v42  ;;  %v11413_v6 = vpop.f32.mrf.mxu0 }
 0x16a   : > { %17473 = vst [vmem:[#allocation25_spill] sm:$0xff] %v11413_v6 }
 0x16c   : > { %9236 = vrot.lane.b32.xlu0 %v11217_v50, %s10388_s17  ;;  %9296 = vrot.lane.b32.xlu1 %v9295_v17, %s10385_s14  ;;  %v8716_v50 = vld [vmem:[%s17110_s3 + $0x68] sm:$0xff]  ;;  %v2294_v17 = vsel %vm2293_vm11, %v2281_v37, %v9023_v3  ;;  %v9320_v37 = vpack.i.bf16 %v11344_v32, %v11387_v14 }
 0x16d   : > { %9316 = vrot.lane.b32.xlu2 %v9315_v63, %s10383_s12  ;;  %v11373_v63 = vpop.f32.mrf.mxu1  ;;  %v2307_v35 = vsel %vm2306_vm12, %v2294_v17, %v9033_v29  ;;  %4811 = vmatpush.bf16.msrb.mxu1 %v8716_v50  ;;  %v1868_v17 = vrot.slane %v11088_v55, 6  ;;  %v8714_v50 = vld [vmem:[%s17110_s3 + $0x58] sm:$0xff] }
 0x16e   : > { %v11366_v26 = vpop.permute.xlu0 %9036  ;;  %v11368_v25 = vpop.permute.xlu1 %9081  ;;  %17471 = vst [vmem:[#allocation24_spill] sm:$0xff] %v11373_v63  ;;  %v1808_v63 = vrot.slane %v11233_v2, 5 }
 0x16f   : > { %v17143_v41 = vunpack.i.h.bf16 %v11366_v26  ;;  %v17144_v61 = vunpack.i.l.bf16 %v11366_v26  ;;  %v11379_v56 = vpop.permute.xlu2 %9161  ;;  %v1869_v39 = vsel %vm17211_vm6, %v1866_v10, %v1868_v17 }
 0x171   : > { %v2320_v36 = vsel %vm2319_vm13, %v2307_v35, %v17144_v61  ;;  %v2321_v3 = vsel %vm2319_vm13, %v2308_v45, %v17143_v41  ;;  %4812 = vmatpush.bf16.msrb.mxu1 %v8715_v59  ;;  %v17474_v35 = vrot.slane %v10808_v57, 6  ;;  %v1930_v41 = vrot.slane %v11088_v55, 7  ;;  %v11457_v4 = vpop.f32.mrf.mxu0 }
 0x172   : > { %v4461_v29 = vpack.c.bf16 %v2321_v3, %v2320_v36  ;;  %v9310_v36 = vpack.i.bf16 %v10978_v27, %v11233_v2  ;;  %v17475_v3 = vrot.slane %v11233_v2, 3  ;;  %v1712_v61 = vrot.slane %v10978_v27, 4  ;;  %17479 = vst [vmem:[#allocation27_spill] sm:$0xff] %v11457_v4 }
 0x174   : > { %9241 = vrot.lane.b32.xlu0 %v9240_v9, %s17315_s18  ;;  %9301 = vrot.lane.b32.xlu1 %v11296_v47, %s10386_s15  ;;  %v1867_v47 = vsel %vm17211_vm6, %v17474_v35, %v1866_v10  ;;  %v8713_v35 = vld [vmem:[%s17110_s3 + $0x50] sm:$0xff]  ;;  %v1928_v10 = vrot.slane %v11039_v34, 7 }
 0x175   : > { %4749 = vmatmul.bf16.vlgmr.msrb.gmra.mxu0 %v4461_v29  ;;  %9321 = vrot.lane.b32.xlu2 %v9320_v37, %s17319_s13  ;;  %v1654_v37 = vsel %vm560_vm1, %v17475_v3, %v11002_v21  ;;  %v11427_v9 = vpop.f32.mrf.mxu1  ;;  %v9245_v59 = vpack.i.bf16 %v1869_v39, %v1867_v47  ;;  %v17477_v39 = vrot.slane %v10808_v57, 7 }
 0x176   : > { %v11406_v23 = vpop.permute.xlu0 %9041  ;;  %v11408_v42 = vpop.permute.xlu1 %9086  ;;  %17476 = vst [vmem:[#allocation26_spill] sm:$0xff] %v11427_v9  ;;  %v9325_v29 = vpack.i.bf16 %v11002_v21, %v1654_v37  ;;  %4813 = vmatpush.bf16.msrb.mxu1 %v8714_v50  ;;  %v8712_v50 = vld [vmem:[%s17110_s3 + $0x48] sm:$0xff] }
 0x177   : > { %v11415_v45 = vpop.permute.xlu2 %9166  ;;  %v1929_v34 = vsel %vm1914_vm7, %v17477_v39, %v1928_v10  ;;  %v8711_v39 = vld [vmem:[%s17110_s3 + $0x40] sm:$0xff]  ;;  %v17151_v11 = vunpack.i.h.bf16 %v11408_v42 }
 0x17a   : > { %4814 = vmatpush.bf16.msrb.mxu1 %v8713_v35 }
 0x17c   : > { %9246 = vrot.lane.b32.xlu0 %v9245_v59, %s10390_s9  ;;  %9311 = vrot.lane.b32.xlu1 %v9310_v36, %s10387_s16  ;;  %v1931_v59 = vsel %vm1914_vm7, %v1928_v10, %v1930_v41  ;;  %v17478_v36 = vrot.slane %v11233_v2, 4 }
 0x17d   : > { %9326 = vrot.lane.b32.xlu2 %v9325_v29, %s10385_s14  ;;  %v9250_v9 = vpack.i.bf16 %v1931_v59, %v1929_v34  ;;  %v11467_v10 = vpop.f32.mrf.mxu1  ;;  %v11475_v34 = vrot.slane %v10998_v19, 4 }
 0x17e   : > { %v11439_v3 = vpop.permute.xlu0 %9046  ;;  %v11441_v21 = vpop.permute.xlu1 %9091  ;;  %v11455_v29 = vsel %vm17348_vm0, %v17478_v36, %v1712_v61  ;;  %4815 = vmatpush.bf16.msrb.mxu1 %v8712_v50  ;;  %17480 = vst [vmem:[#allocation28_spill] sm:$0xff] %v11467_v10  ;;  %v17482_v50 = vrot.slane %v10978_v27, 5 }
 0x17f   : > { %v11446_v47 = vpop.permute.xlu2 %9171  ;;  %v9330_v35 = vpack.i.bf16 %v1712_v61, %v11455_v29  ;;  %v11462_v6 = vpack.i.bf16 %v11455_v29, %v11287_v58  ;;  %v1870_v58 = vrot.slane %v11233_v2, 6  ;;  %v11486_v36 = vsel %vm17348_vm0, %v1712_v61, %v11475_v34 }
 0x180   : > { %v1811_v54 = vsel %vm17153_vm5, %v1808_v63, %v17482_v50  ;;  %v9385_v20 = vpack.i.bf16 %v11475_v34, %v11486_v36  ;;  %v11514_v50 = vpop.f32.mrf.mxu0 }
 0x181   : > { %v1871_v61 = vsel %vm17211_vm6, %v1868_v17, %v1870_v58  ;;  %v1873_v4 = vsel %vm17211_vm6, %v1870_v58, %v17483_v22  ;;  %17485 = vst [vmem:[#allocation29_spill] sm:$0xff] %v11514_v50  ;;  %v9355_v17 = vpack.i.bf16 %v11327_v7, %v11256_v28  ;;  %v9064_v28 = vunpack.i.h.bf16 %v11228_v49  ;;  %v11560_v50 = vpop.f32.mrf.mxu3 }
 0x182   : > { %4816 = vmatpush.bf16.msrb.mxu1 %v8711_v39  ;;  %v9280_v39 = vpack.i.bf16 %v11233_v2, %v11088_v55  ;;  %v9345_v22 = vpack.i.bf16 %v1873_v4, %v1871_v61  ;;  %v9063_v4 = vunpack.i.l.bf16 %v11228_v49  ;;  %v9074_v7 = vunpack.i.h.bf16 %v11273_v0 }
 0x183   : > { %v9083_v49 = vunpack.i.l.bf16 %v11368_v25 }
 0x184   : > { %9251 = vrot.lane.b32.xlu0 %v9250_v9, %s10391_s21  ;;  %9336 = vrot.lane.b32.xlu1 %v11462_v6, %s10388_s17  ;;  %v1932_v9 = vrot.slane %v11233_v2, 7 }
 0x185   : > { %9331 = vrot.lane.b32.xlu2 %v9330_v35, %s10386_s15  ;;  %v17481_v35 = vrot.slane %v11088_v55, 5  ;;  %v11526_v58 = vpop.f32.mrf.mxu1  ;;  %v1812_v55 = vrot.slane %v10998_v19, 5 }
 0x186   : > { %v11480_v59 = vpop.permute.xlu0 %9051  ;;  %v11482_v10 = vpop.permute.xlu1 %9096  ;;  %v11507_v12 = vsel %vm1914_vm7, %v1930_v41, %v1932_v9  ;;  %v11524_v41 = vpack.i.bf16 %v1654_v37, %v11320_v51  ;;  %17486 = vst [vmem:[#allocation30_spill] sm:$0xff] %v11526_v58  ;;  %v9073_v51 = vunpack.i.l.bf16 %v11273_v0 }
 0x187   : > { %v11490_v40 = vpop.permute.xlu2 %9201  ;;  %v1809_v53 = vsel %vm17153_vm5, %v17481_v35, %v1808_v63  ;;  %v17484_v35 = vrot.slane %v10978_v27, 7 }
 0x188   : > { %v9340_v57 = vpack.i.bf16 %v1811_v54, %v1809_v53  ;;  %v9068_v54 = vunpack.i.l.bf16 %v11249_v16  ;;  %v11547_v53 = vpop.f32.mrf.mxu2 }
 0x189   : > { %v11512_v63 = vsel %vm1914_vm7, %v1932_v9, %v17484_v35  ;;  %17487 = vst [vmem:[#allocation31_spill] sm:$0xff] %v11547_v53  ;;  %v17152_v53 = vunpack.i.l.bf16 %v11408_v42 }
 0x18c   : > { %9281 = vrot.lane.b32.xlu0 %v9280_v39, %s17311_s22  ;;  %9341 = vrot.lane.b32.xlu1 %v9340_v57, %s17315_s18  ;;  %v9069_v39 = vunpack.i.h.bf16 %v11249_v16  ;;  %v9084_v57 = vunpack.i.h.bf16 %v11368_v25 }
 0x18d   : > { %9386 = vrot.lane.b32.xlu2 %v9385_v20, %s10388_s17 }
 0x18e   : > { %v9057_v37 = vpop.permute.xlu0 %9056  ;;  %v11537_v61 = vpop.permute.xlu1 %9121 }
 0x18f   : > { %v9059_v35 = vunpack.i.h.bf16 %v9057_v37  ;;  %v9058_v9 = vunpack.i.l.bf16 %v9057_v37  ;;  %v11541_v20 = vpop.permute.xlu2 %9256  ;;  %v9400_v37 = vpack.i.bf16 %v11106_v46, %v10998_v19 }
 0x191   : > { %v2258_v2 = vsel %vm17203_vm8, %v10689_v15, %v9059_v35  ;;  %v2257_v16 = vsel %vm17203_vm8, %v10653_v44, %v9058_v9  ;;  %v9044_v15 = vunpack.i.h.bf16 %v11406_v23  ;;  %v9043_v35 = vunpack.i.l.bf16 %v11406_v23 }
 0x192   : > { %v2271_v58 = vsel %vm17154_vm9, %v2258_v2, %v9064_v28  ;;  %v2270_v0 = vsel %vm17154_vm9, %v2257_v16, %v9063_v4  ;;  %v11572_v28 = vpop.f32.mrf.mxu0  ;;  %v9049_v23 = vunpack.i.h.bf16 %v11439_v3 }
 0x193   : > { %v2283_v44 = vsel %vm17155_vm10, %v2270_v0, %v9068_v54  ;;  %v2284_v9 = vsel %vm17155_vm10, %v2271_v58, %v9069_v39  ;;  %v9048_v54 = vunpack.i.l.bf16 %v11439_v3  ;;  %v11585_v39 = vpop.f32.mrf.mxu1  ;;  %v1874_v0 = vrot.slane %v10998_v19, 6 }
 0x194   : > { %9346 = vrot.lane.b32.xlu1 %v9345_v22, %s10390_s9  ;;  %9356 = vrot.lane.b32.xlu0 %v9355_v17, %s17488_s23  ;;  %v2296_v2 = vsel %vm2293_vm11, %v2283_v44, %v9073_v51  ;;  %v2297_v25 = vsel %vm2293_vm11, %v2284_v9, %v9074_v7  ;;  %17489 = vst [vmem:[#allocation32_spill] sm:$0xff] %v11585_v39  ;;  %v17492_v44 = vunpack.i.l.bf16 %v11366_v26 }
 0x195   : > { %9401 = vrot.lane.b32.xlu2 %v9400_v37, %s10387_s16  ;;  %v2309_v58 = vsel %vm2306_vm12, %v2296_v2, %v9083_v49  ;;  %v2310_v4 = vsel %vm2306_vm12, %v2297_v25, %v9084_v57  ;;  %v17491_v57 = vrot.slane %v10978_v27, 5  ;;  %v17493_v2 = vunpack.i.h.bf16 %v11366_v26 }
 0x196   : > { %v9102_v22 = vpop.permute.xlu0 %9101  ;;  %v9127_v17 = vpop.permute.xlu1 %9126  ;;  %v2322_v7 = vsel %vm2319_vm13, %v2309_v58, %v17152_v53  ;;  %v2323_v51 = vsel %vm2319_vm13, %v2310_v4, %v17151_v11  ;;  %v2333_v9 = vsel %vm2332_vm14, %v17492_v44, %v9043_v35  ;;  %v17494_v4 = vrot.slane %v11106_v46, 5 }
 0x197   : > { %v9129_v3 = vunpack.i.h.bf16 %v9127_v17  ;;  %v9128_v16 = vunpack.i.l.bf16 %v9127_v17  ;;  %v11587_v37 = vpop.permute.xlu2 %9261  ;;  %v1813_v49 = vsel %vm17153_vm5, %v17491_v57, %v1812_v55  ;;  %v2334_v25 = vsel %vm2332_vm14, %v17493_v2, %v9044_v15 }
 0x198   : > { %17490 = vst [vmem:[#allocation33_spill] sm:$0xff] %v11587_v37  ;;  %v4465_v58 = vpack.c.bf16 %v2323_v51, %v2322_v7  ;;  %v1815_v17 = vsel %vm17153_vm5, %v1812_v55, %v17494_v4  ;;  %v2346_v11 = vsel %vm2345_vm15, %v2333_v9, %v9048_v54  ;;  %v2347_v53 = vsel %vm2345_vm15, %v2334_v25, %v9049_v23  ;;  %v11618_v23 = vpop.f32.mrf.mxu2 }
 0x199   : > { %v2260_v57 = vsel %vm17203_vm8, %v10730_v62, %v9129_v3  ;;  %v2259_v39 = vsel %vm17203_vm8, %v10698_v24, %v9128_v16  ;;  %v9054_v35 = vunpack.i.h.bf16 %v11480_v59  ;;  %v9053_v26 = vunpack.i.l.bf16 %v11480_v59 }
 0x19a   : > { %v17495_v15 = vunpack.i.h.bf16 %v11201_v5  ;;  %v17496_v55 = vunpack.i.l.bf16 %v11201_v5  ;;  %4754 = vmatmul.bf16.gmra.mxu0 %v4465_v58  ;;  %v9029_v62 = vunpack.i.h.bf16 %v11271_v18  ;;  %v9028_v24 = vunpack.i.l.bf16 %v11271_v18 }
 0x19b   : > { %vm17321_vm5 = vcmask 588800   ;;  %v9405_v51 = vpack.i.bf16 %v1815_v17, %v1813_v49  ;;  %v9104_v3 = vunpack.i.h.bf16 %v9102_v22  ;;  %v9103_v59 = vunpack.i.l.bf16 %v9102_v22  ;;  %v11639_v22 = vpop.f32.mrf.mxu3  ;;  %v11655_v17 = vpop.f32.mrf.mxu0 }
 0x19c   : > { %v2273_v7 = vsel %vm17154_vm9, %v2260_v57, %v17495_v15  ;;  %v11616_v54 = vsel %vm17154_vm9, %v2259_v39, %v17496_v55  ;;  %v17498_v16 = vpack.i.bf16 %v11512_v63, %v11507_v12  ;;  %v17500_v5 = vpack.i.bf16 %v11387_v14, %v11282_v1 }
 0x19d   : > { %17497 = vst [vmem:[#allocation34_spill] sm:$0xff] %v11616_v54  ;;  %v17501_v39 = vunpack.i.l.bf16 %v11230_v8  ;;  %v17502_v18 = vunpack.i.h.bf16 %v11230_v8  ;;  %v17158_v12 = vunpack.i.h.bf16 %v11313_v30  ;;  %v9158_v63 = vunpack.i.l.bf16 %v11313_v30  ;;  %9406 = vrot.lane.b32.xlu2 %v9405_v51, %s17315_s18 }
 0x19e   : > { %9351 = vrot.lane.b32.xlu1 %v17498_v16, %s10391_s21  ;;  %9361 = vrot.lane.b32.xlu0 %v17500_v5, %s17499_s29  ;;  %v2359_v9 = vsel %vm17327_vm2, %v2346_v11, %v9028_v24  ;;  %v2360_v1 = vsel %vm17327_vm2, %v2347_v53, %v9029_v62  ;;  %vm17189_vm9 = vcmask 752640   ;;  %v11648_v8 = vpop.permute.xlu0 %9106  ;;  %v11650_v25 = vpop.permute.xlu1 %9176  ;;  %v17504_v58 = vrot.slane %v10978_v27, 6 }
 0x19f   : > { %v2285_v44 = vsel %vm17155_vm10, %v11616_v54, %v17501_v39  ;;  %v11637_v49 = vsel %vm17155_vm10, %v2273_v7, %v17502_v18  ;;  %v2373_v14 = vsel %vm17321_vm5, %v2360_v1, %v9054_v35  ;;  %v2372_v2 = vsel %vm17321_vm5, %v2359_v9, %v9053_v26  ;;  %17503 = vst [vmem:[#allocation35_spill] sm:$0xff] %v11648_v8  ;;  %v11659_v57 = vpop.permute.xlu2 %9266  ;;  %v11673_v16 = vpop.f32.mrf.mxu1  ;;  %v17549_v54 = vld [vmem:[#allocation21_spill] sm:$0xff] }
 0x1a0   : > { %v1875_v4 = vsel %vm17211_vm6, %v17504_v58, %v1874_v0  ;;  %v17157_v11 = vunpack.i.h.bf16 %v11648_v8  ;;  %v17156_v53 = vunpack.i.l.bf16 %v11648_v8  ;;  %17505 = vst [vmem:[#allocation36_spill] sm:$0xff] %v11659_v57  ;;  %v17506_v35 = vunpack.i.l.bf16 %v11251_v52  ;;  %v17542_v57 = vld [vmem:[#allocation5_spill] sm:$0xff] }
 0x1a1   : > { %v17507_v15 = vunpack.i.h.bf16 %v11251_v52  ;;  %v2386_v55 = vsel %vm17189_vm9, %v2373_v14, %v9104_v3  ;;  %v2385_v62 = vsel %vm17189_vm9, %v2372_v2, %v9103_v59  ;;  %vm17184_vm10 = vcmask 916480  }
 0x1a2   : > { %v2298_v26 = vsel %vm2293_vm11, %v2285_v44, %v17506_v35  ;;  %v17508_v24 = vrot.slane %v11106_v46, 6  ;;  %v2398_v5 = vsel %vm17184_vm10, %v2385_v62, %v17156_v53  ;;  %v2399_v52 = vsel %vm17184_vm10, %v2386_v55, %v17157_v11 }
 0x1a3   : > { %v2299_v7 = vsel %vm2293_vm11, %v11637_v49, %v17507_v15  ;;  %v9380_v3 = vpack.i.bf16 %v10998_v19, %v10978_v27  ;;  %v2049_v59 = vrot.slane %v10998_v19, 1  ;;  %v11685_v39 = vunpack.i.h.bf16 %v11379_v56 }
 0x1a4   : > { %v1877_v51 = vsel %vm17211_vm6, %v1874_v0, %v17508_v24  ;;  %v4462_v44 = vpack.c.bf16 %v2399_v52, %v2398_v5  ;;  %v2311_v0 = vsel %vm2306_vm12, %v2298_v26, %v9158_v63  ;;  %v2312_v18 = vsel %vm2306_vm12, %v2299_v7, %v17158_v12  ;;  %v11698_v63 = vpop.f32.mrf.mxu2  ;;  %v11737_v12 = vpop.f32.mrf.mxu0 }
 0x1a5   : > { %v17160_v9 = vunpack.i.l.bf16 %v11379_v56  ;;  %v9410_v1 = vpack.i.bf16 %v1877_v51, %v1875_v4  ;;  %v17159_v14 = vrot.slane %v11106_v46, 1  ;;  %v1936_v2 = vrot.slane %v10998_v19, 7 }
 0x1a6   : > { %v9094_v58 = vunpack.i.h.bf16 %v11441_v21  ;;  %v9093_v35 = vunpack.i.l.bf16 %v11441_v21  ;;  %4817 = vmatmul.bf16.vlgmr.msrb.gmra.mxu1 %v4462_v44  ;;  %9366 = vrot.lane.b32.xlu0 %v11524_v41, %s10395_s25  ;;  %v9099_v26 = vunpack.i.h.bf16 %v11482_v10  ;;  %v9098_v15 = vunpack.i.l.bf16 %v11482_v10  ;;  %v11710_v55 = vpop.permute.xlu0 %9111  ;;  %v11712_v62 = vpop.permute.xlu1 %9181 }
 0x1a7   : > { %9381 = vrot.lane.b32.xlu1 %v9380_v3, %s17311_s22  ;;  %9411 = vrot.lane.b32.xlu2 %v9410_v1, %s10390_s9  ;;  %v2324_v4 = vsel %vm2319_vm13, %v2311_v0, %v17160_v9  ;;  %v2325_v21 = vsel %vm2319_vm13, %v2312_v18, %v11685_v39  ;;  %v9079_v7 = vunpack.i.h.bf16 %v11311_v38  ;;  %17509 = vst [vmem:[#allocation37_spill] sm:$0xff] %v11710_v55  ;;  %v17163_v24 = vrot.slane %v11106_v46, 7  ;;  %v11715_v10 = vpop.f32.mrf.mxu3  ;;  %v11718_v5 = vpop.permute.xlu2 %9271 }
 0x1a8   : > { %17510 = vst [vmem:[#allocation38_spill] sm:$0xff] %v11712_v62  ;;  %v9078_v51 = vunpack.i.l.bf16 %v11311_v38  ;;  %v2050_v52 = vsel %vm17347_vm3, %v11302_v48, %v2049_v59  ;;  %v2052_v3 = vsel %vm17347_vm3, %v2049_v59, %v17159_v14  ;;  %v17512_v44 = vrot.slane %v10978_v27, 7 }
 0x1a9   : > { %17511 = vst [vmem:[#allocation39_spill] sm:$0xff] %v11718_v5  ;;  %v17513_v18 = vunpack.i.l.bf16 %v11408_v42  ;;  %v17514_v53 = vunpack.i.h.bf16 %v11408_v42  ;;  %v4469_v11 = vpack.c.bf16 %v2325_v21, %v2324_v4  ;;  %v1939_v48 = vsel %vm1914_vm7, %v1936_v2, %v17163_v24  ;;  %v17541_v5 = vld [vmem:[#allocation6_spill] sm:$0xff] }
 0x1aa   : > { %v1937_v0 = vsel %vm1914_vm7, %v17512_v44, %v1936_v2  ;;  %v9124_v44 = vunpack.i.h.bf16 %v11537_v61  ;;  %v9123_v9 = vunpack.i.l.bf16 %v11537_v61  ;;  %v9178_v42 = vunpack.i.l.bf16 %v11650_v25 }
 0x1ab   : > { %v2335_v1 = vsel %vm2332_vm14, %v17513_v18, %v9093_v35  ;;  %v2336_v38 = vsel %vm2332_vm14, %v17514_v53, %v9094_v58  ;;  %v9179_v35 = vunpack.i.h.bf16 %v11650_v25  ;;  %4759 = vmatmul.bf16.gmra.mxu0 %v4469_v11  ;;  %v17165_v53 = vrot.slane %v11106_v46, 4  ;;  %v11746_v58 = vpop.f32.mrf.mxu1 }
 0x1ac   : > { %v2348_v59 = vsel %vm2345_vm15, %v2335_v1, %v9098_v15  ;;  %v2349_v14 = vsel %vm2345_vm15, %v2336_v38, %v9099_v26  ;;  %v17161_v2 = vunpack.i.h.bf16 %v11712_v62  ;;  %v17162_v4 = vunpack.i.l.bf16 %v11712_v62 }
 0x1ad   : > { %v11750_v15 = vpack.i.bf16 %v2052_v3, %v2050_v52  ;;  %v9415_v26 = vpack.i.bf16 %v1939_v48, %v1937_v0  ;;  %v2361_v21 = vsel %vm17327_vm2, %v2348_v59, %v9078_v51  ;;  %v2362_v61 = vsel %vm17327_vm2, %v2349_v14, %v9079_v7  ;;  %v11788_v59 = vpop.f32.mrf.mxu2 }
 0x1ae   : > { %9371 = vrot.lane.b32.xlu0 %v11462_v6, %s17317_s28  ;;  %v2091_v25 = vrot.slane %v10998_v19, 2  ;;  %v17166_v11 = vrot.slane %v11106_v46, 2  ;;  %v2375_v18 = vsel %vm17321_vm5, %v2362_v61, %v9124_v44  ;;  %v2374_v1 = vsel %vm17321_vm5, %v2361_v21, %v9123_v9  ;;  %v11763_v52 = vpop.permute.xlu0 %9116  ;;  %v11765_v51 = vpop.permute.xlu1 %9186 }
 0x1af   : > { %9421 = vrot.lane.b32.xlu1 %v11750_v15, %s17488_s23  ;;  %9416 = vrot.lane.b32.xlu2 %v9415_v26, %s10391_s21  ;;  %17515 = vst [vmem:[#allocation40_spill] sm:$0xff] %v11763_v52  ;;  %v2387_v14 = vsel %vm17189_vm9, %v2374_v1, %v9178_v42  ;;  %v2388_v6 = vsel %vm17189_vm9, %v2375_v18, %v9179_v35  ;;  %v11769_v7 = vpop.permute.xlu2 %9276  ;;  %v11790_v44 = vpop.f32.mrf.mxu3  ;;  %v9169_v21 = vunpack.i.h.bf16 %v11415_v45  ;;  %v9168_v61 = vunpack.i.l.bf16 %v11415_v45 }
 0x1b0   : > { %17516 = vst [vmem:[#allocation41_spill] sm:$0xff] %v11765_v51  ;;  %v2400_v3 = vsel %vm17184_vm10, %v2387_v14, %v17162_v4  ;;  %v2401_v9 = vsel %vm17184_vm10, %v2388_v6, %v17161_v2  ;;  %v2092_v0 = vsel %vm17349_vm4, %v11344_v32, %v2091_v25  ;;  %v2094_v38 = vsel %vm17349_vm4, %v2091_v25, %v17166_v11  ;;  %v11792_v42 = vpop.f32.mrf.mxu0 }
 0x1b1   : > { %v11786_v48 = vsel %vm17348_vm0, %v11475_v34, %v17165_v53  ;;  %v4466_v35 = vpack.c.bf16 %v2401_v9, %v2400_v3  ;;  %v11794_v26 = vpack.i.bf16 %v2094_v38, %v2092_v0  ;;  %v17164_v34 = vrot.slane %v11106_v46, 3 }
 0x1b2   : > { %v9455_v32 = vpack.i.bf16 %v11786_v48, %v10849_v13  ;;  %v9174_v18 = vunpack.i.h.bf16 %v11446_v47  ;;  %v9173_v1 = vunpack.i.l.bf16 %v11446_v47  ;;  %v9154_v14 = vunpack.i.h.bf16 %v11275_v60 }
 0x1b3   : > { %v11803_v25 = vpop.f32.mrf.mxu1  ;;  %v9153_v6 = vunpack.i.l.bf16 %v11275_v60  ;;  %v17519_v3 = vunpack.i.l.bf16 %v11379_v56  ;;  %v2338_v47 = vsel %vm2332_vm14, %v11685_v39, %v9169_v21  ;;  %v17520_v0 = vrot.slane %v10998_v19, 3 }
 0x1b4   : > { %v9204_v60 = vunpack.i.h.bf16 %v11490_v40  ;;  %v9203_v56 = vunpack.i.l.bf16 %v11490_v40  ;;  %v9258_v21 = vunpack.i.l.bf16 %v11541_v20  ;;  %v9460_v40 = vpack.i.bf16 %v11109_v43, %v11106_v46 }
 0x1b5   : > { %v2337_v9 = vsel %vm2332_vm14, %v17519_v3, %v9168_v61  ;;  %v11828_v38 = vsel %vm560_vm1, %v17520_v0, %v17164_v34  ;;  %v9259_v61 = vunpack.i.h.bf16 %v11541_v20  ;;  %v9390_v3 = vpack.i.bf16 %v11486_v36, %v11455_v29  ;;  %v11840_v2 = vpop.f32.mrf.mxu2 }
 0x1b6   : > { %4822 = vmatmul.bf16.gmra.mxu1 %v4466_v35  ;;  %9376 = vrot.lane.b32.xlu0 %v11524_v41, %s10386_s15  ;;  %v11810_v13 = vpop.permute.xlu0 %9146  ;;  %v11812_v45 = vpop.permute.xlu1 %9191  ;;  %v2350_v35 = vsel %vm2345_vm15, %v2337_v9, %v9173_v1  ;;  %v9430_v9 = vpack.i.bf16 %v11828_v38, %v11030_v31  ;;  %v11855_v29 = vrot.slane %v11109_v43, 1 }
 0x1b7   : > { %9426 = vrot.lane.b32.xlu1 %v11794_v26, %s17499_s29  ;;  %9456 = vrot.lane.b32.xlu2 %v9455_v32, %s10388_s17  ;;  %17517 = vst [vmem:[#allocation42_spill] sm:$0xff] %v11810_v13  ;;  %v11815_v41 = vpop.permute.xlu2 %9286  ;;  %v11832_v32 = vsel %vm2345_vm15, %v2338_v47, %v9174_v18  ;;  %v11842_v0 = vpop.f32.mrf.mxu3  ;;  %v17167_v18 = vunpack.i.l.bf16 %v11587_v37  ;;  %v2363_v47 = vsel %vm17327_vm2, %v2350_v35, %v9153_v6  ;;  %v17537_v13 = vrot.slane %v11106_v46, 4 }
 0x1b8   : > { %17518 = vst [vmem:[#allocation43_spill] sm:$0xff] %v11812_v45  ;;  %v2364_v20 = vsel %vm17327_vm2, %v11832_v32, %v9154_v14  ;;  %v11857_v4 = vpop.f32.mrf.mxu0  ;;  %v2376_v34 = vsel %vm17321_vm5, %v2363_v47, %v9203_v56  ;;  %v17525_v56 = vunpack.i.h.bf16 %v11587_v37  ;;  %v17526_v47 = vrot.slane %v11106_v46, 1  ;;  %v17536_v45 = vld [vmem:[#allocation19_spill] sm:$0xff] }
 0x1b9   : > { %17521 = vst [vmem:[#allocation44_spill] sm:$0xff] %v11832_v32  ;;  %v2377_v24 = vsel %vm17321_vm5, %v2364_v20, %v9204_v60  ;;  %v2389_v14 = vsel %vm17189_vm9, %v2376_v34, %v9258_v21 }
 0x1ba   : > { %v2390_v35 = vsel %vm17189_vm9, %v2377_v24, %v9259_v61  ;;  %v2402_v60 = vsel %vm17184_vm10, %v2389_v14, %v17167_v18  ;;  %v11884_v34 = vsel %vm17347_vm3, %v17526_v47, %v11855_v29  ;;  %v17527_v61 = vunpack.i.h.bf16 %v11313_v30  ;;  %v17534_v18 = vld [vmem:[#allocation31_spill] sm:$0xff] }
 0x1bb   : > { %v9435_v14 = vpack.i.bf16 %v11786_v48, %v11486_v36  ;;  %v1340_v62 = vmax.f32 %v17534_v18, %v11560_v50  ;;  %vm17550_vm9 = vcmask 326656  }
 0x1bd   : > { %v11904_v30 = vpop.f32.mrf.mxu2 }
 0x1be   : > { %9391 = vrot.lane.b32.xlu0 %v9390_v3, %s17313_s30  ;;  %v11863_v53 = vpop.permute.xlu1 %9196  ;;  %v11865_v6 = vpop.permute.xlu0 %9211 }
 0x1bf   : > { %9431 = vrot.lane.b32.xlu1 %v9430_v9, %s10395_s25  ;;  %9461 = vrot.lane.b32.xlu2 %v9460_v40, %s17311_s22  ;;  %17522 = vst [vmem:[#allocation45_spill] sm:$0xff] %v11863_v53  ;;  %v11869_v3 = vpop.f32.mrf.mxu1  ;;  %v9199_v11 = vunpack.i.h.bf16 %v11863_v53  ;;  %v11872_v1 = vpop.permute.xlu2 %9306  ;;  %v2403_v40 = vsel %vm17184_vm10, %v2390_v35, %v17525_v56  ;;  %v9465_v35 = vpack.i.bf16 %v11855_v29, %v11884_v34  ;;  %vm17546_vm10 = vcmask 1042432   ;;  %s17936_s22 = smov 120  }
 0x1c0   : > { %17523 = vst [vmem:[#allocation46_spill] sm:$0xff] %v11869_v3  ;;  %v4470_v20 = vpack.c.bf16 %v2403_v40, %v2402_v60  ;;  %v17528_v56 = vpack.i.bf16 %v11030_v31, %v10805_v33  ;;  %v11910_v40 = vpop.f32.mrf.mxu0  ;;  %v17531_v33 = vrot.slane %v11106_v46, 2  ;;  %v9214_v53 = vunpack.i.h.bf16 %v11865_v6  ;;  %v17561_v3 = vld [vmem:[#allocation24_spill] sm:$0xff] }
 0x1c1   : > { %17524 = vst [vmem:[#allocation47_spill] sm:$0xff] %v11872_v1  ;;  %v2684_v24 = vsel %vm2293_vm11, %v11637_v49, %v9199_v11  ;;  %v11902_v49 = vrot.slane %v11109_v43, 2  ;;  %v11906_v11 = vpop.f32.mrf.mxu3 }
 0x1c2   : > { %v11891_v21 = vsel %vm2306_vm12, %v2684_v24, %v17527_v61  ;;  %17529 = vst [vmem:[#allocation48_spill] sm:$0xff] %v11910_v40 }
 0x1c3   : > { %v11918_v31 = vsel %vm17349_vm4, %v17531_v33, %v11902_v49 }
 0x1c4   : > { %v9470_v61 = vpack.i.bf16 %v11902_v49, %v11918_v31 }
 0x1c5   : > { %v11944_v8 = vpop.f32.mrf.mxu2 }
 0x1c6   : > { %4827 = vmatmul.bf16.gmra.mxu1 %v4470_v20  ;;  %9396 = vrot.lane.b32.xlu0 %v17528_v56, %s10385_s14  ;;  %v9217_v36 = vpop.permute.xlu0 %9216  ;;  %v9207_v60 = vpop.permute.xlu1 %9206  ;;  %v11927_v20 = vrot.slane %v11109_v43, 4 }
 0x1c7   : > { %9436 = vrot.lane.b32.xlu1 %v9435_v14, %s17317_s28  ;;  %9466 = vrot.lane.b32.xlu2 %v9465_v35, %s17488_s23  ;;  %v11912_v47 = vpop.permute.xlu2 %9316  ;;  %v11920_v24 = vpop.f32.mrf.mxu1  ;;  %v11930_v14 = vrot.slane %v11109_v43, 3  ;;  %v9208_v55 = vunpack.i.l.bf16 %v9207_v60  ;;  %v9219_v40 = vunpack.i.h.bf16 %v9217_v36 }
 0x1c8   : > { %17530 = vst [vmem:[#allocation49_spill] sm:$0xff] %v11912_v47  ;;  %v11960_v50 = vpop.f32.mrf.mxu0 }
 0x1c9   : > { %v11958_v52 = vpop.f32.mrf.mxu3  ;;  %17539 = vst [vmem:[#allocation31_spill] sm:$0xff] %v11960_v50 }
 0x1cd   : > { %v12000_v27 = vpop.f32.mrf.mxu2 }
 0x1ce   : > { %9441 = vrot.lane.b32.xlu0 %v11750_v15, %s10383_s12  ;;  %v11934_v35 = vpop.permute.xlu0 %9221  ;;  %v11936_v56 = vpop.permute.xlu1 %9226  ;;  %v17535_v15 = vld [vmem:[#allocation18_spill] sm:$0xff] }
 0x1cf   : > { %9451 = vrot.lane.b32.xlu1 %v9430_v9, %s10386_s15  ;;  %9471 = vrot.lane.b32.xlu2 %v9470_v61, %s17499_s29  ;;  %17532 = vst [vmem:[#allocation50_spill] sm:$0xff] %v11936_v56  ;;  %v11938_v33 = vpop.permute.xlu2 %9321  ;;  %v1304_v51 = vmax.f32 %v17536_v45, %v17535_v15  ;;  %v11950_v9 = vsel %vm17348_vm0, %v17537_v13, %v11927_v20  ;;  %v17538_v61 = vrot.slane %v11106_v46, 3  ;;  %v11963_v18 = vpop.f32.mrf.mxu1  ;;  %v9209_v15 = vunpack.i.h.bf16 %v9207_v60 }
 0x1d0   : > { %17533 = vst [vmem:[#allocation51_spill] sm:$0xff] %v11938_v33  ;;  %v9485_v13 = vpack.i.bf16 %v11950_v9, %v11786_v48  ;;  %v2261_v48 = vsel %vm17203_vm8, %v17542_v57, %v9208_v55  ;;  %v1341_v55 = vmax.f32 %v11618_v23, %v11639_v22  ;;  %v12007_v47 = vpop.f32.mrf.mxu0  ;;  %v9480_v23 = vpack.i.bf16 %v11927_v20, %v11950_v9 }
 0x1d1   : > { %v11956_v56 = vsel %vm560_vm1, %v17538_v61, %v11930_v14  ;;  %17540 = vst [vmem:[#allocation18_spill] sm:$0xff] %v11963_v18  ;;  %v1376_v1 = vmax.f32 %v1304_v51, %v1340_v62  ;;  %v2262_v60 = vsel %vm17203_vm8, %v17541_v5, %v9209_v15  ;;  %v17544_v62 = vrot.slane %v11109_v43, 5  ;;  %v17548_v15 = vld [vmem:[#allocation20_spill] sm:$0xff] }
 0x1d2   : > { %v9475_v37 = vpack.i.bf16 %v11930_v14, %v11956_v56  ;;  %v17545_v51 = vrot.slane %v11106_v46, 5  ;;  %v9213_v5 = vunpack.i.l.bf16 %v11865_v6  ;;  %v1305_v57 = vmax.f32 %v17549_v54, %v17548_v15  ;;  %17553 = vst [vmem:[#allocation5_spill] sm:$0xff] %v12007_v47 }
 0x1d3   : > { %v9218_v6 = vunpack.i.l.bf16 %v9217_v36  ;;  %v9490_v54 = vpack.i.bf16 %v11956_v56, %v11828_v38  ;;  %v9279_v36 = vunpack.i.h.bf16 %v11769_v7  ;;  %v9224_v50 = vunpack.i.h.bf16 %v11934_v35 }
 0x1d4   : > { %v1377_v38 = vmax.f32 %v1305_v57, %v1341_v55 }
 0x1d6   : > { %9446 = vrot.lane.b32.xlu0 %v11794_v26, %s17319_s13  ;;  %v11973_v61 = vpop.permute.xlu0 %9231  ;;  %v11975_v45 = vpop.permute.xlu1 %9291  ;;  %v2587_v26 = vsel %vm17546_vm10, %v17545_v51, %v17544_v62  ;;  %vm17551_vm10 = vmmov %vm17550_vm9  ;;  %v17552_v51 = vld [vmem:[#allocation7_spill] sm:$0xff] }
 0x1d7   : > { %9486 = vrot.lane.b32.xlu1 %v9485_v13, %s17313_s30  ;;  %9476 = vrot.lane.b32.xlu2 %v9475_v37, %s10395_s25  ;;  %v11981_v19 = vpop.permute.xlu2 %9326  ;;  %v11989_v13 = vld [vmem:[%s10493_s27] ss:$0 sm:$0xff]  ;;  %v2274_v62 = vsel %vm17551_vm10, %v2261_v48, %v9213_v5  ;;  %v9495_v33 = vpack.i.bf16 %v2587_v26, %v17552_v51  ;;  %v12017_v26 = vpop.f32.mrf.mxu1 }
 0x1d8   : > { %17543 = vst [vmem:[#allocation19_spill] sm:$0xff] %v11981_v19  ;;  %v11992_v37 = vadd.f32 %v11989_v13, %v1376_v1  ;;  %v2275_v19 = vsel %vm17550_vm9, %v2262_v60, %v9214_v53  ;;  %v12005_v1 = vpop.f32.mrf.mxu3  ;;  %v17554_v53 = vld [vmem:[#allocation22_spill] sm:$0xff]  ;;  %v17555_v60 = vld [vmem:[#allocation23_spill] sm:$0xff]  ;;  %vm17557_vm9 = vcmask 490496  }
 0x1d9   : > { %v1306_v48 = vmax.f32 %v17555_v60, %v17554_v53  ;;  %17556 = vst [vmem:[#allocation20_spill] sm:$0xff] %v12017_v26  ;;  %v2287_v5 = vsel %vm17557_vm9, %v2274_v62, %v9218_v6  ;;  %vm17558_vm10 = vmmov %vm17557_vm9  ;;  %v1342_v62 = vmax.f32 %v11698_v63, %v11715_v10  ;;  %v1343_v60 = vmax.f32 %v11788_v59, %v11790_v44  ;;  %v17562_v63 = vld [vmem:[#allocation25_spill] sm:$0xff] }
 0x1da   : > { %17547 = vst [vmem:[#allocation6_spill] sm:$0xff] %v11992_v37  ;;  %v2288_v15 = vsel %vm17558_vm10, %v2275_v19, %v9219_v40  ;;  %v12028_v53 = vrot.slane %v11992_v37, 4  ;;  %v1307_v10 = vmax.f32 %v17562_v63, %v17561_v3  ;;  %v17566_v3 = vrot.slane %v11109_v43, 7  ;;  %v17569_v63 = vld [vmem:[#allocation29_spill] sm:$0xff] }
 0x1db   : > { %v2686_v55 = vsel %vm2293_vm11, %v2288_v15, %v9279_v36  ;;  %v17565_v36 = vld [vmem:[#allocation27_spill] sm:$0xff]  ;;  %vm17578_vm9 = vcmask 1042432  }
 0x1dc   : > { %v1379_v18 = vmax.f32 %v1307_v10, %v1343_v60  ;;  %v1346_v60 = vmax.f32 %v11944_v8, %v11958_v52  ;;  %v17574_v10 = vld [vmem:[#allocation32_spill] sm:$0xff]  ;;  %v2301_v52 = vsel %vm2293_vm11, %v2288_v15, %v9224_v50  ;;  %vm17584_vm10 = vmmov %vm17578_vm9 }
 0x1de   : > { %9496 = vrot.lane.b32.xlu0 %v9495_v33, %s17315_s18  ;;  %v9278_v33 = vunpack.i.l.bf16 %v11769_v7  ;;  %v9237_v51 = vpop.permute.xlu0 %9236  ;;  %v12025_v22 = vpop.permute.xlu1 %9296  ;;  %v17560_v7 = vrot.slane %v11992_v37, 1 }
 0x1df   : > { %9491 = vrot.lane.b32.xlu1 %v9490_v54, %s10385_s14  ;;  %9481 = vrot.lane.b32.xlu2 %v9480_v23, %s17317_s28  ;;  %v9239_v6 = vunpack.i.h.bf16 %v9237_v51  ;;  %v9238_v19 = vunpack.i.l.bf16 %v9237_v51  ;;  %v12032_v40 = vpop.permute.xlu2 %9331  ;;  %v12048_v54 = vadd.f32 %v11989_v13, %v1377_v38  ;;  %v17568_v38 = vld [vmem:[#allocation28_spill] sm:$0xff]  ;;  %s17915_s28 = smov 40  }
 0x1e0   : > { %17559 = vst [vmem:[#allocation21_spill] sm:$0xff] %v12032_v40  ;;  %v2685_v57 = vsel %vm2293_vm11, %v2287_v5, %v9278_v33  ;;  %v2451_v23 = vsel %vm17347_vm3, %v11855_v29, %v17560_v7  ;;  %v17564_v33 = vld [vmem:[#allocation26_spill] sm:$0xff]  ;;  %v2217_v29 = vsel %vm17348_vm0, %v11927_v20, %v12028_v53  ;;  %v1378_v7 = vmax.f32 %v1306_v48, %v1342_v62  ;;  %v17570_v20 = vld [vmem:[#allocation16_spill] sm:$0xff]  ;;  %v17571_v48 = vld [vmem:[#allocation9_spill] sm:$0xff] }
 0x1e1   : > { %v2698_v51 = vsel %vm2306_vm12, %v2685_v57, %v9238_v19  ;;  %v2699_v40 = vsel %vm2306_vm12, %v2686_v55, %v9239_v6  ;;  %17563 = vst [vmem:[#allocation7_spill] sm:$0xff] %v12048_v54  ;;  %v1308_v26 = vmax.f32 %v17565_v36, %v17564_v33  ;;  %v9510_v59 = vpack.i.bf16 %v2451_v23, %v11884_v34  ;;  %v1048_v33 = vpop.f32.mrf.mxu2 }
 0x1e2   : > { %v9505_v44 = vpack.i.bf16 %v12028_v53, %v2217_v29  ;;  %v17567_v57 = vrot.slane %v11106_v46, 7  ;;  %v1309_v47 = vmax.f32 %v17569_v63, %v17568_v38  ;;  %v9223_v36 = vunpack.i.l.bf16 %v11934_v35  ;;  %v1256_v38 = vpop.f32.mrf.mxu3  ;;  %v12077_v63 = vpop.f32.mrf.mxu0 }
 0x1e3   : > { %v17572_v62 = vpack.i.bf16 %v17570_v20, %v17571_v48  ;;  %v2472_v34 = vrot.slane %v11992_v37, 2  ;;  %v2494_v23 = vrot.slane %v11992_v37, 3  ;;  %v1345_v20 = vmax.f32 %v11904_v30, %v11906_v11 }
 0x1e4   : > { %v12062_v55 = vsel %vm1914_vm7, %v17567_v57, %v17566_v3  ;;  %v1344_v3 = vmax.f32 %v11840_v2, %v11842_v0  ;;  %v17573_v57 = vld [vmem:[#allocation30_spill] sm:$0xff]  ;;  %v1311_v2 = vmax.f32 %v11655_v17, %v17574_v10  ;;  %v1347_v35 = vmax.f32 %v12000_v27, %v12005_v1 }
 0x1e5   : > { %v1310_v46 = vmax.f32 %v11572_v28, %v17573_v57  ;;  %v1312_v28 = vmax.f32 %v11737_v12, %v11673_v16  ;;  %v2300_v17 = vsel %vm2293_vm11, %v2287_v5, %v9223_v36  ;;  %v2473_v12 = vsel %vm17349_vm4, %v11902_v49, %v2472_v34 }
 0x1e6   : > { %9501 = vrot.lane.b32.xlu0 %v17572_v62, %s10390_s9  ;;  %v9242_v0 = vpop.permute.xlu0 %9241  ;;  %v12090_v48 = vpop.permute.xlu1 %9301  ;;  %v12111_v27 = vsel %vm560_vm1, %v11930_v14, %v2494_v23  ;;  %v12116_v16 = vsel %vm2319_vm13, %v11891_v21, %v11685_v39  ;;  %v2313_v1 = vsel %vm2306_vm12, %v2300_v17, %v9238_v19  ;;  %v9525_v5 = vpack.i.bf16 %v2217_v29, %v11950_v9 }
 0x1e7   : > { %9511 = vrot.lane.b32.xlu1 %v9510_v59, %s10383_s12  ;;  %9506 = vrot.lane.b32.xlu2 %v9505_v44, %s17313_s30  ;;  %v1348_v59 = vmax.f32 %v1048_v33, %v1256_v38  ;;  %v12094_v44 = vpop.f32.mrf.mxu1  ;;  %v12096_v62 = vunpack.i.h.bf16 %v9242_v0  ;;  %v12098_v30 = vunpack.i.l.bf16 %v9242_v0  ;;  %v12100_v8 = vpop.permute.xlu2 %9386  ;;  %17577 = vst [vmem:[#allocation24_spill] sm:$0xff] %v12116_v16  ;;  %v2314_v33 = vsel %vm2306_vm12, %v2301_v52, %v9239_v6  ;;  %v17582_v0 = vld [vmem:[#allocation12_spill] sm:$0xff]  ;;  %s17930_s30 = smov 24  }
 0x1e8   : > { %17575 = vst [vmem:[#allocation22_spill] sm:$0xff] %v12094_v44  ;;  %v9515_v21 = vpack.i.bf16 %v2473_v12, %v11918_v31  ;;  %v9520_v50 = vpack.i.bf16 %v12111_v27, %v11956_v56  ;;  %v2588_v9 = vrot.slane %v11992_v37, 5  ;;  %v17198_v6 = vrot.slane %v12048_v54, 5 }
 0x1e9   : > { %17576 = vst [vmem:[#allocation23_spill] sm:$0xff] %v12100_v8  ;;  %v12121_v11 = vsel %vm2319_vm13, %v2698_v51, %v12098_v30  ;;  %v12125_v49 = vsel %vm2319_vm13, %v2699_v40, %v12096_v62  ;;  %v2326_v39 = vsel %vm2319_vm13, %v2313_v1, %v12098_v30  ;;  %v2327_v15 = vsel %vm2319_vm13, %v2314_v33, %v12096_v62 }
 0x1ea   : > { %v17196_v14 = vrot.slane %v12121_v11, 5  ;;  %v17195_v40 = vrot.slane %v12116_v16, 5  ;;  %v4473_v19 = vpack.c.bf16 %v2327_v15, %v2326_v39  ;;  %v2452_v51 = vrot.slane %v12048_v54, 1 }
 0x1eb   : > { %v1380_v29 = vmax.f32 %v1308_v26, %v1344_v3  ;;  %v1381_v36 = vmax.f32 %v1309_v47, %v1345_v20  ;;  %v1382_v56 = vmax.f32 %v1310_v46, %v1346_v60  ;;  %v12157_v26 = vadd.f32 %v11989_v13, %v1378_v7  ;;  %v12162_v20 = vpop.f32.mrf.mxu0 }
 0x1ec   : > { %v12150_v31 = vsel %vm17578_vm9, %v17195_v40, %v17196_v14  ;;  %4764 = vmatmul.bf16.gmra.mxu0 %v4473_v19  ;;  %v12160_v47 = vadd.f32 %v11989_v13, %v1379_v18  ;;  %v1383_v3 = vmax.f32 %v1311_v2, %v1347_v35  ;;  %17580 = vst [vmem:[#allocation26_spill] sm:$0xff] %v12162_v20  ;;  %v17583_v60 = vrot.slane %v11109_v43, 5  ;;  %v17593_v14 = vld [vmem:[#allocation11_spill] sm:$0xff] }
 0x1ed   : > { %v9530_v17 = vpack.i.bf16 %v12062_v55, %v17582_v0  ;;  %v1384_v46 = vmax.f32 %v1312_v28, %v1348_v59  ;;  %v2591_v7 = vsel %vm17578_vm9, %v2588_v9, %v17198_v6  ;;  %v17585_v18 = vrot.slane %v11992_v37, 1 }
 0x1ee   : > { %9526 = vrot.lane.b32.xlu0 %v9525_v5, %s10388_s17  ;;  %v12152_v57 = vpop.permute.xlu0 %9246  ;;  %v12154_v38 = vpop.permute.xlu1 %9311  ;;  %17579 = vst [vmem:[#allocation25_spill] sm:$0xff] %v12160_v47  ;;  %v2589_v12 = vsel %vm17584_vm10, %v17583_v60, %v2588_v9  ;;  %v12178_v35 = vadd.f32 %v11989_v13, %v1380_v29  ;;  %v12181_v52 = vadd.f32 %v11989_v13, %v1381_v36  ;;  %v9289_v28 = vunpack.i.h.bf16 %v11815_v41 }
 0x1ef   : > { %9516 = vrot.lane.b32.xlu1 %v9515_v21, %s17319_s13  ;;  %9521 = vrot.lane.b32.xlu2 %v9520_v50, %s10386_s15  ;;  %v12164_v10 = vpop.permute.xlu2 %9401  ;;  %v2453_v2 = vsel %vm17347_vm3, %v17585_v18, %v2452_v51  ;;  %v12183_v55 = vpop.f32.mrf.mxu1  ;;  %v2614_v59 = vrot.slane %v11992_v37, 6  ;;  %v12188_v1 = vadd.f32 %v11989_v13, %v1382_v56  ;;  %v17197_v5 = vrot.slane %v12048_v54, 6 }
 0x1f0   : > { %17581 = vst [vmem:[#allocation27_spill] sm:$0xff] %v12164_v10  ;;  %v2474_v33 = vrot.slane %v12048_v54, 2  ;;  %v12193_v39 = vrot.slane %v12048_v54, 3  ;;  %v9550_v50 = vpack.i.bf16 %v2591_v7, %v2589_v12  ;;  %v9535_v15 = vpack.i.bf16 %v2452_v51, %v2453_v2  ;;  %v12204_v36 = vpop.f32.mrf.mxu2  ;;  %v12206_v56 = vpop.f32.mrf.mxu3 }
 0x1f1   : > { %17586 = vst [vmem:[#allocation28_spill] sm:$0xff] %v12178_v35  ;;  %v17200_v19 = vrot.slane %v12157_v26, 3  ;;  %v12199_v9 = vadd.f32 %v11989_v13, %v1383_v3  ;;  %v12202_v29 = vadd.f32 %v11989_v13, %v1384_v46  ;;  %v9288_v0 = vunpack.i.l.bf16 %v11815_v41  ;;  %v17590_v3 = vld [vmem:[#allocation13_spill] sm:$0xff] }
 0x1f2   : > { %17587 = vst [vmem:[#allocation29_spill] sm:$0xff] %v12181_v52  ;;  %v9248_v60 = vunpack.i.l.bf16 %v12152_v57  ;;  %v2264_v7 = vsel %vm17203_vm8, %v17590_v3, %v9289_v28  ;;  %v17591_v46 = vrot.slane %v11109_v43, 6  ;;  %v2475_v28 = vsel %vm17349_vm4, %v2472_v34, %v2474_v33 }
 0x1f3   : > { %17588 = vst [vmem:[#allocation16_spill] sm:$0xff] %v12183_v55  ;;  %v9293_v3 = vunpack.i.l.bf16 %v11975_v45  ;;  %v2263_v21 = vsel %vm17203_vm8, %v17593_v14, %v9288_v0  ;;  %v9299_v51 = vunpack.i.h.bf16 %v12025_v22  ;;  %v12253_v6 = vpop.f32.mrf.mxu0  ;;  %v9298_v12 = vunpack.i.l.bf16 %v12025_v22 }
 0x1f4   : > { %17589 = vst [vmem:[#allocation9_spill] sm:$0xff] %v12188_v1  ;;  %v2615_v41 = vsel %vm17211_vm6, %v17591_v46, %v2614_v59  ;;  %v9303_v14 = vunpack.i.l.bf16 %v12090_v48  ;;  %vm17596_vm10 = vcmask 326656   ;;  %v17597_v22 = vrot.slane %v11109_v43, 7 }
 0x1f5   : > { %17594 = vst [vmem:[#allocation32_spill] sm:$0xff] %v12253_v6  ;;  %vm17599_vm9 = vmmov %vm17596_vm10  ;;  %v17618_v20 = vrot.slane %v12188_v1, 1  ;;  %v3042_v44 = vrot.slane %v12188_v1, 3 }
 0x1f6   : > { %9531 = vrot.lane.b32.xlu0 %v9530_v17, %s10391_s21  ;;  %v12221_v18 = vpop.permute.xlu0 %9251  ;;  %v12223_v2 = vpop.permute.xlu1 %9336  ;;  %v2617_v17 = vsel %vm17211_vm6, %v2614_v59, %v17197_v5  ;;  %v2521_v59 = vsel %vm560_vm1, %v12193_v39, %v17200_v19  ;;  %v2339_v5 = vsel %vm2332_vm14, %v12098_v30, %v9248_v60  ;;  %v3037_v19 = vrot.slane %v12160_v47, 3 }
 0x1f7   : > { %9551 = vrot.lane.b32.xlu1 %v9550_v50, %s17315_s18  ;;  %9536 = vrot.lane.b32.xlu2 %v9535_v15, %s10383_s12  ;;  %v12235_v50 = vsel %vm560_vm1, %v2494_v23, %v12193_v39  ;;  %v2640_v15 = vrot.slane %v11992_v37, 7  ;;  %v9253_v46 = vunpack.i.l.bf16 %v12221_v18  ;;  %v12240_v40 = vpop.permute.xlu2 %9406  ;;  %v9294_v23 = vunpack.i.h.bf16 %v11975_v45  ;;  %v12263_v16 = vpop.f32.mrf.mxu1 }
 0x1f8   : > { %17592 = vst [vmem:[#allocation30_spill] sm:$0xff] %v12240_v40  ;;  %v9555_v0 = vpack.i.bf16 %v2617_v17, %v2615_v41  ;;  %v9540_v45 = vpack.i.bf16 %v2474_v33, %v2475_v28  ;;  %v9565_v37 = vpack.i.bf16 %v2521_v59, %v12235_v50  ;;  %v2276_v30 = vsel %vm17596_vm10, %v2263_v21, %v9293_v3 }
 0x1f9   : > { %v12257_v10 = vsel %vm2345_vm15, %v2339_v5, %v9253_v46  ;;  %17595 = vst [vmem:[#allocation12_spill] sm:$0xff] %v12263_v16  ;;  %v9304_v60 = vunpack.i.h.bf16 %v12090_v48  ;;  %v2641_v5 = vsel %vm1914_vm7, %v17597_v22, %v2640_v15  ;;  %v17598_v46 = vrot.slane %v12048_v54, 7 }
 0x1fa   : > { %v2277_v6 = vsel %vm17599_vm9, %v2264_v7, %v9294_v23  ;;  %v17206_v33 = vrot.slane %v12257_v10, 5  ;;  %v17205_v41 = vunpack.i.h.bf16 %v12223_v2  ;;  %v17204_v17 = vunpack.i.l.bf16 %v12223_v2 }
 0x1fb   : > { %v2643_v34 = vsel %vm1914_vm7, %v2640_v15, %v17598_v46  ;;  %vm17600_vm10 = vcmask 490496   ;;  %v17602_v7 = vrot.slane %v12178_v35, 3  ;;  %v2561_v15 = vrot.slane %v12048_v54, 4 }
 0x1fc   : > { %v12279_v48 = vsel %vm17600_vm10, %v2276_v30, %v9298_v12  ;;  %vm17601_vm8 = vmmov %vm17600_vm10  ;;  %v2592_v59 = vrot.slane %v12157_v26, 5  ;;  %vm17627_vm10 = vcmask 752640  }
 0x1fd   : > { %v12282_v21 = vsel %vm17601_vm8, %v2277_v6, %v9299_v51  ;;  %v3039_v28 = vsel %vm560_vm1, %v3037_v19, %v17602_v7  ;;  %v2302_v3 = vsel %vm2293_vm11, %v12279_v48, %v9303_v14  ;;  %v2919_v6 = vrot.slane %v12160_v47, 1  ;;  %v12322_v14 = vpop.f32.mrf.mxu3 }
 0x1fe   : > { %9566 = vrot.lane.b32.xlu0 %v9565_v37, %s10386_s15  ;;  %v12292_v37 = vpop.permute.xlu0 %9281  ;;  %v9342_v12 = vpop.permute.xlu1 %9341  ;;  %v2920_v51 = vrot.slane %v12178_v35, 1  ;;  %v2303_v23 = vsel %vm2293_vm11, %v12282_v21, %v9304_v60  ;;  %v2315_v30 = vsel %vm2306_vm12, %v2302_v3, %v17204_v17  ;;  %v9590_v46 = vpack.i.bf16 %v3039_v28, %v12193_v39 }
 0x1ff   : > { %9556 = vrot.lane.b32.xlu1 %v9555_v0, %s10390_s9  ;;  %9541 = vrot.lane.b32.xlu2 %v9540_v45, %s17319_s13  ;;  %v12299_v0 = vunpack.i.h.bf16 %v9342_v12  ;;  %v12301_v19 = vunpack.i.l.bf16 %v9342_v12  ;;  %v2316_v22 = vsel %vm2306_vm12, %v2303_v23, %v17205_v41  ;;  %v17604_v60 = vrot.slane %v11832_v32, 5  ;;  %v12320_v12 = vpop.f32.mrf.mxu2  ;;  %v12335_v32 = vpop.f32.mrf.mxu0 }
 0x200   : > { %vm17605_vm8 = vcmask 1042432   ;;  %v9545_v3 = vpack.i.bf16 %v12235_v50, %v12111_v27  ;;  %v17209_v28 = vrot.slane %v12157_v26, 4  ;;  %v9560_v23 = vpack.i.bf16 %v2643_v34, %v2641_v5  ;;  %17608 = vst [vmem:[#allocation11_spill] sm:$0xff] %v12335_v32 }
 0x201   : > { %v12303_v45 = vpop.permute.xlu2 %9411  ;;  %v12318_v7 = vsel %vm17605_vm8, %v17604_v60, %v17206_v33  ;;  %v2328_v17 = vsel %vm2319_vm13, %v2315_v30, %v12301_v19  ;;  %v2329_v39 = vsel %vm2319_vm13, %v2316_v22, %v12299_v0  ;;  %v17606_v60 = vrot.slane %v12048_v54, 5  ;;  %vm17607_vm9 = vmmov %vm17605_vm8 }
 0x202   : > { %17603 = vst [vmem:[#allocation13_spill] sm:$0xff] %v12303_v45  ;;  %v4477_v41 = vpack.c.bf16 %v2329_v39, %v2328_v17  ;;  %v2921_v43 = vsel %vm17347_vm3, %v2919_v6, %v2920_v51  ;;  %v17609_v27 = vrot.slane %v12181_v52, 1  ;;  %v3101_v22 = vrot.slane %v12188_v1, 4  ;;  %vm17628_vm8 = vmmov %vm17627_vm10 }
 0x203   : > { %v2593_v33 = vsel %vm17607_vm9, %v17606_v60, %v2592_v59  ;;  %v9249_v5 = vunpack.i.h.bf16 %v12152_v57  ;;  %v2562_v17 = vsel %vm17348_vm0, %v12028_v53, %v2561_v15  ;;  %v2618_v6 = vrot.slane %v12157_v26, 6 }
 0x204   : > { %v2923_v50 = vsel %vm17347_vm3, %v2920_v51, %v17609_v27  ;;  %4769 = vmatmul.bf16.gmra.mxu0 %v4477_v41  ;;  %v12350_v51 = vpop.f32.mrf.mxu1  ;;  %v9233_v60 = vunpack.i.l.bf16 %v11973_v61  ;;  %v9254_v27 = vunpack.i.h.bf16 %v12221_v18  ;;  %v9575_v57 = vpack.i.bf16 %v2592_v59, %v2593_v33 }
 0x205   : > { %17610 = vst [vmem:[#allocation52_spill] sm:$0xff] %v12350_v51  ;;  %v2564_v41 = vsel %vm17348_vm0, %v2561_v15, %v17209_v28  ;;  %v9600_v34 = vpack.i.bf16 %v2923_v50, %v2921_v43  ;;  %v3096_v39 = vrot.slane %v12160_v47, 4  ;;  %v17612_v33 = vrot.slane %v12181_v52, 4 }
 0x206   : > { %9591 = vrot.lane.b32.xlu0 %v9590_v46, %s10385_s14  ;;  %v12359_v53 = vpop.permute.xlu1 %9346  ;;  %v9357_v46 = vpop.permute.xlu0 %9356  ;;  %v17614_v15 = vrot.slane %v12199_v9, 4  ;;  %v2340_v50 = vsel %vm2332_vm14, %v12096_v62, %v9249_v5  ;;  %v17616_v28 = vrot.slane %v12048_v54, 6  ;;  %v2978_v30 = vrot.slane %v12160_v47, 2 }
 0x207   : > { %9561 = vrot.lane.b32.xlu1 %v9560_v23, %s10391_s21  ;;  %9546 = vrot.lane.b32.xlu2 %v9545_v3, %s10385_s14  ;;  %v2926_v23 = vrot.slane %v12199_v9, 1  ;;  %v12370_v59 = vsel %vm17348_vm0, %v17612_v33, %v3101_v22  ;;  %v12387_v32 = vsel %vm2345_vm15, %v2340_v50, %v9254_v27  ;;  %v9234_v62 = vunpack.i.h.bf16 %v11973_v61  ;;  %v12397_v55 = vpop.f32.mrf.mxu2  ;;  %v12399_v33 = vpop.f32.mrf.mxu3 }
 0x208   : > { %17613 = vst [vmem:[#allocation54_spill] sm:$0xff] %v12370_v59  ;;  %v12375_v3 = vsel %vm17348_vm0, %v3101_v22, %v17614_v15  ;;  %v2619_v51 = vsel %vm17211_vm6, %v17616_v28, %v2618_v6  ;;  %v9284_v22 = vunpack.i.h.bf16 %v12292_v37  ;;  %v2979_v15 = vrot.slane %v12178_v35, 2 }
 0x209   : > { %v12364_v18 = vpop.permute.xlu2 %9416  ;;  %17615 = vst [vmem:[#allocation55_spill] sm:$0xff] %v12375_v3  ;;  %v9283_v5 = vunpack.i.l.bf16 %v12292_v37  ;;  %v9570_v16 = vpack.i.bf16 %v2564_v41, %v2562_v17  ;;  %v17617_v28 = vrot.slane %v12178_v35, 4  ;;  %v2365_v27 = vsel %vm17327_vm2, %v12257_v10, %v9233_v60 }
 0x20a   : > { %17611 = vst [vmem:[#allocation53_spill] sm:$0xff] %v12364_v18  ;;  %v9580_v50 = vpack.i.bf16 %v2618_v6, %v2619_v51  ;;  %v12406_v43 = vsel %vm17347_vm3, %v17618_v20, %v2926_v23  ;;  %v17620_v61 = vrot.slane %v12202_v29, 1  ;;  %v2366_v17 = vsel %vm17327_vm2, %v12387_v32, %v9234_v62  ;;  %v12418_v51 = vpop.f32.mrf.mxu0 }
 0x20b   : > { %v3098_v47 = vsel %vm17348_vm0, %v3096_v39, %v17617_v28  ;;  %17619 = vst [vmem:[#allocation56_spill] sm:$0xff] %v12406_v43  ;;  %v9359_v39 = vunpack.i.h.bf16 %v9357_v46  ;;  %v9358_v41 = vunpack.i.l.bf16 %v9357_v46  ;;  %v2379_v20 = vsel %vm17321_vm5, %v2366_v17, %v9284_v22 }
 0x20c   : > { %v12411_v37 = vsel %vm17347_vm3, %v2926_v23, %v17620_v61  ;;  %17622 = vst [vmem:[#allocation58_spill] sm:$0xff] %v12418_v51  ;;  %v2980_v60 = vsel %vm17349_vm4, %v2978_v30, %v2979_v15  ;;  %v17623_v23 = vrot.slane %v12181_v52, 2  ;;  %v2378_v46 = vsel %vm17321_vm5, %v2365_v27, %v9283_v5 }
 0x20d   : > { %17621 = vst [vmem:[#allocation57_spill] sm:$0xff] %v12411_v37  ;;  %v2983_v61 = vrot.slane %v12188_v1, 2  ;;  %v3044_v22 = vrot.slane %v12199_v9, 3  ;;  %v2985_v5 = vrot.slane %v12199_v9, 2  ;;  %v2392_v6 = vsel %vm17628_vm8, %v2379_v20, %v9359_v39 }
 0x20e   : > { %9601 = vrot.lane.b32.xlu0 %v9600_v34, %s10383_s12  ;;  %v2982_v62 = vsel %vm17349_vm4, %v2979_v15, %v17623_v23  ;;  %v2391_v23 = vsel %vm17627_vm10, %v2378_v46, %v9358_v41  ;;  %vm17629_vm9 = vcmask 916480   ;;  %v3040_v27 = vrot.slane %v12181_v52, 3 }
 0x20f   : > { %9576 = vrot.lane.b32.xlu2 %v9575_v57, %s17315_s18  ;;  %9571 = vrot.lane.b32.xlu1 %v9570_v16, %s10388_s17  ;;  %v12435_v57 = vrot.slane %v12202_v29, 3  ;;  %v12437_v16 = vpop.f32.mrf.mxu1  ;;  %v9605_v51 = vpack.i.bf16 %v2982_v62, %v2980_v60  ;;  %vm17630_vm6 = vmmov %vm17629_vm9  ;;  %v2644_v41 = vrot.slane %v12157_v26, 7  ;;  %v3045_v39 = vsel %vm560_vm1, %v3042_v44, %v3044_v22 }
 0x210   : > { %v12428_v34 = vpop.permute.xlu1 %9351  ;;  %v12430_v28 = vpop.permute.xlu0 %9361  ;;  %17625 = vst [vmem:[#allocation60_spill] sm:$0xff] %v12437_v16  ;;  %v12462_v60 = vsel %vm17349_vm4, %v2983_v61, %v2985_v5 }
 0x211   : > { %17624 = vst [vmem:[#allocation59_spill] sm:$0xff] %v12430_v28  ;;  %v17216_v30 = vunpack.i.h.bf16 %v12430_v28  ;;  %v17217_v17 = vunpack.i.l.bf16 %v12430_v28  ;;  %v12441_v15 = vpop.permute.xlu2 %9456  ;;  %v3047_v20 = vsel %vm560_vm1, %v3044_v22, %v12435_v57  ;;  %v9313_v28 = vunpack.i.l.bf16 %v12154_v38 }
 0x212   : > { %17626 = vst [vmem:[#allocation61_spill] sm:$0xff] %v12441_v15  ;;  %v17631_v15 = vrot.slane %v12157_v26, 3  ;;  %v12464_v62 = vpack.i.bf16 %v3047_v20, %v3045_v39  ;;  %v17641_v39 = vrot.slane %v12188_v1, 1  ;;  %v17642_v20 = vrot.slane %v12181_v52, 1 }
 0x213   : > { %v2404_v16 = vsel %vm17629_vm9, %v2391_v23, %v17217_v17  ;;  %v2405_v18 = vsel %vm17630_vm6, %v2392_v6, %v17216_v30  ;;  %17632 = vst [vmem:[#allocation62_spill] sm:$0xff] %v12462_v60  ;;  %v17634_v6 = vrot.slane %v12202_v29, 2  ;;  %v12482_v23 = vpop.f32.mrf.mxu3  ;;  %v1350_v30 = vmax.f32 %v12320_v12, %v12322_v14  ;;  %vm17665_vm6 = vmmov %vm17628_vm8 }
 0x214   : > { %v9595_v45 = vpack.i.bf16 %v3098_v47, %v17631_v15  ;;  %v4474_v40 = vpack.c.bf16 %v2405_v18, %v2404_v16  ;;  %17633 = vst [vmem:[#allocation63_spill] sm:$0xff] %v12464_v62  ;;  %v17636_v47 = vmax.f32 %v12204_v36, %v12206_v56  ;;  %v17637_v18 = vmax.f32 %v11792_v42, %v11746_v58  ;;  %v12480_v15 = vpop.f32.mrf.mxu2  ;;  %v4750_v42 = vpop.f32.mrf.mxu0  ;;  %vm17667_vm10 = vmmov %vm17665_vm6 }
 0x215   : > { %v12469_v46 = vsel %vm17349_vm4, %v2985_v5, %v17634_v6  ;;  %v17638_v36 = vrot.slane %v12178_v35, 3  ;;  %v3043_v58 = vsel %vm560_vm1, %v3040_v27, %v3042_v44  ;;  %v17651_v12 = vrot.slane %v12181_v52, 2  ;;  %vm17669_vm8 = vmmov %vm17629_vm9 }
 0x216   : > { %17635 = vst [vmem:[#allocation64_spill] sm:$0xff] %v12469_v46  ;;  %v1385_v16 = vmax.f32 %v17637_v18, %v17636_v47  ;;  %4832 = vmatmul.bf16.gmra.mxu1 %v4474_v40  ;;  %9606 = vrot.lane.b32.xlu0 %v9605_v51, %s17319_s13  ;;  %v17640_v51 = vrot.slane %v12048_v54, 7  ;;  %vm17674_vm9 = vmmov %vm17669_vm8 }
 0x217   : > { %9581 = vrot.lane.b32.xlu2 %v9580_v50, %s10390_s9  ;;  %9596 = vrot.lane.b32.xlu1 %v9595_v45, %s10386_s15  ;;  %v3041_v56 = vsel %vm560_vm1, %v17638_v36, %v3040_v27  ;;  %v2925_v50 = vsel %vm17347_vm3, %v17642_v20, %v17641_v39  ;;  %v12507_v27 = vpop.f32.mrf.mxu1  ;;  %v1314_v39 = vmax.f32 %v11857_v4, %v11803_v25  ;;  %v12518_v20 = vld [vmem:[%s17111_s4] ss:$0 sm:$0xff]  ;;  %v9348_v4 = vunpack.i.l.bf16 %v12359_v53 }
 0x218   : > { %v12490_v40 = vpop.permute.xlu0 %9366  ;;  %v2645_v5 = vsel %vm1914_vm7, %v17640_v51, %v2644_v41  ;;  %v12505_v47 = vadd.f32 %v11989_v13, %v1385_v16  ;;  %v9610_v44 = vpack.i.bf16 %v3043_v58, %v3041_v56  ;;  %17645 = vst [vmem:[#allocation68_spill] sm:$0xff] %v12507_v27  ;;  %v9620_v36 = vpack.i.bf16 %v12406_v43, %v2925_v50  ;;  %v17672_v43 = vld [vmem:[#allocation20_spill] sm:$0xff] }
 0x219   : > { %17639 = vst [vmem:[#allocation65_spill] sm:$0xff] %v12490_v40  ;;  %v12500_v45 = vpop.permute.xlu1 %9381  ;;  %v12502_v6 = vpop.permute.xlu2 %9461  ;;  %v9585_v18 = vpack.i.bf16 %v2644_v41, %v2645_v5  ;;  %v17647_v41 = vrot.slane %v12181_v52, 4  ;;  %v17648_v16 = vrot.slane %v12178_v35, 4  ;;  %v2984_v56 = vsel %vm17349_vm4, %v17651_v12, %v2983_v61  ;;  %v17671_v40 = vld [vmem:[#allocation5_spill] sm:$0xff] }
 0x21a   : > { %17643 = vst [vmem:[#allocation66_spill] sm:$0xff] %v12502_v6  ;;  %v17218_v51 = vrot.slane %v12505_v47, 1  ;;  %v17652_v58 = vrot.slane %v12202_v29, 1  ;;  %v1386_v50 = vmax.f32 %v1314_v39, %v1350_v30  ;;  %v4751_v61 = vadd.f32 %v12518_v20, %v4750_v42 }
 0x21b   : > { %17644 = vst [vmem:[#allocation67_spill] sm:$0xff] %v12505_v47  ;;  %v12528_v14 = vsel %vm17348_vm0, %v17648_v16, %v17647_v41  ;;  %v12549_v17 = vpop.f32.mrf.mxu3  ;;  %v9354_v12 = vunpack.i.h.bf16 %v12428_v34  ;;  %v17223_v42 = vrot.slane %v12505_v47, 2  ;;  %v9314_v27 = vunpack.i.h.bf16 %v12154_v38 }
 0x21c   : > { %17646 = vst [vmem:[#allocation69_spill] sm:$0xff] %v12518_v20  ;;  %v12541_v5 = vsel %vm17347_vm3, %v17652_v58, %v17218_v51  ;;  %v12547_v16 = vpop.f32.mrf.mxu2  ;;  %v9615_v58 = vpack.i.bf16 %v12370_v59, %v12528_v14  ;;  %v12555_v22 = vpop.f32.mrf.mxu0  ;;  %v2341_v51 = vsel %vm2332_vm14, %v12301_v19, %v9348_v4  ;;  %v12974_v35 = vrot.slane %v12505_v47, 7 }
 0x21d   : > { %17649 = vst [vmem:[#allocation70_spill] sm:$0xff] %v12528_v14  ;;  %v9650_v39 = vpack.i.bf16 %v12541_v5, %v12411_v37  ;;  %v12977_v54 = vrot.slane %v12505_v47, 6 }
 0x21e   : > { %9611 = vrot.lane.b32.xlu0 %v9610_v44, %s10385_s14  ;;  %17653 = vst [vmem:[#allocation72_spill] sm:$0xff] %v12541_v5  ;;  %v9349_v44 = vunpack.i.h.bf16 %v12359_v53  ;;  %v9625_v53 = vpack.i.bf16 %v12462_v60, %v2984_v56  ;;  %v9383_v56 = vunpack.i.l.bf16 %v12500_v45 }
 0x21f   : > { %9586 = vrot.lane.b32.xlu2 %v9585_v18, %s10391_s21  ;;  %9621 = vrot.lane.b32.xlu1 %v9620_v36, %s10383_s12  ;;  %v9353_v18 = vunpack.i.l.bf16 %v12428_v34  ;;  %17655 = vst [vmem:[#allocation74_spill] sm:$0xff] %v12555_v22  ;;  %v12566_v34 = vadd.f32 %v11989_v13, %v1386_v50  ;;  %v9384_v50 = vunpack.i.h.bf16 %v12500_v45 }
 0x220   : > { %v12531_v25 = vpop.permute.xlu0 %9371  ;;  %v2342_v6 = vsel %vm2332_vm14, %v12299_v0, %v9349_v44 }
 0x221   : > { %17650 = vst [vmem:[#allocation71_spill] sm:$0xff] %v12531_v25  ;;  %v9422_v36 = vpop.permute.xlu1 %9421  ;;  %v12545_v41 = vpop.permute.xlu2 %9466  ;;  %v12571_v22 = vsel %vm2345_vm15, %v2341_v51, %v9353_v18  ;;  %v12577_v4 = vsel %vm2345_vm15, %v2342_v6, %v9354_v12  ;;  %v12584_v51 = vrot.slane %v12505_v47, 3  ;;  %v17658_v12 = vrot.slane %v12202_v29, 2 }
 0x222   : > { %17654 = vst [vmem:[#allocation73_spill] sm:$0xff] %v12545_v41  ;;  %v2367_v38 = vsel %vm17327_vm2, %v12571_v22, %v9313_v28  ;;  %v9424_v18 = vunpack.i.h.bf16 %v9422_v36 }
 0x223   : > { %v4818_v30 = vpop.f32.mrf.mxu1  ;;  %17657 = vst [vmem:[#allocation76_spill] sm:$0xff] %v12584_v51  ;;  %v12594_v45 = vsel %vm17349_vm4, %v17658_v12, %v17223_v42  ;;  %v3049_v12 = vsel %vm560_vm1, %v12435_v57, %v12584_v51  ;;  %v17663_v42 = vrot.slane %v12566_v34, 3  ;;  %v1271_v59 = vpop.f32.mrf.mxu3 }
 0x224   : > { %v12562_v41 = vadd.f32 %v4818_v30, %v4751_v61  ;;  %v9423_v61 = vunpack.i.l.bf16 %v9422_v36  ;;  %17659 = vst [vmem:[#allocation77_spill] sm:$0xff] %v12594_v45  ;;  %v9655_v36 = vpack.i.bf16 %v12594_v45, %v12469_v46 }
 0x226   : > { %17656 = vst [vmem:[#allocation75_spill] sm:$0xff] %v12562_v41  ;;  %9616 = vrot.lane.b32.xlu0 %v9615_v58, %s10386_s15  ;;  %v17660_v58 = vld [vmem:[#allocation31_spill] sm:$0xff] }
 0x227   : > { %9626 = vrot.lane.b32.xlu1 %v9625_v53, %s17319_s13  ;;  %9651 = vrot.lane.b32.xlu2 %v9650_v39, %s10383_s12  ;;  %v1316_v30 = vmax.f32 %v17660_v58, %v11920_v24  ;;  %v2368_v53 = vsel %vm17327_vm2, %v12577_v4, %v9314_v27  ;;  %v2380_v39 = vsel %vm17321_vm5, %v2367_v38, %v9383_v56  ;;  %v4755_v56 = vpop.f32.mrf.mxu0 }
 0x228   : > { %v9377_v6 = vpop.permute.xlu0 %9376  ;;  %v12614_v24 = vsel %vm560_vm1, %v12584_v51, %v17663_v42  ;;  %v2381_v27 = vsel %vm17321_vm5, %v2368_v53, %v9384_v50  ;;  %v2393_v58 = vsel %vm17665_vm6, %v2380_v39, %v9423_v61  ;;  %v17234_v53 = vrot.slane %v12202_v29, 4  ;;  %v1063_v39 = vpop.f32.mrf.mxu2 }
 0x229   : > { %v12601_v44 = vpop.permute.xlu1 %9426  ;;  %v12603_v28 = vpop.permute.xlu2 %9471  ;;  %v12623_v41 = vpack.i.bf16 %v12614_v24, %v3049_v12  ;;  %v2394_v25 = vsel %vm17667_vm10, %v2381_v27, %v9424_v18  ;;  %v1318_v12 = vmax.f32 %v12077_v63, %v17672_v43  ;;  %v1354_v18 = vmax.f32 %v1063_v39, %v1271_v59 }
 0x22a   : > { %17661 = vst [vmem:[#allocation31_spill] sm:$0xff] %v12601_v44  ;;  %v17668_v42 = vunpack.i.l.bf16 %v12601_v44  ;;  %v17673_v37 = vunpack.i.h.bf16 %v12601_v44  ;;  %v17230_v27 = vrot.slane %v12387_v32, 5  ;;  %v9379_v63 = vunpack.i.h.bf16 %v9377_v6 }
 0x22b   : > { %17662 = vst [vmem:[#allocation78_spill] sm:$0xff] %v12603_v28  ;;  %v12617_v38 = vpop.f32.mrf.mxu1  ;;  %v1352_v28 = vmax.f32 %v12480_v15, %v12482_v23  ;;  %v1353_v23 = vmax.f32 %v12547_v16, %v12549_v17  ;;  %v9378_v17 = vunpack.i.l.bf16 %v9377_v6  ;;  %vm17681_vm6 = vcmask 1042432  }
 0x22c   : > { %17664 = vst [vmem:[#allocation79_spill] sm:$0xff] %v12617_v38  ;;  %v2406_v50 = vsel %vm17669_vm8, %v2393_v58, %v17668_v42  ;;  %v17670_v38 = vld [vmem:[#allocation18_spill] sm:$0xff]  ;;  %v2407_v15 = vsel %vm17674_vm9, %v2394_v25, %v17673_v37  ;;  %v17676_v37 = vrot.slane %v12199_v9, 4  ;;  %vm17685_vm10 = vmmov %vm17681_vm6 }
 0x22d   : > { %17666 = vst [vmem:[#allocation80_spill] sm:$0xff] %v12623_v41  ;;  %v1317_v61 = vmax.f32 %v17671_v40, %v17670_v38  ;;  %v4478_v58 = vpack.c.bf16 %v2407_v15, %v2406_v50  ;;  %v1388_v40 = vmax.f32 %v1316_v30, %v1352_v28  ;;  %v17231_v38 = vrot.slane %v12125_v49, 5  ;;  %vm17704_vm8 = vmmov %vm17681_vm6 }
 0x22e   : > { %v12653_v59 = vsel %vm17348_vm0, %v17676_v37, %v17234_v53  ;;  %v1390_v30 = vmax.f32 %v1318_v12, %v1354_v18  ;;  %v17680_v28 = vrot.slane %v12257_v10, 5  ;;  %v4756_v50 = vadd.f32 %v12518_v20, %v4755_v56  ;;  %vm17709_vm9 = vmmov %vm17681_vm6 }
 0x22f   : > { %9636 = vrot.lane.b32.xlu1 %v12464_v62, %s10385_s14  ;;  %9656 = vrot.lane.b32.xlu2 %v9655_v36, %s17319_s13  ;;  %17677 = vst [vmem:[#allocation5_spill] sm:$0xff] %v12653_v59  ;;  %v1389_v36 = vmax.f32 %v1317_v61, %v1353_v23  ;;  %v12667_v15 = vpack.i.bf16 %v12653_v59, %v12375_v3  ;;  %v17684_v12 = vrot.slane %v12121_v11, 5  ;;  %v12679_v23 = vpop.f32.mrf.mxu0  ;;  %v17233_v11 = vrot.slane %v12566_v34, 4  ;;  %v17721_v3 = vld [vmem:[#allocation8_spill] sm:$0xff] }
 0x230   : > { %4837 = vmatmul.bf16.gmra.mxu1 %v4478_v58  ;;  %v12646_v43 = vpop.permute.xlu0 %9391  ;;  %v2773_v42 = vsel %vm17681_vm6, %v17680_v28, %v17230_v27  ;;  %v12670_v6 = vadd.f32 %v11989_v13, %v1388_v40  ;;  %v2688_v61 = vsel %vm2293_vm11, %v12282_v21, %v9379_v63  ;;  %17686 = vst [vmem:[#allocation84_spill] sm:$0xff] %v12679_v23  ;;  %v12692_v21 = vrot.slane %v12505_v47, 4  ;;  %v17690_v28 = vld [vmem:[#allocation46_spill] sm:$0xff] }
 0x231   : > { %17675 = vst [vmem:[#allocation18_spill] sm:$0xff] %v12646_v43  ;;  %v12655_v25 = vpop.permute.xlu1 %9431  ;;  %v12657_v16 = vpop.permute.xlu2 %9476  ;;  %v2771_v10 = vsel %vm17685_vm10, %v17684_v12, %v17231_v38  ;;  %v2687_v56 = vsel %vm2293_vm11, %v12279_v48, %v9378_v17  ;;  %v12686_v40 = vadd.f32 %v11989_v13, %v1389_v36  ;;  %v12689_v37 = vadd.f32 %v11989_v13, %v1390_v30  ;;  %v17691_v12 = vld [vmem:[#allocation48_spill] sm:$0xff] }
 0x232   : > { %17678 = vst [vmem:[#allocation20_spill] sm:$0xff] %v12655_v25  ;;  %v9660_v58 = vpack.i.bf16 %v2773_v42, %v2771_v10  ;;  %v1351_v63 = vmax.f32 %v12397_v55, %v12399_v33  ;;  %v1315_v48 = vmax.f32 %v17691_v12, %v17690_v28  ;;  %v17692_v17 = vunpack.i.h.bf16 %v12223_v2 }
 0x233   : > { %17679 = vst [vmem:[#allocation81_spill] sm:$0xff] %v12657_v16  ;;  %v4823_v39 = vpop.f32.mrf.mxu1  ;;  %v17693_v36 = vunpack.i.l.bf16 %v12223_v2  ;;  %v17232_v55 = vrot.slane %v12670_v6, 1  ;;  %v2938_v33 = vrot.slane %v12686_v40, 1  ;;  %v12723_v2 = vsel %vm17348_vm0, %v12692_v21, %v17233_v11 }
 0x234   : > { %17682 = vst [vmem:[#allocation82_spill] sm:$0xff] %v12667_v15  ;;  %v12683_v18 = vadd.f32 %v4823_v39, %v4756_v50  ;;  %v2701_v42 = vsel %vm2306_vm12, %v2688_v61, %v17692_v17  ;;  %v12713_v39 = vrot.slane %v12689_v37, 1  ;;  %v1387_v12 = vmax.f32 %v1315_v48, %v1351_v63 }
 0x235   : > { %17683 = vst [vmem:[#allocation83_spill] sm:$0xff] %v12670_v6  ;;  %v2700_v30 = vsel %vm2306_vm12, %v2687_v56, %v17693_v36  ;;  %v12733_v28 = vsel %vm2319_vm13, %v2701_v42, %v12299_v0  ;;  %v12738_v17 = vsel %vm17347_vm3, %v17232_v55, %v2938_v33  ;;  %v17700_v27 = vrot.slane %v12157_v26, 4 }
 0x236   : > { %17687 = vst [vmem:[#allocation85_spill] sm:$0xff] %v12683_v18  ;;  %v12742_v36 = vsel %vm17347_vm3, %v2938_v33, %v12713_v39  ;;  %v17237_v63 = vrot.slane %v12733_v28, 5  ;;  %v17701_v42 = vpack.i.bf16 %v12318_v7, %v12150_v31  ;;  %v2997_v26 = vrot.slane %v12686_v40, 2  ;;  %v17712_v18 = vld [vmem:[#allocation19_spill] sm:$0xff] }
 0x237   : > { %17688 = vst [vmem:[#allocation86_spill] sm:$0xff] %v12686_v40  ;;  %9641 = vrot.lane.b32.xlu1 %v12667_v15, %s10386_s15  ;;  %9661 = vrot.lane.b32.xlu2 %v9660_v58, %s10398_s24  ;;  %v12729_v58 = vsel %vm2319_vm13, %v2700_v30, %v12301_v19  ;;  %v9665_v38 = vpack.i.bf16 %v12723_v2, %v17700_v27  ;;  %v4760_v48 = vpop.f32.mrf.mxu0  ;;  %v17239_v30 = vrot.slane %v12670_v6, 2  ;;  %v12759_v27 = vrot.slane %v12689_v37, 2  ;;  %v17738_v15 = vld [vmem:[#allocation61_spill] sm:$0xff] }
 0x238   : > { %17689 = vst [vmem:[#allocation87_spill] sm:$0xff] %v12689_v37  ;;  %v12708_v50 = vpop.permute.xlu0 %9396  ;;  %v17236_v0 = vrot.slane %v12729_v58, 5  ;;  %v12762_v33 = vadd.f32 %v11989_v13, %v1387_v12  ;;  %v17241_v55 = vrot.slane %v12577_v4, 5  ;;  %vm17717_vm6 = vcmask 162816  }
 0x239   : > { %v12715_v61 = vpop.permute.xlu1 %9436  ;;  %v12717_v10 = vpop.permute.xlu2 %9481  ;;  %17696 = vst [vmem:[#allocation88_spill] sm:$0xff] %v12723_v2  ;;  %v12779_v13 = vsel %vm17349_vm4, %v17239_v30, %v2997_v26  ;;  %v12783_v12 = vsel %vm17349_vm4, %v2997_v26, %v12759_v27  ;;  %v17711_v26 = vld [vmem:[#allocation51_spill] sm:$0xff]  ;;  %vm17720_vm10 = vcmask 326656  }
 0x23a   : > { %17694 = vst [vmem:[#allocation46_spill] sm:$0xff] %v12715_v61  ;;  %v9323_v23 = vunpack.i.l.bf16 %v17711_v26  ;;  %v2993_v60 = vrot.slane %v12762_v33, 2 }
 0x23b   : > { %17695 = vst [vmem:[#allocation48_spill] sm:$0xff] %v12717_v10  ;;  %v12725_v56 = vpop.f32.mrf.mxu1  ;;  %v17710_v10 = vld [vmem:[#allocation49_spill] sm:$0xff] }
 0x23c   : > { %17697 = vst [vmem:[#allocation89_spill] sm:$0xff] %v12725_v56  ;;  %v9318_v30 = vunpack.i.l.bf16 %v17710_v10  ;;  %v2932_v56 = vrot.slane %v12566_v34, 1 }
 0x23d   : > { %17698 = vst [vmem:[#allocation90_spill] sm:$0xff] %v12738_v17 }
 0x23e   : > { %17699 = vst [vmem:[#allocation91_spill] sm:$0xff] %v12742_v36 }
 0x23f   : > { %9646 = vrot.lane.b32.xlu1 %v17701_v42, %s10398_s24  ;;  %9666 = vrot.lane.b32.xlu2 %v9665_v38, %s10388_s17  ;;  %17702 = vst [vmem:[#allocation92_spill] sm:$0xff] %v12762_v33  ;;  %v4761_v38 = vadd.f32 %v12518_v20, %v4760_v48  ;;  %v2779_v42 = vsel %vm17704_vm8, %v17236_v0, %v17237_v63  ;;  %v17708_v48 = vrot.slane %v12571_v22, 5  ;;  %v17249_v0 = vrot.slane %v12762_v33, 3  ;;  %v12806_v63 = vpop.f32.mrf.mxu3  ;;  %vm17722_vm8 = vmmov %vm17717_vm6 }
 0x240   : > { %v12766_v11 = vpop.permute.xlu0 %9441  ;;  %17705 = vst [vmem:[#allocation94_spill] sm:$0xff] %v12779_v13 }
 0x241   : > { %v9452_v31 = vpop.permute.xlu1 %9451  ;;  %v12768_v7 = vpop.permute.xlu2 %9506  ;;  %17706 = vst [vmem:[#allocation95_spill] sm:$0xff] %v12783_v12 }
 0x242   : > { %17703 = vst [vmem:[#allocation93_spill] sm:$0xff] %v12768_v7  ;;  %v2781_v7 = vsel %vm17709_vm9, %v17708_v48, %v17241_v55  ;;  %v9328_v48 = vunpack.i.l.bf16 %v17712_v18  ;;  %vm17725_vm9 = vcmask 490496  }
 0x243   : > { %v4828_v53 = vpop.f32.mrf.mxu1  ;;  %v9695_v16 = vpack.i.bf16 %v2781_v7, %v2779_v42  ;;  %v17713_v42 = vrot.slane %v12202_v29, 4 }
 0x244   : > { %v12785_v19 = vadd.f32 %v4828_v53, %v4761_v38  ;;  %v9443_v53 = vunpack.i.l.bf16 %v12766_v11  ;;  %v17715_v38 = vrot.slane %v12566_v34, 3 }
 0x245   : > { %v12814_v55 = vsel %vm17348_vm0, %v17713_v42, %v12692_v21  ;;  %v17719_v42 = vrot.slane %v12505_v47, 1 }
 0x246   : > { %17707 = vst [vmem:[#allocation96_spill] sm:$0xff] %v12785_v19  ;;  %v12800_v19 = vpop.f32.mrf.mxu2  ;;  %v12821_v18 = vsel %vm560_vm1, %v17715_v38, %v17249_v0  ;;  %v2664_v38 = vsel %vm17722_vm8, %v17721_v3, %v9443_v53  ;;  %v17723_v0 = vrot.slane %v12566_v34, 2  ;;  %v17259_v53 = vrot.slane %v12762_v33, 4 }
 0x247   : > { %9696 = vrot.lane.b32.xlu1 %v9695_v16, %s10398_s24  ;;  %9671 = vrot.lane.b32.xlu2 %v12623_v41, %s10385_s14  ;;  %17714 = vst [vmem:[#allocation97_spill] sm:$0xff] %v12814_v55  ;;  %v17716_v16 = vld [vmem:[#allocation17_spill] sm:$0xff]  ;;  %v9453_v41 = vunpack.i.l.bf16 %v9452_v31  ;;  %v12833_v25 = vsel %vm17347_vm3, %v17719_v42, %v2932_v56  ;;  %v12851_v42 = vpack.i.bf16 %v12723_v2, %v12814_v55  ;;  %v2934_v3 = vrot.slane %v12762_v33, 1  ;;  %v1276_v55 = vpop.f32.mrf.mxu3 }
 0x248   : > { %v12808_v7 = vpop.permute.xlu0 %9446  ;;  %v2265_v26 = vsel %vm17717_vm6, %v17716_v16, %v9318_v30  ;;  %v17724_v30 = vrot.slane %v12505_v47, 2  ;;  %vm17727_vm6 = vmmov %vm17720_vm10  ;;  %vm17746_vm8 = vcmask 1042432  }
 0x249   : > { %v9448_v10 = vunpack.i.l.bf16 %v12808_v7  ;;  %v12826_v44 = vpop.permute.xlu1 %9486  ;;  %v12828_v61 = vpop.permute.xlu2 %9521  ;;  %v2278_v43 = vsel %vm17720_vm10, %v2265_v26, %v9323_v23  ;;  %17728 = vst [vmem:[#allocation99_spill] sm:$0xff] %v12851_v42  ;;  %v9710_v23 = vpack.i.bf16 %v12821_v18, %v12614_v24  ;;  %v9399_v26 = vunpack.i.h.bf16 %v12708_v50  ;;  %vm17729_vm10 = vmmov %vm17725_vm9 }
 0x24a   : > { %17718 = vst [vmem:[#allocation17_spill] sm:$0xff] %v12826_v44  ;;  %v12843_v16 = vsel %vm17349_vm4, %v17724_v30, %v17723_v0  ;;  %v12846_v44 = vsel %vm17725_vm9, %v2278_v43, %v9328_v48  ;;  %v17255_v48 = vunpack.i.l.bf16 %v12100_v8  ;;  %v9454_v24 = vunpack.i.h.bf16 %v9452_v31  ;;  %vm17751_vm9 = vmmov %vm17746_vm8 }
 0x24b   : > { %17726 = vst [vmem:[#allocation98_spill] sm:$0xff] %v12846_v44  ;;  %v2670_v59 = vsel %vm17727_vm6, %v2664_v38, %v9448_v10  ;;  %v2689_v43 = vsel %vm2293_vm11, %v12846_v44, %v9453_v41  ;;  %v17730_v41 = vrot.slane %v12566_v34, 4  ;;  %v17736_v44 = vld [vmem:[#allocation13_spill] sm:$0xff]  ;;  %vm17757_vm6 = vmmov %vm17746_vm8 }
 0x24c   : > { %v2677_v38 = vsel %vm17729_vm10, %v2670_v59, %v9399_v26  ;;  %v2702_v30 = vsel %vm2306_vm12, %v2689_v43, %v17255_v48  ;;  %v17732_v59 = vrot.slane %v12670_v6, 1  ;;  %v17734_v26 = vld [vmem:[#allocation30_spill] sm:$0xff]  ;;  %v9413_v8 = vunpack.i.l.bf16 %v17736_v44  ;;  %vm17760_vm10 = vmmov %vm17757_vm6 }
 0x24d   : > { %v12879_v10 = vsel %vm17348_vm0, %v17730_v41, %v17259_v53  ;;  %v2690_v43 = vsel %vm2293_vm11, %v2677_v38, %v9454_v24  ;;  %v9414_v41 = vunpack.i.h.bf16 %v17736_v44  ;;  %v17737_v53 = vld [vmem:[#allocation53_spill] sm:$0xff]  ;;  %v12906_v62 = vunpack.i.h.bf16 %v17734_v26 }
 0x24e   : > { %17731 = vst [vmem:[#allocation100_spill] sm:$0xff] %v12879_v10  ;;  %v12884_v31 = vsel %vm17347_vm3, %v2934_v3, %v17732_v59  ;;  %v1068_v45 = vpop.f32.mrf.mxu2  ;;  %v9418_v2 = vunpack.i.l.bf16 %v17737_v53  ;;  %v9459_v59 = vunpack.i.h.bf16 %v17738_v15  ;;  %v9715_v14 = vpack.i.bf16 %v12879_v10, %v12692_v21  ;;  %v10369_v10 = vld [vmem:[%s10493_s27] ss:$0 sm:$0xff] }
 0x24f   : > { %9676 = vrot.lane.b32.xlu2 %v12851_v42, %s10386_s15  ;;  %9711 = vrot.lane.b32.xlu1 %v9710_v23, %s10386_s15  ;;  %17733 = vst [vmem:[#allocation101_spill] sm:$0xff] %v12884_v31  ;;  %v12887_v23 = vunpack.i.l.bf16 %v17734_v26  ;;  %v9419_v42 = vunpack.i.h.bf16 %v17737_v53  ;;  %v9725_v38 = vpack.i.bf16 %v12738_v17, %v12884_v31  ;;  %v12913_v53 = vsel %vm17347_vm3, %v2932_v56, %v2934_v3  ;;  %v17748_v26 = vld [vmem:[#allocation22_spill] sm:$0xff] }
 0x250   : > { %v12872_v0 = vpop.permute.xlu0 %9496  ;;  %17739 = vst [vmem:[#allocation13_spill] sm:$0xff] %v12906_v62  ;;  %v2703_v44 = vsel %vm2306_vm12, %v2690_v43, %v9459_v59  ;;  %v2344_v21 = vsel %vm2332_vm14, %v12906_v62, %v9414_v41  ;;  %v17745_v59 = vrot.slane %v12733_v28, 5 }
 0x251   : > { %17735 = vst [vmem:[#allocation30_spill] sm:$0xff] %v12887_v23  ;;  %v12891_v48 = vpop.permute.xlu1 %9491  ;;  %v12893_v5 = vpop.permute.xlu2 %9536  ;;  %v2715_v24 = vsel %vm2319_vm13, %v2702_v30, %v12887_v23  ;;  %v2343_v46 = vsel %vm2332_vm14, %v12887_v23, %v9413_v8  ;;  %v12923_v43 = vsel %vm2345_vm15, %v2344_v21, %v9419_v42  ;;  %v12929_v8 = vsel %vm2319_vm13, %v2703_v44, %v12906_v62  ;;  %v17752_v62 = vld [vmem:[#allocation16_spill] sm:$0xff] }
 0x252   : > { %17740 = vst [vmem:[#allocation53_spill] sm:$0xff] %v12913_v53  ;;  %v12918_v17 = vsel %vm2345_vm15, %v2343_v46, %v9418_v2  ;;  %v2782_v30 = vrot.slane %v2715_v24, 5  ;;  %v17743_v46 = vrot.slane %v12670_v6, 2  ;;  %v17747_v44 = vrot.slane %v12566_v34, 2 }
 0x253   : > { %17741 = vst [vmem:[#allocation61_spill] sm:$0xff] %v12918_v17  ;;  %v2784_v56 = vrot.slane %v12918_v17, 5  ;;  %v17749_v17 = vld [vmem:[#allocation26_spill] sm:$0xff]  ;;  %v9398_v23 = vunpack.i.l.bf16 %v12708_v50  ;;  %v17750_v24 = vrot.slane %v12577_v4, 5  ;;  %v17756_v4 = vrot.slane %v12929_v8, 5 }
 0x254   : > { %17742 = vst [vmem:[#allocation102_spill] sm:$0xff] %v12923_v43  ;;  %v12936_v2 = vsel %vm17349_vm4, %v2993_v60, %v17743_v46  ;;  %v12951_v21 = vsel %vm17349_vm4, %v17747_v44, %v2993_v60  ;;  %v1355_v46 = vmax.f32 %v12800_v19, %v12806_v63  ;;  %v1319_v31 = vmax.f32 %v17749_v17, %v17748_v26  ;;  %v17753_v17 = vld [vmem:[#allocation32_spill] sm:$0xff] }
 0x255   : > { %17744 = vst [vmem:[#allocation103_spill] sm:$0xff] %v12936_v2  ;;  %v9730_v28 = vpack.i.bf16 %v12779_v13, %v12936_v2  ;;  %v2785_v60 = vsel %vm17751_vm9, %v17750_v24, %v2784_v56  ;;  %v17279_v44 = vrot.slane %v12566_v34, 7  ;;  %v1356_v63 = vmax.f32 %v1068_v45, %v1276_v55  ;;  %v17769_v13 = vld [vmem:[#allocation52_spill] sm:$0xff]  ;;  %v17770_v2 = vld [vmem:[#allocation58_spill] sm:$0xff] }
 0x256   : > { %v1320_v26 = vmax.f32 %v17753_v17, %v17752_v62  ;;  %17754 = vst [vmem:[#allocation22_spill] sm:$0xff] %v12974_v35  ;;  %v12982_v24 = vsel %vm17757_vm6, %v2782_v30, %v17756_v4  ;;  %v17759_v45 = vrot.slane %v12923_v43, 5  ;;  %v1391_v62 = vmax.f32 %v1319_v31, %v1355_v46 }
 0x257   : > { %9716 = vrot.lane.b32.xlu2 %v9715_v14, %s10388_s17  ;;  %9726 = vrot.lane.b32.xlu1 %v9725_v38, %s10383_s12  ;;  %v2783_v38 = vsel %vm17746_vm8, %v17745_v59, %v2782_v30  ;;  %v12960_v14 = vpop.f32.mrf.mxu2  ;;  %v12962_v59 = vpop.f32.mrf.mxu3  ;;  %17755 = vst [vmem:[#allocation26_spill] sm:$0xff] %v12977_v54  ;;  %vm17763_vm8 = vcmask 490496   ;;  %v9444_v17 = vunpack.i.h.bf16 %v12766_v11  ;;  %v17764_v30 = vld [vmem:[#allocation45_spill] sm:$0xff]  ;;  %v9449_v19 = vunpack.i.h.bf16 %v12808_v7  ;;  %v17767_v7 = vld [vmem:[#allocation12_spill] sm:$0xff] }
 0x258   : > { %v12931_v3 = vpop.permute.xlu0 %9501  ;;  %v9720_v50 = vpack.i.bf16 %v2785_v60, %v2783_v38  ;;  %17758 = vst [vmem:[#allocation16_spill] sm:$0xff] %v12982_v24  ;;  %v12987_v55 = vsel %vm17760_vm10, %v2784_v56, %v17759_v45  ;;  %v17762_v38 = vld [vmem:[#allocation34_spill] sm:$0xff]  ;;  %v9198_v4 = vunpack.i.l.bf16 %v17764_v30  ;;  %v3329_v31 = vsel %vm1914_vm7, %v12974_v35, %v17279_v44 }
 0x259   : > { %v12939_v41 = vpop.permute.xlu1 %9511  ;;  %v12941_v42 = vpop.permute.xlu2 %9541  ;;  %17761 = vst [vmem:[#allocation32_spill] sm:$0xff] %v12987_v55  ;;  %v2676_v60 = vsel %vm17763_vm8, %v17762_v38, %v9398_v23  ;;  %v17765_v11 = vrot.slane %v12566_v34, 6  ;;  %vm17766_vm9 = vcmask 1041408   ;;  %v1392_v46 = vmax.f32 %v1320_v26, %v1356_v63  ;;  %v17768_v38 = vld [vmem:[#allocation11_spill] sm:$0xff]  ;;  %v17771_v55 = vld [vmem:[#allocation10_spill] sm:$0xff] }
 0x25a   : > { %v1321_v30 = vmax.f32 %v17768_v38, %v17767_v7  ;;  %v1322_v47 = vmax.f32 %v17770_v2, %v17769_v13  ;;  %v9458_v44 = vunpack.i.l.bf16 %v17738_v15  ;;  %v2683_v24 = vsel %vm2293_vm11, %v2676_v60, %v9198_v4 }
 0x25b   : > { %v3268_v23 = vsel %vm17766_vm9, %v12977_v54, %v17765_v11  ;;  %vm17772_vm6 = vcmask 162816   ;;  %v9498_v63 = vunpack.i.l.bf16 %v12872_v0  ;;  %v9750_v26 = vpack.i.bf16 %v12974_v35, %v3329_v31 }
 0x25c   : > { %v2665_v11 = vsel %vm17772_vm6, %v17771_v55, %v9444_v17  ;;  %v9745_v51 = vpack.i.bf16 %v12977_v54, %v3268_v23  ;;  %v13025_v20 = vadd.f32 %v10369_v10, %v1391_v62  ;;  %vm17774_vm10 = vcmask 326656   ;;  %vm17781_vm6 = vmmov %vm17766_vm9 }
 0x25d   : > { %v2671_v7 = vsel %vm17774_vm10, %v2665_v11, %v9449_v19  ;;  %v3056_v15 = vrot.slane %v12686_v40, 3  ;;  %v13030_v2 = vadd.f32 %v10369_v10, %v1392_v46  ;;  %v2696_v60 = vsel %vm2306_vm12, %v2683_v24, %v9458_v44 }
 0x25e   : > { %17773 = vst [vmem:[#allocation34_spill] sm:$0xff] %v13025_v20  ;;  %v13035_v17 = vrot.slane %v12689_v37, 3  ;;  %v9523_v62 = vunpack.i.l.bf16 %v12828_v61  ;;  %v9504_v23 = vunpack.i.h.bf16 %v12931_v3  ;;  %v9503_v19 = vunpack.i.l.bf16 %v12931_v3 }
 0x25f   : > { %9721 = vrot.lane.b32.xlu2 %v9720_v50, %s10398_s24  ;;  %9731 = vrot.lane.b32.xlu1 %v9730_v28, %s17319_s13  ;;  %v9493_v28 = vunpack.i.l.bf16 %v12891_v48  ;;  %17775 = vst [vmem:[#allocation45_spill] sm:$0xff] %v13030_v2  ;;  %v1073_v4 = vpop.f32.mrf.mxu2  ;;  %v1281_v31 = vpop.f32.mrf.mxu3  ;;  %v1357_v46 = vmax.f32 %v12960_v14, %v12962_v59  ;;  %v2709_v44 = vsel %vm2319_vm13, %v2696_v60, %v9498_v63  ;;  %v17776_v3 = vrot.slane %v12670_v6, 3 }
 0x260   : > { %v12998_v56 = vpop.permute.xlu0 %9526  ;;  %v1358_v11 = vmax.f32 %v1073_v4, %v1281_v31  ;;  %v13056_v14 = vsel %vm560_vm1, %v3056_v15, %v13035_v17  ;;  %v2760_v4 = vrot.slane %v2709_v44, 5  ;;  %v2722_v31 = vsel %vm2332_vm14, %v9498_v63, %v9503_v19 }
 0x261   : > { %v13009_v50 = vpop.permute.xlu1 %9516  ;;  %v13011_v45 = vpop.permute.xlu2 %9546  ;;  %v2678_v55 = vsel %vm17763_vm8, %v2671_v7, %v9493_v28  ;;  %v9528_v38 = vunpack.i.l.bf16 %v12998_v56  ;;  %v9499_v28 = vunpack.i.h.bf16 %v12872_v0  ;;  %v13052_v54 = vsel %vm560_vm1, %v17776_v3, %v3056_v15 }
 0x262   : > { %v2691_v7 = vsel %vm2293_vm11, %v2678_v55, %v9523_v62  ;;  %v13073_v24 = vpack.i.bf16 %v13056_v14, %v13052_v54  ;;  %v17288_v0 = vrot.slane %v13025_v20, 6  ;;  %v1394_v35 = vmax.f32 %v1322_v47, %v1358_v11 }
 0x263   : > { %v2723_v62 = vsel %vm2332_vm14, %v9499_v28, %v9504_v23  ;;  %v2704_v3 = vsel %vm2306_vm12, %v2691_v7, %v9528_v38  ;;  %v9760_v63 = vpack.i.bf16 %v12435_v57, %v13035_v17  ;;  %v17778_v23 = vrot.slane %v12188_v1, 6 }
 0x264   : > { %17777 = vst [vmem:[#allocation12_spill] sm:$0xff] %v13073_v24  ;;  %v13077_v44 = vsel %vm2319_vm13, %v2704_v3, %v9499_v28  ;;  %v17779_v19 = vrot.slane %v12181_v52, 6  ;;  %v17780_v7 = vrot.slane %v13030_v2, 6  ;;  %v1393_v11 = vmax.f32 %v1321_v30, %v1357_v46 }
 0x265   : > { %vm17784_vm10 = vcmask 1042432   ;;  %v17290_v30 = vrot.slane %v13077_v44, 5  ;;  %v17291_v46 = vrot.slane %v12686_v40, 4 }
 0x266   : > { %v13086_v38 = vsel %vm17766_vm9, %v17779_v19, %v17778_v23  ;;  %v13093_v47 = vsel %vm17781_vm6, %v17288_v0, %v17780_v7  ;;  %vm17787_vm8 = vmmov %vm17784_vm10  ;;  %v13105_v23 = vadd.f32 %v10369_v10, %v1394_v35  ;;  %v17791_v7 = vrot.slane %v12729_v58, 5 }
 0x267   : > { %9751 = vrot.lane.b32.xlu2 %v9750_v26, %s10391_s21  ;;  %9746 = vrot.lane.b32.xlu1 %v9745_v51, %s10390_s9  ;;  %vm17790_vm9 = vmmov %vm17787_vm8  ;;  %v17794_v58 = vrot.slane %v12929_v8, 5  ;;  %v9538_v0 = vunpack.i.l.bf16 %v12893_v5  ;;  %v3113_v8 = vrot.slane %v12670_v6, 4 }
 0x268   : > { %v9532_v13 = vpop.permute.xlu0 %9531  ;;  %17788 = vst [vmem:[#allocation11_spill] sm:$0xff] %v13105_v23  ;;  %vm17793_vm6 = vmmov %vm17787_vm8 }
 0x269   : > { %v9534_v59 = vunpack.i.h.bf16 %v9532_v13  ;;  %v9533_v26 = vunpack.i.l.bf16 %v9532_v13  ;;  %v13058_v60 = vpop.permute.xlu1 %9551  ;;  %v13060_v51 = vpop.permute.xlu2 %9576 }
 0x26b   : > { %v13068_v15 = vsel %vm2345_vm15, %v2723_v62, %v9534_v59  ;;  %v2728_v13 = vsel %vm2345_vm15, %v2722_v31, %v9533_v26  ;;  %v17782_v59 = vld [vmem:[#allocation24_spill] sm:$0xff] }
 0x26c   : > { %v2763_v55 = vrot.slane %v2728_v13, 5  ;;  %v17289_v28 = vrot.slane %v13068_v15, 5  ;;  %v17783_v26 = vrot.slane %v17782_v59, 5  ;;  %v17785_v31 = vld [vmem:[#allocation44_spill] sm:$0xff]  ;;  %v17792_v59 = vrot.slane %v12125_v49, 5 }
 0x26d   : > { %v17786_v62 = vrot.slane %v17785_v31, 5  ;;  %v9513_v31 = vunpack.i.l.bf16 %v12939_v41 }
 0x26e   : > { %v2762_v57 = vsel %vm17784_vm10, %v2760_v4, %v17783_v26  ;;  %v2775_v26 = vsel %vm17793_vm6, %v17792_v59, %v17791_v7  ;;  %vm17795_vm10 = vmmov %vm17793_vm6 }
 0x26f   : > { %v2765_v3 = vsel %vm17787_vm8, %v2763_v55, %v17786_v62  ;;  %9761 = vrot.lane.b32.xlu2 %v9760_v63, %s10385_s14  ;;  %9776 = vrot.lane.b32.xlu1 %v13073_v24, %s10385_s14  ;;  %v13115_v55 = vadd.f32 %v10369_v10, %v1393_v11  ;;  %v17789_v63 = vrot.slane %v12923_v43, 5  ;;  %v9765_v10 = vpack.i.bf16 %v12713_v39, %v12742_v36  ;;  %vm17798_vm8 = vmmov %vm17793_vm6 }
 0x270   : > { %v9630_v13 = vpack.i.bf16 %v2765_v3, %v2762_v57  ;;  %v3330_v57 = vrot.slane %v12762_v33, 7  ;;  %v9518_v3 = vunpack.i.l.bf16 %v13009_v50  ;;  %v2791_v49 = vsel %vm17795_vm10, %v17794_v58, %v17290_v30 }
 0x271   : > { %v13110_v19 = vpop.permute.xlu1 %9556  ;;  %v13112_v4 = vpop.permute.xlu2 %9581  ;;  %v2793_v35 = vsel %vm17790_vm9, %v17789_v63, %v17289_v28  ;;  %v17797_v63 = vrot.slane %v12387_v32, 5  ;;  %v9524_v11 = vunpack.i.h.bf16 %v12828_v61  ;;  %v17799_v58 = vrot.slane %v12566_v34, 7 }
 0x272   : > { %9631 = vrot.lane.b32.xlu0 %v9630_v13, %s10398_s24  ;;  %v17796_v13 = vrot.slane %v12571_v22, 5  ;;  %v9780_v28 = vpack.i.bf16 %v2793_v35, %v2791_v49  ;;  %v17294_v32 = vrot.slane %v12566_v34, 5  ;;  %vm17801_vm9 = vcmask 162816  }
 0x273   : > { %v13152_v22 = vsel %vm1914_vm7, %v17799_v58, %v3330_v57  ;;  %v17802_v35 = vrot.slane %v12670_v6, 7  ;;  %v17297_v49 = vrot.slane %v12670_v6, 5  ;;  %v9543_v58 = vunpack.i.l.bf16 %v12941_v42  ;;  %vm17806_vm10 = vmmov %vm17801_vm9 }
 0x274   : > { %v2777_v7 = vsel %vm17798_vm8, %v17797_v63, %v17796_v13  ;;  %v17800_v13 = vld [vmem:[#allocation14_spill] sm:$0xff]  ;;  %vm17803_vm6 = vcmask 326656   ;;  %vm17809_vm8 = vcmask 490496   ;;  %v9548_v24 = vunpack.i.l.bf16 %v13011_v45 }
 0x275   : > { %v9680_v62 = vpack.i.bf16 %v2777_v7, %v2775_v26  ;;  %v2666_v63 = vsel %vm17801_vm9, %v17800_v13, %v9513_v31  ;;  %v13162_v61 = vsel %vm1914_vm7, %v3330_v57, %v17802_v35  ;;  %v3208_v26 = vrot.slane %v12762_v33, 5 }
 0x276   : > { %v9514_v7 = vunpack.i.h.bf16 %v12939_v41  ;;  %v2672_v30 = vsel %vm17803_vm6, %v2666_v63, %v9518_v3  ;;  %v9494_v31 = vunpack.i.h.bf16 %v12891_v48  ;;  %v9519_v3 = vunpack.i.h.bf16 %v13009_v50  ;;  %vm17813_vm6 = vmmov %vm17806_vm10 }
 0x277   : > { %9781 = vrot.lane.b32.xlu1 %v9780_v28, %s10398_s24  ;;  %9766 = vrot.lane.b32.xlu2 %v9765_v10, %s10383_s12  ;;  %v13172_v28 = vsel %vm17348_vm0, %v3113_v8, %v17291_v46  ;;  %v17805_v10 = vld [vmem:[#allocation6_spill] sm:$0xff]  ;;  %v17807_v63 = vrot.slane %v12762_v33, 4  ;;  %v9685_v48 = vpack.i.bf16 %v12913_v53, %v12833_v25  ;;  %v9770_v50 = vpack.i.bf16 %v12759_v27, %v12783_v12 }
 0x278   : > { %17804 = vst [vmem:[#allocation52_spill] sm:$0xff] %v13172_v28  ;;  %v2668_v57 = vsel %vm17806_vm10, %v17805_v10, %v9538_v0  ;;  %v9810_v0 = vpack.i.bf16 %v13162_v61, %v13152_v22  ;;  %v2679_v10 = vsel %vm17809_vm8, %v2672_v30, %v9494_v31  ;;  %vm17811_vm9 = vcmask 1042432   ;;  %v9567_v61 = vpop.permute.xlu0 %9566 }
 0x279   : > { %v9562_v13 = vpop.permute.xlu1 %9561  ;;  %v13177_v35 = vpop.permute.xlu2 %9586  ;;  %v13186_v46 = vsel %vm17348_vm0, %v17807_v63, %v3113_v8  ;;  %v3209_v8 = vsel %vm17811_vm9, %v17294_v32, %v3208_v26  ;;  %v17812_v63 = vld [vmem:[#allocation15_spill] sm:$0xff]  ;;  %vm17814_vm10 = vcmask 326656   ;;  %v9549_v22 = vunpack.i.h.bf16 %v13011_v45  ;;  %vm17815_vm8 = vmmov %vm17811_vm9 }
 0x27a   : > { %9681 = vrot.lane.b32.xlu0 %v9680_v62, %s10398_s24  ;;  %17808 = vst [vmem:[#allocation58_spill] sm:$0xff] %v13186_v46  ;;  %v13195_v62 = vpack.i.bf16 %v13172_v28, %v13186_v46  ;;  %v2667_v59 = vsel %vm17813_vm6, %v17812_v63, %v9514_v7  ;;  %v2674_v41 = vsel %vm17814_vm10, %v2668_v57, %v9543_v58  ;;  %v9529_v31 = vunpack.i.h.bf16 %v12998_v56  ;;  %vm17816_vm9 = vmmov %vm17814_vm10 }
 0x27b   : > { %v3211_v30 = vsel %vm17815_vm8, %v3208_v26, %v17297_v49  ;;  %v9578_v36 = vunpack.i.l.bf16 %v13060_v51  ;;  %v9583_v32 = vunpack.i.l.bf16 %v13112_v4  ;;  %v2673_v28 = vsel %vm17816_vm9, %v2667_v59, %v9519_v3  ;;  %vm17828_vm9 = vmmov %vm17815_vm8 }
 0x27c   : > { %17810 = vst [vmem:[#allocation10_spill] sm:$0xff] %v13195_v62  ;;  %v2692_v7 = vsel %vm2293_vm11, %v2679_v10, %v9524_v11  ;;  %v9553_v58 = vunpack.i.l.bf16 %v13058_v60  ;;  %v9558_v57 = vunpack.i.l.bf16 %v13110_v19  ;;  %v9559_v63 = vunpack.i.h.bf16 %v13110_v19 }
 0x27d   : > { %v9569_v43 = vunpack.i.h.bf16 %v9567_v61  ;;  %v9568_v26 = vunpack.i.l.bf16 %v9567_v61  ;;  %v9563_v49 = vunpack.i.l.bf16 %v9562_v13  ;;  %vm17817_vm6 = vcmask 490496  }
 0x27e   : > { %v2681_v56 = vsel %vm17817_vm6, %v2674_v41, %v9549_v22  ;;  %v9564_v45 = vunpack.i.h.bf16 %v9562_v13  ;;  %v9588_v59 = vunpack.i.l.bf16 %v13177_v35  ;;  %v9790_v11 = vpack.i.bf16 %v3211_v30, %v3209_v8  ;;  %vm17818_vm10 = vmmov %vm17817_vm6 }
 0x27f   : > { %9786 = vrot.lane.b32.xlu1 %v13195_v62, %s10388_s17  ;;  %9771 = vrot.lane.b32.xlu2 %v9770_v50, %s17319_s13  ;;  %v2705_v3 = vsel %vm2306_vm12, %v2692_v7, %v9529_v31  ;;  %v2680_v10 = vsel %vm17818_vm10, %v2673_v28, %v9548_v24  ;;  %v9554_v19 = vunpack.i.h.bf16 %v13058_v60  ;;  %v2726_v61 = vsel %vm2332_vm14, %v9578_v36, %v9583_v32  ;;  %vm17830_vm6 = vmmov %vm17815_vm8 }
 0x280   : > { %v13231_v50 = vsel %vm2319_vm13, %v2705_v3, %v9553_v58  ;;  %v2724_v13 = vsel %vm2332_vm14, %v9553_v58, %v9558_v57  ;;  %v2694_v24 = vsel %vm2293_vm11, %v2681_v56, %v9569_v43  ;;  %v2693_v60 = vsel %vm2293_vm11, %v2680_v10, %v9568_v26  ;;  %vm17832_vm10 = vmmov %vm17830_vm6 }
 0x281   : > { %v9572_v46 = vpop.permute.xlu1 %9571  ;;  %v13227_v12 = vpop.permute.xlu2 %9651  ;;  %v2725_v22 = vsel %vm2332_vm14, %v9554_v19, %v9559_v63  ;;  %v13238_v32 = vsel %vm2345_vm15, %v2724_v13, %v9563_v49  ;;  %v17819_v7 = vrot.slane %v12202_v29, 7  ;;  %v17820_v49 = vrot.slane %v12199_v9, 7 }
 0x282   : > { %9686 = vrot.lane.b32.xlu0 %v9685_v48, %s10383_s12  ;;  %v9574_v41 = vunpack.i.h.bf16 %v9572_v46  ;;  %v9573_v8 = vunpack.i.l.bf16 %v9572_v46  ;;  %v13241_v28 = vsel %vm2345_vm15, %v2725_v22, %v9564_v45  ;;  %v13244_v48 = vsel %vm2345_vm15, %v2726_v61, %v9588_v59  ;;  %v13271_v59 = vpop.f32.mrf.mxu0 }
 0x283   : > { %v13259_v58 = vsel %vm1914_vm7, %v17820_v49, %v17819_v7  ;;  %v17822_v57 = vrot.slane %v13105_v23, 7  ;;  %v17823_v63 = vrot.slane %v13115_v55, 7  ;;  %v17301_v56 = vrot.slane %v13238_v32, 5  ;;  %17825 = vst [vmem:[#allocation14_spill] sm:$0xff] %v13271_v59 }
 0x284   : > { %v2706_v30 = vsel %vm2306_vm12, %v2693_v60, %v9573_v8  ;;  %v2707_v31 = vsel %vm2306_vm12, %v2694_v24, %v9574_v41  ;;  %17821 = vst [vmem:[#allocation24_spill] sm:$0xff] %v13259_v58  ;;  %v9690_v3 = vpack.i.bf16 %v12951_v21, %v12843_v16  ;;  %v17303_v10 = vrot.slane %v13231_v50, 5  ;;  %v13297_v24 = vpop.f32.mrf.mxu1 }
 0x285   : > { %v13249_v46 = vsel %vm2319_vm13, %v2706_v30, %v9554_v19  ;;  %v13252_v43 = vsel %vm2319_vm13, %v2707_v31, %v9578_v36  ;;  %v13266_v26 = vsel %vm1914_vm7, %v17823_v63, %v17822_v57  ;;  %v17302_v19 = vrot.slane %v13241_v28, 5  ;;  %17829 = vst [vmem:[#allocation15_spill] sm:$0xff] %v13297_v24 }
 0x286   : > { %17824 = vst [vmem:[#allocation44_spill] sm:$0xff] %v13266_v26  ;;  %v17304_v45 = vrot.slane %v13249_v46, 5  ;;  %v17306_v36 = vrot.slane %v13252_v43, 5  ;;  %v17305_v61 = vrot.slane %v13244_v48, 5  ;;  %v17831_v30 = vrot.slane %v13077_v44, 5 }
 0x287   : > { %9811 = vrot.lane.b32.xlu1 %v9810_v0, %s10391_s21  ;;  %9791 = vrot.lane.b32.xlu2 %v9790_v11, %s17315_s18  ;;  %v17827_v11 = vrot.slane %v13068_v15, 5  ;;  %v17833_v7 = vrot.slane %v12670_v6, 3  ;;  %v17834_v15 = vrot.slane %v12762_v33, 3  ;;  %v17300_v57 = vrot.slane %v13025_v20, 3 }
 0x288   : > { %v2803_v0 = vsel %vm17815_vm8, %v17304_v45, %v17306_v36  ;;  %v2805_v60 = vsel %vm17830_vm6, %v17302_v19, %v17305_v61  ;;  %v2795_v31 = vsel %vm17832_vm10, %v17831_v30, %v17303_v10  ;;  %v3214_v30 = vrot.slane %v12689_v37, 5  ;;  %vm17838_vm8 = vmmov %vm17830_vm6 }
 0x289   : > { %v13282_v41 = vpop.permute.xlu1 %9596  ;;  %v13284_v8 = vpop.permute.xlu2 %9656  ;;  %v2797_v22 = vsel %vm17828_vm9, %v17827_v11, %v17301_v56  ;;  %v13314_v49 = vsel %vm560_vm1, %v17834_v15, %v17833_v7  ;;  %v9825_v63 = vpack.i.bf16 %v2805_v60, %v2803_v0  ;;  %v3212_v11 = vrot.slane %v12686_v40, 5  ;;  %v17839_v15 = vld [vmem:[#allocation69_spill] sm:$0xff]  ;;  %vm17840_vm9 = vmmov %vm17830_vm6 }
 0x28a   : > { %17826 = vst [vmem:[#allocation6_spill] sm:$0xff] %v13282_v41  ;;  %9691 = vrot.lane.b32.xlu0 %v9690_v3, %s17319_s13  ;;  %v9795_v3 = vpack.i.bf16 %v2797_v22, %v2795_v31  ;;  %v4765_v13 = vpop.f32.mrf.mxu0  ;;  %v13322_v44 = vpack.i.bf16 %v13314_v49, %v12821_v18  ;;  %v13329_v7 = vsel %vm560_vm1, %v13035_v17, %v17300_v57  ;;  %v17837_v60 = vrot.slane %v12670_v6, 5  ;;  %v13344_v57 = vpop.permute.xlu0 %9591  ;;  %s17964_s13 = smov 72  }
 0x28b   : > { %v9579_v31 = vunpack.i.h.bf16 %v13060_v51  ;;  %v3215_v17 = vsel %vm17840_vm9, %v3212_v11, %v3214_v30  ;;  %17841 = vst [vmem:[#allocation69_spill] sm:$0xff] %v13344_v57  ;;  %v9815_v19 = vpack.i.bf16 %v13329_v7, %v13056_v14  ;;  %v9539_v10 = vunpack.i.h.bf16 %v12893_v5  ;;  %v17843_v14 = vld [vmem:[#allocation100_spill] sm:$0xff] }
 0x28c   : > { %17835 = vst [vmem:[#allocation104_spill] sm:$0xff] %v13322_v44  ;;  %v3213_v18 = vsel %vm17838_vm8, %v17837_v60, %v3212_v11  ;;  %v9544_v60 = vunpack.i.h.bf16 %v12941_v42  ;;  %v9589_v51 = vunpack.i.h.bf16 %v13177_v35  ;;  %v9598_v11 = vunpack.i.l.bf16 %v13282_v41 }
 0x28d   : > { %v9830_v61 = vpack.i.bf16 %v3215_v17, %v3213_v18  ;;  %vm17846_vm6 = vcmask 162816   ;;  %vm17847_vm10 = vcmask 326656   ;;  %vm17849_vm8 = vcmask 490496  }
 0x28e   : > { %v17874_v59 = vrot.slane %v12181_v52, 7 }
 0x28f   : > { %9826 = vrot.lane.b32.xlu1 %v9825_v63, %s10398_s24  ;;  %9796 = vrot.lane.b32.xlu2 %v9795_v3, %s10398_s24  ;;  %v4766_v63 = vadd.f32 %v17839_v15, %v4765_v13  ;;  %v9584_v3 = vunpack.i.h.bf16 %v13112_v4  ;;  %v9593_v4 = vunpack.i.l.bf16 %v13344_v57  ;;  %v17844_v15 = vld [vmem:[#allocation76_spill] sm:$0xff]  ;;  %v17950_v57 = vld [vmem:[#allocation77_spill] sm:$0xff] }
 0x290   : > { %v9705_v5 = vpack.i.bf16 %v17844_v15, %v17843_v14 }
 0x291   : > { %v13331_v0 = vpop.permute.xlu1 %9621  ;;  %v13333_v22 = vpop.permute.xlu2 %9661  ;;  %v2727_v13 = vsel %vm2332_vm14, %v9579_v31, %v9584_v3 }
 0x292   : > { %17836 = vst [vmem:[#allocation105_spill] sm:$0xff] %v13331_v0  ;;  %9701 = vrot.lane.b32.xlu0 %v13322_v44, %s10385_s14  ;;  %v2733_v35 = vsel %vm2345_vm15, %v2727_v13, %v9589_v51  ;;  %v17307_v51 = vrot.slane %v12181_v52, 5  ;;  %v3269_v44 = vrot.slane %v12762_v33, 6  ;;  %v17942_v0 = vld [vmem:[#allocation42_spill] sm:$0xff] }
 0x293   : > { %v4833_v56 = vpop.f32.mrf.mxu1  ;;  %v2808_v15 = vrot.slane %v2733_v35, 5 }
 0x294   : > { %v13349_v45 = vadd.f32 %v4833_v56, %v4766_v63  ;;  %v17845_v56 = vld [vmem:[#allocation7_spill] sm:$0xff] }
 0x295   : > { %v2669_v63 = vsel %vm17846_vm6, %v17845_v56, %v9539_v10  ;;  %vm17857_vm6 = vmmov %vm17840_vm9 }
 0x296   : > { %17842 = vst [vmem:[#allocation106_spill] sm:$0xff] %v13349_v45  ;;  %v2675_v42 = vsel %vm17847_vm10, %v2669_v63, %v9544_v60  ;;  %v17850_v60 = vld [vmem:[#allocation28_spill] sm:$0xff]  ;;  %v17852_v45 = vld [vmem:[#allocation62_spill] sm:$0xff]  ;;  %vm17862_vm10 = vmmov %vm17857_vm6 }
 0x297   : > { %9831 = vrot.lane.b32.xlu1 %v9830_v61, %s17315_s18  ;;  %9816 = vrot.lane.b32.xlu2 %v9815_v19, %s10386_s15  ;;  %v2682_v61 = vsel %vm17849_vm8, %v2675_v42, %v9593_v4  ;;  %v3195_v56 = vrot.slane %v17850_v60, 5  ;;  %v13381_v42 = vpop.f32.mrf.mxu0  ;;  %vm17864_vm8 = vmmov %vm17857_vm6 }
 0x298   : > { %v2695_v17 = vsel %vm2293_vm11, %v2682_v61, %v9598_v11  ;;  %17854 = vst [vmem:[#allocation7_spill] sm:$0xff] %v13381_v42  ;;  %v17855_v11 = vrot.slane %v13252_v43, 5 }
 0x299   : > { %v13364_v18 = vpop.permute.xlu1 %9626  ;;  %v13366_v3 = vpop.permute.xlu2 %9666  ;;  %v3197_v43 = vsel %vm17862_vm10, %v3195_v56, %v17307_v51  ;;  %v3275_v56 = vrot.slane %v12689_v37, 6 }
 0x29a   : > { %17848 = vst [vmem:[#allocation76_spill] sm:$0xff] %v13364_v18  ;;  %9706 = vrot.lane.b32.xlu0 %v9705_v5, %s10386_s15  ;;  %v9668_v19 = vunpack.i.l.bf16 %v13366_v3  ;;  %v17851_v5 = vld [vmem:[#allocation64_spill] sm:$0xff]  ;;  %v3218_v18 = vrot.slane %v13030_v2, 5 }
 0x29b   : > { %v17853_v4 = vpack.i.bf16 %v17851_v5, %v17852_v45  ;;  %v17865_v5 = vld [vmem:[#allocation67_spill] sm:$0xff] }
 0x29c   : > { %v2708_v36 = vsel %vm2306_vm12, %v2695_v17, %v9668_v19  ;;  %v17859_v17 = vld [vmem:[#allocation32_spill] sm:$0xff] }
 0x29d   : > { %v2721_v10 = vsel %vm2319_vm13, %v2708_v36, %v9579_v31  ;;  %v17856_v36 = vrot.slane %v13244_v48, 5 }
 0x29e   : > { %v2806_v63 = vrot.slane %v2721_v10, 5  ;;  %v17860_v10 = vld [vmem:[#allocation16_spill] sm:$0xff] }
 0x29f   : > { %9851 = vrot.lane.b32.xlu1 %v17853_v4, %s17499_s29  ;;  %v2809_v31 = vsel %vm17857_vm6, %v17856_v36, %v2808_v15  ;;  %v17861_v13 = vpack.i.bf16 %v17859_v17, %v17860_v10  ;;  %v13404_v15 = vrot.slane %v17865_v5, 5  ;;  %v3273_v4 = vrot.slane %v12686_v40, 6  ;;  %v4770_v42 = vpop.f32.mrf.mxu0 }
 0x2a0   : > { %v2807_v35 = vsel %vm17840_vm9, %v17855_v11, %v2806_v63  ;;  %v17863_v63 = vrot.slane %v13025_v20, 5  ;;  %v17866_v36 = vrot.slane %v12566_v34, 5  ;;  %vm17867_vm9 = vmmov %vm17857_vm6  ;;  %v3317_v17 = vrot.slane %v17850_v60, 7 }
 0x2a1   : > { %v13389_v61 = vpop.permute.xlu1 %9636  ;;  %v13391_v19 = vpop.permute.xlu2 %9671  ;;  %v9835_v45 = vpack.i.bf16 %v2809_v31, %v2807_v35  ;;  %v17308_v35 = vrot.slane %v12670_v6, 6  ;;  %v9654_v31 = vunpack.i.h.bf16 %v13227_v12  ;;  %vm17869_vm6 = vcmask 1041408  }
 0x2a2   : > { %17858 = vst [vmem:[#allocation64_spill] sm:$0xff] %v13389_v61  ;;  %9736 = vrot.lane.b32.xlu0 %v17861_v13, %s10398_s24  ;;  %v3217_v48 = vsel %vm17864_vm8, %v3214_v30, %v17863_v63  ;;  %v3207_v13 = vsel %vm17867_vm9, %v13404_v15, %v17866_v36  ;;  %v13415_v30 = vpop.f32.mrf.mxu1  ;;  %vm17870_vm10 = vmmov %vm17869_vm6  ;;  %v9673_v51 = vunpack.i.l.bf16 %v13391_v19  ;;  %vm17871_vm8 = vcmask 162816  }
 0x2a3   : > { %9836 = vrot.lane.b32.xlu2 %v9835_v45, %s10398_s24  ;;  %v9865_v11 = vpack.i.bf16 %v3217_v48, %v3197_v43  ;;  %17868 = vst [vmem:[#allocation62_spill] sm:$0xff] %v13415_v30  ;;  %v9659_v43 = vunpack.i.h.bf16 %v13284_v8  ;;  %v3274_v63 = vsel %vm17869_vm6, %v17308_v35, %v3273_v4  ;;  %v3276_v48 = vsel %vm17870_vm10, %v3273_v4, %v3275_v56 }
 0x2a4   : > { %v9740_v30 = vpack.i.bf16 %v13404_v15, %v3207_v13  ;;  %v3661_v45 = vsel %vm17871_vm8, %v12202_v29, %v9654_v31  ;;  %v9840_v35 = vpack.i.bf16 %v3276_v48, %v3274_v63  ;;  %vm17873_vm9 = vcmask 326656  }
 0x2a5   : > { %v3673_v4 = vsel %vm17873_vm9, %v3661_v45, %v9659_v43  ;;  %v17875_v13 = vrot.slane %v13025_v20, 7  ;;  %v17876_v61 = vrot.slane %v12689_v37, 7  ;;  %vm17877_vm6 = vcmask 490496  }
 0x2a6   : > { %v9755_v48 = vpack.i.bf16 %v13052_v54, %v13314_v49  ;;  %vm2410_vm8 = vcmask 31744   ;;  %v17880_v54 = vld [vmem:[#allocation36_spill] sm:$0xff]  ;;  %vm17883_vm9 = vcmask 1042432  }
 0x2a7   : > { %9866 = vrot.lane.b32.xlu1 %v9865_v11, %s17315_s18  ;;  %v3319_v11 = vsel %vm1914_vm7, %v3317_v17, %v17874_v59  ;;  %v3339_v31 = vsel %vm1914_vm7, %v17876_v61, %v17875_v13  ;;  %v8726_v59 = vld [vmem:[%s17110_s3 + $0xb8] sm:$0xff]  ;;  %v9269_v49 = vunpack.i.h.bf16 %v17880_v54 }
 0x2a8   : > { %v9880_v17 = vpack.i.bf16 %v3339_v31, %v3319_v11  ;;  %4877 = vmatpush.bf16.msrb.mxu2 %v8726_v59  ;;  %v3256_v31 = vrot.slane %v17850_v60, 6  ;;  %v9268_v59 = vunpack.i.l.bf16 %v17880_v54  ;;  %v17888_v54 = vrot.slane %v12181_v52, 6 }
 0x2a9   : > { %v13431_v10 = vpop.permute.xlu1 %9641  ;;  %v13433_v24 = vpop.permute.xlu2 %9676 }
 0x2aa   : > { %17872 = vst [vmem:[#allocation32_spill] sm:$0xff] %v13431_v10  ;;  %9741 = vrot.lane.b32.xlu0 %v9740_v30, %s17315_s18  ;;  %v9678_v36 = vunpack.i.l.bf16 %v13433_v24  ;;  %v13447_v10 = vsel %vm17877_vm6, %v3673_v4, %v9673_v51  ;;  %v10370_v30 = vld [vmem:[%s17111_s4] ss:$0 sm:$0xff]  ;;  %v1498_v51 = vld [vmem:[%s17110_s3 + $0xf8] sm:$0x3]  ;;  %vm2423_vm6 = vcmask 195584  }
 0x2ab   : > { %9841 = vrot.lane.b32.xlu2 %v9840_v35, %s10390_s9  ;;  %v4771_v45 = vadd.f32 %v10370_v30, %v4770_v42  ;;  %v4637_v35 = vunpack.c.l.b16 %v1498_v51  ;;  %v8725_v42 = vld [vmem:[%s17110_s3 + $0xb0] sm:$0xff]  ;;  %v17881_v51 = vrot.slane %v13249_v46, 5  ;;  %v17886_v46 = vrot.slane %v13238_v32, 5  ;;  %v8723_v32 = vld [vmem:[%s17110_s3 + $0xa0] sm:$0xff]  ;;  %s10402_s18 = smov 22  }
 0x2ac   : > { %v13455_v43 = vsel %vm2293_vm11, %v13447_v10, %v9678_v36  ;;  %4878 = vmatpush.bf16.msrb.mxu2 %v8725_v42  ;;  %v8733_v30 = vld [vmem:[%s17110_s3 + $0xf0] sm:$0xff]  ;;  %v17884_v42 = vld [vmem:[#allocation39_spill] sm:$0xff] }
 0x2ad   : > { %v4838_v61 = vpop.f32.mrf.mxu1  ;;  %v4669_v36 = vpack.c.b16 %v4637_v35, %v4637_v35  ;;  %v8724_v35 = vld [vmem:[%s17110_s3 + $0xa8] sm:$0xff] }
 0x2ae   : > { %v13463_v63 = vadd.f32 %v4838_v61, %v4771_v45  ;;  %v17879_v45 = vld [vmem:[#allocation63_spill] sm:$0xff]  ;;  %v17882_v61 = vrot.slane %v13231_v50, 5 }
 0x2af   : > { %9881 = vrot.lane.b32.xlu1 %v9880_v17, %s10391_s21  ;;  %v4739_v11 = vsel %vm17870_vm10, %v4669_v36, 0  ;;  %v9273_v36 = vunpack.i.l.bf16 %v17884_v42  ;;  %vm17887_vm10 = vmmov %vm17883_vm9 }
 0x2b0   : > { %17878 = vst [vmem:[#allocation16_spill] sm:$0xff] %v13463_v63  ;;  %4945 = vmatpush.bf16.msra.mxu3 %v4739_v11  ;;  %v2799_v17 = vsel %vm17883_vm9, %v17882_v61, %v17881_v51  ;;  %v9890_v11 = vpack.i.bf16 %v12188_v1, %v12181_v52  ;;  %vm17889_vm9 = vcmask 1041408   ;;  %v17890_v61 = vrot.slane %v13025_v20, 6  ;;  %4879 = vmatpush.bf16.msrb.mxu2 %v8724_v35 }
 0x2b1   : > { %v13471_v4 = vpop.permute.xlu1 %9646  ;;  %v13473_v13 = vpop.permute.xlu2 %9716  ;;  %v3258_v51 = vsel %vm17889_vm9, %v3256_v31, %v17888_v54  ;;  %vm17891_vm5 = vmmov %vm17889_vm9 }
 0x2b2   : > { %9756 = vrot.lane.b32.xlu0 %v9755_v48, %s10386_s15  ;;  %v9274_v48 = vunpack.i.h.bf16 %v17884_v42  ;;  %v3278_v63 = vsel %vm17891_vm5, %v3275_v56, %v17890_v61  ;;  %v17892_v42 = vld [vmem:[#allocation47_spill] sm:$0xff]  ;;  %v17893_v56 = vld [vmem:[#allocation33_spill] sm:$0xff]  ;;  %vm2436_vm5 = vcmask 359424   ;;  %vm17900_vm2 = vmmov %vm17889_vm9 }
 0x2b3   : > { %9856 = vrot.lane.b32.xlu2 %v17879_v45, %s10395_s25  ;;  %v17885_v45 = vrot.slane %v13241_v28, 5  ;;  %v8732_v28 = vld [vmem:[%s17110_s3 + $0xe8] sm:$0xff]  ;;  %v9308_v31 = vunpack.i.l.bf16 %v17892_v42  ;;  %v17894_v54 = vunpack.i.l.bf16 %v17893_v56  ;;  %v17895_v35 = vunpack.i.h.bf16 %v17893_v56 }
 0x2b4   : > { %4946 = vmatpush.bf16.msra.mxu3 %v8733_v30  ;;  %v17897_v56 = vrot.slane %v13025_v20, 3  ;;  %4880 = vmatpush.bf16.msrb.mxu2 %v8723_v32 }
 0x2b5   : > { %v2801_v50 = vsel %vm17887_vm10, %v17886_v46, %v17885_v45  ;;  %v9309_v45 = vunpack.i.h.bf16 %v17892_v42  ;;  %v2415_v30 = vsel %vm2410_vm8, %v17894_v54, %v9268_v59  ;;  %v2416_v61 = vsel %vm2410_vm8, %v17895_v35, %v9269_v49  ;;  %v13549_v54 = vpop.permute.xlu0 %9601 }
 0x2b6   : > { %v9800_v46 = vpack.i.bf16 %v2801_v50, %v2799_v17  ;;  %v2428_v62 = vsel %vm2423_vm6, %v2415_v30, %v9273_v36  ;;  %v2429_v60 = vsel %vm2423_vm6, %v2416_v61, %v9274_v48  ;;  %v9870_v17 = vpack.i.bf16 %v3278_v63, %v3258_v51  ;;  %v8731_v63 = vld [vmem:[%s17110_s3 + $0xe0] sm:$0xff]  ;;  %v8722_v61 = vld [vmem:[%s17110_s3 + $0x98] sm:$0xff] }
 0x2b7   : > { %9891 = vrot.lane.b32.xlu1 %v9890_v11, %s10387_s16  ;;  %v3451_v59 = vrot.slane %v13025_v20, 1  ;;  %v17896_v50 = vrot.slane %v13030_v2, 3  ;;  %v17328_v48 = vrot.slane %v13030_v2, 1  ;;  %vm17418_vm10 = vcmask 523264  }
 0x2b8   : > { %4947 = vmatpush.bf16.msra.mxu3 %v8732_v28  ;;  %v2441_v51 = vsel %vm2436_vm5, %v2428_v62, %v9308_v31  ;;  %v17898_v30 = vrot.slane %v12566_v34, 6  ;;  %v17899_v28 = vrot.slane %v12670_v6, 6  ;;  %4881 = vmatpush.bf16.msrb.mxu2 %v8722_v61  ;;  %v17334_v61 = vrot.slane %v13030_v2, 2 }
 0x2b9   : > { %v13527_v26 = vpop.permute.xlu1 %9696  ;;  %v13529_v42 = vpop.permute.xlu2 %9721  ;;  %v13540_v36 = vsel %vm560_vm1, %v17897_v56, %v17896_v50  ;;  %v3452_v31 = vsel %vm17347_vm3, %v12713_v39, %v3451_v59  ;;  %v13582_v50 = vrot.slane %v13025_v20, 4  ;;  %v17329_v56 = vrot.slane %v13030_v2, 4 }
 0x2ba   : > { %9801 = vrot.lane.b32.xlu0 %v9800_v46, %s10398_s24  ;;  %v17331_v11 = vunpack.i.l.bf16 %v13527_v26  ;;  %v17330_v49 = vunpack.i.l.bf16 %v13529_v42  ;;  %v2442_v46 = vsel %vm2436_vm5, %v2429_v60, %v9309_v45  ;;  %v3270_v35 = vsel %vm17889_vm9, %v17898_v30, %v3269_v44 }
 0x2bb   : > { %9871 = vrot.lane.b32.xlu2 %v9870_v17, %s10390_s9  ;;  %v3272_v32 = vsel %vm17900_vm2, %v3269_v44, %v17899_v28  ;;  %v13572_v45 = vpack.i.bf16 %v13540_v36, %v13329_v7  ;;  %v3454_v17 = vsel %vm17347_vm3, %v3451_v59, %v17328_v48  ;;  %17902 = vst [vmem:[#allocation36_spill] sm:$0xff] %v13582_v50  ;;  %v8730_v7 = vld [vmem:[%s17110_s3 + $0xd8] sm:$0xff]  ;;  %v13594_v59 = vrot.slane %v12689_v37, 4  ;;  %v8720_v48 = vld [vmem:[%s17110_s3 + $0x88] sm:$0xff] }
 0x2bc   : > { %v13563_v62 = vsel %vm17418_vm10, %v2441_v51, %v17331_v11  ;;  %v13568_v60 = vsel %vm17418_vm10, %v2442_v46, %v17330_v49  ;;  %4948 = vmatpush.bf16.msra.mxu3 %v8731_v63  ;;  %v8721_v51 = vld [vmem:[%s17110_s3 + $0x90] sm:$0xff]  ;;  %v9805_v39 = vpack.i.bf16 %v3272_v32, %v3270_v35  ;;  %v13601_v63 = vpack.i.bf16 %v3454_v17, %v3452_v31  ;;  %v8728_v11 = vld [vmem:[%s17110_s3 + $0xc8] sm:$0xff] }
 0x2bd   : > { %17901 = vst [vmem:[#allocation63_spill] sm:$0xff] %v13572_v45  ;;  %v13606_v28 = vsel %vm17348_vm0, %v13594_v59, %v13582_v50  ;;  %v13612_v35 = vsel %vm17348_vm0, %v13582_v50, %v17329_v56  ;;  %v3493_v32 = vrot.slane %v13025_v20, 2  ;;  %4882 = vmatpush.bf16.msrb.mxu2 %v8721_v51  ;;  %v8729_v31 = vld [vmem:[%s17110_s3 + $0xd0] sm:$0xff]  ;;  %v17907_v17 = vrot.slane %v12686_v40, 4  ;;  %v13634_v51 = vpop.permute.xlu0 %9606  ;;  %v17910_v50 = vld [vmem:[#allocation70_spill] sm:$0xff] }
 0x2be   : > { %17903 = vst [vmem:[#allocation39_spill] sm:$0xff] %v13594_v59  ;;  %vm17919_vm2 = vcmask 162816   ;;  %vm17924_vm3 = vcmask 326656  }
 0x2bf   : > { %9906 = vrot.lane.b32.xlu1 %v13572_v45, %s10385_s14  ;;  %17904 = vst [vmem:[#allocation47_spill] sm:$0xff] %v13601_v63  ;;  %v3494_v56 = vsel %vm17349_vm4, %v12759_v27, %v3493_v32  ;;  %v3496_v44 = vsel %vm17349_vm4, %v3493_v32, %v17334_v61  ;;  %v8719_v27 = vld [vmem:[%s17110_s3 + $0x80] sm:$0xff]  ;;  %v3334_v32 = vrot.slane %v12686_v40, 7  ;;  %v17344_v61 = vunpack.i.h.bf16 %v13366_v3  ;;  %vm17920_vm9 = vmmov %vm17919_vm2 }
 0x2c0   : > { %17905 = vst [vmem:[#allocation33_spill] sm:$0xff] %v13606_v28  ;;  %4949 = vmatpush.bf16.msra.mxu3 %v8730_v7  ;;  %v13632_v7 = vpack.i.bf16 %v13612_v35, %v13606_v28  ;;  %v13658_v49 = vpack.i.bf16 %v3496_v44, %v3494_v56  ;;  %v17914_v45 = vrot.slane %v13025_v20, 7  ;;  %v17916_v56 = vrot.slane %v12670_v6, 7 }
 0x2c1   : > { %v13596_v46 = vpop.permute.xlu2 %9751  ;;  %v13598_v30 = vpop.permute.xlu1 %9711  ;;  %17906 = vst [vmem:[#allocation107_spill] sm:$0xff] %v13612_v35  ;;  %4883 = vmatpush.bf16.msrb.mxu2 %v8720_v48  ;;  %v17913_v35 = vrot.slane %v13030_v2, 7  ;;  %v13679_v44 = vsel %vm2306_vm12, %v13455_v43, %v17344_v61  ;;  %vm17927_vm4 = vcmask 1042432  }
 0x2c2   : > { %9806 = vrot.lane.b32.xlu0 %v9805_v39, %s10390_s9  ;;  %v13625_v39 = vsel %vm17348_vm0, %v17907_v17, %v13594_v59  ;;  %17909 = vst [vmem:[#allocation109_spill] sm:$0xff] %v13632_v7  ;;  %v17339_v17 = vrot.slane %v12188_v1, 7  ;;  %vm17925_vm0 = vmmov %vm17924_vm3 }
 0x2c3   : > { %9886 = vrot.lane.b32.xlu2 %v13601_v63, %s10383_s12  ;;  %17908 = vst [vmem:[#allocation108_spill] sm:$0xff] %v13625_v39  ;;  %v9820_v59 = vpack.i.bf16 %v17910_v50, %v13625_v39  ;;  %v17912_v50 = vrot.slane %v12181_v52, 7 }
 0x2c4   : > { %4950 = vmatpush.bf16.msra.mxu3 %v8729_v31  ;;  %17911 = vst [vmem:[#allocation70_spill] sm:$0xff] %v13658_v49 }
 0x2c5   : > { %v3321_v63 = vsel %vm1914_vm7, %v17912_v50, %v17339_v17  ;;  %4884 = vmatpush.bf16.msrb.mxu2 %v8719_v27  ;;  %v3335_v50 = vsel %vm1914_vm7, %v17916_v56, %v3334_v32  ;;  %v13688_v28 = vpop.permute.xlu0 %9611  ;;  %v3198_v56 = vrot.slane %v12188_v1, 5 }
 0x2c6   : > { %17918 = vst [vmem:[#allocation110_spill] sm:$0xff] %v13688_v28 }
 0x2c7   : > { %9921 = vrot.lane.b32.xlu1 %v13632_v7, %s10388_s17  ;;  %v3341_v7 = vsel %vm1914_vm7, %v17914_v45, %v17913_v35 }
 0x2c8   : > { %4951 = vmatpush.bf16.msra.mxu3 %v8728_v11  ;;  %v17917_v11 = vrot.slane %v12689_v37, 7  ;;  %v9935_v35 = vpack.i.bf16 %v3321_v63, %v3341_v7 }
 0x2c9   : > { %v9727_v31 = vpop.permute.xlu1 %9726  ;;  %v13655_v48 = vpop.permute.xlu2 %9761 }
 0x2ca   : > { %9821 = vrot.lane.b32.xlu0 %v9820_v59, %s10388_s17  ;;  %v8727_v59 = vld [vmem:[%s17110_s3 + $0xc0] sm:$0xff]  ;;  %v3337_v45 = vsel %vm1914_vm7, %v3334_v32, %v17917_v11  ;;  %v9729_v27 = vunpack.i.h.bf16 %v9727_v31  ;;  %v9728_v17 = vunpack.i.l.bf16 %v9727_v31  ;;  %v17921_v32 = vld [vmem:[#allocation57_spill] sm:$0xff]  ;;  %v17922_v31 = vld [vmem:[#allocation56_spill] sm:$0xff] }
 0x2cb   : > { %9896 = vrot.lane.b32.xlu2 %v13658_v49, %s17915_s28  ;;  %v9845_v49 = vpack.i.bf16 %v3337_v45, %v3335_v50  ;;  %v17928_v45 = vrot.slane %v13025_v20, 5 }
 0x2cc   : > { %4952 = vmatpush.bf16.msra.mxu3 %v8727_v59  ;;  %v3665_v63 = vsel %vm17919_vm2, %v12670_v6, %v9729_v27  ;;  %v3664_v7 = vsel %vm17920_vm9, %v12762_v33, %v9728_v17  ;;  %v17923_v59 = vpack.i.bf16 %v17921_v32, %v17922_v31  ;;  %vm17929_vm2 = vmmov %vm17927_vm4  ;;  %v17931_v6 = vld [vmem:[#allocation99_spill] sm:$0xff] }
 0x2cf   : > { %9936 = vrot.lane.b32.xlu1 %v9935_v35, %s10391_s21  ;;  %v3219_v35 = vsel %vm17929_vm2, %v17928_v45, %v3218_v18  ;;  %vm17952_vm2 = vcmask 490496  }
 0x2d1   : > { %v9732_v39 = vpop.permute.xlu1 %9731  ;;  %v9767_v43 = vpop.permute.xlu2 %9766 }
 0x2d2   : > { %9846 = vrot.lane.b32.xlu0 %v9845_v49, %s10391_s21  ;;  %v9734_v61 = vunpack.i.h.bf16 %v9732_v39  ;;  %v9733_v58 = vunpack.i.l.bf16 %v9732_v39  ;;  %v17926_v39 = vrot.slane %v12181_v52, 5  ;;  %v9769_v27 = vunpack.i.h.bf16 %v9767_v43 }
 0x2d3   : > { %9911 = vrot.lane.b32.xlu2 %v17923_v59, %s17488_s23  ;;  %v9768_v17 = vunpack.i.l.bf16 %v9767_v43  ;;  %v13717_v59 = vpop.permute.xlu0 %9616 }
 0x2d4   : > { %v13702_v50 = vsel %vm17924_vm3, %v3664_v7, %v9733_v58  ;;  %v3677_v49 = vsel %vm17925_vm0, %v3665_v63, %v9734_v61  ;;  %v3199_v11 = vsel %vm17927_vm4, %v17926_v39, %v3198_v56  ;;  %v17932_v58 = vld [vmem:[#allocation82_spill] sm:$0xff]  ;;  %17933 = vst [vmem:[#allocation57_spill] sm:$0xff] %v13717_v59  ;;  %vm17934_vm0 = vmmov %vm17920_vm9  ;;  %vm17938_vm4 = vcmask 326656  }
 0x2d5   : > { %v9925_v61 = vpack.i.bf16 %v3199_v11, %v3219_v35  ;;  %v3667_v39 = vsel %vm17934_vm0, %v12689_v37, %v9769_v27  ;;  %vm17935_vm3 = vmmov %vm17934_vm0  ;;  %v17940_v11 = vld [vmem:[#allocation88_spill] sm:$0xff] }
 0x2d6   : > { %v3666_v43 = vsel %vm17935_vm3, %v12686_v40, %v9768_v17  ;;  %vm17939_vm9 = vmmov %vm17938_vm4  ;;  %v9970_v35 = vpack.i.bf16 %v17843_v14, %v17940_v11  ;;  %v9149_v17 = vunpack.i.h.bf16 %v17942_v0  ;;  %v17945_v40 = vld [vmem:[#allocation97_spill] sm:$0xff]  ;;  %v9648_v11 = vunpack.i.l.bf16 %v13471_v4 }
 0x2d7   : > { %9956 = vrot.lane.b32.xlu1 %v17931_v6, %s17930_s30  ;;  %v17937_v6 = vld [vmem:[#allocation37_spill] sm:$0xff]  ;;  %vm17954_vm0 = vmmov %vm17952_vm2  ;;  %vm17957_vm3 = vcmask 1042432  }
 0x2d8   : > { %v9114_v45 = vunpack.i.h.bf16 %v17937_v6 }
 0x2d9   : > { %v13713_v32 = vpop.permute.xlu1 %9746  ;;  %v9772_v31 = vpop.permute.xlu2 %9771 }
 0x2da   : > { %9861 = vrot.lane.b32.xlu0 %v17932_v58, %s17930_s30  ;;  %v9774_v63 = vunpack.i.h.bf16 %v9772_v31  ;;  %v9773_v7 = vunpack.i.l.bf16 %v9772_v31  ;;  %v9113_v31 = vunpack.i.l.bf16 %v17937_v6  ;;  %v17941_v58 = vld [vmem:[#allocation40_spill] sm:$0xff]  ;;  %v9649_v6 = vunpack.i.h.bf16 %v13471_v4 }
 0x2db   : > { %9926 = vrot.lane.b32.xlu2 %v9925_v61, %s17936_s22  ;;  %v9119_v59 = vunpack.i.h.bf16 %v17941_v58  ;;  %v9118_v27 = vunpack.i.l.bf16 %v17941_v58  ;;  %v17944_v61 = vld [vmem:[#allocation5_spill] sm:$0xff] }
 0x2dc   : > { %v3678_v52 = vsel %vm17938_vm4, %v3666_v43, %v9773_v7  ;;  %v13727_v28 = vsel %vm17939_vm9, %v3667_v39, %v9774_v63  ;;  %v13738_v53 = vpack.i.bf16 %v17945_v40, %v17944_v61  ;;  %v17947_v7 = vld [vmem:[#allocation35_spill] sm:$0xff]  ;;  %v9148_v43 = vunpack.i.l.bf16 %v17942_v0  ;;  %vm17959_vm4 = vmmov %vm17957_vm3 }
 0x2dd   : > { %v17948_v63 = vunpack.i.h.bf16 %v17947_v7  ;;  %v17949_v61 = vunpack.i.l.bf16 %v17947_v7  ;;  %vm17393_vm9 = vcmask 949248  }
 0x2de   : > { %17946 = vst [vmem:[#allocation56_spill] sm:$0xff] %v13738_v53 }
 0x2df   : > { %9971 = vrot.lane.b32.xlu1 %v9970_v35, %s17943_s26  ;;  %v2412_v39 = vsel %vm2410_vm8, %v17948_v63, %v9114_v45  ;;  %v2411_v45 = vsel %vm2410_vm8, %v17949_v61, %v9113_v31 }
 0x2e0   : > { %v2425_v0 = vsel %vm2423_vm6, %v2412_v39, %v9119_v59  ;;  %v2424_v4 = vsel %vm2423_vm6, %v2411_v45, %v9118_v27  ;;  %v2860_v27 = vsel %vm17418_vm10, %v9648_v11, %v9649_v6  ;;  %v17961_v45 = vld [vmem:[#allocation43_spill] sm:$0xff] }
 0x2e1   : > { %v9777_v14 = vpop.permute.xlu1 %9776  ;;  %v13746_v58 = vpop.permute.xlu2 %9791  ;;  %v2438_v41 = vsel %vm2436_vm5, %v2425_v0, %v9149_v17  ;;  %v17956_v17 = vrot.slane %v12199_v9, 5  ;;  %v9194_v0 = vunpack.i.h.bf16 %v17961_v45 }
 0x2e2   : > { %9876 = vrot.lane.b32.xlu0 %v13738_v53, %s17943_s26  ;;  %v9779_v63 = vunpack.i.h.bf16 %v9777_v14  ;;  %v9778_v33 = vunpack.i.l.bf16 %v9777_v14  ;;  %v17951_v53 = vpack.i.bf16 %v12843_v16, %v17950_v57  ;;  %v2437_v14 = vsel %vm2436_vm5, %v2424_v4, %v9148_v43 }
 0x2e3   : > { %v3201_v39 = vsel %vm17957_vm3, %v3198_v56, %v17956_v17  ;;  %v17958_v16 = vrot.slane %v13115_v55, 5  ;;  %v9193_v56 = vunpack.i.l.bf16 %v17961_v45  ;;  %v17970_v45 = vrot.slane %v12199_v9, 7 }
 0x2e4   : > { %9941 = vrot.lane.b32.xlu2 %v17951_v53, %s17499_s29  ;;  %v9632_v35 = vpop.permute.xlu0 %9631  ;;  %v13763_v40 = vsel %vm17952_vm2, %v3677_v49, %v9778_v33  ;;  %v13766_v7 = vsel %vm17954_vm0, %v3678_v52, %v9779_v63  ;;  %v2896_v33 = vsel %vm17418_vm10, %v2438_v41, %v9648_v11  ;;  %v17960_v49 = vld [vmem:[#allocation41_spill] sm:$0xff]  ;;  %v17962_v63 = vld [vmem:[#allocation50_spill] sm:$0xff]  ;;  %vm17979_vm2 = vcmask 162816  }
 0x2e5   : > { %17953 = vst [vmem:[#allocation99_spill] sm:$0xff] %v13763_v40  ;;  %v9634_v31 = vunpack.i.h.bf16 %v9632_v35  ;;  %v9633_v59 = vunpack.i.l.bf16 %v9632_v35  ;;  %v3974_v53 = vsel %vm17959_vm4, %v3218_v18, %v17958_v16  ;;  %v9189_v35 = vunpack.i.h.bf16 %v17960_v49 }
 0x2e6   : > { %17955 = vst [vmem:[#allocation82_spill] sm:$0xff] %v13766_v7  ;;  %v9188_v43 = vunpack.i.l.bf16 %v17960_v49  ;;  %v9900_v18 = vpack.i.bf16 %v12199_v9, %v12188_v1  ;;  %v9229_v41 = vunpack.i.h.bf16 %v17962_v63  ;;  %v9228_v11 = vunpack.i.l.bf16 %v17962_v63 }
 0x2e7   : > { %v2859_v57 = vsel %vm17418_vm10, %v9633_v59, %v9634_v31  ;;  %v2895_v52 = vsel %vm17418_vm10, %v2437_v14, %v9633_v59  ;;  %v9960_v31 = vpack.i.bf16 %v3974_v53, %v3201_v39  ;;  %v13791_v59 = vrot.slane %v13115_v55, 3 }
 0x2e8   : > { %v4464_v6 = vpack.c.bf16 %v2860_v27, %v2859_v57  ;;  %v4463_v61 = vpack.c.bf16 %v2896_v33, %v2895_v52  ;;  %v9663_v14 = vunpack.i.l.bf16 %v13333_v22  ;;  %v17965_v27 = vld [vmem:[#allocation38_spill] sm:$0xff]  ;;  %v17968_v53 = vrot.slane %v13030_v2, 3 }
 0x2e9   : > { %v13787_v4 = vpop.permute.xlu1 %9781  ;;  %17963 = vst [vmem:[#allocation37_spill] sm:$0xff] %v13791_v59  ;;  %v17966_v17 = vunpack.i.l.bf16 %v17965_v27  ;;  %v17967_v33 = vunpack.i.h.bf16 %v17965_v27  ;;  %v13801_v52 = vpop.permute.xlu2 %9796  ;;  %vm17981_vm0 = vcmask 326656   ;;  %vm17982_vm3 = vcmask 490496  }
 0x2ea   : > { %4885 = vmatmul.bf16.vlgmr.msrb.gmra.mxu2 %v4463_v61  ;;  %7753 = vmatmul.msk.bf16.vlgmr.msra.gmra.mxu3 %vm17393_vm9, %v4464_v6  ;;  %v13808_v49 = vsel %vm560_vm1, %v17968_v53, %v13791_v59  ;;  %vm17989_vm4 = vmmov %vm17982_vm3 }
 0x2eb   : > { %9901 = vrot.lane.b32.xlu0 %v9900_v18, %s17964_s13  ;;  %v2413_v16 = vsel %vm2410_vm8, %v17966_v17, %v9188_v43  ;;  %v2414_v57 = vsel %vm2410_vm8, %v17967_v33, %v9189_v35  ;;  %17969 = vst [vmem:[#allocation88_spill] sm:$0xff] %v13808_v49  ;;  %v17971_v35 = vrot.slane %v12188_v1, 7  ;;  %v9915_v27 = vpack.i.bf16 %v13808_v49, %v13540_v36 }
 0x2ec   : > { %9961 = vrot.lane.b32.xlu2 %v9960_v31, %s17936_s22  ;;  %v9682_v39 = vpop.permute.xlu0 %9681  ;;  %v2426_v6 = vsel %vm2423_vm6, %v2413_v16, %v9193_v56  ;;  %v2427_v61 = vsel %vm2423_vm6, %v2414_v57, %v9194_v0  ;;  %v17972_v17 = vrot.slane %v13115_v55, 7  ;;  %v17973_v56 = vrot.slane %v13030_v2, 7 }
 0x2ed   : > { %v9683_v43 = vunpack.i.l.bf16 %v9682_v39  ;;  %v3323_v18 = vsel %vm1914_vm7, %v17971_v35, %v17970_v45  ;;  %v2439_v63 = vsel %vm2436_vm5, %v2426_v6, %v9228_v11  ;;  %v2440_v31 = vsel %vm2436_vm5, %v2427_v61, %v9229_v41 }
 0x2ee   : > { %v4026_v0 = vsel %vm1914_vm7, %v17973_v56, %v17972_v17  ;;  %v2897_v16 = vsel %vm17418_vm10, %v2439_v63, %v9663_v14  ;;  %v9684_v53 = vunpack.i.h.bf16 %v9682_v39  ;;  %v9664_v41 = vunpack.i.h.bf16 %v13333_v22  ;;  %v17976_v39 = vld [vmem:[#allocation55_spill] sm:$0xff] }
 0x2ef   : > { %v2898_v33 = vsel %vm17418_vm10, %v2440_v31, %v9683_v43  ;;  %v9975_v11 = vpack.i.bf16 %v4026_v0, %v3323_v18  ;;  %v17975_v22 = vpack.i.bf16 %v13086_v38, %v13093_v47  ;;  %v17977_v18 = vld [vmem:[#allocation54_spill] sm:$0xff]  ;;  %v1076_v47 = vpop.f32.mrf.mxu2 }
 0x2f0   : > { %v4467_v57 = vpack.c.bf16 %v2898_v33, %v2897_v16  ;;  %v2862_v6 = vsel %vm17418_vm10, %v9683_v43, %v9684_v53  ;;  %v2861_v35 = vsel %vm17418_vm10, %v9663_v14, %v9664_v41  ;;  %v17978_v43 = vpack.i.bf16 %v17976_v39, %v17977_v18 }
 0x2f1   : > { %v13828_v45 = vpop.permute.xlu1 %9786  ;;  %v13834_v61 = vpop.permute.xlu2 %9816  ;;  %v4468_v63 = vpack.c.bf16 %v2862_v6, %v2861_v35  ;;  %v9674_v14 = vunpack.i.h.bf16 %v13391_v19  ;;  %v9679_v33 = vunpack.i.h.bf16 %v13433_v24  ;;  %v9699_v53 = vunpack.i.h.bf16 %v13527_v26 }
 0x2f2   : > { %17974 = vst [vmem:[#allocation40_spill] sm:$0xff] %v13828_v45  ;;  %v1284_v19 = vpop.f32.mrf.mxu3  ;;  %v10005_v35 = vpack.i.bf16 %v17865_v5, %v12202_v29  ;;  %v17985_v39 = vunpack.i.l.bf16 %v13529_v42 }
 0x2f3   : > { %9916 = vrot.lane.b32.xlu0 %v9915_v27, %s10386_s15 }
 0x2f4   : > { %9976 = vrot.lane.b32.xlu2 %v9975_v11, %s10391_s21  ;;  %v9687_v36 = vpop.permute.xlu0 %9686  ;;  %v9724_v11 = vunpack.i.h.bf16 %v13529_v42 }
 0x2f5   : > { %v9688_v31 = vunpack.i.l.bf16 %v9687_v36  ;;  %v9689_v42 = vunpack.i.h.bf16 %v9687_v36  ;;  %v17992_v36 = vld [vmem:[#allocation65_spill] sm:$0xff] }
 0x2f6   : > { %v2864_v18 = vsel %vm17418_vm10, %v17985_v39, %v9724_v11  ;;  %v9764_v39 = vunpack.i.h.bf16 %v13655_v48 }
 0x2f7   : > { %v3662_v0 = vsel %vm17979_vm2, %v17865_v5, %v9688_v31  ;;  %v17984_v31 = vunpack.i.l.bf16 %v13527_v26  ;;  %v9658_v26 = vunpack.i.l.bf16 %v13284_v8  ;;  %v13916_v8 = vunpack.i.l.bf16 %v13746_v58 }
 0x2f9   : > { %v13837_v17 = vpop.permute.xlu1 %9811 }
 0x2fa   : > { %4890 = vmatmul.bf16.gmra.mxu2 %v4467_v57  ;;  %7754 = vmatmul.msk.bf16.gmra.mxu3 %vm17393_vm9, %v4468_v63  ;;  %v1359_v63 = vmax.f32 %v1076_v47, %v1284_v19 }
 0x2fb   : > { %9931 = vrot.lane.b32.xlu0 %v17975_v22, %s10390_s9  ;;  %v2863_v22 = vsel %vm17418_vm10, %v17984_v31, %v9699_v53  ;;  %v9714_v53 = vunpack.i.h.bf16 %v13598_v30  ;;  %v17366_v31 = vrot.slane %v12202_v29, 5 }
 0x2fc   : > { %9991 = vrot.lane.b32.xlu2 %v17978_v43, %s10388_s17  ;;  %v9692_v27 = vpop.permute.xlu0 %9691  ;;  %v4472_v47 = vpack.c.bf16 %v2864_v18, %v2863_v22 }
 0x2fd   : > { %v9693_v56 = vunpack.i.l.bf16 %v9692_v27  ;;  %v13851_v16 = vpop.permute.xlu2 %9836  ;;  %v9694_v11 = vunpack.i.h.bf16 %v9692_v27  ;;  %v9368_v27 = vunpack.i.l.bf16 %v17992_v36 }
 0x2fe   : > { %17980 = vst [vmem:[#allocation42_spill] sm:$0xff] %v13851_v16 }
 0x2ff   : > { %v3674_v57 = vsel %vm17981_vm0, %v3662_v0, %v9693_v56  ;;  %v17988_v0 = vld [vmem:[#allocation3_spill] sm:$0xff] }
 0x300   : > { %v3686_v38 = vsel %vm17982_vm3, %v3674_v57, %v9674_v14  ;;  %v17987_v14 = vld [vmem:[#allocation60_spill] sm:$0xff]  ;;  %v9653_v57 = vunpack.i.l.bf16 %v13227_v12  ;;  %vm17995_vm3 = vmmov %vm17979_vm2 }
 0x301   : > { %v13859_v41 = vsel %vm2293_vm11, %v3686_v38, %v9679_v33  ;;  %v13861_v6 = vpop.permute.xlu1 %9826  ;;  %v1323_v33 = vmax.f32 %v17988_v0, %v17987_v14  ;;  %v4072_v14 = vsel %vm2293_vm11, %v3686_v38, %v9714_v53  ;;  %v17365_v38 = vunpack.i.h.bf16 %v13473_v13 }
 0x302   : > { %17983 = vst [vmem:[#allocation5_spill] sm:$0xff] %v13861_v6  ;;  %v3660_v22 = vsel %vm17979_vm2, %v12199_v9, %v9653_v57  ;;  %vm17999_vm2 = vcmask 490496  }
 0x303   : > { %v1395_v19 = vmax.f32 %v1323_v33, %v1359_v63  ;;  %v9369_v63 = vunpack.i.h.bf16 %v17992_v36  ;;  %v17996_v33 = vld [vmem:[#allocation72_spill] sm:$0xff] }
 0x304   : > { %10006 = vrot.lane.b32.xlu2 %v10005_v35, %s17964_s13  ;;  %v9702_v24 = vpop.permute.xlu0 %9701 }
 0x305   : > { %v9704_v43 = vunpack.i.h.bf16 %v9702_v24  ;;  %v13872_v56 = vpop.permute.xlu2 %9841  ;;  %v9703_v0 = vunpack.i.l.bf16 %v9702_v24  ;;  %v17993_v24 = vld [vmem:[#allocation71_spill] sm:$0xff] }
 0x306   : > { %17986 = vst [vmem:[#allocation97_spill] sm:$0xff] %v13872_v56  ;;  %v9373_v18 = vunpack.i.l.bf16 %v17993_v24 }
 0x307   : > { %v13879_v35 = vsel %vm17989_vm4, %v13702_v50, %v9704_v43  ;;  %v17991_v50 = vpack.c.bf16 %v13568_v60, %v13563_v62  ;;  %v13900_v43 = vsel %vm17981_vm0, %v3660_v22, %v9658_v26  ;;  %v9718_v62 = vunpack.i.l.bf16 %v13473_v13  ;;  %vm17998_vm4 = vmmov %vm17981_vm0 }
 0x308   : > { %17990 = vst [vmem:[#allocation35_spill] sm:$0xff] %v13879_v35  ;;  %v3663_v60 = vsel %vm17995_vm3, %v12566_v34, %v9689_v42  ;;  %v4063_v22 = vsel %vm17999_vm2, %v13900_v43, %v9764_v39  ;;  %v17369_v42 = vunpack.i.l.bf16 %v13828_v45  ;;  %vm18000_vm0 = vmmov %vm17999_vm2  ;;  %vm18002_vm3 = vcmask 1042432  }
 0x309   : > { %v13886_v12 = vpop.permute.xlu1 %9831  ;;  %17994 = vst [vmem:[#allocation77_spill] sm:$0xff] %v13900_v43  ;;  %v3675_v57 = vsel %vm17998_vm4, %v3663_v60, %v9694_v11  ;;  %v18001_v60 = vrot.slane %v12199_v9, 5  ;;  %vm18005_vm4 = vmmov %vm18002_vm3 }
 0x30a   : > { %4895 = vmatmul.bf16.gmra.mxu2 %v17991_v50  ;;  %7755 = vmatmul.msk.bf16.gmra.mxu3 %vm17393_vm9, %v4472_v47  ;;  %v17997_v47 = vpack.i.bf16 %v12833_v25, %v17996_v33  ;;  %v4085_v50 = vsel %vm2306_vm12, %v4072_v14, %v17365_v38  ;;  %v13920_v25 = vsel %vm18000_vm0, %v3675_v57, %v9703_v0  ;;  %v9763_v57 = vunpack.i.l.bf16 %v13655_v48  ;;  %vm18009_vm2 = vmmov %vm18000_vm0 }
 0x30b   : > { %v3203_v39 = vsel %vm18002_vm3, %v18001_v60, %v17366_v31  ;;  %v18006_v60 = vld [vmem:[#allocation59_spill] sm:$0xff]  ;;  %vm18016_vm0 = vmmov %vm18002_vm3 }
 0x30c   : > { %10021 = vrot.lane.b32.xlu2 %v17997_v47, %s17488_s23  ;;  %v9707_v53 = vpop.permute.xlu0 %9706  ;;  %v18003_v47 = vrot.slane %v13105_v23, 5  ;;  %v18007_v38 = vunpack.i.l.bf16 %v18006_v60  ;;  %vm18018_vm3 = vmmov %vm18016_vm0 }
 0x30d   : > { %v9709_v36 = vunpack.i.h.bf16 %v9707_v53  ;;  %v9708_v26 = vunpack.i.l.bf16 %v9707_v53  ;;  %v13922_v33 = vpop.permute.xlu2 %9856  ;;  %v18004_v53 = vrot.slane %v13115_v55, 5 }
 0x30e   : > { %v2417_v31 = vsel %vm2410_vm8, %v18007_v38, %v9368_v27  ;;  %v13965_v38 = vld [vmem:[%s10493_s27] ss:$0 sm:$0xff]  ;;  %s10401_s27 = smov 94  }
 0x30f   : > { %v3699_v11 = vsel %vm2293_vm11, %v13920_v25, %v9708_v26  ;;  %v4070_v14 = vsel %vm2293_vm11, %v4063_v22, %v9709_v36  ;;  %v3976_v0 = vsel %vm18005_vm4, %v18004_v53, %v18003_v47  ;;  %v13946_v22 = vsel %vm2319_vm13, %v4085_v50, %v13916_v8  ;;  %v18008_v53 = vld [vmem:[#allocation18_spill] sm:$0xff]  ;;  %vm18027_vm4 = vmmov %vm18016_vm0 }
 0x310   : > { %v13941_v26 = vsel %vm2306_vm12, %v3699_v11, %v17369_v42  ;;  %v4083_v36 = vsel %vm2306_vm12, %v4070_v14, %v9718_v62  ;;  %v9374_v47 = vunpack.i.h.bf16 %v17993_v24  ;;  %v9394_v6 = vunpack.i.h.bf16 %v18008_v53 }
 0x311   : > { %v9393_v48 = vunpack.i.l.bf16 %v18008_v53  ;;  %v13954_v16 = vpop.permute.xlu1 %9851  ;;  %v10035_v11 = vpack.i.bf16 %v3203_v39, %v3976_v0  ;;  %v13958_v62 = vsel %vm18009_vm2, %v13727_v28, %v9763_v57  ;;  %v9784_v50 = vunpack.i.h.bf16 %v13787_v4  ;;  %vm18029_vm2 = vmmov %vm18016_vm0 }
 0x312   : > { %18010 = vst [vmem:[#allocation41_spill] sm:$0xff] %v13958_v62  ;;  %v9783_v14 = vunpack.i.l.bf16 %v13787_v4  ;;  %v9859_v42 = vunpack.i.h.bf16 %v13922_v33  ;;  %v17372_v27 = vunpack.i.h.bf16 %v13954_v16  ;;  %v13968_v24 = vadd.f32 %v13965_v38, %v1395_v19 }
 0x313   : > { %v18012_v53 = vunpack.i.h.bf16 %v18006_v60  ;;  %v2430_v28 = vsel %vm2423_vm6, %v2417_v31, %v9373_v18  ;;  %v9713_v19 = vunpack.i.l.bf16 %v13598_v30 }
 0x314   : > { %18011 = vst [vmem:[#allocation43_spill] sm:$0xff] %v13968_v24  ;;  %10036 = vrot.lane.b32.xlu2 %v10035_v11, %s17936_s22  ;;  %v9737_v0 = vpop.permute.xlu0 %9736  ;;  %v13979_v57 = vsel %vm2410_vm8, %v17372_v27, %v9859_v42  ;;  %v2866_v18 = vsel %vm17418_vm10, %v9783_v14, %v9784_v50  ;;  %v17373_v30 = vrot.slane %v13968_v24, 7  ;;  %v18015_v50 = vrot.slane %v12202_v29, 5  ;;  %v18025_v27 = vld [vmem:[#allocation20_spill] sm:$0xff] }
 0x315   : > { %v2418_v39 = vsel %vm2410_vm8, %v18012_v53, %v9369_v63  ;;  %v9739_v62 = vunpack.i.h.bf16 %v9737_v0  ;;  %v9738_v43 = vunpack.i.l.bf16 %v9737_v0  ;;  %v13982_v5 = vpop.permute.xlu2 %9871  ;;  %v2443_v63 = vsel %vm2436_vm5, %v2430_v28, %v9393_v48  ;;  %v18013_v48 = vld [vmem:[#allocation103_spill] sm:$0xff] }
 0x316   : > { %v2431_v4 = vsel %vm2423_vm6, %v2418_v39, %v9374_v47  ;;  %v17374_v39 = vrot.slane %v13968_v24, 5  ;;  %v18017_v28 = vrot.slane %v13105_v23, 5 }
 0x317   : > { %v2444_v31 = vsel %vm2436_vm5, %v2431_v4, %v9394_v6  ;;  %v2865_v60 = vsel %vm17418_vm10, %v9738_v43, %v9739_v62  ;;  %v2901_v47 = vsel %vm17418_vm10, %v2443_v63, %v9738_v43  ;;  %v4071_v6 = vsel %vm2293_vm11, %v13447_v10, %v9713_v19  ;;  %v18019_v63 = vld [vmem:[#allocation22_spill] sm:$0xff] }
 0x318   : > { %v2902_v11 = vsel %vm17418_vm10, %v2444_v31, %v9783_v14  ;;  %v4476_v42 = vpack.c.bf16 %v2866_v18, %v2865_v60  ;;  %v18014_v43 = vpack.i.bf16 %v18013_v48, %v12951_v21  ;;  %v3205_v14 = vsel %vm18016_vm0, %v18015_v50, %v13404_v15 }
 0x319   : > { %v4475_v53 = vpack.c.bf16 %v2902_v11, %v2901_v47  ;;  %v13992_v0 = vpop.permute.xlu1 %9866  ;;  %v3978_v4 = vsel %vm18018_vm3, %v18017_v28, %v17374_v39  ;;  %v18020_v10 = vrot.slane %v12202_v29, 7  ;;  %v18021_v21 = vrot.slane %v13105_v23, 7  ;;  %v18026_v39 = vld [vmem:[#allocation46_spill] sm:$0xff] }
 0x31a   : > { %7756 = vmatmul.msk.bf16.gmra.mxu3 %vm17393_vm9, %v4476_v42  ;;  %v9754_v15 = vunpack.i.h.bf16 %v13596_v46  ;;  %v9748_v18 = vunpack.i.l.bf16 %v13713_v32  ;;  %v9753_v11 = vunpack.i.l.bf16 %v13596_v46  ;;  %v9749_v42 = vunpack.i.h.bf16 %v13713_v32 }
 0x31b   : > { %4900 = vmatmul.bf16.gmra.mxu2 %v4475_v53  ;;  %v14014_v19 = vsel %vm1914_vm7, %v18020_v10, %v18019_v63  ;;  %v14021_v31 = vsel %vm1914_vm7, %v18021_v21, %v17373_v30  ;;  %v14028_v53 = vunpack.i.h.bf16 %v13992_v0  ;;  %v18023_v48 = vunpack.i.h.bf16 %v13366_v3 }
 0x31c   : > { %10051 = vrot.lane.b32.xlu2 %v18014_v43, %s17499_s29  ;;  %v9742_v62 = vpop.permute.xlu0 %9741  ;;  %v10065_v30 = vpack.i.bf16 %v3978_v4, %v3205_v14  ;;  %vm18035_vm0 = vcmask 162816  }
 0x31d   : > { %v9744_v60 = vunpack.i.h.bf16 %v9742_v62  ;;  %v9743_v47 = vunpack.i.l.bf16 %v9742_v62  ;;  %18022 = vst [vmem:[#allocation50_spill] sm:$0xff] %v14028_v53  ;;  %v4084_v43 = vsel %vm2306_vm12, %v4071_v6, %v18023_v48  ;;  %v9887_v50 = vpop.permute.xlu2 %9886  ;;  %v9433_v6 = vunpack.i.l.bf16 %v18025_v27  ;;  %vm18036_vm3 = vmmov %vm18035_vm0 }
 0x31e   : > { %v9889_v14 = vunpack.i.h.bf16 %v9887_v50  ;;  %v9888_v4 = vunpack.i.l.bf16 %v9887_v50 }
 0x31f   : > { %v14035_v28 = vsel %vm2319_vm13, %v13679_v44, %v9743_v47  ;;  %v3733_v63 = vsel %vm2332_vm14, %v9743_v47, %v9748_v18  ;;  %v4096_v62 = vsel %vm2319_vm13, %v4083_v36, %v9744_v60  ;;  %v4097_v46 = vsel %vm2319_vm13, %v4084_v43, %v9743_v47 }
 0x320   : > { %v14041_v32 = vsel %vm2345_vm15, %v3733_v63, %v9753_v11  ;;  %v4109_v10 = vsel %vm2332_vm14, %v9744_v60, %v9749_v42  ;;  %v4147_v21 = vrot.slane %v4096_v62, 5  ;;  %v4148_v3 = vrot.slane %v4097_v46, 5 }
 0x321   : > { %18024 = vst [vmem:[#allocation38_spill] sm:$0xff] %v14041_v32  ;;  %v4115_v48 = vsel %vm2345_vm15, %v4109_v10, %v9754_v15  ;;  %v17377_v44 = vrot.slane %v14041_v32, 5  ;;  %v9434_v18 = vunpack.i.h.bf16 %v18025_v27  ;;  %v9438_v36 = vunpack.i.l.bf16 %v18026_v39  ;;  %v14050_v11 = vpop.permute.xlu1 %9881  ;;  %v18030_v10 = vld [vmem:[#allocation31_spill] sm:$0xff] }
 0x322   : > { %v9874_v47 = vunpack.i.h.bf16 %v13982_v5  ;;  %v4150_v43 = vrot.slane %v4115_v48, 5  ;;  %v9884_v60 = vunpack.i.h.bf16 %v14050_v11  ;;  %v4149_v42 = vsel %vm18027_vm4, %v4147_v21, %v4148_v3 }
 0x323   : > { %v10080_v63 = vpack.i.bf16 %v14021_v31, %v14014_v19  ;;  %v14057_v15 = vrot.slane %v13115_v55, 2  ;;  %v18031_v21 = vunpack.i.l.bf16 %v18030_v10  ;;  %vm18039_vm4 = vcmask 1045504  }
 0x324   : > { %v3738_v27 = vsel %vm2332_vm14, %v14028_v53, %v9874_v47  ;;  %10066 = vrot.lane.b32.xlu2 %v10065_v30, %s17936_s22  ;;  %v14062_v62 = vpop.permute.xlu0 %9756  ;;  %v4152_v46 = vsel %vm18029_vm2, %v4150_v43, %v17377_v44  ;;  %v14075_v47 = vrot.slane %v13115_v55, 4  ;;  %v18034_v30 = vunpack.i.h.bf16 %v18030_v10 }
 0x325   : > { %18028 = vst [vmem:[#allocation55_spill] sm:$0xff] %v14057_v15  ;;  %v2419_v19 = vsel %vm2410_vm8, %v18031_v21, %v9433_v6  ;;  %v14071_v31 = vsel %vm2345_vm15, %v3738_v27, %v9884_v60  ;;  %v9758_v48 = vunpack.i.l.bf16 %v14062_v62  ;;  %v9439_v53 = vunpack.i.h.bf16 %v18026_v39  ;;  %v9897_v44 = vpop.permute.xlu2 %9896 }
 0x326   : > { %18032 = vst [vmem:[#allocation54_spill] sm:$0xff] %v14071_v31  ;;  %v2420_v50 = vsel %vm2410_vm8, %v18034_v30, %v9434_v18  ;;  %v2432_v43 = vsel %vm2423_vm6, %v2419_v19, %v9438_v36  ;;  %v9945_v7 = vpack.i.bf16 %v4152_v46, %v4149_v42  ;;  %v14083_v6 = vunpack.i.h.bf16 %v13746_v58  ;;  %v18045_v46 = vld [vmem:[#allocation17_spill] sm:$0xff] }
 0x327   : > { %18033 = vst [vmem:[#allocation60_spill] sm:$0xff] %v14075_v47  ;;  %v4073_v60 = vsel %vm2293_vm11, %v13920_v25, %v9758_v48  ;;  %v9899_v27 = vunpack.i.h.bf16 %v9897_v44  ;;  %v9898_v21 = vunpack.i.l.bf16 %v9897_v44  ;;  %v4052_v31 = vsel %vm18035_vm0, %v13025_v20, %v9889_v14 }
 0x328   : > { %v4051_v18 = vsel %vm18036_vm3, %v12689_v37, %v9888_v4  ;;  %v18037_v39 = vunpack.i.l.bf16 %v13828_v45  ;;  %9946 = vrot.lane.b32.xlu0 %v9945_v7, %s10398_s24  ;;  %v18038_v58 = vrot.slane %v13030_v2, 2  ;;  %vm18040_vm2 = vcmask 326656  }
 0x329   : > { %v14106_v44 = vsel %vm18040_vm2, %v4051_v18, %v9898_v21  ;;  %vm18042_vm0 = vmmov %vm18040_vm2  ;;  %v18043_v4 = vrot.slane %v13030_v2, 4  ;;  %vm18044_vm3 = vcmask 1043456   ;;  %v9489_v10 = vunpack.i.h.bf16 %v18045_v46  ;;  %v14118_v30 = vpop.permute.xlu1 %9891  ;;  %v1078_v21 = vpop.f32.mrf.mxu2 }
 0x32a   : > { %v4086_v36 = vsel %vm2306_vm12, %v4073_v60, %v18037_v39  ;;  %v14099_v42 = vsel %vm18039_vm4, %v18038_v58, %v14057_v15  ;;  %18041 = vst [vmem:[#allocation3_spill] sm:$0xff] %v14106_v44  ;;  %v4058_v14 = vsel %vm18042_vm0, %v4052_v31, %v9899_v27  ;;  %v9488_v19 = vunpack.i.l.bf16 %v18045_v46  ;;  %v1286_v18 = vpop.f32.mrf.mxu3 }
 0x32b   : > { %v14103_v25 = vsel %vm2319_vm13, %v4086_v36, %v14083_v6  ;;  %v14113_v7 = vsel %vm18044_vm3, %v18043_v4, %v14075_v47  ;;  %18046 = vst [vmem:[#allocation65_spill] sm:$0xff] %v14118_v30  ;;  %v4153_v60 = vrot.slane %v13946_v22, 5  ;;  %v2433_v31 = vsel %vm2423_vm6, %v2420_v50, %v9439_v53  ;;  %v18049_v36 = vld [vmem:[#allocation49_spill] sm:$0xff] }
 0x32c   : > { %v17386_v48 = vrot.slane %v14103_v25, 5  ;;  %v9799_v27 = vunpack.i.h.bf16 %v13801_v52  ;;  %v9798_v39 = vunpack.i.l.bf16 %v13801_v52  ;;  %10081 = vrot.lane.b32.xlu2 %v10080_v63, %s10391_s21  ;;  %v9802_v58 = vpop.permute.xlu0 %9801  ;;  %vm18047_vm4 = vcmask 1042432  }
 0x32d   : > { %v4154_v4 = vsel %vm18047_vm4, %v4148_v3, %v4153_v60  ;;  %vm18048_vm2 = vmmov %vm18047_vm4  ;;  %v17389_v46 = vrot.slane %v12199_v9, 6  ;;  %v9804_v50 = vunpack.i.h.bf16 %v9802_v58  ;;  %v9803_v20 = vunpack.i.l.bf16 %v9802_v58  ;;  %v14136_v56 = vpop.permute.xlu2 %9911 }
 0x32e   : > { %v4158_v22 = vsel %vm18048_vm2, %v4153_v60, %v17386_v48  ;;  %v17387_v37 = vrot.slane %v13115_v55, 6  ;;  %v9319_v44 = vunpack.i.h.bf16 %v18049_v36  ;;  %v1360_v63 = vmax.f32 %v1078_v21, %v1286_v18  ;;  %v18050_v36 = vld [vmem:[#allocation80_spill] sm:$0xff] }
 0x32f   : > { %v9985_v52 = vpack.i.bf16 %v4158_v22, %v4154_v4  ;;  %v2445_v3 = vsel %vm2436_vm5, %v2432_v43, %v9488_v19  ;;  %v2446_v30 = vsel %vm2436_vm5, %v2433_v31, %v9489_v10  ;;  %v2867_v60 = vsel %vm17418_vm10, %v9798_v39, %v9799_v27  ;;  %v18051_v43 = vld [vmem:[#allocation68_spill] sm:$0xff] }
 0x330   : > { %v2868_v48 = vsel %vm17418_vm10, %v9803_v20, %v9804_v50  ;;  %v2903_v58 = vsel %vm17418_vm10, %v2445_v3, %v9798_v39  ;;  %v2904_v4 = vsel %vm17418_vm10, %v2446_v30, %v9803_v20  ;;  %9951 = vrot.lane.b32.xlu0 %v18050_v36, %s10395_s25  ;;  %v17388_v18 = vrot.slane %v13105_v23, 2  ;;  %v18052_v19 = vld [vmem:[#allocation4_spill] sm:$0xff]  ;;  %v18061_v36 = vld [vmem:[#allocation51_spill] sm:$0xff] }
 0x331   : > { %9986 = vrot.lane.b32.xlu1 %v9985_v52, %s10398_s24  ;;  %v4480_v22 = vpack.c.bf16 %v2868_v48, %v2867_v60  ;;  %v4479_v21 = vpack.c.bf16 %v2904_v4, %v2903_v58  ;;  %v1324_v10 = vmax.f32 %v18052_v19, %v18051_v43  ;;  %v18053_v31 = vrot.slane %v12188_v1, 6  ;;  %v14161_v39 = vpop.permute.xlu1 %9906  ;;  %v18059_v52 = vld [vmem:[#allocation8_spill] sm:$0xff]  ;;  %v18062_v19 = vld [vmem:[#allocation19_spill] sm:$0xff] }
 0x332   : > { %vm18054_vm0 = vcmask 1041408   ;;  %v18055_v20 = vrot.slane %v13030_v2, 6  ;;  %v9603_v30 = vunpack.i.l.bf16 %v13549_v54  ;;  %18057 = vst [vmem:[#allocation71_spill] sm:$0xff] %v14161_v39  ;;  %vm18058_vm4 = vcmask 1045504  }
 0x333   : > { %v3262_v27 = vsel %vm18054_vm0, %v18053_v31, %v17389_v46  ;;  %vm18056_vm3 = vmmov %vm18054_vm0  ;;  %4905 = vmatmul.bf16.gmra.mxu2 %v4479_v21  ;;  %7757 = vmatmul.msk.bf16.gmra.mxu3 %vm17393_vm9, %v4480_v22  ;;  %v3860_v50 = vsel %vm18058_vm4, %v14057_v15, %v17388_v18  ;;  %vm18060_vm2 = vcmask 162816   ;;  %v1396_v60 = vmax.f32 %v1324_v10, %v1360_v63  ;;  %v18063_v21 = vld [vmem:[#allocation21_spill] sm:$0xff]  ;;  %v18064_v22 = vld [vmem:[#allocation56_spill] sm:$0xff] }
 0x334   : > { %v4000_v48 = vsel %vm18056_vm3, %v18055_v20, %v17387_v37  ;;  %v2266_v3 = vsel %vm18060_vm2, %v18059_v52, %v9319_v44  ;;  %v9608_v58 = vunpack.i.l.bf16 %v13634_v51  ;;  %v9909_v4 = vunpack.i.h.bf16 %v14161_v39  ;;  %10096 = vrot.lane.b32.xlu2 %v18064_v22, %s10388_s17  ;;  %v9807_v53 = vpop.permute.xlu0 %9806  ;;  %v18066_v52 = vld [vmem:[#allocation69_spill] sm:$0xff]  ;;  %vm18068_vm3 = vmmov %vm18060_vm2 }
 0x335   : > { %v9324_v43 = vunpack.i.h.bf16 %v18061_v36  ;;  %v9329_v31 = vunpack.i.h.bf16 %v18062_v19  ;;  %v9334_v20 = vunpack.i.h.bf16 %v18063_v21  ;;  %v9965_v37 = vpack.i.bf16 %v4000_v48, %v3262_v27  ;;  %v18067_v15 = vld [vmem:[#allocation25_spill] sm:$0xff]  ;;  %v14186_v39 = vpop.permute.xlu2 %9926 }
 0x336   : > { %vm18065_vm0 = vcmask 490496   ;;  %v9809_v44 = vunpack.i.h.bf16 %v9807_v53  ;;  %v9808_v63 = vunpack.i.l.bf16 %v9807_v53  ;;  %v10000_v10 = vpack.i.bf16 %v3860_v50, %v14099_v42 }
 0x337   : > { %v14178_v18 = vsel %vm18065_vm0, %v4058_v14, %v9909_v4  ;;  %v9594_v46 = vunpack.i.h.bf16 %v18066_v52  ;;  %v3656_v36 = vsel %vm18068_vm3, %v18067_v15, %v9603_v30  ;;  %v9814_v19 = vunpack.i.h.bf16 %v13837_v17  ;;  %vm18075_vm2 = vmmov %vm18065_vm0 }
 0x338   : > { %v9813_v1 = vunpack.i.l.bf16 %v13837_v17  ;;  %vm18069_vm4 = vcmask 326656   ;;  %v3734_v14 = vsel %vm2332_vm14, %v13916_v8, %v9808_v63  ;;  %v3735_v53 = vsel %vm2332_vm14, %v14083_v6, %v9809_v44  ;;  %9966 = vrot.lane.b32.xlu0 %v9965_v37, %s10390_s9 }
 0x339   : > { %v3668_v27 = vsel %vm18069_vm4, %v3656_v36, %v9608_v58  ;;  %10001 = vrot.lane.b32.xlu1 %v10000_v10, %s17915_s28  ;;  %v14195_v48 = vrot.slane %v13115_v55, 1  ;;  %v9333_v15 = vunpack.i.l.bf16 %v18063_v21  ;;  %v14202_v17 = vsel %vm2345_vm15, %v3735_v53, %v9814_v19  ;;  %v18074_v21 = vld [vmem:[#allocation6_spill] sm:$0xff] }
 0x33a   : > { %v14199_v30 = vsel %vm2345_vm15, %v3734_v14, %v9813_v1  ;;  %18072 = vst [vmem:[#allocation18_spill] sm:$0xff] %v14202_v17  ;;  %v18073_v50 = vunpack.i.h.bf16 %v13473_v13  ;;  %v17395_v22 = vrot.slane %v14202_v17, 5  ;;  %v17394_v44 = vrot.slane %v13105_v23, 1  ;;  %v18076_v13 = vld [vmem:[#allocation92_spill] sm:$0xff]  ;;  %v18085_v14 = vld [vmem:[#allocation23_spill] sm:$0xff] }
 0x33b   : > { %18070 = vst [vmem:[#allocation72_spill] sm:$0xff] %v14195_v48  ;;  %v4155_v4 = vrot.slane %v14199_v30, 5  ;;  %v9599_v63 = vunpack.i.h.bf16 %v18074_v21  ;;  %v3680_v10 = vsel %vm18075_vm2, %v3668_v27, %v9594_v46  ;;  %v9759_v37 = vunpack.i.h.bf16 %v14062_v62 }
 0x33c   : > { %18071 = vst [vmem:[#allocation59_spill] sm:$0xff] %v14199_v30  ;;  %v3710_v58 = vsel %vm2306_vm12, %v13859_v41, %v18073_v50  ;;  %v10110_v52 = vpack.i.bf16 %v18076_v13, %v12566_v34  ;;  %v18077_v41 = vrot.slane %v13030_v2, 1  ;;  %vm18078_vm0 = vcmask 1046528   ;;  %v18124_v30 = vld [vmem:[#allocation95_spill] sm:$0xff]  ;;  %v18188_v2 = vld [vmem:[#allocation50_spill] sm:$0xff] }
 0x33d   : > { %v14214_v1 = vsel %vm2319_vm13, %v3710_v58, %v13916_v8  ;;  %vm18080_vm3 = vmmov %vm18078_vm0  ;;  %v18081_v19 = vrot.slane %v14041_v32, 5  ;;  %vm18082_vm4 = vcmask 1042432   ;;  %vm18084_vm9 = vcmask 326656   ;;  %v14241_v58 = vpop.permute.xlu0 %9821 }
 0x33e   : > { %v14225_v36 = vsel %vm18078_vm0, %v18077_v41, %v14195_v48  ;;  %v3838_v8 = vsel %vm18080_vm3, %v14195_v48, %v17394_v44  ;;  %vm18083_vm2 = vmmov %vm18082_vm4  ;;  %v2279_v27 = vsel %vm18084_vm9, %v2266_v3, %v9324_v43  ;;  %v9389_v53 = vunpack.i.h.bf16 %v18085_v14  ;;  %10111 = vrot.lane.b32.xlu2 %v10110_v52, %s17964_s13  ;;  %18086 = vst [vmem:[#allocation22_spill] sm:$0xff] %v14241_v58  ;;  %v14253_v52 = vpop.permute.xlu2 %9941 }
 0x33f   : > { %18079 = vst [vmem:[#allocation103_spill] sm:$0xff] %v14225_v36  ;;  %v4156_v46 = vsel %vm18082_vm4, %v18081_v19, %v4155_v4  ;;  %v4160_v62 = vsel %vm18083_vm2, %v4155_v4, %v17395_v22  ;;  %v9818_v50 = vunpack.i.l.bf16 %v13834_v61  ;;  %v14244_v41 = vadd.f32 %v13965_v38, %v1396_v60  ;;  %vm18104_vm4 = vmmov %vm18083_vm2 }
 0x340   : > { %v10015_v21 = vpack.i.bf16 %v4160_v62, %v4156_v46  ;;  %vm18087_vm0 = vcmask 490496   ;;  %v9824_v44 = vunpack.i.h.bf16 %v14241_v58  ;;  %v17399_v3 = vunpack.i.l.bf16 %v13992_v0  ;;  %v18088_v62 = vld [vmem:[#allocation98_spill] sm:$0xff] }
 0x341   : > { %v2292_v19 = vsel %vm18087_vm0, %v2279_v27, %v9329_v31  ;;  %v4074_v43 = vsel %vm2293_vm11, %v13879_v35, %v9759_v37  ;;  %v3692_v22 = vsel %vm2293_vm11, %v3680_v10, %v9599_v63  ;;  %v9980_v46 = vpack.i.bf16 %v3838_v8, %v14225_v36  ;;  %vm18108_vm0 = vmmov %vm18104_vm4  ;;  %v18159_v36 = vld [vmem:[#allocation86_spill] sm:$0xff] }
 0x342   : > { %v2304_v38 = vsel %vm2293_vm11, %v18088_v62, %v9333_v15  ;;  %v2305_v60 = vsel %vm2293_vm11, %v2292_v19, %v9334_v20  ;;  %v17397_v31 = vunpack.i.h.bf16 %v13828_v45  ;;  %v3704_v27 = vsel %vm2306_vm12, %v3692_v22, %v9824_v44  ;;  %10016 = vrot.lane.b32.xlu1 %v10015_v21, %s10398_s24  ;;  %v18094_v19 = vld [vmem:[#allocation13_spill] sm:$0xff]  ;;  %v18097_v62 = vld [vmem:[#allocation30_spill] sm:$0xff] }
 0x343   : > { %v2318_v4 = vsel %vm2306_vm12, %v2305_v60, %v9389_v53  ;;  %v4075_v63 = vsel %vm2293_vm11, %v13763_v40, %v9818_v50  ;;  %v14268_v10 = vsel %vm2319_vm13, %v3704_v27, %v17399_v3  ;;  %9981 = vrot.lane.b32.xlu0 %v9980_v46, %s10383_s12  ;;  %v14272_v20 = vrot.slane %v13105_v23, 4  ;;  %v18099_v27 = vld [vmem:[#allocation101_spill] sm:$0xff]  ;;  %v18111_v3 = vld [vmem:[#allocation76_spill] sm:$0xff] }
 0x344   : > { %v4087_v15 = vsel %vm2306_vm12, %v4074_v43, %v17397_v31  ;;  %v18090_v22 = vunpack.i.l.bf16 %v14241_v58  ;;  %v17398_v37 = vrot.slane %v14268_v10, 4  ;;  %v18091_v8 = vunpack.i.l.bf16 %v18085_v14  ;;  %v18113_v40 = vld [vmem:[#allocation24_spill] sm:$0xff] }
 0x345   : > { %18089 = vst [vmem:[#allocation20_spill] sm:$0xff] %v14272_v20  ;;  %v14285_v50 = vunpack.i.h.bf16 %v13886_v12  ;;  %v14288_v21 = vunpack.i.l.bf16 %v13886_v12  ;;  %v2331_v46 = vsel %vm2319_vm13, %v2318_v4, %v18094_v19  ;;  %vm18095_vm9 = vcmask 1043456  }
 0x346   : > { %v4088_v44 = vsel %vm2306_vm12, %v4075_v63, %v18090_v22  ;;  %v2317_v53 = vsel %vm2306_vm12, %v2304_v38, %v18091_v8  ;;  %v14295_v43 = vsel %vm18095_vm9, %v14075_v47, %v14272_v20  ;;  %vm18098_vm3 = vmmov %vm18095_vm9  ;;  %v3979_v38 = vrot.slane %v14244_v41, 5  ;;  %v18100_v63 = vld [vmem:[#allocation53_spill] sm:$0xff]  ;;  %v14313_v8 = vpop.permute.xlu0 %9846  ;;  %v18148_v47 = vld [vmem:[#allocation10_spill] sm:$0xff] }
 0x347   : > { %18092 = vst [vmem:[#allocation46_spill] sm:$0xff] %v14285_v50  ;;  %v2330_v60 = vsel %vm2319_vm13, %v2317_v53, %v18097_v62  ;;  %v4457_v14 = vsel %vm18098_vm3, %v2331_v46, %v17398_v37  ;;  %v4100_v12 = vsel %vm2319_vm13, %v4087_v15, %v14288_v21  ;;  %v14307_v4 = vsel %vm2319_vm13, %v4088_v44, %v14285_v50  ;;  %v14317_v46 = vpop.permute.xlu2 %9961  ;;  %vm18105_vm2 = vmmov %vm18098_vm3 }
 0x348   : > { %18093 = vst [vmem:[#allocation31_spill] sm:$0xff] %v14288_v21  ;;  %v18101_v22 = vpack.i.bf16 %v18099_v27, %v18100_v63  ;;  %v4481_v53 = vpack.c.bf16 %v4457_v14, %v2330_v60  ;;  %v10030_v19 = vpack.i.bf16 %v14295_v43, %v14113_v7  ;;  %v9995_v15 = vpack.i.bf16 %v12202_v29, %v12199_v9  ;;  %vm18109_vm9 = vmmov %vm18108_vm0 }
 0x349   : > { %18096 = vst [vmem:[#allocation17_spill] sm:$0xff] %v14295_v43  ;;  %v14324_v44 = vsel %vm2319_vm13, %v13941_v26, %v14083_v6  ;;  %v4161_v62 = vrot.slane %v4100_v12, 5  ;;  %v17400_v27 = vrot.slane %v14307_v4, 5  ;;  %v18103_v60 = vrot.slane %v13968_v24, 5 }
 0x34a   : > { %10126 = vrot.lane.b32.xlu2 %v18101_v22, %s17488_s23  ;;  %4774 = vmatmul.bf16.gmra.mxu0 %v4481_v53  ;;  %18102 = vst [vmem:[#allocation49_spill] sm:$0xff] %v14324_v44  ;;  %v4361_v63 = vrot.slane %v14214_v1, 4  ;;  %v17396_v22 = vrot.slane %v14324_v44, 4  ;;  %v3881_v53 = vrot.slane %v13105_v23, 3  ;;  %v9628_v26 = vunpack.i.l.bf16 %v18111_v3 }
 0x34b   : > { %10031 = vrot.lane.b32.xlu1 %v10030_v19, %s10388_s17  ;;  %v3980_v14 = vsel %vm18104_vm4, %v18103_v60, %v3979_v38  ;;  %9996 = vrot.lane.b32.xlu0 %v9995_v15, %s10387_s16  ;;  %v18107_v19 = vrot.slane %v14103_v25, 5  ;;  %v14349_v1 = vsel %vm18109_vm9, %v4161_v62, %v17400_v27  ;;  %v9858_v15 = vunpack.i.l.bf16 %v13922_v33 }
 0x34c   : > { %v10140_v6 = vpack.i.bf16 %v3979_v38, %v3980_v14  ;;  %v14339_v12 = vsel %vm18105_vm2, %v4361_v63, %v17396_v22  ;;  %v18110_v22 = vld [vmem:[#allocation105_spill] sm:$0xff]  ;;  %v9604_v58 = vunpack.i.h.bf16 %v13549_v54  ;;  %v14374_v48 = vrot.slane %v13968_v24, 3 }
 0x34d   : > { %18106 = vst [vmem:[#allocation80_spill] sm:$0xff] %v14339_v12  ;;  %v14344_v60 = vsel %vm18108_vm0, %v18107_v19, %v4161_v62  ;;  %v9623_v31 = vunpack.i.l.bf16 %v18110_v22  ;;  %v3882_v19 = vsel %vm560_vm1, %v13791_v59, %v3881_v53  ;;  %v18112_v62 = vunpack.i.l.bf16 %v13954_v16  ;;  %v18114_v12 = vld [vmem:[#allocation44_spill] sm:$0xff] }
 0x34e   : > { %v9862_v38 = vpop.permute.xlu0 %9861  ;;  %v18115_v44 = vpack.i.bf16 %v18113_v40, %v18114_v12  ;;  %vm18118_vm3 = vcmask 162816   ;;  %vm18120_vm4 = vcmask 326656   ;;  %v18121_v40 = vld [vmem:[#allocation28_spill] sm:$0xff]  ;;  %v14388_v12 = vsel %vm560_vm1, %v3881_v53, %v14374_v48 }
 0x34f   : > { %v9864_v37 = vunpack.i.h.bf16 %v9862_v38  ;;  %v9863_v25 = vunpack.i.l.bf16 %v9862_v38  ;;  %v3800_v27 = vsel %vm2410_vm8, %v18112_v62, %v9858_v15  ;;  %v14362_v33 = vpop.permute.xlu2 %9976  ;;  %v9609_v15 = vunpack.i.h.bf16 %v13634_v51  ;;  %v18116_v62 = vld [vmem:[#allocation110_spill] sm:$0xff]  ;;  %vm18122_vm2 = vmmov %vm18118_vm3 }
 0x350   : > { %v9614_v45 = vunpack.i.h.bf16 %v18116_v62  ;;  %v9613_v54 = vunpack.i.l.bf16 %v18116_v62  ;;  %vm18123_vm0 = vmmov %vm18120_vm4  ;;  %vm18129_vm9 = vcmask 490496   ;;  %v17414_v62 = vrot.slane %v12202_v29, 6 }
 0x351   : > { %v3812_v14 = vsel %vm2423_vm6, %v3800_v27, %v9863_v25  ;;  %v3813_v38 = vsel %vm2423_vm6, %v13979_v57, %v9864_v37  ;;  %v18117_v27 = vld [vmem:[#allocation29_spill] sm:$0xff] }
 0x352   : > { %10141 = vrot.lane.b32.xlu2 %v10140_v6, %s17936_s22  ;;  %v10010_v6 = vpack.i.bf16 %v3882_v19, %v13808_v49  ;;  %v3658_v25 = vsel %vm18118_vm3, %v18117_v27, %v9623_v31  ;;  %v18119_v57 = vld [vmem:[#allocation57_spill] sm:$0xff]  ;;  %v18125_v31 = vld [vmem:[#allocation94_spill] sm:$0xff]  ;;  %vm18130_vm3 = vmmov %vm18129_vm9 }
 0x353   : > { %10046 = vrot.lane.b32.xlu1 %v18115_v44, %s10391_s21  ;;  %v9618_v37 = vunpack.i.l.bf16 %v18119_v57  ;;  %v3670_v35 = vsel %vm18120_vm4, %v3658_v25, %v9628_v26  ;;  %v3657_v44 = vsel %vm18122_vm2, %v18121_v40, %v9604_v58  ;;  %v18126_v27 = vpack.i.bf16 %v18124_v30, %v18125_v31  ;;  %v18127_v26 = vld [vmem:[#allocation100_spill] sm:$0xff]  ;;  %v18128_v25 = vld [vmem:[#allocation58_spill] sm:$0xff] }
 0x354   : > { %10011 = vrot.lane.b32.xlu0 %v10010_v6, %s10385_s14  ;;  %v3669_v51 = vsel %vm18123_vm0, %v3657_v44, %v9609_v15  ;;  %v9619_v6 = vunpack.i.h.bf16 %v18119_v57  ;;  %v10060_v59 = vpack.i.bf16 %v18128_v25, %v18127_v26  ;;  %v3682_v53 = vsel %vm18130_vm3, %v3670_v35, %v9614_v45 }
 0x355   : > { %v3681_v58 = vsel %vm18129_vm9, %v3669_v51, %v9613_v54  ;;  %v10025_v44 = vpack.i.bf16 %v14388_v12, %v3882_v19  ;;  %v17413_v30 = vrot.slane %v13105_v23, 6  ;;  %v17412_v45 = vunpack.i.h.bf16 %v14186_v39 }
 0x356   : > { %v9877_v32 = vpop.permute.xlu0 %9876  ;;  %v3693_v15 = vsel %vm2293_vm11, %v3681_v58, %v9618_v37  ;;  %v17411_v35 = vunpack.i.l.bf16 %v14317_v46  ;;  %v18131_v19 = vrot.slane %v14035_v28, 4  ;;  %vm18132_vm4 = vcmask 1043456  }
 0x357   : > { %v9879_v40 = vunpack.i.h.bf16 %v9877_v32  ;;  %v9878_v49 = vunpack.i.l.bf16 %v9877_v32  ;;  %v9992_v57 = vpop.permute.xlu2 %9991  ;;  %v3694_v32 = vsel %vm2293_vm11, %v3682_v53, %v9619_v6  ;;  %vm18134_vm2 = vcmask 1041408   ;;  %v18138_v53 = vld [vmem:[#allocation33_spill] sm:$0xff]  ;;  %vm18144_vm9 = vmmov %vm18132_vm4 }
 0x358   : > { %v9994_v54 = vunpack.i.h.bf16 %v9992_v57  ;;  %v9993_v51 = vunpack.i.l.bf16 %v9992_v57  ;;  %v18135_v6 = vrot.slane %v13115_v55, 6  ;;  %vm18136_vm0 = vmmov %vm18134_vm2  ;;  %v9883_v25 = vunpack.i.l.bf16 %v14050_v11  ;;  %v18139_v57 = vld [vmem:[#allocation65_spill] sm:$0xff]  ;;  %v18140_v11 = vld [vmem:[#allocation27_spill] sm:$0xff] }
 0x359   : > { %v14406_v31 = vsel %vm2436_vm5, %v3812_v14, %v9878_v49  ;;  %v14419_v49 = vsel %vm18132_vm4, %v18131_v19, %v4361_v63  ;;  %v9403_v19 = vunpack.i.l.bf16 %v18140_v11  ;;  %vm18145_vm3 = vmmov %vm18132_vm4  ;;  %vm18147_vm4 = vcmask 424960  }
 0x35a   : > { %10156 = vrot.lane.b32.xlu2 %v18126_v27, %s17499_s29  ;;  %v14409_v27 = vsel %vm2436_vm5, %v3813_v38, %v9879_v40  ;;  %v3706_v14 = vsel %vm2306_vm12, %v3694_v32, %v9994_v54  ;;  %v3705_v38 = vsel %vm2306_vm12, %v3693_v15, %v9993_v51  ;;  %v4002_v26 = vsel %vm18136_vm0, %v18135_v6, %v17413_v30  ;;  %vm18152_vm0 = vmmov %vm18147_vm4 }
 0x35b   : > { %10061 = vrot.lane.b32.xlu1 %v10060_v59, %s17930_s30  ;;  %v18133_v59 = vrot.slane %v12199_v9, 6  ;;  %v3717_v63 = vsel %vm2319_vm13, %v3705_v38, %v17412_v45  ;;  %v14440_v58 = vsel %vm2319_vm13, %v3706_v14, %v17411_v35  ;;  %v18137_v9 = vld [vmem:[#allocation108_spill] sm:$0xff]  ;;  %v9873_v15 = vunpack.i.l.bf16 %v13982_v5  ;;  %v18141_v38 = vld [vmem:[#allocation66_spill] sm:$0xff] }
 0x35c   : > { %10026 = vrot.lane.b32.xlu0 %v10025_v44, %s10386_s15  ;;  %v10170_v40 = vpack.i.bf16 %v18138_v53, %v18137_v9  ;;  %v9893_v44 = vunpack.i.l.bf16 %v18139_v57  ;;  %v4321_v54 = vrot.slane %v3717_v63, 4  ;;  %v17416_v51 = vrot.slane %v14440_v58, 4 }
 0x35d   : > { %v3264_v37 = vsel %vm18134_vm2, %v18133_v59, %v17414_v62  ;;  %v9404_v32 = vunpack.i.h.bf16 %v18140_v11  ;;  %v9464_v59 = vunpack.i.h.bf16 %v18141_v38  ;;  %v18142_v14 = vunpack.i.l.bf16 %v13992_v0 }
 0x35e   : > { %v14454_v53 = vpop.permute.xlu0 %9901  ;;  %v18143_v5 = vrot.slane %v14268_v10, 4  ;;  %v4330_v35 = vsel %vm18145_vm3, %v4321_v54, %v17416_v51  ;;  %vm18150_vm2 = vcmask 588800   ;;  %vm18155_vm3 = vmmov %vm18152_vm0 }
 0x35f   : > { %v3728_v6 = vsel %vm2332_vm14, %v18142_v14, %v9873_v15  ;;  %v9903_v45 = vunpack.i.l.bf16 %v14454_v53  ;;  %v14464_v30 = vpop.permute.xlu2 %10006  ;;  %v9463_v15 = vunpack.i.l.bf16 %v18141_v38  ;;  %v18146_v14 = vld [vmem:[#allocation73_spill] sm:$0xff] }
 0x360   : > { %v4322_v63 = vsel %vm18144_vm9, %v18143_v5, %v4321_v54  ;;  %v3740_v11 = vsel %vm2345_vm15, %v3728_v6, %v9883_v25  ;;  %v9469_v62 = vunpack.i.h.bf16 %v18146_v14  ;;  %v9913_v5 = vunpack.i.l.bf16 %v14136_v56  ;;  %v18149_v25 = vld [vmem:[#allocation78_spill] sm:$0xff]  ;;  %v18154_v38 = vld [vmem:[#allocation61_spill] sm:$0xff]  ;;  %v18158_v6 = vld [vmem:[#allocation83_spill] sm:$0xff] }
 0x361   : > { %v4485_v0 = vpack.c.bf16 %v4330_v35, %v4322_v63  ;;  %v3752_v10 = vsel %vm18147_vm4, %v3740_v11, %v9893_v44  ;;  %v9468_v54 = vunpack.i.l.bf16 %v18146_v14  ;;  %v18151_v35 = vld [vmem:[#allocation102_spill] sm:$0xff]  ;;  %vm18153_vm9 = vcmask 752640   ;;  %vm18156_vm4 = vmmov %vm18150_vm2  ;;  %v14483_v14 = vpop.permute.xlu1 %9921 }
 0x362   : > { %10171 = vrot.lane.b32.xlu2 %v10170_v40, %s17943_s26  ;;  %v10040_v40 = vpack.i.bf16 %v3264_v37, %v4002_v26  ;;  %v3764_v51 = vsel %vm18150_vm2, %v3752_v10, %v9903_v45  ;;  %v2370_v37 = vsel %vm18152_vm0, %v18151_v35, %v9404_v32  ;;  %v17420_v26 = vunpack.i.l.bf16 %v18149_v25  ;;  %18157 = vst [vmem:[#allocation68_spill] sm:$0xff] %v14483_v14  ;;  %vm18162_vm0 = vmmov %vm18156_vm4 }
 0x363   : > { %10076 = vrot.lane.b32.xlu1 %v18148_v47, %s17943_s26  ;;  %4779 = vmatmul.bf16.gmra.mxu0 %v4485_v0  ;;  %v3776_v44 = vsel %vm18153_vm9, %v3764_v51, %v9913_v5  ;;  %v2369_v63 = vsel %vm18155_vm3, %v18154_v38, %v9403_v19  ;;  %v2383_v11 = vsel %vm18156_vm4, %v2370_v37, %v9464_v59  ;;  %vm18161_vm2 = vcmask 916480   ;;  %vm18163_vm10 = vmmov %vm18153_vm9 }
 0x364   : > { %10041 = vrot.lane.b32.xlu0 %v10040_v40, %s10390_s9  ;;  %v10185_v45 = vpack.i.bf16 %v18159_v36, %v18158_v6  ;;  %v18160_v40 = vunpack.i.l.bf16 %v13954_v16  ;;  %v2382_v32 = vsel %vm18162_vm0, %v2369_v63, %v9463_v15  ;;  %v2396_v10 = vsel %vm18163_vm10, %v2383_v11, %v9469_v62  ;;  %vm18165_vm3 = vmmov %vm18161_vm2  ;;  %v18203_v36 = vld [vmem:[#allocation3_spill] sm:$0xff] }
 0x365   : > { %v2395_v19 = vsel %vm18153_vm9, %v2382_v32, %v9468_v54  ;;  %v18164_v59 = vunpack.i.h.bf16 %v18149_v25  ;;  %vm18166_vm4 = vmmov %vm18161_vm2  ;;  %v17421_v15 = vrot.slane %v13968_v24, 6  ;;  %v3861_v63 = vrot.slane %v13968_v24, 2  ;;  %v18169_v32 = vld [vmem:[#allocation97_spill] sm:$0xff] }
 0x366   : > { %v14490_v0 = vsel %vm18161_vm2, %v3776_v44, %v18160_v40  ;;  %v14500_v35 = vpop.permute.xlu0 %9916  ;;  %v2408_v37 = vsel %vm18166_vm4, %v2395_v19, %v17420_v26  ;;  %vm18167_vm2 = vcmask 1043456   ;;  %v9849_v11 = vunpack.i.h.bf16 %v14313_v8 }
 0x367   : > { %v17419_v51 = vrot.slane %v14490_v0, 4  ;;  %v2409_v5 = vsel %vm18165_vm3, %v2396_v10, %v18164_v59  ;;  %v9919_v44 = vunpack.i.h.bf16 %v14500_v35  ;;  %v14510_v38 = vpop.permute.xlu2 %10021  ;;  %v18168_v40 = vpack.i.bf16 %v14349_v1, %v14344_v60 }
 0x368   : > { %v9844_v10 = vunpack.i.h.bf16 %v18169_v32  ;;  %v9843_v19 = vunpack.i.l.bf16 %v18169_v32  ;;  %vm18173_vm10 = vcmask 1041408   ;;  %vm18177_vm9 = vcmask 1045504  }
 0x369   : > { %v4458_v62 = vsel %vm18167_vm2, %v2409_v5, %v17419_v51  ;;  %v14523_v59 = vsel %vm2293_vm11, %v14178_v18, %v9919_v44  ;;  %v18170_v5 = vld [vmem:[#allocation104_spill] sm:$0xff]  ;;  %v18174_v18 = vrot.slane %v13105_v23, 6  ;;  %vm18175_vm0 = vmmov %vm18173_vm10  ;;  %vm18183_vm3 = vcmask 424960  }
 0x36a   : > { %10186 = vrot.lane.b32.xlu2 %v10185_v45, %s17964_s13  ;;  %v4482_v54 = vpack.c.bf16 %v4458_v62, %v2408_v37  ;;  %v9848_v45 = vunpack.i.l.bf16 %v14313_v8  ;;  %v3950_v37 = vrot.slane %v14244_v41, 4  ;;  %v18171_v8 = vld [vmem:[#allocation26_spill] sm:$0xff]  ;;  %v18172_v62 = vrot.slane %v12202_v29, 6 }
 0x36b   : > { %10091 = vrot.lane.b32.xlu1 %v18168_v40, %s10398_s24  ;;  %v3736_v1 = vsel %vm2332_vm14, %v14288_v21, %v9843_v19  ;;  %v3737_v40 = vsel %vm2332_vm14, %v14285_v50, %v9844_v10  ;;  %v4004_v44 = vsel %vm18175_vm0, %v18174_v18, %v17421_v15  ;;  %v9819_v29 = vunpack.i.h.bf16 %v13834_v61  ;;  %v18180_v10 = vld [vmem:[#allocation82_spill] sm:$0xff] }
 0x36c   : > { %10056 = vrot.lane.b32.xlu0 %v18170_v5, %s10395_s25  ;;  %4842 = vmatmul.bf16.gmra.mxu1 %v4482_v54  ;;  %v3266_v60 = vsel %vm18173_vm10, %v18172_v62, %v18171_v8  ;;  %v18176_v54 = vrot.slane %v13105_v23, 2  ;;  %v14546_v5 = vsel %vm2345_vm15, %v3736_v1, %v9848_v45  ;;  %v14549_v19 = vsel %vm2345_vm15, %v3737_v40, %v9849_v11  ;;  %v14552_v8 = vpop.permute.xlu1 %9936  ;;  %v18179_v1 = vld [vmem:[#allocation75_spill] sm:$0xff] }
 0x36d   : > { %18178 = vst [vmem:[#allocation4_spill] sm:$0xff] %v14546_v5  ;;  %v4886_v18 = vpop.f32.mrf.mxu2  ;;  %v10070_v51 = vpack.i.bf16 %v4004_v44, %v3266_v60  ;;  %v4954_v40 = vpop.f32.mrf.mxu3  ;;  %v4076_v50 = vsel %vm2293_vm11, %v18180_v10, %v9819_v29  ;;  %v9939_v21 = vunpack.i.h.bf16 %v14552_v8  ;;  %v9894_v60 = vunpack.i.h.bf16 %v18139_v57 }
 0x36e   : > { %v3862_v32 = vsel %vm18177_vm9, %v18176_v54, %v3861_v63  ;;  %v14555_v62 = vpop.permute.xlu0 %9931  ;;  %v4163_v54 = vrot.slane %v14546_v5, 5  ;;  %v4887_v11 = vadd.f32 %v4886_v18, %v18179_v1  ;;  %v18181_v44 = vunpack.i.l.bf16 %v14483_v14 }
 0x36f   : > { %v10105_v26 = vpack.i.bf16 %v3861_v63, %v3862_v32  ;;  %v9934_v45 = vunpack.i.h.bf16 %v14555_v62  ;;  %v14561_v15 = vpop.permute.xlu2 %10036  ;;  %v3839_v63 = vrot.slane %v13968_v24, 1  ;;  %v18182_v18 = vunpack.i.h.bf16 %v14186_v39 }
 0x370   : > { %v4089_v32 = vsel %vm2306_vm12, %v4076_v50, %v18181_v44  ;;  %v14575_v61 = vadd.f32 %v4954_v40, %v4887_v11  ;;  %v9904_v29 = vunpack.i.h.bf16 %v14454_v53  ;;  %v18184_v57 = vrot.slane %v14202_v17, 5  ;;  %v18192_v11 = vld [vmem:[#allocation109_spill] sm:$0xff] }
 0x371   : > { %v3729_v1 = vsel %vm2332_vm14, %v18182_v18, %v9934_v45  ;;  %vm18185_vm4 = vcmask 1042432   ;;  %v18186_v50 = vrot.slane %v14549_v19, 5  ;;  %v14589_v45 = vsel %vm2319_vm13, %v4089_v32, %v18188_v2  ;;  %v18201_v2 = vld [vmem:[#allocation85_spill] sm:$0xff] }
 0x372   : > { %3964 = vrot.lane.b32.xlu2 %v3950_v37, %s10388_s17  ;;  %v4164_v5 = vsel %vm18185_vm4, %v18184_v57, %v4163_v54  ;;  %vm18187_vm2 = vmmov %vm18185_vm4  ;;  %vm18189_vm10 = vcmask 588800   ;;  %v18190_v53 = vrot.slane %v13105_v23, 1  ;;  %vm18191_vm0 = vcmask 1046528   ;;  %v18196_v57 = vld [vmem:[#allocation74_spill] sm:$0xff] }
 0x373   : > { %10106 = vrot.lane.b32.xlu1 %v10105_v26, %s17915_s28  ;;  %v3741_v26 = vsel %vm2345_vm15, %v3729_v1, %v9939_v21  ;;  %v4168_v44 = vsel %vm18187_vm2, %v4163_v54, %v18186_v50  ;;  %v17427_v18 = vrot.slane %v14589_v45, 5  ;;  %v18194_v32 = vrot.slane %v14307_v4, 5  ;;  %vm18195_vm9 = vmmov %vm18187_vm2  ;;  %s10406_s28 = smov 88  }
 0x374   : > { %10071 = vrot.lane.b32.xlu0 %v10070_v51, %s10390_s9  ;;  %v3753_v10 = vsel %vm18183_vm3, %v3741_v26, %v9894_v60  ;;  %v3840_v21 = vsel %vm18191_vm0, %v18190_v53, %v3839_v63  ;;  %v10120_v60 = vpack.i.bf16 %v4168_v44, %v4164_v5  ;;  %v14615_v5 = vld [vmem:[%s17111_s4] ss:$0 sm:$0xff]  ;;  %vm18197_vm3 = vcmask 1043456  }
 0x375   : > { %v14592_v51 = vsel %vm18189_vm10, %v3753_v10, %v9904_v29  ;;  %v4888_v40 = vpop.f32.mrf.mxu2  ;;  %v4956_v1 = vpop.f32.mrf.mxu3  ;;  %v10085_v26 = vpack.i.bf16 %v3839_v63, %v3840_v21  ;;  %v3948_v10 = vrot.slane %v13968_v24, 4  ;;  %v14610_v29 = vsel %vm18195_vm9, %v18194_v32, %v17427_v18  ;;  %v18198_v44 = vld [vmem:[#allocation71_spill] sm:$0xff]  ;;  %vm18200_vm4 = vmmov %vm18197_vm3 }
 0x376   : > { %v4753_v63 = vadd.f32 %v14615_v5, %v18196_v57  ;;  %v9908_v53 = vunpack.i.l.bf16 %v18198_v44  ;;  %v18199_v21 = vld [vmem:[#allocation79_spill] sm:$0xff]  ;;  %v4031_v44 = vrot.slane %v14244_v41, 7  ;;  %vm18204_vm2 = vcmask 490496   ;;  %vm18210_vm10 = vmmov %vm18191_vm0 }
 0x377   : > { %v14600_v54 = vpop.permute.xlu2 %10051  ;;  %v3951_v50 = vsel %vm18197_vm3, %v3948_v10, %v3950_v37  ;;  %v3949_v4 = vsel %vm18200_vm4, %v14272_v20, %v3948_v10  ;;  %v18202_v57 = vld [vmem:[#allocation67_spill] sm:$0xff]  ;;  %vm18212_vm0 = vcmask 1041408   ;;  %vm18214_vm9 = vcmask 162816   ;;  %vm18218_vm3 = vmmov %vm18204_vm2 }
 0x378   : > { %18193 = vst [vmem:[#allocation8_spill] sm:$0xff] %v14600_v54  ;;  %v10135_v32 = vpack.i.bf16 %v3951_v50, %v3949_v4  ;;  %v10100_v37 = vpack.i.bf16 %v12566_v34, %v18202_v57  ;;  %v18206_v34 = vrot.slane %v13968_v24, 7  ;;  %vm18220_vm4 = vmmov %vm18204_vm2 }
 0x37a   : > { %10211 = vrot.lane.b32.xlu2 %v18192_v11, %s17930_s30  ;;  %v4821_v11 = vadd.f32 %v18199_v21, %v4753_v63  ;;  %v4064_v63 = vsel %vm18204_vm2, %v18203_v36, %v9908_v53  ;;  %v3907_v36 = vrot.slane %v14244_v41, 3  ;;  %v18207_v53 = vld [vmem:[#allocation89_spill] sm:$0xff]  ;;  %vm18221_vm2 = vmmov %vm18210_vm10 }
 0x37b   : > { %10121 = vrot.lane.b32.xlu1 %v10120_v60, %s10398_s24  ;;  %v9918_v60 = vunpack.i.l.bf16 %v14500_v35 }
 0x37c   : > { %10086 = vrot.lane.b32.xlu0 %v10085_v26, %s10383_s12  ;;  %v4889_v18 = vadd.f32 %v4888_v40, %v4821_v11  ;;  %v18205_v40 = vld [vmem:[#allocation84_spill] sm:$0xff]  ;;  %v4032_v11 = vsel %vm1914_vm7, %v18206_v34, %v4031_v44  ;;  %s10408_s12 = smov 66  }
 0x37d   : > { %v4891_v26 = vpop.f32.mrf.mxu2  ;;  %v4959_v23 = vpop.f32.mrf.mxu3  ;;  %v4077_v35 = vsel %vm2293_vm11, %v4064_v63, %v9918_v60  ;;  %v4758_v50 = vadd.f32 %v14615_v5, %v18205_v40  ;;  %v10150_v57 = vpack.i.bf16 %v4031_v44, %v4032_v11  ;;  %v18209_v44 = vld [vmem:[#allocation64_spill] sm:$0xff]  ;;  %v18217_v11 = vld [vmem:[#allocation81_spill] sm:$0xff] }
 0x37e   : > { %v4892_v17 = vadd.f32 %v4891_v26, %v18201_v2  ;;  %v9924_v2 = vunpack.i.h.bf16 %v14483_v14  ;;  %v4957_v21 = vadd.f32 %v4956_v1, %v4889_v18  ;;  %v4005_v18 = vrot.slane %v14244_v41, 6 }
 0x37f   : > { %v14626_v54 = vpop.permute.xlu2 %10066  ;;  %v4826_v26 = vadd.f32 %v18207_v53, %v4758_v50  ;;  %v9624_v1 = vunpack.i.h.bf16 %v18110_v22  ;;  %v9639_v41 = vunpack.i.h.bf16 %v18209_v44  ;;  %v9638_v22 = vunpack.i.l.bf16 %v18209_v44  ;;  %v18213_v53 = vld [vmem:[#allocation9_spill] sm:$0xff] }
 0x380   : > { %v4960_v10 = vadd.f32 %v4959_v23, %v4892_v17  ;;  %v4090_v4 = vsel %vm2306_vm12, %v4077_v35, %v9924_v2  ;;  %v14646_v23 = vunpack.i.l.bf16 %v14186_v39  ;;  %v5033_v63 = vrot.slane %v4957_v21, 1 }
 0x381   : > { %v9629_v39 = vunpack.i.h.bf16 %v18111_v3 }
 0x382   : > { %v5090_v17 = vrot.slane %v4960_v10, 1 }
 0x383   : > { %10136 = vrot.lane.b32.xlu1 %v10135_v32, %s10388_s17  ;;  %v10115_v32 = vpack.i.bf16 %v14374_v48, %v14388_v12  ;;  %v3908_v12 = vsel %vm560_vm1, %v14374_v48, %v3907_v36  ;;  %v18215_v48 = vld [vmem:[#allocation32_spill] sm:$0xff]  ;;  %vm18216_vm1 = vcmask 326656  }
 0x384   : > { %10101 = vrot.lane.b32.xlu0 %v10100_v37, %s10387_s16  ;;  %v14654_v37 = vsel %vm2319_vm13, %v4090_v4, %v14646_v23  ;;  %v5091_v50 = vsel %vm18210_vm10, %v5033_v63, %v5090_v17  ;;  %v18211_v4 = vrot.slane %v13968_v24, 6  ;;  %v10130_v14 = vpack.i.bf16 %v3907_v36, %v3908_v12  ;;  %vm18222_vm10 = vmmov %vm18221_vm2 }
 0x385   : > { %v4893_v60 = vpop.f32.mrf.mxu2  ;;  %v4961_v2 = vpop.f32.mrf.mxu3  ;;  %v18225_v36 = vrot.slane %v14589_v45, 5 }
 0x386   : > { %v4894_v35 = vadd.f32 %v4893_v60, %v4826_v26  ;;  %v4006_v3 = vsel %vm18212_vm0, %v18211_v4, %v4005_v18  ;;  %v3659_v26 = vsel %vm18214_vm9, %v18213_v53, %v9624_v1  ;;  %v9644_v60 = vunpack.i.h.bf16 %v18215_v48  ;;  %v18219_v4 = vld [vmem:[#allocation77_spill] sm:$0xff] }
 0x387   : > { %v14656_v40 = vpop.permute.xlu2 %10081  ;;  %v3684_v20 = vsel %vm18220_vm4, %v18219_v4, %v9639_v41  ;;  %vm18226_vm0 = vcmask 1042432   ;;  %vm18228_vm9 = vcmask 1043456  }
 0x388   : > { %18208 = vst [vmem:[#allocation51_spill] sm:$0xff] %v14656_v40  ;;  %v14665_v34 = vadd.f32 %v4961_v2, %v4894_v35  ;;  %v3671_v35 = vsel %vm18216_vm1, %v3659_v26, %v9629_v39  ;;  %v5032_v2 = vrot.slane %v14575_v61, 1  ;;  %v9478_v40 = vunpack.i.l.bf16 %v18217_v11  ;;  %v18223_v39 = vld [vmem:[#allocation52_spill] sm:$0xff]  ;;  %vm18235_vm1 = vmmov %vm18228_vm9 }
 0x389   : > { %v3683_v24 = vsel %vm18218_vm3, %v3671_v35, %v9638_v22  ;;  %v10165_v26 = vpack.i.bf16 %v18137_v9, %v18223_v39  ;;  %v3696_v22 = vsel %vm2293_vm11, %v3684_v20, %v9644_v60  ;;  %v17436_v20 = vunpack.i.l.bf16 %v14626_v54  ;;  %vm18236_vm3 = vmmov %vm18235_vm1 }
 0x38a   : > { %v5035_v44 = vrot.slane %v14665_v34, 1  ;;  %v5034_v53 = vsel %vm18222_vm10, %v5032_v2, %v5033_v63  ;;  %v14701_v2 = vpop.permute.xlu1 %9956  ;;  %vm18238_vm4 = vmmov %vm18235_vm1 }
 0x38b   : > { %10151 = vrot.lane.b32.xlu1 %v10150_v57, %s10391_s21  ;;  %v9643_v57 = vunpack.i.l.bf16 %v18215_v48 }
 0x38c   : > { %10116 = vrot.lane.b32.xlu0 %v10115_v32, %s10385_s14  ;;  %v5117_v32 = vmax.f32 %v4957_v21, %v5091_v50  ;;  %v5092_v1 = vsel %vm18221_vm2, %v5090_v17, %v5035_v44  ;;  %v18224_v21 = vrot.slane %v14654_v37, 5  ;;  %v18227_v50 = vld [vmem:[#allocation96_spill] sm:$0xff]  ;;  %vm18244_vm2 = vcmask 523264  }
 0x38d   : > { %v5118_v48 = vmax.f32 %v4960_v10, %v5092_v1  ;;  %v4896_v43 = vpop.f32.mrf.mxu2  ;;  %v3695_v41 = vsel %vm2293_vm11, %v3683_v24, %v9643_v57  ;;  %v4964_v35 = vpop.f32.mrf.mxu3  ;;  %v5074_v24 = vmax.f32 %v14575_v61, %v5034_v53  ;;  %v9479_v53 = vunpack.i.h.bf16 %v18217_v11  ;;  %vm18245_vm10 = vmmov %vm18244_vm2 }
 0x38e   : > { %v14694_v12 = vsel %vm18226_vm0, %v18225_v36, %v18224_v21  ;;  %v4897_v17 = vadd.f32 %v4896_v43, %v18227_v50  ;;  %v5148_v4 = vrot.slane %v5117_v32, 4  ;;  %v10039_v21 = vunpack.i.h.bf16 %v14561_v15  ;;  %v18229_v36 = vld [vmem:[#allocation14_spill] sm:$0xff]  ;;  %vm18246_vm0 = vmmov %vm18244_vm2 }
 0x38f   : > { %v10097_v63 = vpop.permute.xlu2 %10096  ;;  %v10175_v10 = vpack.i.bf16 %v14694_v12, %v14610_v29  ;;  %v5149_v1 = vrot.slane %v5118_v48, 4  ;;  %v10145_v48 = vpack.i.bf16 %v4005_v18, %v4006_v3  ;;  %v18231_v18 = vunpack.i.l.bf16 %v18149_v25 }
 0x390   : > { %v10099_v39 = vunpack.i.h.bf16 %v10097_v63  ;;  %v10098_v45 = vunpack.i.l.bf16 %v10097_v63  ;;  %v14707_v43 = vadd.f32 %v4964_v35, %v4897_v17  ;;  %v18230_v17 = vld [vmem:[#allocation48_spill] sm:$0xff]  ;;  %v9964_v29 = vunpack.i.h.bf16 %v14317_v46 }
 0x391   : > { %v5150_v60 = vsel %vm18228_vm9, %v5148_v4, %v5149_v1  ;;  %v2421_v3 = vsel %vm2410_vm8, %v18231_v18, %v9478_v40  ;;  %v9484_v63 = vunpack.i.h.bf16 %v18230_v17  ;;  %v18232_v4 = vld [vmem:[#allocation93_spill] sm:$0xff]  ;;  %v18239_v18 = vunpack.i.h.bf16 %v18149_v25  ;;  %vm18247_vm9 = vmmov %vm18246_vm0 }
 0x392   : > { %v3708_v57 = vsel %vm2306_vm12, %v3696_v22, %v10099_v39  ;;  %v3707_v32 = vsel %vm2306_vm12, %v3695_v41, %v10098_v45  ;;  %v14715_v50 = vmax.f32 %v5074_v24, %v5150_v60  ;;  %v9483_v22 = vunpack.i.l.bf16 %v18230_v17  ;;  %v18233_v39 = vld [vmem:[#allocation15_spill] sm:$0xff] }
 0x393   : > { %10166 = vrot.lane.b32.xlu1 %v10165_v26, %s17930_s30  ;;  %v4763_v26 = vadd.f32 %v14615_v5, %v18229_v36  ;;  %v3719_v61 = vsel %vm2319_vm13, %v3707_v32, %v10039_v21  ;;  %v9509_v1 = vunpack.i.h.bf16 %v18232_v4  ;;  %v18234_v60 = vrot.slane %v14440_v58, 4 }
 0x394   : > { %10131 = vrot.lane.b32.xlu0 %v10130_v14, %s10386_s15  ;;  %v3720_v14 = vsel %vm2319_vm13, %v3708_v57, %v17436_v20  ;;  %v4337_v35 = vrot.slane %v3719_v61, 4  ;;  %v10180_v32 = vpack.i.bf16 %v18158_v6, %v18076_v13  ;;  %v18237_v36 = vrot.slane %v14035_v28, 4  ;;  %v18240_v13 = vld [vmem:[#allocation42_spill] sm:$0xff] }
 0x395   : > { %v4345_v41 = vrot.slane %v3720_v14, 4  ;;  %v4831_v45 = vadd.f32 %v18233_v39, %v4763_v26  ;;  %v4898_v24 = vpop.f32.mrf.mxu2  ;;  %v9508_v61 = vunpack.i.l.bf16 %v18232_v4  ;;  %v4966_v17 = vpop.f32.mrf.mxu3  ;;  %v2434_v39 = vsel %vm2423_vm6, %v2421_v3, %v9483_v22 }
 0x396   : > { %v4338_v57 = vsel %vm18235_vm1, %v18234_v60, %v4337_v35  ;;  %v9839_v6 = vunpack.i.h.bf16 %v18240_v13  ;;  %v14760_v3 = vpop.permute.xlu1 %9971  ;;  %vm18248_vm1 = vmmov %vm18246_vm0 }
 0x397   : > { %v4346_v11 = vsel %vm18236_vm3, %v4337_v35, %v4345_v41  ;;  %v14740_v40 = vsel %vm18238_vm4, %v4345_v41, %v18237_v36  ;;  %v4899_v14 = vadd.f32 %v4898_v24, %v4831_v45  ;;  %v2422_v35 = vsel %vm2410_vm8, %v18239_v18, %v9479_v53  ;;  %v18241_v45 = vld [vmem:[#allocation7_spill] sm:$0xff]  ;;  %v18242_v24 = vld [vmem:[#allocation5_spill] sm:$0xff]  ;;  %vm18253_vm3 = vmmov %vm18246_vm0 }
 0x398   : > { %v4489_v26 = vpack.c.bf16 %v4346_v11, %v4338_v57  ;;  %v4493_v58 = vpack.c.bf16 %v14419_v49, %v14740_v40  ;;  %v2435_v28 = vsel %vm2423_vm6, %v2422_v35, %v9484_v63  ;;  %v9838_v41 = vunpack.i.l.bf16 %v18240_v13 }
 0x399   : > { %v14753_v4 = vadd.f32 %v4966_v17, %v4899_v14  ;;  %v4768_v25 = vadd.f32 %v14615_v5, %v18241_v45  ;;  %v9829_v53 = vunpack.i.h.bf16 %v18242_v24  ;;  %v9828_v22 = vunpack.i.l.bf16 %v18242_v24 }
 0x39a   : > { %4784 = vmatmul.bf16.gmra.mxu0 %v4489_v26  ;;  %v9933_v63 = vunpack.i.l.bf16 %v14555_v62  ;;  %v2448_v60 = vsel %vm2436_vm5, %v2435_v28, %v9509_v1  ;;  %v9947_v57 = vpop.permute.xlu0 %9946  ;;  %v2447_v11 = vsel %vm2436_vm5, %v2434_v39, %v9508_v61  ;;  %v2870_v17 = vsel %vm18244_vm2, %v9838_v41, %v9839_v6 }
 0x39b   : > { %10181 = vrot.lane.b32.xlu1 %v10180_v32, %s10387_s16  ;;  %v18243_v32 = vld [vmem:[#allocation62_spill] sm:$0xff]  ;;  %v9948_v14 = vunpack.i.l.bf16 %v9947_v57  ;;  %v2906_v26 = vsel %vm18245_vm10, %v2448_v60, %v9838_v41  ;;  %v5093_v18 = vrot.slane %v14753_v4, 1  ;;  %v2869_v35 = vsel %vm18246_vm0, %v9828_v22, %v9829_v53  ;;  %v18250_v60 = vld [vmem:[#allocation91_spill] sm:$0xff] }
 0x39c   : > { %10146 = vrot.lane.b32.xlu0 %v10145_v48, %s10390_s9  ;;  %v4836_v36 = vadd.f32 %v18243_v32, %v4768_v25  ;;  %v9949_v48 = vunpack.i.h.bf16 %v9947_v57  ;;  %v3739_v62 = vsel %vm2332_vm14, %v14646_v23, %v9933_v63  ;;  %v5036_v28 = vrot.slane %v14707_v43, 1  ;;  %v18249_v41 = vld [vmem:[#allocation106_spill] sm:$0xff]  ;;  %s10403_s9 = smov 16  }
 0x39d   : > { %v4269_v61 = vsel %vm18248_vm1, %v14406_v31, %v9948_v14  ;;  %v4969_v25 = vpop.f32.mrf.mxu3  ;;  %v9914_v24 = vunpack.i.h.bf16 %v14136_v56  ;;  %v17437_v53 = vunpack.i.h.bf16 %v14253_v52  ;;  %v9938_v63 = vunpack.i.l.bf16 %v14552_v8  ;;  %v18251_v57 = vld [vmem:[#allocation90_spill] sm:$0xff] }
 0x39e   : > { %v14773_v1 = vsel %vm18247_vm9, %v9948_v14, %v9949_v48  ;;  %v4901_v39 = vpop.f32.mrf.mxu2  ;;  %v4319_v13 = vrot.slane %v4269_v61, 4  ;;  %v18252_v32 = vpack.i.bf16 %v18250_v60, %v18251_v57  ;;  %v2905_v31 = vsel %vm18253_vm3, %v2447_v11, %v9828_v22  ;;  %v18255_v61 = vld [vmem:[#allocation12_spill] sm:$0xff] }
 0x39f   : > { %v4320_v6 = vrot.slane %v14773_v1, 4  ;;  %v4902_v45 = vadd.f32 %v4901_v39, %v18249_v41  ;;  %vm18254_vm4 = vcmask 1046528   ;;  %vm18256_vm2 = vcmask 1043456  }
 0x3a0   : > { %v5094_v48 = vsel %vm18254_vm4, %v5036_v28, %v5093_v18  ;;  %v4459_v56 = vsel %vm18256_vm2, %v2906_v26, %v4319_v13  ;;  %vm18257_vm10 = vmmov %vm18256_vm2  ;;  %v9943_v39 = vunpack.i.l.bf16 %v14253_v52  ;;  %v14799_v41 = vsel %vm2345_vm15, %v3739_v62, %v9938_v63 }
 0x3a1   : > { %v14789_v14 = vadd.f32 %v4969_v25, %v4902_v45  ;;  %v4460_v8 = vsel %vm18257_vm10, %v2870_v17, %v4320_v6  ;;  %v4483_v22 = vpack.c.bf16 %v4459_v56, %v2905_v31  ;;  %v9959_v45 = vunpack.i.h.bf16 %v14701_v2  ;;  %vm18259_vm9 = vmmov %vm18254_vm4 }
 0x3a2   : > { %v4484_v11 = vpack.c.bf16 %v4460_v8, %v2869_v35  ;;  %v9958_v25 = vunpack.i.l.bf16 %v14701_v2  ;;  %v9952_v26 = vpop.permute.xlu0 %9951  ;;  %v9973_v17 = vunpack.i.l.bf16 %v14760_v3  ;;  %vm18258_vm0 = vcmask 949248   ;;  %vm18260_vm1 = vmmov %vm18254_vm4 }
 0x3a3   : > { %10196 = vrot.lane.b32.xlu1 %v18252_v32, %s17488_s23  ;;  %v14801_v60 = vpop.permute.xlu1 %9986  ;;  %v5038_v57 = vrot.slane %v14789_v14, 1  ;;  %v9954_v20 = vunpack.i.h.bf16 %v9952_v26  ;;  %v9953_v62 = vunpack.i.l.bf16 %v9952_v26  ;;  %4910 = vmatmul.bf16.gmra.mxu2 %v4483_v22  ;;  %v4175_v35 = vrot.slane %v14799_v41, 5  ;;  %vm18262_vm4 = vmmov %vm18253_vm3 }
 0x3a4   : > { %10161 = vrot.lane.b32.xlu0 %v18255_v61, %s10395_s25  ;;  %v9988_v32 = vunpack.i.l.bf16 %v14801_v60  ;;  %v5119_v61 = vmax.f32 %v14707_v43, %v5094_v48  ;;  %7758 = vmatmul.msk.bf16.gmra.mxu3 %vm18258_vm0, %v4484_v11  ;;  %v5037_v2 = vsel %vm18259_vm9, %v5035_v44, %v5036_v28  ;;  %v9989_v28 = vunpack.i.h.bf16 %v14801_v60  ;;  %vm18264_vm10 = vmmov %vm18256_vm2 }
 0x3a5   : > { %v5095_v63 = vsel %vm18260_vm1, %v5093_v18, %v5038_v57  ;;  %v3803_v48 = vsel %vm2410_vm8, %v17437_v53, %v9954_v20  ;;  %v3802_v56 = vsel %vm2410_vm8, %v9943_v39, %v9953_v62  ;;  %v18261_v53 = vld [vmem:[#allocation63_spill] sm:$0xff]  ;;  %vm18265_vm0 = vcmask 752640   ;;  %vm18267_vm1 = vmmov %vm18256_vm2 }
 0x3a6   : > { %v4270_v31 = vsel %vm18253_vm3, %v14409_v27, %v9988_v32  ;;  %v5120_v43 = vmax.f32 %v14753_v4, %v5095_v63  ;;  %v4903_v22 = vpop.f32.mrf.mxu2  ;;  %v14827_v44 = vsel %vm2423_vm6, %v3803_v48, %v9959_v45  ;;  %v3814_v18 = vsel %vm2423_vm6, %v3802_v56, %v9958_v25  ;;  %v4971_v63 = vpop.f32.mrf.mxu3 }
 0x3a7   : > { %v4325_v8 = vrot.slane %v4270_v31, 4  ;;  %v4904_v27 = vadd.f32 %v4903_v22, %v4836_v36  ;;  %v5075_v4 = vmax.f32 %v14665_v34, %v5037_v2  ;;  %v5151_v11 = vrot.slane %v5119_v61, 4  ;;  %v18263_v36 = vld [vmem:[#allocation54_spill] sm:$0xff] }
 0x3a8   : > { %v5152_v26 = vrot.slane %v5120_v43, 4  ;;  %v3826_v20 = vsel %vm2436_vm5, %v3814_v18, %v9973_v17  ;;  %v4171_v25 = vrot.slane %v18263_v36, 5  ;;  %v3777_v2 = vsel %vm18265_vm0, %v14592_v51, %v9914_v24 }
 0x3a9   : > { %v14836_v62 = vsel %vm18262_vm4, %v3826_v20, %v9989_v28  ;;  %v14838_v45 = vadd.f32 %v4971_v63, %v4904_v27  ;;  %v4326_v34 = vsel %vm18256_vm2, %v4319_v13, %v4325_v8  ;;  %vm18266_vm9 = vcmask 1042432  }
 0x3aa   : > { %4789 = vmatmul.bf16.gmra.mxu0 %v4493_v58  ;;  %v4333_v17 = vrot.slane %v14836_v62, 4  ;;  %v4176_v58 = vsel %vm18266_vm9, %v4171_v25, %v4175_v35  ;;  %v18268_v31 = vunpack.i.h.bf16 %v13954_v16  ;;  %vm18269_vm3 = vcmask 916480   ;;  %vm18272_vm2 = vmmov %vm18266_vm9 }
 0x3ab   : > { %10206 = vrot.lane.b32.xlu1 %v18261_v53, %s10395_s25  ;;  %v5153_v53 = vsel %vm18264_vm10, %v5151_v11, %v5152_v26  ;;  %v14851_v61 = vpop.permute.xlu1 %10001  ;;  %v5039_v49 = vrot.slane %v14838_v45, 1  ;;  %v9979_v24 = vunpack.i.h.bf16 %v14362_v33  ;;  %vm18270_vm4 = vcmask 1046528  }
 0x3ac   : > { %10176 = vrot.lane.b32.xlu0 %v10175_v10, %s10398_s24  ;;  %v14856_v12 = vmax.f32 %v5075_v4, %v5153_v53  ;;  %v9967_v10 = vpop.permute.xlu0 %9966  ;;  %v4334_v13 = vsel %vm18267_vm1, %v4325_v8, %v4333_v17  ;;  %v14868_v51 = vsel %vm18269_vm3, %v3777_v2, %v18268_v31  ;;  %v18271_v8 = vrot.slane %v14549_v19, 5  ;;  %v18276_v53 = vld [vmem:[#allocation34_spill] sm:$0xff] }
 0x3ad   : > { %v9969_v40 = vunpack.i.h.bf16 %v9967_v10  ;;  %v14874_v43 = vsel %vm18270_vm4, %v5038_v57, %v5039_v49  ;;  %v4487_v48 = vpack.c.bf16 %v4334_v13, %v4326_v34  ;;  %v10004_v63 = vunpack.i.h.bf16 %v14851_v61 }
 0x3ae   : > { %v5076_v56 = vmax.f32 %v14789_v14, %v14874_v43  ;;  %v4172_v16 = vsel %vm18272_vm2, %v18271_v8, %v4171_v25  ;;  %vm18273_vm10 = vcmask 523264   ;;  %vm18277_vm9 = vcmask 162816   ;;  %v18278_v8 = vld [vmem:[#allocation16_spill] sm:$0xff] }
 0x3af   : > { %v4110_v22 = vsel %vm2332_vm14, %v9964_v29, %v9969_v40  ;;  %v10190_v27 = vpack.i.bf16 %v4176_v58, %v4172_v16  ;;  %vm18274_vm0 = vmmov %vm18273_vm10  ;;  %v9968_v40 = vunpack.i.l.bf16 %v9967_v10  ;;  %vm18279_vm1 = vcmask 326656   ;;  %v4840_v10 = vpop.f32.mrf.mxu1 }
 0x3b0   : > { %v14883_v18 = vsel %vm2345_vm15, %v4110_v22, %v9979_v24  ;;  %v4772_v22 = vpop.f32.mrf.mxu0  ;;  %vm18280_vm3 = vcmask 1043456   ;;  %v9978_v1 = vunpack.i.l.bf16 %v14362_v33  ;;  %vm18284_vm2 = vcmask 949248  }
 0x3b1   : > { %vm18281_vm4 = vmmov %vm18280_vm3  ;;  %v10023_v33 = vunpack.i.l.bf16 %v14510_v38 }
 0x3b3   : > { %10221 = vrot.lane.b32.xlu1 %v18148_v47, %s10386_s15  ;;  %4915 = vmatmul.bf16.gmra.mxu2 %v4487_v48  ;;  %v18275_v47 = vld [vmem:[#allocation87_spill] sm:$0xff] }
 0x3b4   : > { %10191 = vrot.lane.b32.xlu0 %v10190_v27, %s10398_s24  ;;  %v10017_v57 = vpop.permute.xlu1 %10016  ;;  %v10235_v2 = vpack.i.bf16 %v18276_v53, %v18275_v47 }
 0x3b5   : > { %v14888_v4 = vpop.permute.xlu0 %9981  ;;  %v10019_v11 = vunpack.i.h.bf16 %v10017_v57  ;;  %v10018_v26 = vunpack.i.l.bf16 %v10017_v57  ;;  %v18282_v57 = vld [vmem:[#allocation70_spill] sm:$0xff] }
 0x3b6   : > { %v9984_v20 = vunpack.i.h.bf16 %v14888_v4  ;;  %v4906_v24 = vpop.f32.mrf.mxu2  ;;  %v4974_v48 = vpop.f32.mrf.mxu3 }
 0x3b7   : > { %v14893_v34 = vsel %vm18273_vm10, %v9989_v28, %v10019_v11  ;;  %v4246_v25 = vsel %vm18274_vm0, %v9988_v32, %v10018_v26  ;;  %v4907_v28 = vadd.f32 %v4906_v24, %v18278_v8  ;;  %v4773_v26 = vadd.f32 %v14615_v5, %v4772_v22 }
 0x3b8   : > { %v4054_v58 = vsel %vm18277_vm9, %v13115_v55, %v9984_v20  ;;  %v4335_v13 = vrot.slane %v14893_v34, 4  ;;  %v4327_v31 = vrot.slane %v4246_v25, 4  ;;  %v18283_v20 = vunpack.i.l.bf16 %v14317_v46 }
 0x3b9   : > { %v14905_v16 = vsel %vm18279_vm1, %v4054_v58, %v10004_v63  ;;  %v4975_v27 = vadd.f32 %v4974_v48, %v4907_v28  ;;  %v4841_v58 = vadd.f32 %v4840_v10, %v4773_v26  ;;  %v10008_v48 = vunpack.i.l.bf16 %v14464_v30 }
 0x3ba   : > { %v4328_v60 = vsel %vm18280_vm3, %v4320_v6, %v4327_v31  ;;  %v4336_v32 = vsel %vm18281_vm4, %v4327_v31, %v4335_v13  ;;  %v3730_v63 = vsel %vm2332_vm14, %v18283_v20, %v9968_v40  ;;  %v9974_v31 = vunpack.i.h.bf16 %v14760_v3 }
 0x3bb   : > { %10236 = vrot.lane.b32.xlu1 %v10235_v2, %s17964_s13  ;;  %v4488_v11 = vpack.c.bf16 %v4336_v32, %v4328_v60  ;;  %v5096_v46 = vrot.slane %v4975_v27, 1  ;;  %v3742_v40 = vsel %vm2345_vm15, %v3730_v63, %v9978_v1  ;;  %vm18285_vm10 = vcmask 424960   ;;  %v18286_v32 = vld [vmem:[#allocation107_spill] sm:$0xff] }
 0x3bc   : > { %10201 = vrot.lane.b32.xlu0 %v18282_v57, %s17499_s29  ;;  %v10215_v3 = vpack.i.bf16 %v14113_v7, %v18286_v32  ;;  %vm18287_vm0 = vcmask 588800   ;;  %v14941_v26 = vsel %vm2436_vm5, %v14827_v44, %v9974_v31  ;;  %vm18288_vm9 = vcmask 752640   ;;  %v18289_v63 = vld [vmem:[#allocation55_spill] sm:$0xff]  ;;  %v18299_v32 = vld [vmem:[#allocation17_spill] sm:$0xff] }
 0x3bd   : > { %v14920_v25 = vpop.permute.xlu1 %10031  ;;  %v14923_v6 = vpop.permute.xlu0 %9996  ;;  %7759 = vmatmul.msk.bf16.gmra.mxu3 %vm18284_vm2, %v4488_v11  ;;  %v18290_v1 = vpack.i.bf16 %v18289_v63, %v14099_v42  ;;  %vm18291_vm1 = vcmask 1046528   ;;  %vm18292_vm3 = vcmask 916480   ;;  %vm18294_vm4 = vcmask 1042432  }
 0x3be   : > { %v10033_v2 = vunpack.i.l.bf16 %v14920_v25  ;;  %v9998_v24 = vunpack.i.l.bf16 %v14923_v6  ;;  %v4908_v60 = vpop.f32.mrf.mxu2  ;;  %v4976_v20 = vpop.f32.mrf.mxu3  ;;  %vm18296_vm2 = vcmask 1043456  }
 0x3bf   : > { %v4909_v11 = vadd.f32 %v4908_v60, %v4841_v58  ;;  %v18293_v58 = vrot.slane %v14654_v37, 5  ;;  %v9983_v37 = vunpack.i.l.bf16 %v14888_v4 }
 0x3c0   : > { %v4091_v22 = vsel %vm2306_vm12, %v14523_v59, %v10033_v2  ;;  %v3754_v8 = vsel %vm18285_vm10, %v3742_v40, %v9998_v24  ;;  %v5097_v2 = vsel %vm18291_vm1, %v5039_v49, %v5096_v46  ;;  %vm18297_vm10 = vmmov %vm18296_vm2 }
 0x3c1   : > { %v4104_v28 = vsel %vm2319_vm13, %v4091_v22, %v9964_v29  ;;  %v3766_v10 = vsel %vm18287_vm0, %v3754_v8, %v10008_v48  ;;  %v4323_v29 = vrot.slane %v14868_v51, 4  ;;  %v14952_v24 = vadd.f32 %v4976_v20, %v4909_v11  ;;  %vm18298_vm0 = vmmov %vm18291_vm1  ;;  %v18302_v20 = vld [vmem:[#allocation45_spill] sm:$0xff] }
 0x3c2   : > { %v4177_v57 = vrot.slane %v4104_v28, 5  ;;  %v3778_v59 = vsel %vm18288_vm9, %v3766_v10, %v10023_v33  ;;  %v5121_v49 = vmax.f32 %v14838_v45, %v5097_v2  ;;  %v18295_v22 = vrot.slane %v14490_v0, 4  ;;  %v18301_v45 = vld [vmem:[#allocation86_spill] sm:$0xff]  ;;  %vm18304_vm1 = vmmov %vm18296_vm2 }
 0x3c3   : > { %10251 = vrot.lane.b32.xlu1 %v18290_v1, %s17499_s29  ;;  %v14958_v44 = vsel %vm18292_vm3, %v3778_v59, %v9943_v39  ;;  %v5041_v48 = vrot.slane %v14952_v24, 1  ;;  %v10230_v0 = vpack.i.bf16 %v18275_v47, %v18301_v45  ;;  %vm18303_vm9 = vcmask 162816   ;;  %s10404_s29 = smov 116  }
 0x3c4   : > { %10216 = vrot.lane.b32.xlu0 %v10215_v3, %s17943_s26  ;;  %v4178_v42 = vsel %vm18294_vm4, %v18293_v58, %v4177_v57  ;;  %v4331_v51 = vrot.slane %v14958_v44, 4  ;;  %v4324_v33 = vsel %vm18296_vm2, %v18295_v22, %v4323_v29  ;;  %v18300_v3 = vld [vmem:[#allocation20_spill] sm:$0xff]  ;;  %v5154_v11 = vrot.slane %v5121_v49, 4 }
 0x3c5   : > { %v10047_v31 = vpop.permute.xlu1 %10046  ;;  %v5098_v8 = vsel %vm18298_vm0, %v5096_v46, %v5041_v48  ;;  %v10265_v10 = vpack.i.bf16 %v18300_v3, %v18299_v32  ;;  %v4053_v4 = vsel %vm18303_vm9, %v18302_v20, %v9983_v37  ;;  %vm18305_vm3 = vcmask 326656  }
 0x3c6   : > { %v14965_v40 = vpop.permute.xlu0 %10011  ;;  %v4332_v39 = vsel %vm18297_vm10, %v4323_v29, %v4331_v51  ;;  %v5122_v60 = vmax.f32 %v4975_v27, %v5098_v8  ;;  %v10003_v27 = vunpack.i.l.bf16 %v14851_v61  ;;  %v14989_v29 = vpop.permute.xlu2 %10111  ;;  %v10034_v22 = vunpack.i.h.bf16 %v14920_v25 }
 0x3c7   : > { %v4486_v28 = vpack.c.bf16 %v4332_v39, %v4324_v33  ;;  %v10013_v63 = vunpack.i.l.bf16 %v14965_v40  ;;  %vm18306_vm4 = vcmask 490496   ;;  %v10038_v33 = vunpack.i.l.bf16 %v14561_v15 }
 0x3c8   : > { %v5155_v59 = vrot.slane %v5122_v60, 4  ;;  %v4059_v58 = vsel %vm18305_vm3, %v4053_v4, %v10003_v27  ;;  %vm18308_vm2 = vcmask 1042432   ;;  %v10049_v45 = vunpack.i.h.bf16 %v10047_v31 }
 0x3c9   : > { %4847 = vmatmul.bf16.gmra.mxu1 %v4486_v28  ;;  %v4066_v61 = vsel %vm18306_vm4, %v4059_v58, %v10013_v63  ;;  %vm18309_vm10 = vcmask 424960   ;;  %v10009_v15 = vunpack.i.h.bf16 %v14464_v30  ;;  %vm18313_vm0 = vmmov %vm18308_vm2  ;;  %vm18317_vm3 = vcmask 523264  }
 0x3ca   : > { %v5156_v46 = vsel %vm18304_vm1, %v5154_v11, %v5155_v59  ;;  %v9999_v11 = vunpack.i.h.bf16 %v14923_v6  ;;  %vm18314_vm9 = vmmov %vm18313_vm0  ;;  %vm18315_vm1 = vcmask 588800   ;;  %vm18318_vm4 = vcmask 752640  }
 0x3cb   : > { %10266 = vrot.lane.b32.xlu1 %v10265_v10, %s17943_s26  ;;  %v14994_v47 = vmax.f32 %v5076_v56, %v5156_v46  ;;  %v18307_v56 = vld [vmem:[#allocation47_spill] sm:$0xff] }
 0x3cc   : > { %10231 = vrot.lane.b32.xlu0 %v10230_v0, %s10387_s16  ;;  %v10048_v0 = vunpack.i.l.bf16 %v10047_v31 }
 0x3cd   : > { %v10062_v1 = vpop.permute.xlu1 %10061 }
 0x3ce   : > { %v14996_v2 = vpop.permute.xlu0 %10026  ;;  %v15018_v10 = vpop.permute.xlu2 %10126 }
 0x3cf   : > { %v10028_v49 = vunpack.i.l.bf16 %v14996_v2 }
 0x3d1   : > { %v4079_v39 = vsel %vm2293_vm11, %v4066_v61, %v10028_v49  ;;  %v10024_v49 = vunpack.i.h.bf16 %v14510_v38 }
 0x3d2   : > { %v4092_v37 = vsel %vm2306_vm12, %v4079_v39, %v10034_v22  ;;  %v18316_v39 = vld [vmem:[#allocation8_spill] sm:$0xff] }
 0x3d3   : > { %v15006_v14 = vsel %vm2319_vm13, %v4092_v37, %v10038_v33  ;;  %3398 = vrot.lane.b32.xlu1 %v18276_v53, %s10387_s16  ;;  %v4179_v53 = vrot.slane %v14883_v18, 5  ;;  %v18310_v18 = vld [vmem:[#allocation103_spill] sm:$0xff]  ;;  %v10054_v37 = vunpack.i.h.bf16 %v18316_v39 }
 0x3d4   : > { %v4181_v43 = vrot.slane %v15006_v14, 5  ;;  %10246 = vrot.lane.b32.xlu0 %v18307_v56, %s17488_s23 }
 0x3d5   : > { %v15013_v25 = vpop.permute.xlu1 %10076  ;;  %v4180_v46 = vsel %vm18313_vm0, %v4175_v35, %v4179_v53  ;;  %vm18322_vm0 = vmmov %vm18317_vm3 }
 0x3d6   : > { %v10042_v8 = vpop.permute.xlu0 %10041  ;;  %v4182_v28 = vsel %vm18308_vm2, %v4177_v57, %v4181_v43  ;;  %v10078_v35 = vunpack.i.l.bf16 %v15013_v25  ;;  %vm18320_vm2 = vcmask 916480  }
 0x3d7   : > { %v10044_v60 = vunpack.i.h.bf16 %v10042_v8  ;;  %v10043_v32 = vunpack.i.l.bf16 %v10042_v8  ;;  %v10225_v3 = vpack.i.bf16 %v4182_v28, %v4178_v42  ;;  %v10064_v28 = vunpack.i.h.bf16 %v10062_v1 }
 0x3d9   : > { %v3731_v59 = vsel %vm2332_vm14, %v10039_v21, %v10044_v60  ;;  %v4111_v4 = vsel %vm2332_vm14, %v10038_v33, %v10043_v32  ;;  %10226 = vrot.lane.b32.xlu2 %v10225_v3, %s10398_s24  ;;  %v18311_v21 = vld [vmem:[#allocation60_spill] sm:$0xff]  ;;  %v10063_v60 = vunpack.i.l.bf16 %v10062_v1 }
 0x3da   : > { %v3743_v57 = vsel %vm2345_vm15, %v3731_v59, %v10049_v45  ;;  %v15029_v42 = vsel %vm2345_vm15, %v4111_v4, %v10048_v0  ;;  %v18312_v6 = vpack.i.bf16 %v18311_v21, %v14113_v7  ;;  %v10053_v7 = vunpack.i.l.bf16 %v18316_v39  ;;  %v4775_v21 = vpop.f32.mrf.mxu0 }
 0x3db   : > { %v3755_v63 = vsel %vm18309_vm10, %v3743_v57, %v9999_v11  ;;  %v4183_v31 = vrot.slane %v15029_v42, 5  ;;  %3477 = vrot.lane.b32.xlu1 %v18310_v18, %s17488_s23  ;;  %v18319_v59 = vunpack.i.h.bf16 %v14253_v52  ;;  %vm18321_vm10 = vcmask 1043456  }
 0x3dc   : > { %10261 = vrot.lane.b32.xlu0 %v18312_v6, %s17930_s30  ;;  %v3767_v22 = vsel %vm18315_vm1, %v3755_v63, %v10009_v15  ;;  %s10407_s30 = smov 10  }
 0x3dd   : > { %v10092_v27 = vpop.permute.xlu1 %10091  ;;  %v4184_v58 = vsel %vm18314_vm9, %v4179_v53, %v4183_v31  ;;  %v3779_v0 = vsel %vm18318_vm4, %v3767_v22, %v10024_v49  ;;  %v15061_v53 = vpop.permute.xlu2 %10141  ;;  %vm18323_vm9 = vmmov %vm18321_vm10  ;;  %v18325_v49 = vld [vmem:[#allocation37_spill] sm:$0xff] }
 0x3de   : > { %v10057_v61 = vpop.permute.xlu0 %10056  ;;  %v10093_v30 = vunpack.i.l.bf16 %v10092_v27  ;;  %v10240_v33 = vpack.i.bf16 %v4184_v58, %v4180_v46  ;;  %v15070_v4 = vsel %vm18320_vm2, %v3779_v0, %v18319_v59  ;;  %v18324_v58 = vld [vmem:[#allocation88_spill] sm:$0xff]  ;;  %vm18326_vm1 = vmmov %vm18323_vm9 }
 0x3df   : > { %v10059_v56 = vunpack.i.h.bf16 %v10057_v61  ;;  %v10058_v8 = vunpack.i.l.bf16 %v10057_v61  ;;  %v4339_v18 = vrot.slane %v15070_v4, 4  ;;  %v10255_v22 = vpack.i.bf16 %v18325_v49, %v18324_v58  ;;  %vm18330_vm4 = vmmov %vm18322_vm0 }
 0x3e0   : > { %v4272_v32 = vsel %vm18317_vm3, %v14941_v26, %v10093_v30  ;;  %v10094_v26 = vunpack.i.h.bf16 %v10092_v27  ;;  %vm18329_vm3 = vmmov %vm18322_vm0  ;;  %v10014_v58 = vunpack.i.h.bf16 %v14965_v40  ;;  %v10029_v49 = vunpack.i.h.bf16 %v14996_v2 }
 0x3e1   : > { %v3805_v38 = vsel %vm2410_vm8, %v10054_v37, %v10059_v56  ;;  %v3804_v3 = vsel %vm2410_vm8, %v10053_v7, %v10058_v8  ;;  %v4341_v45 = vrot.slane %v4272_v32, 4  ;;  %10241 = vrot.lane.b32.xlu2 %v10240_v33, %s10398_s24  ;;  %v15090_v27 = vsel %vm18323_vm9, %v4331_v51, %v4339_v18  ;;  %v18327_v33 = vld [vmem:[#allocation51_spill] sm:$0xff]  ;;  %vm18331_vm2 = vmmov %vm18326_vm1 }
 0x3e2   : > { %v3816_v1 = vsel %vm2423_vm6, %v3804_v3, %v10063_v60  ;;  %v15065_v11 = vsel %vm2423_vm6, %v3805_v38, %v10064_v28  ;;  %v10084_v56 = vunpack.i.h.bf16 %v18327_v33  ;;  %v4776_v8 = vadd.f32 %v14615_v5, %v4775_v21  ;;  %v18328_v5 = vld [vmem:[#allocation39_spill] sm:$0xff] }
 0x3e3   : > { %v3828_v57 = vsel %vm2436_vm5, %v3816_v1, %v10078_v35  ;;  %3400 = vrot.lane.b32.xlu1 %v18302_v20, %s10387_s16  ;;  %v4342_v63 = vsel %vm18321_vm10, %v4333_v17, %v4341_v45  ;;  %v10069_v17 = vunpack.i.h.bf16 %v14626_v54  ;;  %v10270_v1 = vpack.i.bf16 %v18328_v5, %v18137_v9  ;;  %vm18332_vm10 = vmmov %vm18326_vm1  ;;  %s10399_s16 = smov 50  }
 0x3e4   : > { %v15080_v15 = vsel %vm18322_vm0, %v3828_v57, %v10094_v26  ;;  %vm18334_vm0 = vcmask 490496   ;;  %vm18335_vm9 = vcmask 949248  }
 0x3e5   : > { %v4349_v52 = vrot.slane %v15080_v15, 4  ;;  %v15083_v6 = vpop.permute.xlu1 %10106  ;;  %v15107_v32 = vpop.permute.xlu2 %10156  ;;  %v4067_v34 = vsel %vm18334_vm0, %v14905_v16, %v10014_v58  ;;  %v18336_v16 = vld [vmem:[#allocation38_spill] sm:$0xff] }
 0x3e6   : > { %v10072_v62 = vpop.permute.xlu0 %10071 }
 0x3e7   : > { %v10074_v46 = vunpack.i.h.bf16 %v10072_v62  ;;  %v4350_v61 = vsel %vm18326_vm1, %v4341_v45, %v4349_v52  ;;  %vm18337_vm1 = vcmask 424960  }
 0x3e8   : > { %v4491_v28 = vpack.c.bf16 %v4350_v61, %v4342_v63  ;;  %v10073_v63 = vunpack.i.l.bf16 %v10072_v62 }
 0x3e9   : > { %v4112_v44 = vsel %vm2332_vm14, %v10069_v17, %v10074_v46  ;;  %10256 = vrot.lane.b32.xlu2 %v10255_v22, %s10395_s25  ;;  %v4843_v51 = vpop.f32.mrf.mxu1 }
 0x3ea   : > { %v15103_v60 = vsel %vm2345_vm15, %v4112_v44, %v10084_v56  ;;  %v15105_v35 = vadd.f32 %v4843_v51, %v4776_v8  ;;  %4920 = vmatmul.bf16.gmra.mxu2 %v4491_v28  ;;  %v10083_v56 = vunpack.i.l.bf16 %v18327_v33  ;;  %v10113_v51 = vunpack.i.l.bf16 %v14989_v29 }
 0x3ed   : > { %v10122_v38 = vpop.permute.xlu1 %10121  ;;  %v15131_v40 = vpop.permute.xlu2 %10171 }
 0x3ee   : > { %v10087_v3 = vpop.permute.xlu0 %10086  ;;  %v10124_v45 = vunpack.i.h.bf16 %v10122_v38  ;;  %v10123_v0 = vunpack.i.l.bf16 %v10122_v38 }
 0x3f0   : > { %v4248_v59 = vsel %vm18329_vm3, %v10093_v30, %v10123_v0  ;;  %v15113_v57 = vsel %vm18330_vm4, %v10094_v26, %v10124_v45  ;;  %v18333_v26 = vunpack.i.l.bf16 %v14626_v54  ;;  %v4080_v54 = vsel %vm2293_vm11, %v4067_v34, %v10029_v49  ;;  %vm18338_vm3 = vmmov %vm18337_vm1  ;;  %v18348_v34 = vld [vmem:[#allocation43_spill] sm:$0xff] }
 0x3f1   : > { %v4343_v21 = vrot.slane %v4248_v59, 4  ;;  %v4351_v46 = vrot.slane %v15113_v57, 4  ;;  %10271 = vrot.lane.b32.xlu2 %v10270_v1, %s10386_s15  ;;  %v10128_v45 = vunpack.i.l.bf16 %v15018_v10  ;;  %v10114_v59 = vunpack.i.h.bf16 %v14989_v29  ;;  %v4845_v57 = vpop.f32.mrf.mxu1  ;;  %s10409_s15 = smov 110  }
 0x3f2   : > { %v3732_v62 = vsel %vm2332_vm14, %v18333_v26, %v10073_v63  ;;  %vm18339_vm4 = vcmask 588800  }
 0x3f3   : > { %v4344_v22 = vsel %vm18331_vm2, %v4335_v13, %v4343_v21  ;;  %v4352_v9 = vsel %vm18332_vm10, %v4343_v21, %v4351_v46  ;;  %v4187_v13 = vrot.slane %v15103_v60, 5  ;;  %v3744_v33 = vsel %vm2345_vm15, %v3732_v62, %v10083_v56  ;;  %vm18342_vm0 = vmmov %vm18339_vm4 }
 0x3f4   : > { %v4492_v30 = vpack.c.bf16 %v4352_v9, %v4344_v22  ;;  %vm18340_vm2 = vcmask 1042432   ;;  %vm18341_vm10 = vcmask 752640   ;;  %v10079_v9 = vunpack.i.h.bf16 %v15013_v25 }
 0x3f5   : > { %v15128_v61 = vpop.permute.xlu1 %10136  ;;  %v15156_v58 = vsel %vm18340_vm2, %v4183_v31, %v4187_v13  ;;  %v15176_v14 = vpop.permute.xlu2 %10186  ;;  %v10088_v56 = vunpack.i.l.bf16 %v10087_v3 }
 0x3f6   : > { %v10102_v2 = vpop.permute.xlu0 %10101  ;;  %v10138_v8 = vunpack.i.l.bf16 %v15128_v61  ;;  %7760 = vmatmul.msk.bf16.gmra.mxu3 %vm18335_vm9, %v4492_v30  ;;  %vm18343_vm9 = vcmask 916480  }
 0x3f7   : > { %v10104_v28 = vunpack.i.h.bf16 %v10102_v2  ;;  %v10103_v44 = vunpack.i.l.bf16 %v10102_v2  ;;  %v18350_v2 = vld [vmem:[#allocation11_spill] sm:$0xff] }
 0x3f8   : > { %v4093_v38 = vsel %vm2306_vm12, %v4080_v54, %v10138_v8 }
 0x3f9   : > { %v3757_v0 = vsel %vm18337_vm1, %v18336_v16, %v10104_v28  ;;  %v3756_v5 = vsel %vm18338_vm3, %v3744_v33, %v10103_v44  ;;  %v4106_v1 = vsel %vm2319_vm13, %v4093_v38, %v10069_v17  ;;  %3435 = vrot.lane.b32.xlu2 %v18302_v20, %s17964_s13  ;;  %vm18344_vm1 = vmmov %vm18340_vm2  ;;  %v10129_v17 = vunpack.i.h.bf16 %v15018_v10 }
 0x3fa   : > { %v3768_v63 = vsel %vm18339_vm4, %v3756_v5, %v10113_v51  ;;  %v4185_v21 = vrot.slane %v4106_v1, 5  ;;  %v3769_v22 = vsel %vm18342_vm0, %v3757_v0, %v10114_v59  ;;  %vm18345_vm3 = vmmov %vm18341_vm10  ;;  %vm18346_vm4 = vcmask 1043456  }
 0x3fb   : > { %v3780_v49 = vsel %vm18341_vm10, %v3768_v63, %v10128_v45  ;;  %v3781_v26 = vsel %vm18345_vm3, %v3769_v22, %v10129_v17  ;;  %vm18347_vm2 = vmmov %vm18343_vm9  ;;  %vm18349_vm10 = vcmask 162816   ;;  %v10139_v45 = vunpack.i.h.bf16 %v15128_v61 }
 0x3fc   : > { %v3792_v20 = vsel %vm18343_vm9, %v3780_v49, %v10053_v7  ;;  %v4186_v29 = vsel %vm18344_vm1, %v4181_v43, %v4185_v21  ;;  %v15174_v7 = vsel %vm2436_vm5, %v15065_v11, %v10079_v9  ;;  %v10089_v43 = vunpack.i.h.bf16 %v10087_v3  ;;  %vm18351_vm0 = vmmov %vm18349_vm10 }
 0x3fd   : > { %v10152_v42 = vpop.permute.xlu1 %10151  ;;  %v4347_v30 = vrot.slane %v3792_v20, 4  ;;  %v15182_v25 = vsel %vm18347_vm2, %v3781_v26, %v10054_v37  ;;  %v4055_v11 = vsel %vm18351_vm0, %v18350_v2, %v10088_v56  ;;  %v10109_v3 = vunpack.i.h.bf16 %v15083_v6  ;;  %vm18352_vm9 = vmmov %vm18346_vm4  ;;  %v3965_v59 = vpop.permute.xlu2 %3964 }
 0x3fe   : > { %v10117_v31 = vpop.permute.xlu0 %10116  ;;  %v4355_v4 = vrot.slane %v15182_v25, 4  ;;  %vm18353_vm1 = vcmask 326656   ;;  %v10143_v0 = vunpack.i.l.bf16 %v15061_v53  ;;  %v10144_v20 = vunpack.i.h.bf16 %v15061_v53 }
 0x3ff   : > { %v4348_v62 = vsel %vm18346_vm4, %v4339_v18, %v4347_v30  ;;  %v4056_v18 = vsel %vm18349_vm10, %v18348_v34, %v10089_v43  ;;  %v10119_v8 = vunpack.i.h.bf16 %v10117_v31  ;;  %v10118_v54 = vunpack.i.l.bf16 %v10117_v31  ;;  %vm18354_vm3 = vmmov %vm18353_vm1 }
 0x400   : > { %v4490_v10 = vpack.c.bf16 %v4348_v62, %v15090_v27  ;;  %v10108_v27 = vunpack.i.l.bf16 %v15083_v6  ;;  %v15196_v39 = vsel %vm18352_vm9, %v4347_v30, %v4355_v4  ;;  %v4062_v51 = vsel %vm18354_vm3, %v4056_v18, %v10109_v3  ;;  %v18358_v3 = vld [vmem:[#allocation59_spill] sm:$0xff] }
 0x401   : > { %vm18355_vm4 = vcmask 490496   ;;  %vm18357_vm10 = vcmask 1042432   ;;  %v10154_v56 = vunpack.i.h.bf16 %v10152_v42  ;;  %vm18359_vm0 = vcmask 424960  }
 0x402   : > { %4852 = vmatmul.bf16.gmra.mxu1 %v4490_v10  ;;  %v4061_v44 = vsel %vm18353_vm1, %v4055_v11, %v10108_v27  ;;  %vm18356_vm2 = vmmov %vm18355_vm4  ;;  %v10153_v10 = vunpack.i.l.bf16 %v10152_v42  ;;  %v10188_v42 = vunpack.i.l.bf16 %v15176_v14  ;;  %vm18363_vm3 = vcmask 588800  }
 0x403   : > { %v4068_v16 = vsel %vm18355_vm4, %v4061_v44, %v10118_v54  ;;  %v4069_v6 = vsel %vm18356_vm2, %v4062_v51, %v10119_v8  ;;  %vm18360_vm9 = vmmov %vm18357_vm10  ;;  %vm18364_vm4 = vcmask 752640   ;;  %vm18365_vm2 = vcmask 916480  }
 0x404   : > { %vm18361_vm1 = vmmov %vm18360_vm9 }
 0x405   : > { %v15191_v28 = vpop.permute.xlu1 %10166 }
 0x406   : > { %v10132_v37 = vpop.permute.xlu0 %10131 }
 0x407   : > { %v10134_v33 = vunpack.i.h.bf16 %v10132_v37  ;;  %v10133_v38 = vunpack.i.l.bf16 %v10132_v37 }
 0x409   : > { %v4081_v5 = vsel %vm2293_vm11, %v4068_v16, %v10133_v38  ;;  %v4082_v1 = vsel %vm2293_vm11, %v4069_v6, %v10134_v33  ;;  %v10158_v6 = vunpack.i.l.bf16 %v15107_v32 }
 0x40a   : > { %v4094_v63 = vsel %vm2306_vm12, %v4081_v5, %v10139_v45  ;;  %v4095_v49 = vsel %vm2306_vm12, %v4082_v1, %v3965_v59 }
 0x40b   : > { %v4107_v22 = vsel %vm2319_vm13, %v4094_v63, %v10143_v0  ;;  %v4108_v9 = vsel %vm2319_vm13, %v4095_v49, %v10144_v20 }
 0x40c   : > { %v4189_v61 = vrot.slane %v4107_v22, 5  ;;  %v4193_v18 = vrot.slane %v4108_v9, 5 }
 0x40d   : > { %v15210_v17 = vpop.permute.xlu1 %10181 }
 0x40e   : > { %v10147_v30 = vpop.permute.xlu0 %10146  ;;  %v4190_v31 = vsel %vm18357_vm10, %v4185_v21, %v4189_v61  ;;  %v10183_v34 = vunpack.i.l.bf16 %v15210_v17  ;;  %v4194_v37 = vsel %vm18360_vm9, %v4189_v61, %v4193_v18  ;;  %vm18366_vm10 = vcmask 1043456  }
 0x40f   : > { %v10149_v26 = vunpack.i.h.bf16 %v10147_v30  ;;  %v10148_v62 = vunpack.i.l.bf16 %v10147_v30  ;;  %v10275_v43 = vpack.i.bf16 %v4190_v31, %v4186_v29  ;;  %v10173_v61 = vunpack.i.l.bf16 %v15131_v40 }
 0x410   : > { %v3758_v29 = vsel %vm18359_vm0, %v18358_v3, %v10183_v34  ;;  %vm18367_vm0 = vcmask 523264  }
 0x411   : > { %v4114_v2 = vsel %vm2332_vm14, %v10144_v20, %v10149_v26  ;;  %v4113_v53 = vsel %vm2332_vm14, %v10143_v0, %v10148_v62  ;;  %10276 = vrot.lane.b32.xlu0 %v10275_v43, %s10398_s24  ;;  %vm18362_vm14 = vmmov %vm18361_vm1  ;;  %v3770_v5 = vsel %vm18363_vm3, %v3758_v29, %v10188_v42  ;;  %v18369_v62 = vld [vmem:[#allocation36_spill] sm:$0xff] }
 0x412   : > { %v4119_v11 = vsel %vm2345_vm15, %v4113_v53, %v10153_v10  ;;  %v4120_v8 = vsel %vm2345_vm15, %v4114_v2, %v10154_v56  ;;  %vm18368_vm9 = vmmov %vm18367_vm0  ;;  %v18377_v29 = vld [vmem:[#allocation72_spill] sm:$0xff] }
 0x413   : > { %v4191_v54 = vrot.slane %v4119_v11, 5  ;;  %v4195_v21 = vrot.slane %v4120_v8, 5  ;;  %v18372_v11 = vld [vmem:[#allocation35_spill] sm:$0xff]  ;;  %vm18373_vm3 = vmmov %vm18367_vm0 }
 0x415   : > { %v15223_v27 = vpop.permute.xlu1 %10196  ;;  %v4196_v44 = vsel %vm18361_vm1, %v4191_v54, %v4195_v21  ;;  %v4192_v51 = vsel %vm18362_vm14, %v4187_v13, %v4191_v54  ;;  %vm18370_vm1 = vmmov %vm18366_vm10  ;;  %v18375_v54 = vld [vmem:[#allocation40_spill] sm:$0xff] }
 0x416   : > { %v15230_v33 = vpop.permute.xlu0 %10161  ;;  %v10198_v38 = vunpack.i.l.bf16 %v15223_v27  ;;  %v10285_v45 = vpack.i.bf16 %v4196_v44, %v4194_v37  ;;  %v10280_v16 = vpack.i.bf16 %v4192_v51, %v15156_v58  ;;  %v10168_v58 = vunpack.i.l.bf16 %v15191_v28  ;;  %vm18371_vm14 = vmmov %vm18370_vm1 }
 0x417   : > { %v10163_v0 = vunpack.i.l.bf16 %v15230_v33  ;;  %v18376_v21 = vunpack.i.h.bf16 %v18375_v54 }
 0x418   : > { %v3782_v1 = vsel %vm18364_vm4, %v3770_v5, %v10198_v38  ;;  %10286 = vrot.lane.b32.xlu2 %v10285_v45, %s10398_s24  ;;  %vm18374_vm4 = vmmov %vm18367_vm0  ;;  %v18378_v38 = vld [vmem:[#allocation31_spill] sm:$0xff]  ;;  %v4777_v5 = vpop.f32.mrf.mxu0 }
 0x419   : > { %v15240_v60 = vsel %vm18365_vm2, %v3782_v1, %v10158_v6  ;;  %10281 = vrot.lane.b32.xlu0 %v10280_v16, %s10398_s24  ;;  %v3806_v13 = vsel %vm2410_vm8, %v10158_v6, %v10163_v0  ;;  %v10212_v16 = vpop.permute.xlu2 %10211  ;;  %v10164_v1 = vunpack.i.h.bf16 %v15230_v33  ;;  %vm18379_vm2 = vmmov %vm18370_vm1  ;;  %v10159_v33 = vunpack.i.h.bf16 %v15107_v32  ;;  %s10400_s24 = smov 122  }
 0x41a   : > { %v4363_v59 = vrot.slane %v15240_v60, 4  ;;  %v3818_v49 = vsel %vm2423_vm6, %v3806_v13, %v10168_v58 }
 0x41b   : > { %v3830_v26 = vsel %vm2436_vm5, %v3818_v49, %v10173_v61 }
 0x41c   : > { %v4364_v63 = vsel %vm18366_vm10, %v4355_v4, %v4363_v59  ;;  %vm18380_vm10 = vmmov %vm18370_vm1 }
 0x41d   : > { %v15252_v22 = vpop.permute.xlu1 %10206  ;;  %v4494_v20 = vpack.c.bf16 %v4364_v63, %v15196_v39 }
 0x41e   : > { %v10177_v9 = vpop.permute.xlu0 %10176 }
 0x41f   : > { %v10179_v30 = vunpack.i.h.bf16 %v10177_v9  ;;  %v10178_v31 = vunpack.i.l.bf16 %v10177_v9  ;;  %4857 = vmatmul.bf16.gmra.mxu1 %v4494_v20 }
 0x420   : > { %3437 = vrot.lane.b32.xlu2 %v13115_v55, %s17964_s13 }
 0x421   : > { %v4274_v25 = vsel %vm18367_vm0, %v15174_v7, %v10178_v31  ;;  %v15262_v4 = vsel %vm18368_vm9, %v3830_v26, %v10179_v30  ;;  %3180 = vrot.lane.b32.xlu0 %v18369_v62, %s10388_s17  ;;  %vm18383_vm0 = vmmov %vm18370_vm1  ;;  %v15317_v26 = vld [vmem:[%s17111_s4] ss:$0 sm:$0xff]  ;;  %vm18385_vm9 = vcmask 949248   ;;  %v3807_v62 = vsel %vm2410_vm8, %v10159_v33, %v10164_v1 }
 0x422   : > { %v4357_v39 = vrot.slane %v4274_v25, 4  ;;  %v4365_v43 = vrot.slane %v15262_v4, 4  ;;  %v4778_v25 = vadd.f32 %v15317_v26, %v4777_v5 }
 0x424   : > { %v4358_v56 = vsel %vm18370_vm1, %v4349_v52, %v4357_v39  ;;  %v4366_v55 = vsel %vm18371_vm14, %v4357_v39, %v4365_v43  ;;  %v4846_v39 = vadd.f32 %v4845_v57, %v4778_v25  ;;  %vm18386_vm1 = vmmov %vm18373_vm3  ;;  %vm18387_vm14 = vcmask 1046528  }
 0x425   : > { %v15273_v10 = vpop.permute.xlu1 %10221  ;;  %v4495_v7 = vpack.c.bf16 %v4366_v55, %v4358_v56  ;;  %v10169_v56 = vunpack.i.h.bf16 %v15191_v28  ;;  %v10184_v57 = vunpack.i.h.bf16 %v15210_v17 }
 0x426   : > { %v10192_v34 = vpop.permute.xlu0 %10191  ;;  %v10223_v18 = vunpack.i.l.bf16 %v15273_v10  ;;  %v4911_v44 = vpop.f32.mrf.mxu2 }
 0x427   : > { %v10194_v2 = vunpack.i.h.bf16 %v10192_v34  ;;  %v10193_v53 = vunpack.i.l.bf16 %v10192_v34  ;;  %4925 = vmatmul.bf16.gmra.mxu2 %v4495_v7  ;;  %v4979_v51 = vpop.f32.mrf.mxu3  ;;  %v4912_v6 = vadd.f32 %v4911_v44, %v15105_v35  ;;  %v18381_v35 = vld [vmem:[#allocation49_spill] sm:$0xff]  ;;  %v10213_v44 = vunpack.i.l.bf16 %v10212_v16 }
 0x428   : > { %v3700_v8 = vsel %vm2293_vm11, %v18372_v11, %v10223_v18  ;;  %v18382_v61 = vrot.slane %v18381_v35, 4  ;;  %v3819_v18 = vsel %vm2423_vm6, %v3807_v62, %v10169_v56 }
 0x429   : > { %v4250_v15 = vsel %vm18373_vm3, %v10178_v31, %v10193_v53  ;;  %v15280_v52 = vsel %vm18374_vm4, %v10179_v30, %v10194_v2  ;;  %v3712_v3 = vsel %vm2306_vm12, %v3700_v8, %v18376_v21  ;;  %3479 = vrot.lane.b32.xlu0 %v18377_v29, %s17488_s23  ;;  %v15301_v63 = vadd.f32 %v4979_v51, %v4912_v6  ;;  %vm18388_vm3 = vmmov %vm18386_vm1 }
 0x42a   : > { %v4359_v42 = vrot.slane %v4250_v15, 4  ;;  %v4367_v37 = vrot.slane %v15280_v52, 4  ;;  %v15290_v45 = vsel %vm2319_vm13, %v3712_v3, %v18378_v38  ;;  %v10209_v2 = vunpack.i.h.bf16 %v15252_v22  ;;  %vm18389_vm4 = vmmov %vm18383_vm0  ;;  %v18400_v52 = vld [vmem:[#allocation99_spill] sm:$0xff] }
 0x42b   : > { %v4377_v0 = vrot.slane %v15290_v45, 4  ;;  %v10208_v53 = vunpack.i.l.bf16 %v15252_v22  ;;  %v10174_v15 = vunpack.i.h.bf16 %v15131_v40  ;;  %v5042_v40 = vrot.slane %v15301_v63, 1 }
 0x42c   : > { %v4360_v13 = vsel %vm18379_vm2, %v4351_v46, %v4359_v42  ;;  %v4368_v58 = vsel %vm18380_vm10, %v4359_v42, %v4367_v37  ;;  %v18384_v46 = vld [vmem:[#allocation80_spill] sm:$0xff]  ;;  %v10214_v42 = vunpack.i.h.bf16 %v10212_v16  ;;  %vm18391_vm2 = vcmask 424960   ;;  %vm18392_vm10 = vmmov %vm18386_vm1 }
 0x42d   : > { %v15303_v49 = vpop.permute.xlu1 %10236  ;;  %v4496_v20 = vpack.c.bf16 %v4368_v58, %v4360_v13  ;;  %v4378_v9 = vsel %vm18383_vm0, %v18382_v61, %v4377_v0  ;;  %v3831_v22 = vsel %vm2436_vm5, %v3819_v18, %v10174_v15  ;;  %vm18393_vm0 = vmmov %vm18386_vm1  ;;  %v10199_v15 = vunpack.i.h.bf16 %v15223_v27 }
 0x42e   : > { %v15311_v30 = vpop.permute.xlu0 %10201  ;;  %v4497_v31 = vpack.c.bf16 %v4378_v9, %v18384_v46  ;;  %v4913_v34 = vpop.f32.mrf.mxu2 }
 0x42f   : > { %7761 = vmatmul.msk.bf16.gmra.mxu3 %vm18385_vm9, %v4496_v20  ;;  %v10204_v55 = vunpack.i.h.bf16 %v15311_v30  ;;  %v10203_v7 = vunpack.i.l.bf16 %v15311_v30  ;;  %v4914_v11 = vadd.f32 %v4913_v34, %v4846_v39  ;;  %v4981_v54 = vpop.f32.mrf.mxu3  ;;  %vm18394_vm9 = vmmov %vm18389_vm4 }
 0x430   : > { %4794 = vmatmul.bf16.gmra.mxu0 %v4497_v31 }
 0x431   : > { %v3808_v28 = vsel %vm2410_vm8, %v10203_v7, %v10208_v53  ;;  %v3809_v3 = vsel %vm2410_vm8, %v10204_v55, %v10209_v2  ;;  %v15337_v29 = vadd.f32 %v4981_v54, %v4914_v11  ;;  %v18390_v2 = vld [vmem:[#allocation18_spill] sm:$0xff] }
 0x432   : > { %v3820_v20 = vsel %vm2423_vm6, %v3808_v28, %v10213_v44  ;;  %v3821_v35 = vsel %vm2423_vm6, %v3809_v3, %v10214_v42  ;;  %v3759_v53 = vsel %vm18391_vm2, %v18390_v2, %v10184_v57  ;;  %v10189_v42 = vunpack.i.h.bf16 %v15176_v14 }
 0x433   : > { %v10227_v8 = vpop.permute.xlu2 %10226  ;;  %v5044_v6 = vrot.slane %v15337_v29, 1  ;;  %vm18399_vm2 = vcmask 949248  }
 0x434   : > { %v10228_v21 = vunpack.i.l.bf16 %v10227_v8  ;;  %v10229_v13 = vunpack.i.h.bf16 %v10227_v8 }
 0x435   : > { %v15340_v38 = vpop.permute.xlu1 %10251  ;;  %v15352_v16 = vsel %vm18387_vm14, %v5042_v40, %v5044_v6 }
 0x436   : > { %v10217_v51 = vpop.permute.xlu0 %10216  ;;  %v4276_v58 = vsel %vm18386_vm1, %v3831_v22, %v10228_v21  ;;  %v5123_v46 = vmax.f32 %v15301_v63, %v15352_v16  ;;  %vm18395_vm1 = vmmov %vm18389_vm4 }
 0x437   : > { %v10219_v5 = vunpack.i.h.bf16 %v10217_v51  ;;  %v10218_v1 = vunpack.i.l.bf16 %v10217_v51  ;;  %v4373_v25 = vrot.slane %v4276_v58, 4  ;;  %vm18396_vm14 = vmmov %vm18395_vm1  ;;  %v18401_v58 = vld [vmem:[#allocation4_spill] sm:$0xff] }
 0x439   : > { %v3832_v61 = vsel %vm2436_vm5, %v3820_v20, %v10218_v1  ;;  %v15356_v9 = vsel %vm2436_vm5, %v3821_v35, %v10219_v5  ;;  %v4374_v3 = vsel %vm18394_vm9, %v4365_v43, %v4373_v25 }
 0x43a   : > { %v15362_v31 = vsel %vm18388_vm3, %v3832_v61, %v10229_v13  ;;  %vm18397_vm3 = vcmask 588800   ;;  %v10238_v61 = vunpack.i.l.bf16 %v15303_v49 }
 0x43b   : > { %v4381_v62 = vrot.slane %v15362_v31, 4  ;;  %v10242_v39 = vpop.permute.xlu2 %10241  ;;  %v3771_v4 = vsel %vm18397_vm3, %v3759_v53, %v10189_v42  ;;  %vm18406_vm9 = vmmov %vm18397_vm3  ;;  %v18409_v42 = vld [vmem:[#allocation46_spill] sm:$0xff]  ;;  %vm18410_vm3 = vcmask 1043456  }
 0x43c   : > { %v10244_v56 = vunpack.i.h.bf16 %v10242_v39  ;;  %v10243_v34 = vunpack.i.l.bf16 %v10242_v39 }
 0x43d   : > { %v4382_v18 = vsel %vm18389_vm4, %v4373_v25, %v4381_v62  ;;  %v15380_v44 = vpop.permute.xlu1 %10266  ;;  %vm18398_vm4 = vcmask 752640  }
 0x43e   : > { %v4252_v17 = vsel %vm18392_vm10, %v10228_v21, %v10243_v34  ;;  %v15372_v11 = vsel %vm18393_vm0, %v10229_v13, %v10244_v56  ;;  %v10232_v8 = vpop.permute.xlu0 %10231  ;;  %v4499_v22 = vpack.c.bf16 %v4382_v18, %v4374_v3  ;;  %v10224_v21 = vunpack.i.h.bf16 %v15273_v10  ;;  %v18404_v56 = vld [vmem:[#allocation22_spill] sm:$0xff] }
 0x43f   : > { %v4375_v54 = vrot.slane %v4252_v17, 4  ;;  %v4383_v28 = vrot.slane %v15372_v11, 4  ;;  %v10233_v51 = vunpack.i.l.bf16 %v10232_v8  ;;  %v3783_v14 = vsel %vm18398_vm4, %v3771_v4, %v10199_v15 }
 0x440   : > { %4930 = vmatmul.bf16.gmra.mxu2 %v4499_v22  ;;  %v10254_v13 = vunpack.i.h.bf16 %v15340_v38  ;;  %vm18402_vm10 = vcmask 424960   ;;  %vm18403_vm0 = vcmask 916480   ;;  %v18405_v34 = vunpack.i.l.bf16 %v18404_v56 }
 0x441   : > { %v4376_v5 = vsel %vm18395_vm1, %v4367_v37, %v4375_v54  ;;  %v4384_v27 = vsel %vm18396_vm14, %v4375_v54, %v4383_v28  ;;  %v3701_v37 = vsel %vm2293_vm11, %v18400_v52, %v10224_v21  ;;  %v3760_v20 = vsel %vm18402_vm10, %v18401_v58, %v10233_v51  ;;  %vm18407_vm1 = vmmov %vm18398_vm4  ;;  %v18414_v52 = vld [vmem:[#allocation68_spill] sm:$0xff] }
 0x442   : > { %v4500_v43 = vpack.c.bf16 %v4384_v27, %v4376_v5  ;;  %v3795_v35 = vsel %vm18403_vm0, %v3783_v14, %v10159_v33  ;;  %v3713_v18 = vsel %vm2306_vm12, %v3701_v37, %v18405_v34  ;;  %v3772_v2 = vsel %vm18406_vm9, %v3760_v20, %v10238_v61  ;;  %vm18408_vm14 = vmmov %vm18403_vm0  ;;  %v18412_v27 = vld [vmem:[#allocation82_spill] sm:$0xff] }
 0x443   : > { %v15391_v1 = vpop.permute.xlu2 %10256  ;;  %v4371_v53 = vrot.slane %v3795_v35, 4  ;;  %v10234_v15 = vunpack.i.h.bf16 %v10232_v8  ;;  %v3725_v22 = vsel %vm2319_vm13, %v3713_v18, %v18409_v42  ;;  %vm18411_vm4 = vmmov %vm18410_vm3  ;;  %v18415_v37 = vunpack.i.l.bf16 %v18414_v52  ;;  %v18416_v20 = vld [vmem:[#allocation50_spill] sm:$0xff] }
 0x444   : > { %v10259_v10 = vunpack.i.h.bf16 %v15391_v1  ;;  %7762 = vmatmul.msk.bf16.gmra.mxu3 %vm18399_vm2, %v4500_v43  ;;  %v4385_v14 = vrot.slane %v3725_v22, 4  ;;  %vm18413_vm2 = vmmov %vm18402_vm10  ;;  %v10269_v61 = vunpack.i.h.bf16 %v15380_v44 }
 0x445   : > { %v3399_v33 = vpop.permute.xlu1 %3398  ;;  %v4372_v51 = vsel %vm18410_vm3, %v4363_v59, %v4371_v53  ;;  %v3761_v8 = vsel %vm18413_vm2, %v14549_v19, %v10234_v15  ;;  %v10239_v59 = vunpack.i.h.bf16 %v15303_v49  ;;  %vm18417_vm10 = vmmov %vm18406_vm9 }
 0x446   : > { %v3811_v57 = vsel %vm2410_vm8, %v10254_v13, %v10259_v10  ;;  %v10247_v25 = vpop.permute.xlu0 %10246  ;;  %vm18418_vm0 = vmmov %vm18410_vm3 }
 0x447   : > { %v10248_v39 = vunpack.i.l.bf16 %v10247_v25  ;;  %v10249_v10 = vunpack.i.h.bf16 %v10247_v25  ;;  %v3773_v25 = vsel %vm18417_vm10, %v3761_v8, %v10239_v59  ;;  %v4386_v56 = vsel %vm18418_vm0, %v4377_v0, %v4385_v14  ;;  %vm18419_vm9 = vmmov %vm18407_vm1 }
 0x448   : > { %vm18422_vm3 = vmmov %vm18417_vm10 }
 0x449   : > { %v3784_v17 = vsel %vm18407_vm1, %v3772_v2, %v10248_v39  ;;  %v3785_v34 = vsel %vm18419_vm9, %v3773_v25, %v10249_v10  ;;  %vm18420_vm1 = vmmov %vm18413_vm2  ;;  %vm18424_vm2 = vcmask 916480  }
 0x44a   : > { %v3796_v32 = vsel %vm18408_vm14, %v3784_v17, %v10203_v7  ;;  %v3762_v49 = vsel %vm18420_vm1, %v18263_v36, %v3399_v33  ;;  %vm18421_vm14 = vmmov %vm18418_vm0  ;;  %v3797_v36 = vsel %vm18424_vm2, %v3785_v34, %v10204_v55  ;;  %vm18428_vm1 = vcmask 1046528  }
 0x44b   : > { %v4379_v54 = vrot.slane %v3796_v32, 4  ;;  %v10272_v3 = vpop.permute.xlu2 %10271  ;;  %vm18425_vm10 = vmmov %vm18424_vm2  ;;  %v4387_v42 = vrot.slane %v3797_v36, 4 }
 0x44c   : > { %v10273_v21 = vunpack.i.l.bf16 %v10272_v3  ;;  %v10274_v8 = vunpack.i.h.bf16 %v10272_v3  ;;  %vm18435_vm2 = vmmov %vm18418_vm0 }
 0x44d   : > { %v4380_v5 = vsel %vm18411_vm4, %v4371_v53, %v4379_v54  ;;  %v10253_v53 = vunpack.i.l.bf16 %v15340_v38  ;;  %v3478_v17 = vpop.permute.xlu1 %3477  ;;  %vm18423_vm4 = vmmov %vm18419_vm9 }
 0x44e   : > { %v3702_v4 = vsel %vm2293_vm11, %v18412_v27, %v10273_v21  ;;  %v15423_v43 = vpop.permute.xlu0 %10261  ;;  %v4498_v7 = vpack.c.bf16 %v4380_v5, %v4372_v51  ;;  %vm18426_vm9 = vmmov %vm18418_vm0  ;;  %v4780_v5 = vpop.f32.mrf.mxu0 }
 0x44f   : > { %v3714_v58 = vsel %vm2306_vm12, %v3702_v4, %v18415_v37  ;;  %v10264_v60 = vunpack.i.h.bf16 %v15423_v43  ;;  %v4388_v21 = vsel %vm18426_vm9, %v4379_v54, %v4387_v42  ;;  %v4848_v27 = vpop.f32.mrf.mxu1  ;;  %v4781_v30 = vadd.f32 %v15317_v26, %v4780_v5  ;;  %v4916_v4 = vpop.f32.mrf.mxu2 }
 0x450   : > { %4862 = vmatmul.bf16.gmra.mxu1 %v4498_v7  ;;  %v15434_v35 = vsel %vm2319_vm13, %v3714_v58, %v18416_v20  ;;  %v18427_v58 = vld [vmem:[#allocation41_spill] sm:$0xff]  ;;  %v10268_v5 = vunpack.i.l.bf16 %v15380_v44  ;;  %v5157_v44 = vrot.slane %v5123_v46, 4 }
 0x451   : > { %v3823_v39 = vsel %vm2423_vm6, %v3811_v57, %v10264_v60  ;;  %v4393_v19 = vrot.slane %v15434_v35, 4  ;;  %v4849_v55 = vadd.f32 %v4848_v27, %v4781_v30  ;;  %v15470_v60 = vsel %vm2293_vm11, %v18427_v58, %v10274_v8  ;;  %vm18429_vm11 = vmmov %vm18428_vm1 }
 0x452   : > { %v15450_v57 = vsel %vm2436_vm5, %v3823_v39, %v10269_v61 }
 0x453   : > { %v3436_v18 = vpop.permute.xlu2 %3435  ;;  %v4394_v2 = vsel %vm18421_vm14, %v4385_v14, %v4393_v19  ;;  %v4984_v14 = vpop.f32.mrf.mxu3  ;;  %v4917_v10 = vadd.f32 %v4916_v4, %v4849_v55 }
 0x454   : > { %v3774_v45 = vsel %vm18422_vm3, %v3762_v49, %v3436_v18  ;;  %v4501_v32 = vpack.c.bf16 %v4394_v2, %v4386_v56  ;;  %v10258_v49 = vunpack.i.l.bf16 %v15391_v1  ;;  %v10263_v2 = vunpack.i.l.bf16 %v15423_v43  ;;  %vm18433_vm3 = vmmov %vm18428_vm1 }
 0x455   : > { %v3786_v0 = vsel %vm18423_vm4, %v3774_v45, %v3478_v17  ;;  %v4985_v54 = vadd.f32 %v4984_v14, %v4917_v10  ;;  %vm18434_vm4 = vmmov %vm18418_vm0 }
 0x456   : > { %v15459_v33 = vsel %vm18425_vm10, %v3786_v0, %v10253_v53  ;;  %4799 = vmatmul.bf16.gmra.mxu0 %v4501_v32  ;;  %v4782_v7 = vpop.f32.mrf.mxu0  ;;  %vm18436_vm10 = vmmov %vm18418_vm0 }
 0x457   : > { %v4395_v15 = vrot.slane %v15459_v33, 4  ;;  %v4850_v52 = vpop.f32.mrf.mxu1  ;;  %v4783_v37 = vadd.f32 %v15317_v26, %v4782_v7  ;;  %v4918_v20 = vpop.f32.mrf.mxu2  ;;  %v5045_v39 = vrot.slane %v4985_v54, 1 }
 0x459   : > { %v4396_v22 = vsel %vm18418_vm0, %v4387_v42, %v4395_v15  ;;  %v4851_v59 = vadd.f32 %v4850_v52, %v4783_v37  ;;  %v5046_v34 = vsel %vm18428_vm1, %v5044_v6, %v5045_v39  ;;  %v3810_v42 = vsel %vm2410_vm8, %v10253_v53, %v10258_v49  ;;  %vm18430_vm8 = vmmov %vm18428_vm1 }
 0x45a   : > { %v4502_v51 = vpack.c.bf16 %v4396_v22, %v4388_v21  ;;  %v5078_v17 = vmax.f32 %v15337_v29, %v5046_v34  ;;  %v5043_v53 = vsel %vm18430_vm8, %v5041_v48, %v5042_v40  ;;  %vm18440_vm8 = vmmov %vm18418_vm0 }
 0x45b   : > { %v4919_v25 = vadd.f32 %v4918_v20, %v4851_v59  ;;  %v4986_v56 = vpop.f32.mrf.mxu3  ;;  %v5077_v20 = vmax.f32 %v14952_v24, %v5043_v53 }
 0x45c   : > { %v5158_v1 = vrot.slane %v5078_v17, 4 }
 0x45d   : > { %v4987_v3 = vadd.f32 %v4986_v56, %v4919_v25 }
 0x45e   : > { %v4785_v61 = vpop.f32.mrf.mxu0 }
 0x45f   : > { %v4786_v18 = vadd.f32 %v15317_v26, %v4785_v61  ;;  %v5047_v0 = vrot.slane %v4987_v3, 1  ;;  %v5159_v61 = vsel %vm18434_vm4, %v5157_v44, %v5158_v1  ;;  %vm18444_vm4 = vmmov %vm18418_vm0 }
 0x460   : > { %4867 = vmatmul.bf16.gmra.mxu1 %v4502_v51  ;;  %v3822_v51 = vsel %vm2423_vm6, %v3810_v42, %v10263_v2  ;;  %vm18431_vm6 = vcmask 523264   ;;  %v15503_v56 = vmax.f32 %v5077_v20, %v5159_v61 }
 0x461   : > { %v5048_v30 = vsel %vm18429_vm11, %v5045_v39, %v5047_v0  ;;  %v3834_v7 = vsel %vm2436_vm5, %v3822_v51, %v10268_v5  ;;  %vm18432_vm14 = vmmov %vm18431_vm6 }
 0x462   : > { %v5079_v52 = vmax.f32 %v4985_v54, %v5048_v30  ;;  %vm18437_vm9 = vmmov %vm18431_vm6 }
 0x463   : > { %vm18438_vm1 = vmmov %vm18431_vm6 }
 0x464   : > { %v5160_v34 = vrot.slane %v5079_v52, 4  ;;  %vm18439_vm11 = vmmov %vm18433_vm3 }
 0x466   : > { %v4787_v21 = vpop.f32.mrf.mxu0 }
 0x467   : > { %v4788_v4 = vadd.f32 %v15317_v26, %v4787_v21 }
 0x46d   : > { %v4921_v45 = vpop.f32.mrf.mxu2 }
 0x472   : > { %v10287_v46 = vpop.permute.xlu2 %10286 }
 0x473   : > { %v10289_v44 = vunpack.i.h.bf16 %v10287_v46 }
 0x475   : > { %v4923_v39 = vpop.f32.mrf.mxu2 }
 0x479   : > { %v4989_v22 = vpop.f32.mrf.mxu3 }
 0x47f   : > { %v4853_v32 = vpop.f32.mrf.mxu1 }
 0x480   : > { %v4854_v36 = vadd.f32 %v4853_v32, %v4786_v18 }
 0x481   : > { %v4991_v49 = vpop.f32.mrf.mxu3 }
 0x482   : > { %v4922_v6 = vadd.f32 %v4921_v45, %v4854_v36 }
 0x483   : > { %v10277_v27 = vpop.permute.xlu0 %10276 }
 0x484   : > { %v4990_v43 = vadd.f32 %v4989_v22, %v4922_v6  ;;  %v10279_v55 = vunpack.i.h.bf16 %v10277_v27  ;;  %v10278_v29 = vunpack.i.l.bf16 %v10277_v27  ;;  %v5203_v6 = vrot.slane %v14715_v50, 2 }
 0x486   : > { %v5049_v14 = vrot.slane %v4990_v43, 1  ;;  %v4278_v8 = vsel %vm18431_vm6, %v15356_v9, %v10278_v29  ;;  %v4279_v10 = vsel %vm18432_vm14, %v3834_v7, %v10279_v55  ;;  %vm18441_vm6 = vmmov %vm18418_vm0 }
 0x487   : > { %v4389_v37 = vrot.slane %v4278_v8, 4  ;;  %v4397_v58 = vrot.slane %v4279_v10, 4  ;;  %v4855_v59 = vpop.f32.mrf.mxu1  ;;  %vm18442_vm14 = vmmov %vm18438_vm1  ;;  %v3401_v8 = vpop.permute.xlu1 %3400 }
 0x488   : > { %v5100_v48 = vsel %vm18433_vm3, %v5047_v0, %v5049_v14  ;;  %v4856_v40 = vadd.f32 %v4855_v59, %v4788_v4  ;;  %vm18443_vm3 = vcmask 949248   ;;  %v5207_v59 = vrot.slane %v14715_v50, 4 }
 0x489   : > { %v5124_v63 = vmax.f32 %v4987_v3, %v5100_v48  ;;  %v4390_v16 = vsel %vm18435_vm2, %v4381_v62, %v4389_v37  ;;  %v4398_v9 = vsel %vm18436_vm10, %v4389_v37, %v4397_v58  ;;  %v10288_v3 = vunpack.i.l.bf16 %v10287_v46  ;;  %vm18445_vm2 = vmmov %vm18418_vm0  ;;  %v3438_v37 = vpop.permute.xlu2 %3437 }
 0x48a   : > { %v4924_v54 = vadd.f32 %v4923_v39, %v4856_v40  ;;  %v4503_v25 = vpack.c.bf16 %v4398_v9, %v4390_v16  ;;  %vm18446_vm10 = vmmov %vm18418_vm0 }
 0x48b   : > { %v5161_v24 = vrot.slane %v5124_v63, 4  ;;  %v10282_v18 = vpop.permute.xlu0 %10281 }
 0x48c   : > { %v15505_v2 = vadd.f32 %v4991_v49, %v4924_v54  ;;  %v10284_v45 = vunpack.i.h.bf16 %v10282_v18  ;;  %v10283_v32 = vunpack.i.l.bf16 %v10282_v18  ;;  %4935 = vmatmul.bf16.gmra.mxu2 %v4503_v25  ;;  %v4790_v25 = vpop.f32.mrf.mxu0 }
 0x48d   : > { %v5162_v31 = vsel %vm18418_vm0, %v5160_v34, %v5161_v24  ;;  %vm18448_vm0 = vmmov %vm18438_vm1  ;;  %v4791_v49 = vadd.f32 %v15317_v26, %v4790_v25 }
 0x48e   : > { %v5050_v62 = vrot.slane %v15505_v2, 1  ;;  %v4254_v0 = vsel %vm18437_vm9, %v10278_v29, %v10283_v32  ;;  %v4255_v36 = vsel %vm18438_vm1, %v10279_v55, %v10284_v45  ;;  %v15511_v42 = vmax.f32 %v5078_v17, %v5162_v31 }
 0x48f   : > { %v4391_v22 = vrot.slane %v4254_v0, 4  ;;  %v4399_v21 = vrot.slane %v4255_v36, 4  ;;  %v4280_v17 = vsel %vm18442_vm14, %v15450_v57, %v10288_v3  ;;  %v4256_v40 = vsel %vm18448_vm0, %v10288_v3, %v10289_v44  ;;  %vm18454_vm14 = vmmov %vm18443_vm3  ;;  %v8760_v44 = vld [vmem:[%s17112_s5 + $0xcc] sm:$0xf0] }
 0x490   : > { %v5051_v51 = vsel %vm18439_vm11, %v5049_v14, %v5050_v62  ;;  %v5289_v5 = vrot.slane %v15511_v42, 2  ;;  %v4405_v11 = vrot.slane %v4280_v17, 4  ;;  %vm18449_vm9 = vcmask 588800  }
 0x491   : > { %v15518_v1 = vmax.f32 %v4990_v43, %v5051_v51  ;;  %v4392_v27 = vsel %vm18440_vm8, %v4383_v28, %v4391_v22  ;;  %v4400_v30 = vsel %vm18441_vm6, %v4391_v22, %v4399_v21  ;;  %vm18450_vm1 = vcmask 752640   ;;  %vm18452_vm8 = vmmov %vm18445_vm2 }
 0x492   : > { %v10290_v55 = vpack.i.bf16 %v5203_v6, %v5289_v5  ;;  %v4504_v29 = vpack.c.bf16 %v4400_v30, %v4392_v27  ;;  %v4406_v10 = vsel %vm18445_vm2, %v4397_v58, %v4405_v11  ;;  %vm18451_vm11 = vcmask 916480   ;;  %vm18453_vm6 = vmmov %vm18445_vm2 }
 0x493   : > { %v5163_v4 = vrot.slane %v15518_v1, 4  ;;  %v3181_v53 = vpop.permute.xlu0 %3180  ;;  %v4507_v61 = vpack.c.bf16 %v4406_v10, %v4406_v10 }
 0x494   : > { %v3715_v7 = vsel %vm2306_vm12, %v15470_v60, %v3181_v53  ;;  %10291 = vrot.lane.b32.xlu1 %v10290_v55, %s10399_s16  ;;  %7763 = vmatmul.msk.bf16.gmra.mxu3 %vm18443_vm3, %v4504_v29  ;;  %vm18455_vm3 = vcmask 1046528  }
 0x495   : > { %v3727_v28 = vsel %vm2319_vm13, %v3715_v7, %v14646_v23  ;;  %v5164_v43 = vsel %vm18444_vm4, %v5161_v24, %v5163_v4  ;;  %vm18447_vm13 = vcmask 424960   ;;  %vm18456_vm4 = vmmov %vm18455_vm3  ;;  %v5219_v7 = vrot.slane %v14856_v12, 2 }
 0x496   : > { %v4401_v57 = vrot.slane %v3727_v28, 4  ;;  %v15533_v14 = vmax.f32 %v5079_v52, %v5164_v43  ;;  %v3763_v23 = vsel %vm18447_vm13, %v14799_v41, %v3401_v8  ;;  %v8764_v28 = vld [vmem:[%s17112_s5 + $0xec] sm:$0xf0]  ;;  %v7863_v43 = vld [vmem:[%s17112_s5 + $0xc0] sm:$0xf]  ;;  %vm18458_vm13 = vmmov %vm18445_vm2 }
 0x497   : > { %v3775_v39 = vsel %vm18449_vm9, %v3763_v23, %v3438_v37  ;;  %v7864_v37 = vor.u32 %v8760_v44, %v7863_v43  ;;  %vm18459_vm0 = vmmov %vm18455_vm3  ;;  %v8796_v44 = vld [vmem:[%s17112_s5 + $0x1ec] sm:$0xf0]  ;;  %vm5263_vm9 = vcmask 408576  }
 0x498   : > { %v4402_v60 = vsel %vm18446_vm10, %v4393_v19, %v4401_v57  ;;  %v5294_v20 = vrot.slane %v15533_v14, 4  ;;  %v4407_v19 = vrot.slane %v4256_v40, 4  ;;  %vm18457_vm10 = vmmov %vm18455_vm3 }
 0x499   : > { %v4505_v48 = vpack.c.bf16 %v4402_v60, %v4402_v60 }
 0x49a   : > { %v10295_v52 = vpack.i.bf16 %v5207_v59, %v5294_v20  ;;  %v4408_v41 = vsel %vm18452_vm8, %v4399_v21, %v4407_v19 }
 0x49b   : > { %v3480_v58 = vpop.permute.xlu0 %3479  ;;  %4804 = vmatmul.bf16.gmra.mxu0 %v4505_v48  ;;  %v4508_v54 = vpack.c.bf16 %v4408_v41, %v4408_v41  ;;  %v7831_v41 = vld [vmem:[%s17112_s5 + $0x80] sm:$0xf] }
 0x49c   : > { %v3787_v35 = vsel %vm18450_vm1, %v3775_v39, %v3480_v58  ;;  %10296 = vrot.lane.b32.xlu2 %v10295_v52, %s10388_s17  ;;  %4940 = vmatmul.bf16.gmra.mxu2 %v4507_v61  ;;  %v4858_v34 = vpop.f32.mrf.mxu1  ;;  %vm18461_vm1 = vmmov %vm18445_vm2 }
 0x49d   : > { %v3799_v63 = vsel %vm18451_vm11, %v3787_v35, %v10254_v13  ;;  %v4859_v38 = vadd.f32 %v4858_v34, %v4791_v49  ;;  %v4792_v13 = vpop.f32.mrf.mxu0  ;;  %vm18462_vm11 = vmmov %vm18459_vm0 }
 0x49e   : > { %v4403_v16 = vrot.slane %v3799_v63, 4  ;;  %v4793_v33 = vadd.f32 %v15317_v26, %v4792_v13  ;;  %v7847_v63 = vld [vmem:[%s17112_s5 + $0xa0] sm:$0xf]  ;;  %vm18463_vm8 = vmmov %vm18461_vm1 }
 0x4a0   : > { %v4404_v9 = vsel %vm18453_vm6, %v4395_v15, %v4403_v16  ;;  %v8756_v16 = vld [vmem:[%s17112_s5 + $0xac] sm:$0xf0]  ;;  %vm18464_vm6 = vmmov %vm18459_vm0 }
 0x4a1   : > { %v4506_v46 = vpack.c.bf16 %v4404_v9, %v4404_v9 }
 0x4a3   : > { %4872 = vmatmul.bf16.gmra.mxu1 %v4506_v46  ;;  %v7848_v46 = vor.u32 %v8756_v16, %v7847_v63 }
 0x4a4   : > { %7764 = vmatmul.msk.bf16.gmra.mxu3 %vm18454_vm14, %v4508_v54  ;;  %v4860_v3 = vpop.f32.mrf.mxu1  ;;  %v8752_v54 = vld [vmem:[%s17112_s5 + $0x8c] sm:$0xf0]  ;;  %vm18465_vm14 = vmmov %vm18461_vm1 }
 0x4a5   : > { %v4861_v15 = vadd.f32 %v4860_v3, %v4793_v33  ;;  %v7832_v49 = vor.u32 %v8752_v54, %v7831_v41  ;;  %v5227_v3 = vrot.slane %v14856_v12, 6  ;;  %v8119_v54 = vld [vmem:[%s17112_s5 + $0x2c0] sm:$0xf] }
 0x4aa   : > { %v4926_v24 = vpop.f32.mrf.mxu2 }
 0x4ab   : > { %v4927_v18 = vadd.f32 %v4926_v24, %v4859_v38 }
 0x4ad   : > { %v4795_v53 = vpop.f32.mrf.mxu0 }
 0x4ae   : > { %v4796_v57 = vadd.f32 %v15317_v26, %v4795_v53  ;;  %v8740_v53 = vld [vmem:[%s17112_s5 + $0x2c] sm:$0xf0] }
 0x4b2   : > { %v4994_v45 = vpop.f32.mrf.mxu3  ;;  %v4928_v31 = vpop.f32.mrf.mxu2 }
 0x4b3   : > { %v4995_v32 = vadd.f32 %v4994_v45, %v4927_v18  ;;  %v4929_v36 = vadd.f32 %v4928_v31, %v4861_v15  ;;  %v7815_v45 = vld [vmem:[%s17112_s5 + $0x60] sm:$0xf]  ;;  %v5223_v15 = vrot.slane %v14856_v12, 4 }
 0x4b5   : > { %v5052_v0 = vrot.slane %v4995_v32, 1  ;;  %v4797_v48 = vpop.f32.mrf.mxu0 }
 0x4b6   : > { %v4798_v40 = vadd.f32 %v15317_v26, %v4797_v48 }
 0x4b7   : > { %v5053_v21 = vsel %vm18455_vm3, %v5050_v62, %v5052_v0  ;;  %vm5272_vm3 = vcmask 769024  }
 0x4b8   : > { %v5081_v5 = vmax.f32 %v15505_v2, %v5053_v21  ;;  %v7879_v2 = vld [vmem:[%s17112_s5 + $0xe0] sm:$0xf] }
 0x4ba   : > { %v4996_v22 = vpop.f32.mrf.mxu3  ;;  %v5165_v17 = vrot.slane %v5081_v5, 4 }
 0x4bb   : > { %v4997_v51 = vadd.f32 %v4996_v22, %v4929_v36 }
 0x4bd   : > { %v5054_v6 = vrot.slane %v4997_v51, 1 }
 0x4bf   : > { %v5101_v27 = vsel %vm18456_vm4, %v5052_v0, %v5054_v6  ;;  %vm5266_vm4 = vcmask 179200  }
 0x4c0   : > { %v5125_v30 = vmax.f32 %v4995_v32, %v5101_v27  ;;  %v8748_v32 = vld [vmem:[%s17112_s5 + $0x6c] sm:$0xf0] }
 0x4c1   : > { %v7816_v22 = vor.u32 %v8748_v32, %v7815_v45 }
 0x4c2   : > { %v5166_v55 = vrot.slane %v5125_v30, 4  ;;  %v5298_v30 = vrot.slane %v15533_v14, 6  ;;  %v8736_v14 = vld [vmem:[%s17112_s5 + $0xc] sm:$0xf0] }
 0x4c3   : > { %v4931_v8 = vpop.f32.mrf.mxu2 }
 0x4c4   : > { %v5167_v29 = vsel %vm18445_vm2, %v5165_v17, %v5166_v55  ;;  %v5211_v17 = vrot.slane %v14715_v50, 6  ;;  %vm5281_vm2 = vcmask 719872  }
 0x4c5   : > { %v15564_v4 = vmax.f32 %v15518_v1, %v5167_v29  ;;  %v7880_v1 = vor.u32 %v8764_v28, %v7879_v2  ;;  %v7783_v29 = vld [vmem:[%s17112_s5 + $0x20] sm:$0xf]  ;;  %v8828_v2 = vld [vmem:[%s17112_s5 + $0x2ec] sm:$0xf0] }
 0x4c7   : > { %v5306_v11 = vrot.slane %v15564_v4, 2  ;;  %6615 = vmatpush.bf16.msra.mxu0 %v7880_v1  ;;  %v4999_v59 = vpop.f32.mrf.mxu3  ;;  %v8007_v1 = vld [vmem:[%s17112_s5 + $0x1e0] sm:$0xf] }
 0x4c9   : > { %v10300_v62 = vpack.i.bf16 %v5219_v7, %v5306_v11  ;;  %v7767_v7 = vld [vmem:[%s17112_s5] sm:$0xf]  ;;  %v7784_v11 = vor.u32 %v8740_v53, %v7783_v29 }
 0x4ca   : > { %v7768_v28 = vor.u32 %v8736_v14, %v7767_v7 }
 0x4cb   : > { %10301 = vrot.lane.b32.xlu0 %v10300_v62, %s10400_s24  ;;  %6616 = vmatpush.bf16.msra.mxu0 %v7864_v37  ;;  %v4933_v35 = vpop.f32.mrf.mxu2  ;;  %v8135_v62 = vld [vmem:[%s17112_s5 + $0x2e0] sm:$0xf]  ;;  %s10405_s24 = smov 38  }
 0x4cc   : > { %v8136_v43 = vor.u32 %v8828_v2, %v8135_v62 }
 0x4cd   : > { %v4863_v10 = vpop.f32.mrf.mxu1 }
 0x4ce   : > { %v4864_v60 = vadd.f32 %v4863_v10, %v4796_v57  ;;  %6641 = vmatpush.bf16.msra.mxu2 %v8136_v43  ;;  %v8008_v57 = vor.u32 %v8796_v44, %v8007_v1  ;;  %v8860_v10 = vld [vmem:[%s17112_s5 + $0x3ec] sm:$0xf0] }
 0x4cf   : > { %v5001_v34 = vpop.f32.mrf.mxu3  ;;  %6617 = vmatpush.bf16.msra.mxu0 %v7848_v46 }
 0x4d0   : > { %v4932_v20 = vadd.f32 %v4931_v8, %v4864_v60  ;;  %6628 = vmatpush.bf16.msra.mxu1 %v8008_v57  ;;  %v8263_v8 = vld [vmem:[%s17112_s5 + $0x3e0] sm:$0xf] }
 0x4d1   : > { %v8264_v60 = vor.u32 %v8860_v10, %v8263_v8 }
 0x4d2   : > { %v5000_v23 = vadd.f32 %v4999_v59, %v4932_v20 }
 0x4d3   : > { %6618 = vmatpush.bf16.msra.mxu0 %v7832_v49  ;;  %v4800_v59 = vpop.f32.mrf.mxu0  ;;  %6654 = vmatpush.bf16.msrb.mxu3 %v8264_v60  ;;  %v5235_v60 = vrot.slane %v14994_v47, 2 }
 0x4d4   : > { %v5055_v52 = vrot.slane %v5000_v23, 1 }
 0x4d5   : > { %v4865_v61 = vpop.f32.mrf.mxu1 }
 0x4d6   : > { %v5056_v39 = vsel %vm18457_vm10, %v5054_v6, %v5055_v52  ;;  %v4866_v58 = vadd.f32 %v4865_v61, %v4798_v40  ;;  %v7799_v6 = vld [vmem:[%s17112_s5 + $0x40] sm:$0xf]  ;;  %vm5269_vm10 = vcmask 998400  }
 0x4d7   : > { %v15583_v19 = vmax.f32 %v4997_v51, %v5056_v39  ;;  %6619 = vmatpush.bf16.msra.mxu0 %v7816_v22  ;;  %v8247_v22 = vld [vmem:[%s17112_s5 + $0x3c0] sm:$0xf] }
 0x4d8   : > { %v4934_v9 = vadd.f32 %v4933_v35, %v4866_v58 }
 0x4d9   : > { %v5168_v25 = vrot.slane %v15583_v19, 4 }
 0x4da   : > { %v15598_v24 = vadd.f32 %v5001_v34, %v4934_v9  ;;  %v7991_v34 = vld [vmem:[%s17112_s5 + $0x1c0] sm:$0xf] }
 0x4db   : > { %v5169_v38 = vsel %vm18458_vm13, %v5166_v55, %v5168_v25  ;;  %v10315_v55 = vpack.i.bf16 %v5211_v17, %v5298_v30  ;;  %v8824_v25 = vld [vmem:[%s17112_s5 + $0x2cc] sm:$0xf0]  ;;  %vm18466_vm13 = vcmask 588800  }
 0x4dc   : > { %v5057_v18 = vrot.slane %v15598_v24, 1  ;;  %v5197_v13 = vmax.f32 %v5081_v5, %v5169_v38  ;;  %v8744_v5 = vld [vmem:[%s17112_s5 + $0x4c] sm:$0xf0]  ;;  %v8120_v49 = vor.u32 %v8824_v25, %v8119_v54  ;;  %v8071_v54 = vld [vmem:[%s17112_s5 + $0x260] sm:$0xf] }
 0x4dd   : > { %v7800_v27 = vor.u32 %v8744_v5, %v7799_v6  ;;  %v4868_v41 = vpop.f32.mrf.mxu1  ;;  %v8792_v38 = vld [vmem:[%s17112_s5 + $0x1cc] sm:$0xf0] }
 0x4de   : > { %v5058_v33 = vsel %vm18459_vm0, %v5055_v52, %v5057_v18  ;;  %v5315_v31 = vrot.slane %v5197_v13, 6  ;;  %v5311_v0 = vrot.slane %v5197_v13, 4  ;;  %v7992_v45 = vor.u32 %v8792_v38, %v7991_v34  ;;  %6642 = vmatpush.bf16.msra.mxu2 %v8120_v49  ;;  %v8812_v25 = vld [vmem:[%s17112_s5 + $0x26c] sm:$0xf0] }
 0x4df   : > { %v15613_v36 = vmax.f32 %v5000_v23, %v5058_v33  ;;  %6620 = vmatpush.bf16.msra.mxu0 %v7800_v27 }
 0x4e0   : > { %v10310_v21 = vpack.i.bf16 %v5227_v3, %v5315_v31  ;;  %v10305_v51 = vpack.i.bf16 %v5223_v15, %v5311_v0  ;;  %6629 = vmatpush.bf16.msra.mxu1 %v7992_v45  ;;  %v8852_v45 = vld [vmem:[%s17112_s5 + $0x3ac] sm:$0xf0] }
 0x4e1   : > { %v5170_v29 = vrot.slane %v15613_v36, 4 }
 0x4e2   : > { %10311 = vrot.lane.b32.xlu2 %v10310_v21, %s10401_s27  ;;  %10306 = vrot.lane.b32.xlu1 %v10305_v51, %s17943_s26  ;;  %v8856_v21 = vld [vmem:[%s17112_s5 + $0x3cc] sm:$0xf0] }
 0x4e3   : > { %6621 = vmatpush.bf16.msra.mxu0 %v7784_v11  ;;  %v8248_v5 = vor.u32 %v8856_v21, %v8247_v22  ;;  %v8055_v21 = vld [vmem:[%s17112_s5 + $0x240] sm:$0xf] }
 0x4e5   : > { %v4870_v31 = vpop.f32.mrf.mxu1  ;;  %6655 = vmatpush.bf16.msrb.mxu3 %v8248_v5 }
 0x4e7   : > { %6622 = vmatpush.bf16.msra.mxu0 %v7768_v28 }
 0x4ea   : > { %10316 = vrot.lane.b32.xlu2 %v10315_v55, %s10402_s18 }
 0x4f6   : > { %v15654_v37 = vpop.permute.xlu2 %10296 }
 0x4f7   : > { %v10298_v40 = vunpack.i.l.bf16 %v15654_v37  ;;  %v10299_v39 = vunpack.i.h.bf16 %v15654_v37 }
 0x506   : > { %v10292_v20 = vpop.permute.xlu1 %10291 }
 0x507   : > { %v10294_v48 = vunpack.i.h.bf16 %v10292_v20  ;;  %v10293_v23 = vunpack.i.l.bf16 %v10292_v20 }
 0x509   : > { %v5264_v52 = vsel %vm5263_vm9, %v14715_v50, %v10294_v48  ;;  %v5353_v61 = vsel %vm5263_vm9, %v15511_v42, %v10293_v23  ;;  %v4802_v50 = vpop.f32.mrf.mxu0  ;;  %v4801_v42 = vadd.f32 %v15317_v26, %v4800_v59  ;;  %vm5274_vm9 = vcmask 130048  }
 0x50a   : > { %v5354_v58 = vsel %vm2306_vm12, %v5353_v61, %v10298_v40  ;;  %v5265_v63 = vsel %vm2306_vm12, %v5264_v52, %v10299_v39  ;;  %v4803_v51 = vadd.f32 %v15317_v26, %v4802_v50  ;;  %vm18460_vm12 = vmmov %vm18459_vm0 }
 0x50b   : > { %v5374_v35 = vrot.slane %v5354_v58, 3  ;;  %v4869_v13 = vadd.f32 %v4868_v41, %v4801_v42  ;;  %v7975_v41 = vld [vmem:[%s17112_s5 + $0x1a0] sm:$0xf]  ;;  %v8788_v42 = vld [vmem:[%s17112_s5 + $0x1ac] sm:$0xf0]  ;;  %vm18467_vm0 = vmmov %vm18466_vm13 }
 0x50c   : > { %v4871_v27 = vadd.f32 %v4870_v31, %v4803_v51  ;;  %v7976_v38 = vor.u32 %v8788_v42, %v7975_v41  ;;  %v8808_v51 = vld [vmem:[%s17112_s5 + $0x24c] sm:$0xf0] }
 0x50d   : > { %v5388_v16 = vsel %vm1914_vm7, %v5265_v63, %v5374_v35  ;;  %v8087_v63 = vld [vmem:[%s17112_s5 + $0x280] sm:$0xf] }
 0x50e   : > { %v15667_v9 = vpack.c.bf16 %v5388_v16, %v5388_v16  ;;  %v8816_v16 = vld [vmem:[%s17112_s5 + $0x28c] sm:$0xf0]  ;;  %6630 = vmatpush.bf16.msra.mxu1 %v7976_v38 }
 0x50f   : > { %v4936_v46 = vpop.f32.mrf.mxu2  ;;  %v8088_v50 = vor.u32 %v8816_v16, %v8087_v63  ;;  %v5255_v63 = vrot.slane %v15503_v56, 4 }
 0x510   : > { %6623 = vmatmul.bf16.vlgmr.msra.gmra.mxu0 %v15667_v9  ;;  %v4937_v32 = vadd.f32 %v4936_v46, %v4869_v13  ;;  %v8231_v13 = vld [vmem:[%s17112_s5 + $0x3a0] sm:$0xf] }
 0x511   : > { %v8232_v31 = vor.u32 %v8852_v45, %v8231_v13 }
 0x513   : > { %6656 = vmatpush.bf16.msrb.mxu3 %v8232_v31  ;;  %v8199_v31 = vld [vmem:[%s17112_s5 + $0x360] sm:$0xf] }
 0x517   : > { %v4938_v3 = vpop.f32.mrf.mxu2  ;;  %v5004_v33 = vpop.f32.mrf.mxu3 }
 0x518   : > { %v5005_v15 = vadd.f32 %v5004_v33, %v4937_v32  ;;  %v4805_v0 = vpop.f32.mrf.mxu0  ;;  %v4939_v55 = vadd.f32 %v4938_v3, %v4871_v27  ;;  %v5239_v32 = vrot.slane %v14994_v47, 4  ;;  %v5243_v3 = vrot.slane %v14994_v47, 6 }
 0x519   : > { %v4806_v14 = vadd.f32 %v15317_v26, %v4805_v0  ;;  %v8072_v33 = vor.u32 %v8812_v25, %v8071_v54 }
 0x51a   : > { %v5059_v6 = vrot.slane %v5005_v15, 1 }
 0x51c   : > { %v5102_v30 = vsel %vm18460_vm12, %v5057_v18, %v5059_v6  ;;  %v8103_v18 = vld [vmem:[%s17112_s5 + $0x2a0] sm:$0xf]  ;;  %vm5276_vm12 = vcmask 539648  }
 0x51d   : > { %v5126_v17 = vmax.f32 %v15598_v24, %v5102_v30  ;;  %v8820_v24 = vld [vmem:[%s17112_s5 + $0x2ac] sm:$0xf0] }
 0x51e   : > { %v8104_v57 = vor.u32 %v8820_v24, %v8103_v18  ;;  %v10330_v18 = vpack.i.bf16 %v14856_v12, %v15564_v4  ;;  %v5259_v12 = vrot.slane %v15503_v56, 6 }
 0x51f   : > { %v5171_v53 = vrot.slane %v5126_v17, 4  ;;  %v4941_v7 = vpop.f32.mrf.mxu2  ;;  %v5006_v11 = vpop.f32.mrf.mxu3 }
 0x520   : > { %v15696_v62 = vadd.f32 %v5006_v11, %v4939_v55  ;;  %v4807_v2 = vpop.f32.mrf.mxu0  ;;  %v4873_v28 = vpop.f32.mrf.mxu1  ;;  %6643 = vmatpush.bf16.msra.mxu2 %v8104_v57  ;;  %v8056_v55 = vor.u32 %v8808_v51, %v8055_v21  ;;  %v7959_v57 = vld [vmem:[%s17112_s5 + $0x180] sm:$0xf]  ;;  %v8888_v51 = vld [vmem:[%s17112_s5 + $0x4cc] sm:$0xf0] }
 0x521   : > { %v5172_v43 = vsel %vm18461_vm1, %v5170_v29, %v5171_v53  ;;  %v4874_v44 = vadd.f32 %v4873_v28, %v4806_v14  ;;  %v8375_v21 = vld [vmem:[%s17112_s5 + $0x4c0] sm:$0xf]  ;;  %vm18468_vm1 = vcmask 949248  }
 0x522   : > { %v15706_v1 = vrot.slane %v15696_v62, 1  ;;  %v5198_v26 = vmax.f32 %v15583_v19, %v5172_v43 }
 0x523   : > { %v4942_v48 = vadd.f32 %v4941_v7, %v4874_v44  ;;  %v5251_v7 = vrot.slane %v15503_v56, 2  ;;  %v8039_v44 = vld [vmem:[%s17112_s5 + $0x220] sm:$0xf] }
 0x524   : > { %v5061_v8 = vsel %vm18462_vm11, %v5059_v6, %v15706_v1  ;;  %v10335_v10 = vpack.i.bf16 %v14994_v47, %v5198_v26  ;;  %v5323_v59 = vrot.slane %v5198_v26, 2  ;;  %6644 = vmatpush.bf16.msra.mxu2 %v8088_v50  ;;  %v5085_v14 = vmax.f32 %v15696_v62, %v15706_v1  ;;  %v8800_v26 = vld [vmem:[%s17112_s5 + $0x20c] sm:$0xf0]  ;;  %vm18469_vm11 = vmmov %vm18468_vm1 }
 0x525   : > { %v5084_v20 = vmax.f32 %v5005_v15, %v5061_v8  ;;  %v8784_v8 = vld [vmem:[%s17112_s5 + $0x18c] sm:$0xf0] }
 0x526   : > { %10336 = vrot.lane.b32.xlu2 %v10335_v10, %s10403_s9  ;;  %v15713_v23 = vpack.i.bf16 %v5235_v60, %v5323_v59  ;;  %v8215_v10 = vld [vmem:[%s17112_s5 + $0x380] sm:$0xf] }
 0x527   : > { %v4943_v52 = vpop.f32.mrf.mxu2  ;;  %v5009_v61 = vpop.f32.mrf.mxu3  ;;  %v5173_v58 = vrot.slane %v5084_v20, 4 }
 0x528   : > { %v5010_v19 = vadd.f32 %v5009_v61, %v4942_v48  ;;  %v4875_v35 = vpop.f32.mrf.mxu1  ;;  %6645 = vmatpush.bf16.msra.mxu2 %v8072_v33  ;;  %v8848_v48 = vld [vmem:[%s17112_s5 + $0x38c] sm:$0xf0]  ;;  %v7943_v52 = vld [vmem:[%s17112_s5 + $0x160] sm:$0xf] }
 0x529   : > { %v5174_v46 = vsel %vm18463_vm8, %v5171_v53, %v5173_v58  ;;  %v8780_v61 = vld [vmem:[%s17112_s5 + $0x16c] sm:$0xf0]  ;;  %v8216_v58 = vor.u32 %v8848_v48, %v8215_v10  ;;  %vm5283_vm8 = vcmask 80896  }
 0x52a   : > { %v5103_v34 = vrot.slane %v5010_v19, 1  ;;  %v5199_v49 = vmax.f32 %v15613_v36, %v5174_v46 }
 0x52b   : > { %6657 = vmatpush.bf16.msrb.mxu3 %v8216_v58  ;;  %v8836_v58 = vld [vmem:[%s17112_s5 + $0x32c] sm:$0xf0] }
 0x52c   : > { %v5104_v15 = vsel %vm18464_vm6, %v15706_v1, %v5103_v34  ;;  %v5128_v36 = vmax.f32 %v5010_v19, %v5103_v34  ;;  %v5328_v0 = vrot.slane %v5199_v49, 4  ;;  %v5332_v22 = vrot.slane %v5199_v49, 6  ;;  %6646 = vmatpush.bf16.msra.mxu2 %v8056_v55  ;;  %v8023_v1 = vld [vmem:[%s17112_s5 + $0x200] sm:$0xf]  ;;  %v8776_v55 = vld [vmem:[%s17112_s5 + $0x14c] sm:$0xf0] }
 0x52d   : > { %v5127_v47 = vmax.f32 %v15696_v62, %v5104_v15  ;;  %v8804_v62 = vld [vmem:[%s17112_s5 + $0x22c] sm:$0xf0]  ;;  %v8024_v59 = vor.u32 %v8800_v26, %v8023_v1  ;;  %v7944_v19 = vor.u32 %v8780_v61, %v7943_v52  ;;  %v8183_v1 = vld [vmem:[%s17112_s5 + $0x340] sm:$0xf]  ;;  %vm5286_vm6 = vcmask 900096  }
 0x52e   : > { %v5176_v6 = vrot.slane %v5128_v36, 4  ;;  %v10320_v5 = vpack.i.bf16 %v5239_v32, %v5328_v0  ;;  %v10325_v27 = vpack.i.bf16 %v5243_v3, %v5332_v22  ;;  %v8040_v4 = vor.u32 %v8804_v62, %v8039_v44  ;;  %v8844_v15 = vld [vmem:[%s17112_s5 + $0x36c] sm:$0xf0]  ;;  %v8391_v36 = vld [vmem:[%s17112_s5 + $0x4e0] sm:$0xf] }
 0x52f   : > { %v5175_v30 = vrot.slane %v5127_v47, 4  ;;  %v5011_v17 = vpop.f32.mrf.mxu3  ;;  %v8200_v0 = vor.u32 %v8844_v15, %v8199_v31  ;;  %v8892_v22 = vld [vmem:[%s17112_s5 + $0x4ec] sm:$0xf0]  ;;  %v7895_v44 = vld [vmem:[%s17112_s5 + $0x100] sm:$0xf] }
 0x530   : > { %10321 = vrot.lane.b32.xlu0 %v10320_v5, %s10404_s29  ;;  %10326 = vrot.lane.b32.xlu1 %v10325_v27, %s10405_s24  ;;  %v5201_v43 = vmax.f32 %v5085_v14, %v5176_v6  ;;  %v8392_v47 = vor.u32 %v8892_v22, %v8391_v36  ;;  %v8359_v5 = vld [vmem:[%s17112_s5 + $0x4a0] sm:$0xf]  ;;  %v8884_v27 = vld [vmem:[%s17112_s5 + $0x4ac] sm:$0xf0] }
 0x531   : > { %v5177_v29 = vsel %vm18465_vm14, %v5175_v30, %v5176_v6  ;;  %6647 = vmatpush.bf16.msra.mxu2 %v8040_v4  ;;  %6658 = vmatpush.bf16.msrb.mxu3 %v8200_v0  ;;  %v8376_v6 = vor.u32 %v8888_v51, %v8375_v21  ;;  %v8360_v30 = vor.u32 %v8884_v27, %v8359_v5  ;;  %v7927_v17 = vld [vmem:[%s17112_s5 + $0x140] sm:$0xf]  ;;  %v8772_v14 = vld [vmem:[%s17112_s5 + $0x12c] sm:$0xf0]  ;;  %v8762_v51 = vld [vmem:[%s17112_s5 + $0xe4] sm:$0xf] }
 0x532   : > { %v5200_v53 = vmax.f32 %v5084_v20, %v5177_v29  ;;  %v5349_v24 = vrot.slane %v5201_v43, 6  ;;  %v7960_v20 = vor.u32 %v8784_v8, %v7959_v57  ;;  %v5345_v35 = vrot.slane %v5201_v43, 4  ;;  %6667 = vmatpush.bf16.msrb.mxu0 %v8392_v47  ;;  %v8343_v29 = vld [vmem:[%s17112_s5 + $0x480] sm:$0xf]  ;;  %v8768_v62 = vld [vmem:[%s17112_s5 + $0x10c] sm:$0xf0] }
 0x533   : > { %v8327_v43 = vld [vmem:[%s17112_s5 + $0x460] sm:$0xf]  ;;  %v8840_v4 = vld [vmem:[%s17112_s5 + $0x34c] sm:$0xf0]  ;;  %v7881_v47 = vld [vmem:[%s17112_s5 + $0xf0] sm:$0xf0] }
 0x534   : > { %v5340_v11 = vrot.slane %v5200_v53, 2  ;;  %v10340_v2 = vpack.i.bf16 %v15503_v56, %v5200_v53  ;;  %v10350_v60 = vpack.i.bf16 %v5259_v12, %v5349_v24  ;;  %6631 = vmatpush.bf16.msra.mxu1 %v7960_v20  ;;  %v10360_v16 = vpack.i.bf16 %v5255_v63, %v5345_v35  ;;  %v8519_v26 = vld [vmem:[%s17112_s5 + $0x5e0] sm:$0xf]  ;;  %v8924_v57 = vld [vmem:[%s17112_s5 + $0x5ec] sm:$0xf0] }
 0x535   : > { %6648 = vmatpush.bf16.msra.mxu2 %v8024_v59  ;;  %v7928_v53 = vor.u32 %v8776_v55, %v7927_v17  ;;  %v7896_v12 = vor.u32 %v8768_v62, %v7895_v44  ;;  %v8184_v8 = vor.u32 %v8840_v4, %v8183_v1  ;;  %v8520_v10 = vor.u32 %v8924_v57, %v8519_v26  ;;  %v8872_v59 = vld [vmem:[%s17112_s5 + $0x44c] sm:$0xf0]  ;;  %v8551_v20 = vld [vmem:[%s17112_s5 + $0x620] sm:$0xf]  ;;  %v8790_v17 = vld [vmem:[%s17112_s5 + $0x1c4] sm:$0xf] }
 0x536   : > { %v10355_v28 = vpack.i.bf16 %v5251_v7, %v5340_v11  ;;  %6668 = vmatpush.bf16.msrb.mxu0 %v8376_v6  ;;  %v8880_v7 = vld [vmem:[%s17112_s5 + $0x48c] sm:$0xf0]  ;;  %v7911_v11 = vld [vmem:[%s17112_s5 + $0x120] sm:$0xf]  ;;  %v7884_v27 = vor.u32 %v8762_v51, %v7881_v47  ;;  %v7993_v55 = vld [vmem:[%s17112_s5 + $0x1d0] sm:$0xf0] }
 0x537   : > { %v8932_v52 = vld [vmem:[%s17112_s5 + $0x62c] sm:$0xf0]  ;;  %v8167_v61 = vld [vmem:[%s17112_s5 + $0x320] sm:$0xf]  ;;  %6659 = vmatpush.bf16.msrb.mxu3 %v8184_v8  ;;  %v8786_v44 = vld [vmem:[%s17112_s5 + $0x1a4] sm:$0xf] }
 0x538   : > { %10341 = vrot.lane.b32.xlu0 %v10340_v2, %s10406_s28  ;;  %10356 = vrot.lane.b32.xlu2 %v10355_v28, %s10407_s30  ;;  %v8344_v2 = vor.u32 %v8880_v7, %v8343_v29  ;;  %v7912_v28 = vor.u32 %v8772_v14, %v7911_v11  ;;  %v8168_v35 = vor.u32 %v8836_v58, %v8167_v61  ;;  %v8503_v63 = vld [vmem:[%s17112_s5 + $0x5c0] sm:$0xf]  ;;  %v8832_v36 = vld [vmem:[%s17112_s5 + $0x30c] sm:$0xf0]  ;;  %vm18470_vm14 = vcmask 490496   ;;  %s8700_s28 = sshll.u32 %s18475_s20, 3 }
 0x539   : > { %10331 = vrot.lane.b32.xlu1 %v10330_v18, %s17964_s13  ;;  %6632 = vmatpush.bf16.msra.mxu1 %v7944_v19  ;;  %v8876_v18 = vld [vmem:[%s17112_s5 + $0x46c] sm:$0xf0]  ;;  %v8552_v19 = vor.u32 %v8932_v52, %v8551_v20  ;;  %v8151_v31 = vld [vmem:[%s17112_s5 + $0x300] sm:$0xf]  ;;  %v8137_v7 = vld [vmem:[%s17112_s5 + $0x2f0] sm:$0xf0]  ;;  %v7996_v11 = vor.u32 %v8790_v17, %v7993_v55  ;;  %s428_s27 = scalar_lea.vmem %s17117_s10, %s8700_s28 }
 0x53a   : > { %6669 = vmatpush.bf16.msrb.mxu0 %v8360_v30  ;;  %v8328_v24 = vor.u32 %v8876_v18, %v8327_v43  ;;  %v8487_v0 = vld [vmem:[%s17112_s5 + $0x5a0] sm:$0xf]  ;;  %v8916_v22 = vld [vmem:[%s17112_s5 + $0x5ac] sm:$0xf0]  ;;  %v8152_v21 = vor.u32 %v8832_v36, %v8151_v31  ;;  %v8758_v43 = vld [vmem:[%s17112_s5 + $0xc4] sm:$0xf] }
 0x53b   : > { %6699 = vmatpush.bf16.msrb.mxu2 %v8552_v19  ;;  %6660 = vmatpush.bf16.msrb.mxu3 %v8168_v35  ;;  %v8279_v6 = vld [vmem:[%s17112_s5 + $0x400] sm:$0xf]  ;;  %v8488_v5 = vor.u32 %v8916_v22, %v8487_v0  ;;  %v8864_v30 = vld [vmem:[%s17112_s5 + $0x40c] sm:$0xf0]  ;;  %v7977_v62 = vld [vmem:[%s17112_s5 + $0x1b0] sm:$0xf0] }
 0x53c   : > { %v15796_v46 = vpop.permute.xlu2 %10311  ;;  %v8280_v29 = vor.u32 %v8864_v30, %v8279_v6  ;;  %v8822_v4 = vld [vmem:[%s17112_s5 + $0x2c4] sm:$0xf]  ;;  %v8121_v26 = vld [vmem:[%s17112_s5 + $0x2d0] sm:$0xf0]  ;;  %v8455_v57 = vld [vmem:[%s17112_s5 + $0x560] sm:$0xf] }
 0x53d   : > { %v15794_v41 = vpop.permute.xlu0 %10301  ;;  %v10313_v34 = vunpack.i.l.bf16 %v15796_v46  ;;  %v10314_v38 = vunpack.i.h.bf16 %v15796_v46  ;;  %6633 = vmatpush.bf16.msra.mxu1 %v7928_v53  ;;  %v8826_v53 = vld [vmem:[%s17112_s5 + $0x2e4] sm:$0xf]  ;;  %v8124_v8 = vor.u32 %v8822_v4, %v8121_v26  ;;  %v7961_v61 = vld [vmem:[%s17112_s5 + $0x190] sm:$0xf0]  ;;  %v8423_v0 = vld [vmem:[%s17112_s5 + $0x520] sm:$0xf] }
 0x53e   : > { %v10304_v50 = vunpack.i.h.bf16 %v15794_v41  ;;  %v10303_v42 = vunpack.i.l.bf16 %v15794_v41  ;;  %6670 = vmatpush.bf16.msrb.mxu0 %v8344_v2  ;;  %v8140_v14 = vor.u32 %v8826_v53, %v8137_v7  ;;  %v8471_v2 = vld [vmem:[%s17112_s5 + $0x580] sm:$0xf]  ;;  %v8782_v52 = vld [vmem:[%s17112_s5 + $0x184] sm:$0xf]  ;;  %v8105_v35 = vld [vmem:[%s17112_s5 + $0x2b0] sm:$0xf0] }
 0x53f   : > { %6661 = vmatpush.bf16.msrb.mxu3 %v8152_v21  ;;  %v8818_v58 = vld [vmem:[%s17112_s5 + $0x2a4] sm:$0xf]  ;;  %v7964_v19 = vor.u32 %v8782_v52, %v7961_v61  ;;  %v8089_v36 = vld [vmem:[%s17112_s5 + $0x290] sm:$0xf0]  ;;  %v8900_v21 = vld [vmem:[%s17112_s5 + $0x52c] sm:$0xf0] }
 0x540   : > { %10346 = vrot.lane.b32.xlu0 %v15713_v23, %s10408_s12  ;;  %v8746_v51 = vld [vmem:[%s17112_s5 + $0x64] sm:$0xf]  ;;  %v7817_v47 = vld [vmem:[%s17112_s5 + $0x70] sm:$0xf0]  ;;  %v8424_v6 = vor.u32 %v8900_v21, %v8423_v0  ;;  %v8407_v7 = vld [vmem:[%s17112_s5 + $0x500] sm:$0xf] }
 0x541   : > { %10351 = vrot.lane.b32.xlu1 %v10350_v60, %s10409_s15  ;;  %6634 = vmatpush.bf16.msra.mxu1 %v7912_v28  ;;  %v8311_v60 = vld [vmem:[%s17112_s5 + $0x440] sm:$0xf]  ;;  %v8912_v28 = vld [vmem:[%s17112_s5 + $0x58c] sm:$0xf0]  ;;  %v7929_v30 = vld [vmem:[%s17112_s5 + $0x150] sm:$0xf0] }
 0x542   : > { %6671 = vmatpush.bf16.msrb.mxu0 %v8328_v24  ;;  %v8312_v48 = vor.u32 %v8872_v59, %v8311_v60  ;;  %v8472_v18 = vor.u32 %v8912_v28, %v8471_v2  ;;  %v7865_v24 = vld [vmem:[%s17112_s5 + $0xd0] sm:$0xf0]  ;;  %v8754_v60 = vld [vmem:[%s17112_s5 + $0xa4] sm:$0xf]  ;;  %s6979_s12 = sld [smem:[#allocation2]]  ;;  %s7440_s15 = sshll.u32 %s18475_s20, 1 }
 0x543   : > { %6706 = vmatpush.bf16.msra.mxu3 %v7884_v27  ;;  %v7868_v1 = vor.u32 %v8758_v43, %v7865_v24  ;;  %v7849_v59 = vld [vmem:[%s17112_s5 + $0xb0] sm:$0xf0]  ;;  %v8774_v27 = vld [vmem:[%s17112_s5 + $0x144] sm:$0xf]  ;;  %s432_s17 = scalar_lea.vmem %s17118_s11, %s7440_s15 }
 0x544   : > { %v8810_v17 = vld [vmem:[%s17112_s5 + $0x264] sm:$0xf]  ;;  %v7932_v55 = vor.u32 %v8774_v27, %v7929_v30  ;;  %v7801_v28 = vld [vmem:[%s17112_s5 + $0x50] sm:$0xf0] }
 0x545   : > { %6635 = vmatpush.bf16.msra.mxu1 %v7896_v12  ;;  %v7980_v12 = vor.u32 %v8786_v44, %v7977_v62  ;;  %v7913_v24 = vld [vmem:[%s17112_s5 + $0x130] sm:$0xf0]  ;;  %v8806_v44 = vld [vmem:[%s17112_s5 + $0x244] sm:$0xf] }
 0x546   : > { %6672 = vmatpush.bf16.msrb.mxu0 %v8312_v48  ;;  %v7852_v48 = vor.u32 %v8754_v60, %v7849_v59  ;;  %v7785_v4 = vld [vmem:[%s17112_s5 + $0x30] sm:$0xf0]  ;;  %v8802_v60 = vld [vmem:[%s17112_s5 + $0x224] sm:$0xf] }
 0x547   : > { %6707 = vmatpush.bf16.msra.mxu3 %v7868_v1  ;;  %v8057_v1 = vld [vmem:[%s17112_s5 + $0x250] sm:$0xf0]  ;;  %v8930_v30 = vld [vmem:[%s17112_s5 + $0x624] sm:$0xf] }
 0x548   : > { %10361 = vrot.lane.b32.xlu0 %v10360_v16, %s10385_s14  ;;  %v8920_v16 = vld [vmem:[%s17112_s5 + $0x5cc] sm:$0xf0]  ;;  %v8060_v26 = vor.u32 %v8806_v44, %v8057_v1  ;;  %v8041_v59 = vld [vmem:[%s17112_s5 + $0x230] sm:$0xf0]  ;;  %v8926_v44 = vld [vmem:[%s17112_s5 + $0x604] sm:$0xf] }
 0x549   : > { %6680 = vmatpush.bf16.msrb.mxu1 %v8520_v10  ;;  %v8908_v10 = vld [vmem:[%s17112_s5 + $0x56c] sm:$0xf0]  ;;  %v8521_v46 = vld [vmem:[%s17112_s5 + $0x5f0] sm:$0xf0] }
 0x54a   : > { %v8456_v20 = vor.u32 %v8908_v10, %v8455_v57  ;;  %v8766_v57 = vld [vmem:[%s17112_s5 + $0x104] sm:$0xf]  ;;  %v7897_v10 = vld [vmem:[%s17112_s5 + $0x110] sm:$0xf0] }
 0x54b   : > { %6708 = vmatpush.bf16.msra.mxu3 %v7852_v48  ;;  %v8044_v48 = vor.u32 %v8802_v60, %v8041_v59 }
 0x554   : > { %v10307_v23 = vpop.permute.xlu1 %10306 }
 0x555   : > { %v10309_v54 = vunpack.i.h.bf16 %v10307_v23  ;;  %v10308_v25 = vunpack.i.l.bf16 %v10307_v23  ;;  %v8295_v23 = vld [vmem:[%s17112_s5 + $0x420] sm:$0xf] }
 0x557   : > { %v5271_v56 = vsel %vm2436_vm5, %v10304_v50, %v10309_v54  ;;  %v5358_v49 = vsel %vm2436_vm5, %v10303_v42, %v10308_v25  ;;  %v8504_v54 = vor.u32 %v8920_v16, %v8503_v63  ;;  %v8868_v25 = vld [vmem:[%s17112_s5 + $0x42c] sm:$0xf0]  ;;  %v8108_v63 = vor.u32 %v8818_v58, %v8105_v35  ;;  %v8734_v58 = vld [vmem:[%s17112_s5 + $0x4] sm:$0xf]  ;;  %v10317_v35 = vpop.permute.xlu2 %10316 }
 0x558   : > { %v5359_v13 = vsel %vm5272_vm3, %v5358_v49, %v10313_v34  ;;  %v5273_v32 = vsel %vm5272_vm3, %v5271_v56, %v10314_v38  ;;  %v8535_v56 = vld [vmem:[%s17112_s5 + $0x600] sm:$0xf]  ;;  %v8928_v49 = vld [vmem:[%s17112_s5 + $0x60c] sm:$0xf0]  ;;  %vm5279_vm5 = vcmask 310272   ;;  %vm18471_vm3 = vmmov %vm18470_vm14 }
 0x559   : > { %v5376_v45 = vrot.slane %v5359_v13, 3  ;;  %v8296_v13 = vor.u32 %v8868_v25, %v8295_v23  ;;  %6681 = vmatpush.bf16.msrb.mxu1 %v8504_v54  ;;  %v8439_v23 = vld [vmem:[%s17112_s5 + $0x540] sm:$0xf]  ;;  %v8904_v54 = vld [vmem:[%s17112_s5 + $0x54c] sm:$0xf0] }
 0x55a   : > { %v8750_v25 = vld [vmem:[%s17112_s5 + $0x84] sm:$0xf] }
 0x55b   : > { %v5390_v3 = vsel %vm1914_vm7, %v5273_v32, %v5376_v45  ;;  %v8536_v45 = vor.u32 %v8928_v49, %v8535_v56  ;;  %v8794_v32 = vld [vmem:[%s17112_s5 + $0x1e4] sm:$0xf]  ;;  %6673 = vmatpush.bf16.msrb.mxu0 %v8296_v13  ;;  %v8440_v56 = vor.u32 %v8904_v54, %v8439_v23  ;;  %v7833_v49 = vld [vmem:[%s17112_s5 + $0x90] sm:$0xf0] }
 0x55c   : > { %v15813_v33 = vpack.c.bf16 %v5390_v3, %v5390_v3  ;;  %v8009_v3 = vld [vmem:[%s17112_s5 + $0x1f0] sm:$0xf0]  ;;  %v8778_v13 = vld [vmem:[%s17112_s5 + $0x164] sm:$0xf] }
 0x55d   : > { %v8012_v15 = vor.u32 %v8794_v32, %v8009_v3  ;;  %6700 = vmatpush.bf16.msrb.mxu2 %v8536_v45  ;;  %6682 = vmatpush.bf16.msrb.mxu1 %v8488_v5  ;;  %v7945_v45 = vld [vmem:[%s17112_s5 + $0x170] sm:$0xf0]  ;;  %v7836_v3 = vor.u32 %v8750_v25, %v7833_v49  ;;  %v7820_v5 = vor.u32 %v8746_v51, %v7817_v47  ;;  %v8798_v23 = vld [vmem:[%s17112_s5 + $0x204] sm:$0xf] }
 0x55e   : > { %6649 = vmatmul.bf16.vlgmr.msra.gmra.mxu2 %v15813_v33  ;;  %v7948_v31 = vor.u32 %v8778_v13, %v7945_v45  ;;  %v8025_v54 = vld [vmem:[%s17112_s5 + $0x210] sm:$0xf0]  ;;  %v10319_v13 = vunpack.i.h.bf16 %v10317_v35  ;;  %v10318_v45 = vunpack.i.l.bf16 %v10317_v35 }
 0x55f   : > { %6674 = vmatpush.bf16.msrb.mxu0 %v8280_v29  ;;  %6709 = vmatpush.bf16.msra.mxu3 %v7836_v3  ;;  %v8073_v29 = vld [vmem:[%s17112_s5 + $0x270] sm:$0xf0]  ;;  %v8028_v25 = vor.u32 %v8798_v23, %v8025_v54  ;;  %v8890_v23 = vld [vmem:[%s17112_s5 + $0x4e4] sm:$0xf] }
 0x560   : > { %v8076_v53 = vor.u32 %v8810_v17, %v8073_v29  ;;  %v8553_v17 = vld [vmem:[%s17112_s5 + $0x630] sm:$0xf0] }
 0x561   : > { %6719 = vmatpush.bf16.msra.mxu2 %v8012_v15  ;;  %6683 = vmatpush.bf16.msrb.mxu1 %v8472_v18  ;;  %v8814_v15 = vld [vmem:[%s17112_s5 + $0x284] sm:$0xf]  ;;  %v8393_v54 = vld [vmem:[%s17112_s5 + $0x4f0] sm:$0xf0] }
 0x562   : > { %v8092_v22 = vor.u32 %v8814_v15, %v8089_v36  ;;  %v8770_v18 = vld [vmem:[%s17112_s5 + $0x124] sm:$0xf] }
 0x563   : > { %6732 = vmatpush.bf16.msra.mxu0 %v8140_v14  ;;  %v8742_v14 = vld [vmem:[%s17112_s5 + $0x44] sm:$0xf]  ;;  %6710 = vmatpush.bf16.msra.mxu3 %v7820_v5  ;;  %v7916_v62 = vor.u32 %v8770_v18, %v7913_v24  ;;  %v5355_v5 = vsel %vm5266_vm4, %v10298_v40, %v10318_v45  ;;  %v8556_v18 = vor.u32 %v8930_v30, %v8553_v17 }
 0x564   : > { %v7804_v43 = vor.u32 %v8742_v14, %v7801_v28  ;;  %v8265_v14 = vld [vmem:[%s17112_s5 + $0x3f0] sm:$0xf0]  ;;  %v8886_v17 = vld [vmem:[%s17112_s5 + $0x4c4] sm:$0xf] }
 0x565   : > { %6720 = vmatpush.bf16.msra.mxu2 %v7996_v11  ;;  %6684 = vmatpush.bf16.msrb.mxu1 %v8456_v20  ;;  %v8896_v11 = vld [vmem:[%s17112_s5 + $0x50c] sm:$0xf0]  ;;  %v7900_v20 = vor.u32 %v8766_v57, %v7897_v10  ;;  %v8249_v10 = vld [vmem:[%s17112_s5 + $0x3d0] sm:$0xf0] }
 0x566   : > { %v8408_v2 = vor.u32 %v8896_v11, %v8407_v7  ;;  %v8858_v11 = vld [vmem:[%s17112_s5 + $0x3e4] sm:$0xf] }
 0x567   : > { %6733 = vmatpush.bf16.msra.mxu0 %v8124_v8  ;;  %6711 = vmatpush.bf16.msra.mxu3 %v7804_v43 }
 0x569   : > { %6721 = vmatpush.bf16.msra.mxu2 %v7980_v12  ;;  %6685 = vmatpush.bf16.msrb.mxu1 %v8440_v56  ;;  %v8738_v12 = vld [vmem:[%s17112_s5 + $0x24] sm:$0xf] }
 0x56a   : > { %v7788_v8 = vor.u32 %v8738_v12, %v7785_v4  ;;  %v8268_v4 = vor.u32 %v8858_v11, %v8265_v14  ;;  %v8914_v14 = vld [vmem:[%s17112_s5 + $0x5a4] sm:$0xf] }
 0x56b   : > { %6734 = vmatpush.bf16.msra.mxu0 %v8108_v63 }
 0x56c   : > { %6712 = vmatpush.bf16.msra.mxu3 %v7788_v8 }
 0x56d   : > { %6722 = vmatpush.bf16.msra.mxu2 %v7964_v19  ;;  %6686 = vmatpush.bf16.msrb.mxu1 %v8424_v6  ;;  %v7769_v19 = vld [vmem:[%s17112_s5 + $0x10] sm:$0xf0]  ;;  %v5267_v6 = vsel %vm5266_vm4, %v10299_v39, %v10319_v13  ;;  %v8850_v13 = vld [vmem:[%s17112_s5 + $0x3a4] sm:$0xf] }
 0x56e   : > { %v7772_v63 = vor.u32 %v8734_v58, %v7769_v19  ;;  %v8922_v19 = vld [vmem:[%s17112_s5 + $0x5e4] sm:$0xf] }
 0x56f   : > { %6735 = vmatpush.bf16.msra.mxu0 %v8092_v22 }
 0x570   : > { %6713 = vmatpush.bf16.msra.mxu3 %v7772_v63 }
 0x571   : > { %6723 = vmatpush.bf16.msra.mxu2 %v7948_v31  ;;  %6687 = vmatpush.bf16.msrb.mxu1 %v8408_v2 }
 0x573   : > { %6736 = vmatpush.bf16.msra.mxu0 %v8076_v53 }
 0x575   : > { %6724 = vmatpush.bf16.msra.mxu2 %v7932_v55 }
 0x577   : > { %6737 = vmatpush.bf16.msra.mxu0 %v8060_v26 }
 0x579   : > { %6725 = vmatpush.bf16.msra.mxu2 %v7916_v62  ;;  %v8537_v62 = vld [vmem:[%s17112_s5 + $0x610] sm:$0xf0] }
 0x57b   : > { %6738 = vmatpush.bf16.msra.mxu0 %v8044_v48  ;;  %v8540_v48 = vor.u32 %v8926_v44, %v8537_v62  ;;  %v8882_v44 = vld [vmem:[%s17112_s5 + $0x4a4] sm:$0xf]  ;;  %v8361_v62 = vld [vmem:[%s17112_s5 + $0x4b0] sm:$0xf0] }
 0x57d   : > { %6726 = vmatpush.bf16.msra.mxu2 %v7900_v20 }
 0x57f   : > { %6739 = vmatpush.bf16.msra.mxu0 %v8028_v25 }
 0x580   : > { %v10337_v22 = vpop.permute.xlu2 %10336 }
 0x581   : > { %v10339_v29 = vunpack.i.h.bf16 %v10337_v22  ;;  %v10338_v2 = vunpack.i.l.bf16 %v10337_v22 }
 0x583   : > { %v5275_v60 = vsel %vm5274_vm9, %v10314_v38, %v10339_v29  ;;  %v5360_v59 = vsel %vm5274_vm9, %v10313_v34, %v10338_v2  ;;  %v8217_v29 = vld [vmem:[%s17112_s5 + $0x390] sm:$0xf0] }
 0x58d   : > { %v16008_v16 = vpop.f32.mrf.mxu0 }
 0x592   : > { %v10357_v25 = vpop.permute.xlu2 %10356 }
 0x595   : > { %v6626_v32 = vpop.f32.mrf.mxu0 }
 0x5a2   : > { %v16100_v52 = vpop.permute.xlu0 %10321  ;;  %v10327_v61 = vpop.permute.xlu1 %10326 }
 0x5a3   : > { %v10323_v56 = vunpack.i.l.bf16 %v16100_v52  ;;  %v10328_v49 = vunpack.i.l.bf16 %v10327_v61  ;;  %v10324_v32 = vunpack.i.h.bf16 %v16100_v52  ;;  %v10329_v3 = vunpack.i.h.bf16 %v10327_v61  ;;  %v8505_v52 = vld [vmem:[%s17112_s5 + $0x5d0] sm:$0xf0] }
 0x5a5   : > { %v5363_v21 = vsel %vm5279_vm5, %v10323_v56, %v10328_v49  ;;  %v5280_v55 = vsel %vm5279_vm5, %v10324_v32, %v10329_v3  ;;  %vm18472_vm5 = vcmask 1041408  }
 0x5aa   : > { %v16116_v31 = vpop.permute.xlu0 %10341 }
 0x5ab   : > { %v10344_v15 = vunpack.i.h.bf16 %v16116_v31  ;;  %v10343_v36 = vunpack.i.l.bf16 %v16116_v31  ;;  %v10332_v0 = vpop.permute.xlu1 %10331  ;;  %v8489_v31 = vld [vmem:[%s17112_s5 + $0x5b0] sm:$0xf0] }
 0x5ac   : > { %v10334_v51 = vunpack.i.h.bf16 %v10332_v0  ;;  %v10333_v47 = vunpack.i.l.bf16 %v10332_v0  ;;  %v8524_v0 = vor.u32 %v8922_v19, %v8521_v46  ;;  %v8878_v19 = vld [vmem:[%s17112_s5 + $0x484] sm:$0xf]  ;;  %v8345_v46 = vld [vmem:[%s17112_s5 + $0x490] sm:$0xf0] }
 0x5ad   : > { %v5364_v27 = vsel %vm5281_vm2, %v5363_v21, %v10343_v36  ;;  %v5282_v53 = vsel %vm5281_vm2, %v5280_v55, %v10344_v15  ;;  %v8377_v55 = vld [vmem:[%s17112_s5 + $0x4d0] sm:$0xf0] }
 0x5ae   : > { %v5378_v39 = vrot.slane %v5364_v27, 3  ;;  %v5268_v37 = vsel %vm18466_vm13, %v5267_v6, %v10334_v51  ;;  %v5356_v40 = vsel %vm18467_vm0, %v5355_v5, %v10333_v47  ;;  %v8396_v51 = vor.u32 %v8890_v23, %v8393_v54  ;;  %v8918_v47 = vld [vmem:[%s17112_s5 + $0x5c4] sm:$0xf] }
 0x5af   : > { %v5357_v7 = vsel %vm5269_vm10, %v5356_v40, %v10303_v42  ;;  %v5270_v42 = vsel %vm5269_vm10, %v5268_v37, %v10304_v50  ;;  %v8854_v50 = vld [vmem:[%s17112_s5 + $0x3c4] sm:$0xf]  ;;  %v10359_v6 = vunpack.i.h.bf16 %v10357_v25  ;;  %v8508_v11 = vor.u32 %v8918_v47, %v8505_v52 }
 0x5b0   : > { %v5392_v28 = vsel %vm1914_vm7, %v5282_v53, %v5378_v39  ;;  %v5375_v43 = vrot.slane %v5357_v7, 3  ;;  %v8252_v63 = vor.u32 %v8854_v50, %v8249_v10  ;;  %v8846_v40 = vld [vmem:[%s17112_s5 + $0x384] sm:$0xf]  ;;  %v8348_v54 = vor.u32 %v8878_v19, %v8345_v46 }
 0x5b1   : > { %v16154_v24 = vpack.c.bf16 %v5392_v28, %v5392_v28  ;;  %v5284_v53 = vsel %vm5283_vm8, %v10344_v15, %v10359_v6  ;;  %v8143_v15 = vld [vmem:[%s17112_s5 + $0x2e8] sm:$0xf]  ;;  %v8910_v50 = vld [vmem:[%s17112_s5 + $0x584] sm:$0xf]  ;;  %v8441_v6 = vld [vmem:[%s17112_s5 + $0x550] sm:$0xf0] }
 0x5b2   : > { %v5389_v1 = vsel %vm1914_vm7, %v5270_v42, %v5375_v43  ;;  %v10347_v12 = vpop.permute.xlu0 %10346  ;;  %v8380_v43 = vor.u32 %v8886_v17, %v8377_v55  ;;  %v8220_v42 = vor.u32 %v8846_v40, %v8217_v29  ;;  %v8906_v23 = vld [vmem:[%s17112_s5 + $0x564] sm:$0xf]  ;;  %v8313_v40 = vld [vmem:[%s17112_s5 + $0x450] sm:$0xf0]  ;;  %vm7001_vm10 = vcmask 1045508  }
 0x5b3   : > { %v16166_v26 = vpack.c.bf16 %v5389_v1, %v5389_v1  ;;  %v10349_v57 = vunpack.i.h.bf16 %v10347_v12  ;;  %v10348_v8 = vunpack.i.l.bf16 %v10347_v12  ;;  %v16168_v41 = vpop.permute.xlu1 %10351  ;;  %6675 = vmatmul.bf16.vlgmr.msrb.gmra.mxu0 %v16154_v24  ;;  %v8842_v12 = vld [vmem:[%s17112_s5 + $0x364] sm:$0xf]  ;;  %vm18473_vm13 = vcmask 1043456  }
 0x5b4   : > { %v10353_v20 = vunpack.i.l.bf16 %v16168_v41  ;;  %6790 = vmatpush.bf16.msrb.mxu0 %v8556_v18  ;;  %v10354_v38 = vunpack.i.h.bf16 %v16168_v41  ;;  %v8902_v52 = vld [vmem:[%s17112_s5 + $0x544] sm:$0xf] }
 0x5b5   : > { %v5277_v61 = vsel %vm5276_vm12, %v5275_v60, %v10349_v57  ;;  %v5361_v58 = vsel %vm5276_vm12, %v5360_v59, %v10348_v8  ;;  %6636 = vmatmul.bf16.vlgmr.msra.gmra.mxu1 %v16166_v26  ;;  %v8492_v8 = vor.u32 %v8914_v14, %v8489_v31  ;;  %v8364_v60 = vor.u32 %v8882_v44, %v8361_v62  ;;  %v8473_v59 = vld [vmem:[%s17112_s5 + $0x590] sm:$0xf0]  ;;  %v8830_v55 = vld [vmem:[%s17112_s5 + $0x304] sm:$0xf] }
 0x5b6   : > { %v5362_v34 = vsel %vm18468_vm1, %v5361_v58, %v10323_v56  ;;  %v5380_v35 = vrot.slane %v10353_v20, 3  ;;  %6745 = vmatpush.bf16.msra.mxu1 %v8268_v4  ;;  %v8233_v56 = vld [vmem:[%s17112_s5 + $0x3b0] sm:$0xf0]  ;;  %v5278_v45 = vsel %vm18469_vm11, %v5277_v61, %v10324_v32  ;;  %v10358_v32 = vunpack.i.l.bf16 %v10357_v25  ;;  %v8898_v14 = vld [vmem:[%s17112_s5 + $0x524] sm:$0xf] }
 0x5b7   : > { %v5377_v49 = vrot.slane %v5362_v34, 3  ;;  %v8236_v30 = vor.u32 %v8850_v13, %v8233_v56  ;;  %v8201_v4 = vld [vmem:[%s17112_s5 + $0x370] sm:$0xf0]  ;;  %v8838_v34 = vld [vmem:[%s17112_s5 + $0x344] sm:$0xf]  ;;  %v8444_v29 = vor.u32 %v8902_v52, %v8441_v6 }
 0x5b8   : > { %v5394_v3 = vsel %vm1914_vm7, %v10354_v38, %v5380_v35  ;;  %6791 = vmatpush.bf16.msrb.mxu0 %v8540_v48  ;;  %v5365_v7 = vsel %vm5283_vm8, %v10343_v36, %v10358_v32  ;;  %v8829_v36 = vld [vmem:[%s17112_s5 + $0x2f4] sm:$0xf0]  ;;  %v8204_v58 = vor.u32 %v8842_v12, %v8201_v4  ;;  %v8476_v35 = vor.u32 %v8910_v50, %v8473_v59  ;;  %v8457_v25 = vld [vmem:[%s17112_s5 + $0x570] sm:$0xf0]  ;;  %v8095_v32 = vld [vmem:[%s17112_s5 + $0x288] sm:$0xf] }
 0x5b9   : > { %v5391_v22 = vsel %vm1914_vm7, %v5278_v45, %v5377_v49  ;;  %v16214_v21 = vpack.c.bf16 %v5394_v3, %v5394_v3  ;;  %v8144_v41 = vor.u32 %v8829_v36, %v8143_v15  ;;  %v8825_v48 = vld [vmem:[%s17112_s5 + $0x2d4] sm:$0xf0]  ;;  %v8111_v49 = vld [vmem:[%s17112_s5 + $0x2a8] sm:$0xf]  ;;  %v8834_v45 = vld [vmem:[%s17112_s5 + $0x324] sm:$0xf] }
 0x5ba   : > { %v16222_v5 = vpack.c.bf16 %v5391_v22, %v5391_v22  ;;  %6746 = vmatpush.bf16.msra.mxu1 %v8252_v63  ;;  %v10362_v27 = vpop.permute.xlu0 %10361  ;;  %v8821_v13 = vld [vmem:[%s17112_s5 + $0x2b4] sm:$0xf0]  ;;  %v8169_v3 = vld [vmem:[%s17112_s5 + $0x330] sm:$0xf0]  ;;  %v8894_v4 = vld [vmem:[%s17112_s5 + $0x504] sm:$0xf] }
 0x5bb   : > { %v10364_v39 = vunpack.i.h.bf16 %v10362_v27  ;;  %v10363_v37 = vunpack.i.l.bf16 %v10362_v27  ;;  %8565 = vmatmul.msk.bf16.vlgmr.msrb.gmra.mxu2 %vm2345_vm15, %v16214_v21  ;;  %v8329_v22 = vld [vmem:[%s17112_s5 + $0x470] sm:$0xf0]  ;;  %v8112_v47 = vor.u32 %v8821_v13, %v8111_v49  ;;  %v8817_v27 = vld [vmem:[%s17112_s5 + $0x294] sm:$0xf0]  ;;  %v8255_v49 = vld [vmem:[%s17112_s5 + $0x3c8] sm:$0xf] }
 0x5bc   : > { %6771 = vmatpush.bf16.msrb.mxu2 %v8524_v0  ;;  %6662 = vmatmul.bf16.vlgmr.msrb.gmra.mxu3 %v16222_v5  ;;  %v8874_v0 = vld [vmem:[%s17112_s5 + $0x464] sm:$0xf]  ;;  %v8761_v12 = vld [vmem:[%s17112_s5 + $0xd4] sm:$0xf0]  ;;  %v8031_v6 = vld [vmem:[%s17112_s5 + $0x208] sm:$0xf] }
 0x5bd   : > { %v5285_v2 = vsel %vm18470_vm14, %v5284_v53, %v10364_v39  ;;  %v5366_v28 = vsel %vm18471_vm3, %v5365_v7, %v10363_v37  ;;  %6758 = vmatpush.bf16.msrb.mxu3 %v8396_v51  ;;  %v8460_v51 = vor.u32 %v8906_v23, %v8457_v25  ;;  %v8332_v17 = vor.u32 %v8874_v0, %v8329_v22  ;;  %v8153_v39 = vld [vmem:[%s17112_s5 + $0x310] sm:$0xf0]  ;;  %v8870_v37 = vld [vmem:[%s17112_s5 + $0x444] sm:$0xf]  ;;  %v7887_v7 = vld [vmem:[%s17112_s5 + $0xe8] sm:$0xf] }
 0x5be   : > { %v5367_v18 = vsel %vm5286_vm6, %v5366_v28, %v10353_v20  ;;  %6747 = vmatpush.bf16.msra.mxu1 %v8236_v30  ;;  %v5287_v57 = vsel %vm5286_vm6, %v5285_v2, %v10354_v38  ;;  %v8127_v20 = vld [vmem:[%s17112_s5 + $0x2c8] sm:$0xf]  ;;  %v8185_v38 = vld [vmem:[%s17112_s5 + $0x350] sm:$0xf0]  ;;  %v8172_v30 = vor.u32 %v8834_v45, %v8169_v3  ;;  %v8096_v53 = vor.u32 %v8817_v27, %v8095_v32  ;;  %v8857_v13 = vld [vmem:[%s17112_s5 + $0x3d4] sm:$0xf0] }
 0x5bf   : > { %v5379_v1 = vrot.slane %v5367_v18, 3  ;;  %v8128_v63 = vor.u32 %v8825_v48, %v8127_v20  ;;  %v8188_v56 = vor.u32 %v8838_v34, %v8185_v38  ;;  %v8425_v2 = vld [vmem:[%s17112_s5 + $0x530] sm:$0xf0]  ;;  %v8079_v28 = vld [vmem:[%s17112_s5 + $0x268] sm:$0xf]  ;;  %v8156_v31 = vor.u32 %v8830_v55, %v8153_v39 }
 0x5c0   : > { %6772 = vmatpush.bf16.msrb.mxu2 %v8508_v11  ;;  %v8765_v11 = vld [vmem:[%s17112_s5 + $0xf4] sm:$0xf0]  ;;  %v8316_v15 = vor.u32 %v8870_v37, %v8313_v40  ;;  %v8866_v18 = vld [vmem:[%s17112_s5 + $0x424] sm:$0xf]  ;;  %v8428_v44 = vor.u32 %v8898_v14, %v8425_v2  ;;  %v8281_v48 = vld [vmem:[%s17112_s5 + $0x410] sm:$0xf0]  ;;  %v8256_v52 = vor.u32 %v8857_v13, %v8255_v49 }
 0x5c1   : > { %v5393_v10 = vsel %vm1914_vm7, %v5287_v57, %v5379_v1  ;;  %6759 = vmatpush.bf16.msrb.mxu3 %v8380_v43  ;;  %v8813_v43 = vld [vmem:[%s17112_s5 + $0x274] sm:$0xf0]  ;;  %v7888_v36 = vor.u32 %v8765_v11, %v7887_v7  ;;  %v7871_v1 = vld [vmem:[%s17112_s5 + $0xc8] sm:$0xf]  ;;  %v8409_v57 = vld [vmem:[%s17112_s5 + $0x510] sm:$0xf0] }
 0x5c2   : > { %v16286_v61 = vpack.c.bf16 %v5393_v10, %v5393_v10  ;;  %6748 = vmatpush.bf16.msra.mxu1 %v8220_v42  ;;  %v8297_v42 = vld [vmem:[%s17112_s5 + $0x430] sm:$0xf0]  ;;  %v8080_v62 = vor.u32 %v8813_v43, %v8079_v28  ;;  %v8271_v10 = vld [vmem:[%s17112_s5 + $0x3e8] sm:$0xf]  ;;  %v7872_v59 = vor.u32 %v8761_v12, %v7871_v1  ;;  %v8862_v20 = vld [vmem:[%s17112_s5 + $0x404] sm:$0xf]  ;;  %v8412_v19 = vor.u32 %v8894_v4, %v8409_v57 }
 0x5c3   : > { %6740 = vmatmul.bf16.vlgmr.msra.gmra.mxu0 %v15813_v33  ;;  %v8300_v50 = vor.u32 %v8866_v18, %v8297_v42  ;;  %v8757_v34 = vld [vmem:[%s17112_s5 + $0xb4] sm:$0xf0]  ;;  %v8015_v38 = vld [vmem:[%s17112_s5 + $0x1e8] sm:$0xf]  ;;  %v8284_v25 = vor.u32 %v8862_v20, %v8281_v48 }
 0x5c4   : > { %6773 = vmatpush.bf16.msrb.mxu2 %v8492_v8  ;;  %6823 = vmatpush.bf16.msra.mxu0 %v8144_v41  ;;  %v8063_v8 = vld [vmem:[%s17112_s5 + $0x248] sm:$0xf]  ;;  %v8809_v41 = vld [vmem:[%s17112_s5 + $0x254] sm:$0xf0] }
 0x5c5   : > { %6688 = vmatmul.bf16.vlgmr.msrb.gmra.mxu1 %v16286_v61  ;;  %6760 = vmatpush.bf16.msrb.mxu3 %v8364_v60  ;;  %v8861_v60 = vld [vmem:[%s17112_s5 + $0x3f4] sm:$0xf0]  ;;  %v8064_v46 = vor.u32 %v8809_v41, %v8063_v8  ;;  %v8047_v23 = vld [vmem:[%s17112_s5 + $0x228] sm:$0xf] }
 0x5c6   : > { %6749 = vmatpush.bf16.msra.mxu1 %v8204_v58  ;;  %v7855_v58 = vld [vmem:[%s17112_s5 + $0xa8] sm:$0xf]  ;;  %v8753_v22 = vld [vmem:[%s17112_s5 + $0x94] sm:$0xf0] }
 0x5c7   : > { %v7839_v3 = vld [vmem:[%s17112_s5 + $0x88] sm:$0xf]  ;;  %v8801_v32 = vld [vmem:[%s17112_s5 + $0x214] sm:$0xf0] }
 0x5c8   : > { %6774 = vmatpush.bf16.msrb.mxu2 %v8476_v35  ;;  %6824 = vmatpush.bf16.msra.mxu0 %v8128_v63  ;;  %v8797_v35 = vld [vmem:[%s17112_s5 + $0x1f4] sm:$0xf0]  ;;  %v8272_v63 = vor.u32 %v8861_v60, %v8271_v10  ;;  %v8239_v27 = vld [vmem:[%s17112_s5 + $0x3a8] sm:$0xf]  ;;  %v7840_v39 = vor.u32 %v8753_v22, %v7839_v3 }
 0x5c9   : > { %6761 = vmatpush.bf16.msrb.mxu3 %v8348_v54  ;;  %v8805_v54 = vld [vmem:[%s17112_s5 + $0x234] sm:$0xf0]  ;;  %v8016_v45 = vor.u32 %v8797_v35, %v8015_v38  ;;  %v7823_v40 = vld [vmem:[%s17112_s5 + $0x68] sm:$0xf] }
 0x5ca   : > { %6750 = vmatpush.bf16.msra.mxu1 %v8188_v56  ;;  %v7856_v56 = vor.u32 %v8757_v34, %v7855_v58  ;;  %v8048_v0 = vor.u32 %v8805_v54, %v8047_v23  ;;  %v8933_v55 = vld [vmem:[%s17112_s5 + $0x634] sm:$0xf0]  ;;  %v7983_v7 = vld [vmem:[%s17112_s5 + $0x1a8] sm:$0xf]  ;;  %v8791_v58 = vld [vmem:[%s17112_s5 + $0x1cc] sm:$0xf] }
 0x5cb   : > { %6727 = vmatmul.bf16.vlgmr.msra.gmra.mxu2 %v16166_v26  ;;  %v8789_v11 = vld [vmem:[%s17112_s5 + $0x1b4] sm:$0xf0]  ;;  %v8223_v28 = vld [vmem:[%s17112_s5 + $0x388] sm:$0xf] }
 0x5cc   : > { %6775 = vmatpush.bf16.msrb.mxu2 %v8460_v51  ;;  %6825 = vmatpush.bf16.msra.mxu0 %v8112_v47  ;;  %v7999_v51 = vld [vmem:[%s17112_s5 + $0x1c8] sm:$0xf]  ;;  %v8793_v47 = vld [vmem:[%s17112_s5 + $0x1d4] sm:$0xf0]  ;;  %v7984_v18 = vor.u32 %v8789_v11, %v7983_v7 }
 0x5cd   : > { %6714 = vmatmul.bf16.vlgmr.msra.gmra.mxu3 %v15667_v9  ;;  %v8000_v37 = vor.u32 %v8793_v47, %v7999_v51  ;;  %v8849_v43 = vld [vmem:[%s17112_s5 + $0x394] sm:$0xf0]  ;;  %v7807_v42 = vld [vmem:[%s17112_s5 + $0x48] sm:$0xf] }
 0x5ce   : > { %6751 = vmatpush.bf16.msra.mxu1 %v8172_v30  ;;  %6762 = vmatpush.bf16.msrb.mxu3 %v8332_v17  ;;  %v8853_v30 = vld [vmem:[%s17112_s5 + $0x3b4] sm:$0xf0]  ;;  %v8559_v17 = vld [vmem:[%s17112_s5 + $0x628] sm:$0xf]  ;;  %v8224_v8 = vor.u32 %v8849_v43, %v8223_v28 }
 0x5cf   : > { %v8240_v14 = vor.u32 %v8853_v30, %v8239_v27  ;;  %v8560_v2 = vor.u32 %v8933_v55, %v8559_v17  ;;  %v8745_v1 = vld [vmem:[%s17112_s5 + $0x54] sm:$0xf0]  ;;  %v7967_v12 = vld [vmem:[%s17112_s5 + $0x188] sm:$0xf] }
 0x5d0   : > { %6776 = vmatpush.bf16.msrb.mxu2 %v8444_v29  ;;  %6826 = vmatpush.bf16.msra.mxu0 %v8096_v53  ;;  %v8032_v29 = vor.u32 %v8801_v32, %v8031_v6  ;;  %v8749_v53 = vld [vmem:[%s17112_s5 + $0x74] sm:$0xf0]  ;;  %v8207_v10 = vld [vmem:[%s17112_s5 + $0x368] sm:$0xf] }
 0x5d1   : > { %v8785_v4 = vld [vmem:[%s17112_s5 + $0x194] sm:$0xf0]  ;;  %v7791_v48 = vld [vmem:[%s17112_s5 + $0x28] sm:$0xf] }
 0x5d2   : > { %6752 = vmatpush.bf16.msra.mxu1 %v8156_v31  ;;  %6763 = vmatpush.bf16.msrb.mxu3 %v8316_v15  ;;  %v8543_v31 = vld [vmem:[%s17112_s5 + $0x608] sm:$0xf]  ;;  %v8929_v15 = vld [vmem:[%s17112_s5 + $0x614] sm:$0xf0]  ;;  %v7968_v20 = vor.u32 %v8785_v4, %v7967_v12 }
 0x5d3   : > { %8566 = vmatmul.msk.bf16.vlgmr.msrb.gmra.mxu0 %vm2345_vm15, %v16214_v21  ;;  %v8544_v41 = vor.u32 %v8929_v15, %v8543_v31  ;;  %v8845_v60 = vld [vmem:[%s17112_s5 + $0x374] sm:$0xf0]  ;;  %v7951_v34 = vld [vmem:[%s17112_s5 + $0x168] sm:$0xf]  ;;  %v8763_v31 = vld [vmem:[%s17112_s5 + $0xec] sm:$0xf] }
 0x5d4   : > { %6777 = vmatpush.bf16.msrb.mxu2 %v8428_v44  ;;  %6827 = vmatpush.bf16.msra.mxu0 %v8080_v62  ;;  %v8795_v44 = vld [vmem:[%s17112_s5 + $0x1ec] sm:$0xf]  ;;  %v8017_v62 = vld [vmem:[%s17112_s5 + $0x1f8] sm:$0xf0]  ;;  %v8781_v38 = vld [vmem:[%s17112_s5 + $0x174] sm:$0xf0]  ;;  %v8208_v35 = vor.u32 %v8845_v60, %v8207_v10 }
 0x5d5   : > { %6753 = vmatmul.bf16.vlgmr.msra.gmra.mxu1 %v16222_v5  ;;  %v8191_v23 = vld [vmem:[%s17112_s5 + $0x348] sm:$0xf]  ;;  %v8841_v54 = vld [vmem:[%s17112_s5 + $0x354] sm:$0xf0]  ;;  %v7952_v49 = vor.u32 %v8781_v38, %v7951_v34 }
 0x5d6   : > { %6797 = vmatpush.bf16.msrb.mxu1 %v7888_v36  ;;  %6764 = vmatpush.bf16.msrb.mxu3 %v8300_v50  ;;  %v7824_v36 = vor.u32 %v8749_v53, %v7823_v40  ;;  %v8020_v50 = vor.u32 %v8795_v44, %v8017_v62  ;;  %v7775_v13 = vld [vmem:[%s17112_s5 + $0x8] sm:$0xf]  ;;  %v8737_v3 = vld [vmem:[%s17112_s5 + $0x14] sm:$0xf0]  ;;  %v8192_v47 = vor.u32 %v8841_v54, %v8191_v23 }
 0x5d7   : > { %v8777_v22 = vld [vmem:[%s17112_s5 + $0x154] sm:$0xf0]  ;;  %v8175_v27 = vld [vmem:[%s17112_s5 + $0x328] sm:$0xf]  ;;  %v7776_v17 = vor.u32 %v8737_v3, %v7775_v13  ;;  %v7857_v13 = vld [vmem:[%s17112_s5 + $0xb8] sm:$0xf0] }
 0x5d8   : > { %6778 = vmatpush.bf16.msrb.mxu2 %v8412_v19  ;;  %6828 = vmatpush.bf16.msra.mxu0 %v8064_v46  ;;  %v8001_v19 = vld [vmem:[%s17112_s5 + $0x1d8] sm:$0xf0]  ;;  %v8741_v46 = vld [vmem:[%s17112_s5 + $0x34] sm:$0xf0]  ;;  %v8383_v11 = vld [vmem:[%s17112_s5 + $0x4c8] sm:$0xf] }
 0x5d9   : > { %v8893_v6 = vld [vmem:[%s17112_s5 + $0x4f4] sm:$0xf0]  ;;  %v8159_v28 = vld [vmem:[%s17112_s5 + $0x308] sm:$0xf]  ;;  %v7921_v3 = vld [vmem:[%s17112_s5 + $0x138] sm:$0xf0] }
 0x5da   : > { %6798 = vmatpush.bf16.msrb.mxu1 %v7872_v59  ;;  %6765 = vmatpush.bf16.msrb.mxu3 %v8284_v25  ;;  %v7808_v59 = vor.u32 %v8745_v1, %v7807_v42  ;;  %v7792_v25 = vor.u32 %v8741_v46, %v7791_v48  ;;  %v8837_v30 = vld [vmem:[%s17112_s5 + $0x334] sm:$0xf0]  ;;  %v7953_v42 = vld [vmem:[%s17112_s5 + $0x178] sm:$0xf0]  ;;  %v7903_v62 = vld [vmem:[%s17112_s5 + $0x108] sm:$0xf] }
 0x5db   : > { %6779 = vmatmul.bf16.vlgmr.msrb.gmra.mxu2 %v16286_v61  ;;  %v8773_v53 = vld [vmem:[%s17112_s5 + $0x134] sm:$0xf0]  ;;  %v8176_v7 = vor.u32 %v8837_v30, %v8175_v27  ;;  %v8367_v4 = vld [vmem:[%s17112_s5 + $0x4a8] sm:$0xf]  ;;  %v7873_v48 = vld [vmem:[%s17112_s5 + $0xd8] sm:$0xf0] }
 0x5dc   : > { %6836 = vmatpush.bf16.msra.mxu2 %v8272_v63  ;;  %6829 = vmatpush.bf16.msra.mxu0 %v8048_v0  ;;  %v8004_v63 = vor.u32 %v8791_v58, %v8001_v19  ;;  %v7935_v0 = vld [vmem:[%s17112_s5 + $0x148] sm:$0xf]  ;;  %v8833_v43 = vld [vmem:[%s17112_s5 + $0x314] sm:$0xf0]  ;;  %v8775_v19 = vld [vmem:[%s17112_s5 + $0x14c] sm:$0xf] }
 0x5dd   : > { %6766 = vmatmul.bf16.vlgmr.msrb.gmra.mxu3 %v16154_v24  ;;  %v7936_v55 = vor.u32 %v8777_v22, %v7935_v0  ;;  %v8769_v1 = vld [vmem:[%s17112_s5 + $0x114] sm:$0xf0]  ;;  %v8160_v12 = vor.u32 %v8833_v43, %v8159_v28  ;;  %v8527_v10 = vld [vmem:[%s17112_s5 + $0x5e8] sm:$0xf]  ;;  %v7937_v46 = vld [vmem:[%s17112_s5 + $0x158] sm:$0xf0] }
 0x5de   : > { %6799 = vmatpush.bf16.msrb.mxu1 %v7856_v56  ;;  %6810 = vmatpush.bf16.msra.mxu3 %v8016_v45  ;;  %v8787_v56 = vld [vmem:[%s17112_s5 + $0x1ac] sm:$0xf]  ;;  %v7985_v45 = vld [vmem:[%s17112_s5 + $0x1b8] sm:$0xf0]  ;;  %v8925_v60 = vld [vmem:[%s17112_s5 + $0x5f4] sm:$0xf0] }
 0x5df   : > { %v7988_v32 = vor.u32 %v8787_v56, %v7985_v45  ;;  %v8528_v34 = vor.u32 %v8925_v60, %v8527_v10  ;;  %v8351_v38 = vld [vmem:[%s17112_s5 + $0x488] sm:$0xf]  ;;  %v8921_v54 = vld [vmem:[%s17112_s5 + $0x5d4] sm:$0xf0]  ;;  %v8771_v45 = vld [vmem:[%s17112_s5 + $0x12c] sm:$0xf] }
 0x5e0   : > { %6837 = vmatpush.bf16.msra.mxu2 %v8256_v52  ;;  %6830 = vmatpush.bf16.msra.mxu0 %v8032_v29  ;;  %v8399_v52 = vld [vmem:[%s17112_s5 + $0x4e8] sm:$0xf]  ;;  %v8751_v27 = vld [vmem:[%s17112_s5 + $0x8c] sm:$0xf]  ;;  %v7841_v30 = vld [vmem:[%s17112_s5 + $0x98] sm:$0xf0] }
 0x5e1   : > { %v16507_v57 = vpop.f32.mrf.mxu2  ;;  %v8400_v40 = vor.u32 %v8893_v6, %v8399_v52  ;;  %v7919_v29 = vld [vmem:[%s17112_s5 + $0x128] sm:$0xf]  ;;  %v8917_v6 = vld [vmem:[%s17112_s5 + $0x5b4] sm:$0xf0]  ;;  %v8747_v43 = vld [vmem:[%s17112_s5 + $0x6c] sm:$0xf] }
 0x5e2   : > { %6800 = vmatpush.bf16.msrb.mxu1 %v7840_v39  ;;  %6811 = vmatpush.bf16.msra.mxu3 %v8000_v37  ;;  %v8783_v39 = vld [vmem:[%s17112_s5 + $0x18c] sm:$0xf]  ;;  %v7969_v37 = vld [vmem:[%s17112_s5 + $0x198] sm:$0xf0]  ;;  %v7920_v15 = vor.u32 %v8773_v53, %v7919_v29  ;;  %v8511_v23 = vld [vmem:[%s17112_s5 + $0x5c8] sm:$0xf] }
 0x5e3   : > { %6831 = vmatmul.bf16.vlgmr.msra.gmra.mxu0 %v15813_v33  ;;  %v8512_v0 = vor.u32 %v8921_v54, %v8511_v23  ;;  %v8335_v22 = vld [vmem:[%s17112_s5 + $0x468] sm:$0xf]  ;;  %v8873_v29 = vld [vmem:[%s17112_s5 + $0x454] sm:$0xf0]  ;;  %v8923_v53 = vld [vmem:[%s17112_s5 + $0x5ec] sm:$0xf] }
 0x5e4   : > { %6838 = vmatpush.bf16.msra.mxu2 %v8240_v14  ;;  %6881 = vmatpush.bf16.msrb.mxu0 %v8560_v2  ;;  %v8889_v14 = vld [vmem:[%s17112_s5 + $0x4d4] sm:$0xf0]  ;;  %v7972_v2 = vor.u32 %v8783_v39, %v7969_v37  ;;  %v8495_v52 = vld [vmem:[%s17112_s5 + $0x5a8] sm:$0xf]  ;;  %v7905_v39 = vld [vmem:[%s17112_s5 + $0x118] sm:$0xf0] }
 0x5e5   : > { %v8384_v44 = vor.u32 %v8889_v14, %v8383_v11  ;;  %v8319_v37 = vld [vmem:[%s17112_s5 + $0x448] sm:$0xf]  ;;  %v7844_v11 = vor.u32 %v8751_v27, %v7841_v30  ;;  %v8739_v23 = vld [vmem:[%s17112_s5 + $0x2c] sm:$0xf]  ;;  %v8401_v30 = vld [vmem:[%s17112_s5 + $0x4f8] sm:$0xf0] }
 0x5e6   : > { %6801 = vmatpush.bf16.msrb.mxu1 %v7824_v36  ;;  %6812 = vmatpush.bf16.msra.mxu3 %v7984_v18  ;;  %v7889_v36 = vld [vmem:[%s17112_s5 + $0xf8] sm:$0xf0]  ;;  %v8779_v18 = vld [vmem:[%s17112_s5 + $0x16c] sm:$0xf]  ;;  %v8479_v14 = vld [vmem:[%s17112_s5 + $0x588] sm:$0xf] }
 0x5e7   : > { %v8891_v27 = vld [vmem:[%s17112_s5 + $0x4ec] sm:$0xf] }
 0x5e8   : > { %6839 = vmatpush.bf16.msra.mxu2 %v8224_v8  ;;  %6882 = vmatpush.bf16.msrb.mxu0 %v8544_v41  ;;  %v8885_v8 = vld [vmem:[%s17112_s5 + $0x4b4] sm:$0xf0]  ;;  %v7892_v41 = vor.u32 %v8763_v31, %v7889_v36  ;;  %v7825_v31 = vld [vmem:[%s17112_s5 + $0x78] sm:$0xf0] }
 0x5e9   : > { %v6652_v51 = vpop.f32.mrf.mxu2  ;;  %v8368_v58 = vor.u32 %v8885_v8, %v8367_v4  ;;  %v8463_v4 = vld [vmem:[%s17112_s5 + $0x568] sm:$0xf]  ;;  %v8909_v8 = vld [vmem:[%s17112_s5 + $0x574] sm:$0xf0] }
 0x5ea   : > { %6802 = vmatpush.bf16.msrb.mxu1 %v7808_v59  ;;  %6813 = vmatpush.bf16.msra.mxu3 %v7968_v20  ;;  %v7904_v59 = vor.u32 %v8769_v1, %v7903_v62  ;;  %v8759_v20 = vld [vmem:[%s17112_s5 + $0xcc] sm:$0xf]  ;;  %v8877_v51 = vld [vmem:[%s17112_s5 + $0x474] sm:$0xf0]  ;;  %v8513_v1 = vld [vmem:[%s17112_s5 + $0x5d8] sm:$0xf0] }
 0x5eb   : > { %v8919_v62 = vld [vmem:[%s17112_s5 + $0x5cc] sm:$0xf] }
 0x5ec   : > { %6901 = vmatpush.bf16.msra.mxu0 %v8020_v50  ;;  %6840 = vmatpush.bf16.msra.mxu2 %v8208_v35  ;;  %v7956_v50 = vor.u32 %v8779_v18, %v7953_v42  ;;  %v8881_v35 = vld [vmem:[%s17112_s5 + $0x494] sm:$0xf0]  ;;  %v8303_v18 = vld [vmem:[%s17112_s5 + $0x428] sm:$0xf]  ;;  %v8516_v60 = vor.u32 %v8919_v62, %v8513_v1  ;;  %v8815_v1 = vld [vmem:[%s17112_s5 + $0x28c] sm:$0xf] }
 0x5ed   : > { %v8352_v56 = vor.u32 %v8881_v35, %v8351_v38  ;;  %v8905_v38 = vld [vmem:[%s17112_s5 + $0x554] sm:$0xf0]  ;;  %v8827_v35 = vld [vmem:[%s17112_s5 + $0x2ec] sm:$0xf] }
 0x5ee   : > { %6803 = vmatpush.bf16.msrb.mxu1 %v7792_v25  ;;  %6814 = vmatpush.bf16.msra.mxu3 %v7952_v49  ;;  %v7940_v25 = vor.u32 %v8775_v19, %v7937_v46  ;;  %v8755_v49 = vld [vmem:[%s17112_s5 + $0xac] sm:$0xf]  ;;  %v8497_v46 = vld [vmem:[%s17112_s5 + $0x5b8] sm:$0xf0] }
 0x5ef   : > { %v8915_v19 = vld [vmem:[%s17112_s5 + $0x5ac] sm:$0xf] }
 0x5f0   : > { %6902 = vmatpush.bf16.msra.mxu0 %v8004_v63  ;;  %6841 = vmatpush.bf16.msra.mxu2 %v8192_v47  ;;  %v7876_v63 = vor.u32 %v8759_v20, %v7873_v48  ;;  %v7860_v47 = vor.u32 %v8755_v49, %v7857_v13  ;;  %v8865_v20 = vld [vmem:[%s17112_s5 + $0x414] sm:$0xf0]  ;;  %v8464_v48 = vor.u32 %v8909_v8, %v8463_v4  ;;  %v8097_v4 = vld [vmem:[%s17112_s5 + $0x298] sm:$0xf0]  ;;  %v8855_v8 = vld [vmem:[%s17112_s5 + $0x3cc] sm:$0xf] }
 0x5f2   : > { %6804 = vmatpush.bf16.msrb.mxu1 %v7776_v17  ;;  %6815 = vmatpush.bf16.msra.mxu3 %v7936_v55  ;;  %v8336_v17 = vor.u32 %v8877_v51, %v8335_v22  ;;  %v8767_v55 = vld [vmem:[%s17112_s5 + $0x10c] sm:$0xf]  ;;  %v8901_v22 = vld [vmem:[%s17112_s5 + $0x534] sm:$0xf0] }
 0x5f3   : > { %8567 = vmatmul.msk.bf16.vlgmr.msrb.gmra.mxu0 %vm2345_vm15, %v16214_v21  ;;  %v7908_v28 = vor.u32 %v8767_v55, %v7905_v39  ;;  %v8823_v51 = vld [vmem:[%s17112_s5 + $0x2cc] sm:$0xf] }
 0x5f4   : > { %6903 = vmatpush.bf16.msra.mxu0 %v7988_v32  ;;  %6842 = vmatpush.bf16.msra.mxu2 %v8176_v7  ;;  %v7924_v32 = vor.u32 %v8771_v45, %v7921_v3  ;;  %v8529_v7 = vld [vmem:[%s17112_s5 + $0x5f8] sm:$0xf0]  ;;  %v8911_v45 = vld [vmem:[%s17112_s5 + $0x58c] sm:$0xf] }
 0x5f5   : > { %6805 = vmatmul.bf16.vlgmr.msrb.gmra.mxu1 %v15667_v9  ;;  %v8532_v36 = vor.u32 %v8923_v53, %v8529_v7  ;;  %v8481_v3 = vld [vmem:[%s17112_s5 + $0x598] sm:$0xf0]  ;;  %v8907_v39 = vld [vmem:[%s17112_s5 + $0x56c] sm:$0xf]  ;;  %v8897_v53 = vld [vmem:[%s17112_s5 + $0x514] sm:$0xf0] }
 0x5f6   : > { %6849 = vmatpush.bf16.msra.mxu1 %v8400_v40  ;;  %6816 = vmatpush.bf16.msra.mxu3 %v7920_v15  ;;  %v8496_v40 = vor.u32 %v8917_v6, %v8495_v52  ;;  %v8320_v15 = vor.u32 %v8873_v29, %v8319_v37  ;;  %v8735_v52 = vld [vmem:[%s17112_s5 + $0xc] sm:$0xf]  ;;  %v7777_v6 = vld [vmem:[%s17112_s5 + $0x18] sm:$0xf0]  ;;  %v8415_v29 = vld [vmem:[%s17112_s5 + $0x508] sm:$0xf] }
 0x5f7   : > { %v8465_v37 = vld [vmem:[%s17112_s5 + $0x578] sm:$0xf0]  ;;  %v8819_v7 = vld [vmem:[%s17112_s5 + $0x2ac] sm:$0xf] }
 0x5f8   : > { %6904 = vmatpush.bf16.msra.mxu0 %v7972_v2  ;;  %6843 = vmatpush.bf16.msra.mxu2 %v8160_v12  ;;  %v8913_v2 = vld [vmem:[%s17112_s5 + $0x594] sm:$0xf0]  ;;  %v7828_v12 = vor.u32 %v8747_v43, %v7825_v31  ;;  %v8468_v43 = vor.u32 %v8907_v39, %v8465_v37  ;;  %v8887_v31 = vld [vmem:[%s17112_s5 + $0x4cc] sm:$0xf]  ;;  %v8321_v37 = vld [vmem:[%s17112_s5 + $0x458] sm:$0xf0] }
 0x5f9   : > { %v8480_v42 = vor.u32 %v8913_v2, %v8479_v14  ;;  %v8113_v14 = vld [vmem:[%s17112_s5 + $0x2b8] sm:$0xf0]  ;;  %v8859_v2 = vld [vmem:[%s17112_s5 + $0x3ec] sm:$0xf] }
 0x5fa   : > { %6850 = vmatpush.bf16.msra.mxu1 %v8384_v44  ;;  %6817 = vmatpush.bf16.msra.mxu3 %v7904_v59  ;;  %v8869_v44 = vld [vmem:[%s17112_s5 + $0x434] sm:$0xf0]  ;;  %v8287_v59 = vld [vmem:[%s17112_s5 + $0x408] sm:$0xf]  ;;  %v8871_v39 = vld [vmem:[%s17112_s5 + $0x44c] sm:$0xf] }
 0x5fb   : > { %6844 = vmatmul.bf16.vlgmr.msra.gmra.mxu2 %v16222_v5  ;;  %v8304_v10 = vor.u32 %v8869_v44, %v8303_v18  ;;  %v8288_v54 = vor.u32 %v8865_v20, %v8287_v59  ;;  %v8903_v18 = vld [vmem:[%s17112_s5 + $0x54c] sm:$0xf]  ;;  %v8116_v44 = vor.u32 %v8819_v7, %v8113_v14  ;;  %v8433_v20 = vld [vmem:[%s17112_s5 + $0x538] sm:$0xf0] }
 0x5fc   : > { %6888 = vmatpush.bf16.msrb.mxu2 %v7892_v41  ;;  %6905 = vmatpush.bf16.msra.mxu0 %v7956_v50  ;;  %v8743_v41 = vld [vmem:[%s17112_s5 + $0x4c] sm:$0xf]  ;;  %v7809_v50 = vld [vmem:[%s17112_s5 + $0x58] sm:$0xf0] }
 0x5fd   : > { %6818 = vmatmul.bf16.vlgmr.msra.gmra.mxu3 %v16166_v26  ;;  %v8899_v59 = vld [vmem:[%s17112_s5 + $0x52c] sm:$0xf]  ;;  %v8033_v7 = vld [vmem:[%s17112_s5 + $0x218] sm:$0xf0] }
 0x5fe   : > { %6851 = vmatpush.bf16.msra.mxu1 %v8368_v58  ;;  %6862 = vmatpush.bf16.msrb.mxu3 %v8528_v34  ;;  %v8447_v58 = vld [vmem:[%s17112_s5 + $0x548] sm:$0xf]  ;;  %v7812_v34 = vor.u32 %v8743_v41, %v7809_v50  ;;  %v8257_v41 = vld [vmem:[%s17112_s5 + $0x3d8] sm:$0xf0]  ;;  %v8839_v14 = vld [vmem:[%s17112_s5 + $0x34c] sm:$0xf] }
 0x5ff   : > { %v8448_v49 = vor.u32 %v8905_v38, %v8447_v58  ;;  %v8260_v58 = vor.u32 %v8855_v8, %v8257_v41  ;;  %v8241_v38 = vld [vmem:[%s17112_s5 + $0x3b8] sm:$0xf0] }
 0x600   : > { %6889 = vmatpush.bf16.msrb.mxu2 %v7876_v63  ;;  %6906 = vmatpush.bf16.msra.mxu0 %v7940_v25  ;;  %v8145_v63 = vld [vmem:[%s17112_s5 + $0x2f8] sm:$0xf0]  ;;  %v8500_v25 = vor.u32 %v8915_v19, %v8497_v46  ;;  %v8811_v19 = vld [vmem:[%s17112_s5 + $0x26c] sm:$0xf] }
 0x601   : > { %v8148_v13 = vor.u32 %v8827_v35, %v8145_v63  ;;  %v8436_v35 = vor.u32 %v8899_v59, %v8433_v20  ;;  %v8879_v63 = vld [vmem:[%s17112_s5 + $0x48c] sm:$0xf]  ;;  %v8545_v8 = vld [vmem:[%s17112_s5 + $0x618] sm:$0xf0] }
 0x602   : > { %6852 = vmatpush.bf16.msra.mxu1 %v8352_v56  ;;  %6863 = vmatpush.bf16.msrb.mxu3 %v8512_v0  ;;  %v8431_v56 = vld [vmem:[%s17112_s5 + $0x528] sm:$0xf] }
 0x604   : > { %6890 = vmatpush.bf16.msrb.mxu2 %v7860_v47  ;;  %6907 = vmatpush.bf16.msra.mxu0 %v7924_v32  ;;  %v8129_v47 = vld [vmem:[%s17112_s5 + $0x2d8] sm:$0xf0]  ;;  %v8484_v32 = vor.u32 %v8911_v45, %v8481_v3  ;;  %v8847_v3 = vld [vmem:[%s17112_s5 + $0x38c] sm:$0xf] }
 0x605   : > { %v8132_v55 = vor.u32 %v8823_v51, %v8129_v47  ;;  %v8065_v45 = vld [vmem:[%s17112_s5 + $0x258] sm:$0xf0]  ;;  %v8875_v51 = vld [vmem:[%s17112_s5 + $0x46c] sm:$0xf] }
 0x606   : > { %6853 = vmatpush.bf16.msra.mxu1 %v8336_v17  ;;  %6864 = vmatpush.bf16.msrb.mxu3 %v8496_v40  ;;  %v8432_v17 = vor.u32 %v8901_v22, %v8431_v56  ;;  %v7780_v40 = vor.u32 %v8735_v52, %v7777_v6  ;;  %v8337_v47 = vld [vmem:[%s17112_s5 + $0x478] sm:$0xf0] }
 0x608   : > { %6891 = vmatpush.bf16.msrb.mxu2 %v7844_v11  ;;  %6908 = vmatpush.bf16.msra.mxu0 %v7908_v28  ;;  %v8404_v11 = vor.u32 %v8891_v27, %v8401_v30  ;;  %v8273_v28 = vld [vmem:[%s17112_s5 + $0x3f8] sm:$0xf0]  ;;  %v8340_v27 = vor.u32 %v8875_v51, %v8337_v47 }
 0x609   : > { %v8276_v62 = vor.u32 %v8859_v2, %v8273_v28  ;;  %v8049_v30 = vld [vmem:[%s17112_s5 + $0x238] sm:$0xf0]  ;;  %v8867_v28 = vld [vmem:[%s17112_s5 + $0x42c] sm:$0xf] }
 0x60a   : > { %6854 = vmatpush.bf16.msra.mxu1 %v8320_v15  ;;  %6865 = vmatpush.bf16.msrb.mxu3 %v8480_v42  ;;  %v8385_v15 = vld [vmem:[%s17112_s5 + $0x4d8] sm:$0xf0] }
 0x60b   : > { %6909 = vmatmul.bf16.vlgmr.msra.gmra.mxu0 %v16166_v26  ;;  %v7793_v26 = vld [vmem:[%s17112_s5 + $0x38] sm:$0xf0] }
 0x60c   : > { %6953 = vmatpush.bf16.msrb.mxu0 %v8532_v36  ;;  %6892 = vmatpush.bf16.msrb.mxu2 %v7828_v12  ;;  %v7796_v0 = vor.u32 %v8739_v23, %v7793_v26  ;;  %v8416_v36 = vor.u32 %v8897_v53, %v8415_v29  ;;  %v8449_v42 = vld [vmem:[%s17112_s5 + $0x558] sm:$0xf0]  ;;  %v8388_v12 = vor.u32 %v8887_v31, %v8385_v15  ;;  %v8895_v26 = vld [vmem:[%s17112_s5 + $0x50c] sm:$0xf] }
 0x60d   : > { %v8452_v50 = vor.u32 %v8903_v18, %v8449_v42  ;;  %v8353_v23 = vld [vmem:[%s17112_s5 + $0x498] sm:$0xf0]  ;;  %v8799_v53 = vld [vmem:[%s17112_s5 + $0x20c] sm:$0xf] }
 0x60e   : > { %6855 = vmatpush.bf16.msra.mxu1 %v8304_v10  ;;  %6866 = vmatpush.bf16.msrb.mxu3 %v8464_v48  ;;  %v8883_v10 = vld [vmem:[%s17112_s5 + $0x4ac] sm:$0xf]  ;;  %v8100_v48 = vor.u32 %v8815_v1, %v8097_v4  ;;  %v8356_v56 = vor.u32 %v8879_v63, %v8353_v23  ;;  %v8193_v2 = vld [vmem:[%s17112_s5 + $0x358] sm:$0xf0]  ;;  %v8036_v15 = vor.u32 %v8799_v53, %v8033_v7 }
 0x60f   : > { %v8561_v31 = vld [vmem:[%s17112_s5 + $0x638] sm:$0xf0]  ;;  %v8835_v42 = vld [vmem:[%s17112_s5 + $0x32c] sm:$0xf] }
 0x610   : > { %6954 = vmatpush.bf16.msrb.mxu0 %v8516_v60  ;;  %6893 = vmatpush.bf16.msrb.mxu2 %v7812_v34  ;;  %v8369_v60 = vld [vmem:[%s17112_s5 + $0x4b8] sm:$0xf0]  ;;  %v8851_v34 = vld [vmem:[%s17112_s5 + $0x3ac] sm:$0xf] }
 0x611   : > { %v8372_v46 = vor.u32 %v8883_v10, %v8369_v60  ;;  %v8927_v4 = vld [vmem:[%s17112_s5 + $0x60c] sm:$0xf]  ;;  %v8161_v60 = vld [vmem:[%s17112_s5 + $0x318] sm:$0xf0] }
 0x612   : > { %6856 = vmatpush.bf16.msra.mxu1 %v8288_v54  ;;  %6867 = vmatpush.bf16.msrb.mxu3 %v8448_v49  ;;  %v8417_v54 = vld [vmem:[%s17112_s5 + $0x518] sm:$0xf0]  ;;  %v8244_v49 = vor.u32 %v8851_v34, %v8241_v38  ;;  %v8831_v10 = vld [vmem:[%s17112_s5 + $0x30c] sm:$0xf]  ;;  %v8548_v59 = vor.u32 %v8927_v4, %v8545_v8  ;;  %v8948_v34 = vld [vmem:[%s17114_s7 + $0x70] sm:$0xff] }
 0x613   : > { %v8420_v22 = vor.u32 %v8895_v26, %v8417_v54  ;;  %v8164_v20 = vor.u32 %v8831_v10, %v8161_v60  ;;  %v8943_v53 = vld [vmem:[%s17114_s7 + $0x48] sm:$0xff]  ;;  %v8957_v10 = vld [vmem:[%s17114_s7 + $0xb8] sm:$0xff] }
 0x614   : > { %6955 = vmatpush.bf16.msrb.mxu0 %v8500_v25  ;;  %6894 = vmatpush.bf16.msrb.mxu2 %v7796_v0  ;;  %v8225_v0 = vld [vmem:[%s17112_s5 + $0x398] sm:$0xf0] }
 0x615   : > { %6857 = vmatmul.bf16.vlgmr.msra.gmra.mxu1 %v16154_v24  ;;  %v8228_v6 = vor.u32 %v8847_v3, %v8225_v0 }
 0x616   : > { %6914 = vmatpush.bf16.msrb.mxu1 %v8148_v13  ;;  %6868 = vmatpush.bf16.msrb.mxu3 %v8432_v17  ;;  %v8807_v13 = vld [vmem:[%s17112_s5 + $0x24c] sm:$0xf] }
 0x617   : > { %v8068_v52 = vor.u32 %v8807_v13, %v8065_v45  ;;  %v8843_v17 = vld [vmem:[%s17112_s5 + $0x36c] sm:$0xf]  ;;  %v8937_v45 = vld [vmem:[%s17114_s7 + $0x18] sm:$0xff] }
 0x618   : > { %6956 = vmatpush.bf16.msrb.mxu0 %v8484_v32  ;;  %6895 = vmatpush.bf16.msrb.mxu2 %v7780_v40  ;;  %v8803_v32 = vld [vmem:[%s17112_s5 + $0x22c] sm:$0xf] }
 0x619   : > { %v8052_v40 = vor.u32 %v8803_v32, %v8049_v30 }
 0x61a   : > { %6915 = vmatpush.bf16.msrb.mxu1 %v8132_v55  ;;  %6869 = vmatpush.bf16.msrb.mxu3 %v8416_v36  ;;  %v8209_v55 = vld [vmem:[%s17112_s5 + $0x378] sm:$0xf0]  ;;  %v8196_v36 = vor.u32 %v8839_v14, %v8193_v2 }
 0x61b   : > { %6896 = vmatmul.bf16.vlgmr.msrb.gmra.mxu2 %v15667_v9  ;;  %v8081_v9 = vld [vmem:[%s17112_s5 + $0x278] sm:$0xf0]  ;;  %v8212_v29 = vor.u32 %v8843_v17, %v8209_v55 }
 0x61c   : > { %6940 = vmatpush.bf16.msra.mxu2 %v8404_v11  ;;  %6957 = vmatpush.bf16.msrb.mxu0 %v8468_v43  ;;  %v8084_v25 = vor.u32 %v8811_v19, %v8081_v9  ;;  %v8324_v11 = vor.u32 %v8871_v39, %v8321_v37  ;;  %v8305_v43 = vld [vmem:[%s17112_s5 + $0x438] sm:$0xf0]  ;;  %v8940_v9 = vld [vmem:[%s17114_s7 + $0x30] sm:$0xff]  ;;  %v8934_v39 = vld [vmem:[%s17114_s7] sm:$0xff] }
 0x61d   : > { %6870 = vmatmul.bf16.vlgmr.msrb.gmra.mxu3 %v16286_v61  ;;  %v8308_v18 = vor.u32 %v8867_v28, %v8305_v43  ;;  %v8944_v37 = vld [vmem:[%s17114_s7 + $0x50] sm:$0xff]  ;;  %v8942_v43 = vld [vmem:[%s17114_s7 + $0x40] sm:$0xff] }
 0x61e   : > { %6916 = vmatpush.bf16.msrb.mxu1 %v8116_v44  ;;  %6927 = vmatpush.bf16.msra.mxu3 %v8276_v62  ;;  %v8177_v44 = vld [vmem:[%s17112_s5 + $0x338] sm:$0xf0]  ;;  %v8863_v62 = vld [vmem:[%s17112_s5 + $0x40c] sm:$0xf] }
 0x61f   : > { %v8180_v41 = vor.u32 %v8835_v42, %v8177_v44 }
 0x620   : > { %6941 = vmatpush.bf16.msra.mxu2 %v8388_v12  ;;  %6958 = vmatpush.bf16.msrb.mxu0 %v8452_v50  ;;  %v8289_v12 = vld [vmem:[%s17112_s5 + $0x418] sm:$0xf0] }
 0x621   : > { %v8292_v50 = vor.u32 %v8863_v62, %v8289_v12 }
 0x622   : > { %6917 = vmatpush.bf16.msrb.mxu1 %v8100_v48  ;;  %6928 = vmatpush.bf16.msra.mxu3 %v8260_v58  ;;  %v8941_v48 = vld [vmem:[%s17114_s7 + $0x38] sm:$0xff] }
 0x623   : > { %v8949_v58 = vld [vmem:[%s17114_s7 + $0x78] sm:$0xff] }
 0x624   : > { %6942 = vmatpush.bf16.msra.mxu2 %v8372_v46  ;;  %6959 = vmatpush.bf16.msrb.mxu0 %v8436_v35  ;;  %v16980_v46 = vld [vmem:[%s17113_s6] sm:$0xf]  ;;  %v8947_v35 = vld [vmem:[%s17114_s7 + $0x68] sm:$0xff] }
 0x625   : > { %v5604_v38 = vperm.slane %v16980_v46, 0  ;;  %v5605_v7 = vperm.slane %v16980_v46, 1 }
 0x626   : > { %6918 = vmatpush.bf16.msrb.mxu1 %v8084_v25  ;;  %6929 = vmatpush.bf16.msra.mxu3 %v8244_v49  ;;  %v8938_v25 = vld [vmem:[%s17114_s7 + $0x20] sm:$0xff] }
 0x627   : > { %v6625_v63 = vadd.f32 %v16008_v16, %v5604_v38  ;;  %v8945_v16 = vld [vmem:[%s17114_s7 + $0x58] sm:$0xff]  ;;  %v8955_v38 = vld [vmem:[%s17114_s7 + $0xa8] sm:$0xff] }
 0x628   : > { %6943 = vmatpush.bf16.msra.mxu2 %v8356_v56  ;;  %6960 = vmatpush.bf16.msrb.mxu0 %v8420_v22 }
 0x62a   : > { %6919 = vmatpush.bf16.msrb.mxu1 %v8068_v52  ;;  %6930 = vmatpush.bf16.msra.mxu3 %v8228_v6  ;;  %v17016_v52 = vstv %s6979_s12 }
 0x62b   : > { %6961 = vmatmul.bf16.vlgmr.msrb.gmra.mxu0 %v16286_v61  ;;  %v8931_v61 = vld [vmem:[%s17112_s5 + $0x62c] sm:$0xf] }
 0x62c   : > { %6944 = vmatpush.bf16.msra.mxu2 %v8340_v27  ;;  %v8564_v1 = vor.u32 %v8931_v61, %v8561_v31  ;;  %v8935_v27 = vld [vmem:[%s17114_s7 + $0x8] sm:$0xff] }
 0x62e   : > { %6920 = vmatpush.bf16.msrb.mxu1 %v8052_v40  ;;  %6931 = vmatpush.bf16.msra.mxu3 %v8212_v29 }
 0x630   : > { %6945 = vmatpush.bf16.msra.mxu2 %v8324_v11  ;;  %v6676_v19 = vpop.f32.mrf.mxu0 }
 0x632   : > { %6921 = vmatpush.bf16.msrb.mxu1 %v8036_v15  ;;  %6932 = vmatpush.bf16.msra.mxu3 %v8196_v36 }
 0x634   : > { %6946 = vmatpush.bf16.msra.mxu2 %v8308_v18 }
 0x635   : > { %6922 = vmatmul.bf16.vlgmr.msrb.gmra.mxu1 %v15813_v33  ;;  %v6637_v33 = vpop.f32.mrf.mxu1 }
 0x636   : > { %6972 = vmatpush.bf16.msra.mxu1 %v8564_v1  ;;  %6933 = vmatpush.bf16.msra.mxu3 %v8180_v41  ;;  %v6638_v26 = vadd.f32 %v6637_v33, %v6625_v63 }
 0x638   : > { %6947 = vmatpush.bf16.msra.mxu2 %v8292_v50  ;;  %v6678_v23 = vpop.f32.mrf.mxu0  ;;  %v6651_v13 = vadd.f32 %v16507_v57, %v6638_v26 }
 0x639   : > { %v8953_v23 = vld [vmem:[%s17114_s7 + $0x98] sm:$0xff] }
 0x63a   : > { %6973 = vmatpush.bf16.msra.mxu1 %v8548_v59  ;;  %6934 = vmatpush.bf16.msra.mxu3 %v8164_v20  ;;  %v8956_v20 = vld [vmem:[%s17114_s7 + $0xb0] sm:$0xff] }
 0x63b   : > { %6948 = vmatmul.bf16.vlgmr.msra.gmra.mxu2 %v16154_v24  ;;  %v8939_v24 = vld [vmem:[%s17114_s7 + $0x28] sm:$0xff] }
 0x63c   : > { %7296 = vmatpush.bf16.msrb.mxu2 %v8957_v10 }
 0x63d   : > { %6935 = vmatmul.bf16.vlgmr.msra.gmra.mxu3 %v16222_v5  ;;  %v6639_v54 = vpop.f32.mrf.mxu1  ;;  %v8946_v5 = vld [vmem:[%s17114_s7 + $0x60] sm:$0xff] }
 0x63e   : > { %7283 = vmatpush.bf16.msrb.mxu1 %v8949_v58  ;;  %7270 = vmatpush.bf16.msrb.mxu3 %v8941_v48  ;;  %v6702_v49 = vpop.f32.mrf.mxu2 }
 0x63f   : > { %v6663_v56 = vpop.f32.mrf.mxu3 }
 0x640   : > { %v6664_v3 = vadd.f32 %v6663_v56, %v6651_v13  ;;  %v6741_v0 = vpop.f32.mrf.mxu0  ;;  %7297 = vmatpush.bf16.msrb.mxu2 %v8956_v20  ;;  %v8951_v56 = vld [vmem:[%s17114_s7 + $0x88] sm:$0xff] }
 0x642   : > { %7284 = vmatpush.bf16.msrb.mxu1 %v8948_v34  ;;  %7271 = vmatpush.bf16.msrb.mxu3 %v8940_v9  ;;  %v6677_v22 = vadd.f32 %v6676_v19, %v6664_v3  ;;  %v8950_v3 = vld [vmem:[%s17114_s7 + $0x80] sm:$0xff] }
 0x644   : > { %7298 = vmatpush.bf16.msrb.mxu2 %v8955_v38 }
 0x645   : > { %8568 = vmatmul.msk.bf16.vlgmr.msra.gmra.mxu1 %vm2345_vm15, %v16214_v21  ;;  %v6689_v51 = vpop.f32.mrf.mxu1  ;;  %v8936_v21 = vld [vmem:[%s17114_s7 + $0x10] sm:$0xff] }
 0x646   : > { %7285 = vmatpush.bf16.msrb.mxu1 %v8947_v35  ;;  %7272 = vmatpush.bf16.msrb.mxu3 %v8939_v24  ;;  %v6690_v57 = vadd.f32 %v6689_v51, %v6677_v22  ;;  %v6704_v6 = vpop.f32.mrf.mxu2  ;;  %v8954_v35 = vld [vmem:[%s17114_s7 + $0xa0] sm:$0xff]  ;;  %v5606_v22 = vperm.slane %v16980_v46, 2 }
 0x647   : > { %v6665_v32 = vpop.f32.mrf.mxu3 }
 0x648   : > { %v6703_v47 = vadd.f32 %v6702_v49, %v6690_v57  ;;  %v6743_v30 = vpop.f32.mrf.mxu0  ;;  %7299 = vmatpush.bf16.msrb.mxu2 %v8954_v35 }
 0x64a   : > { %7286 = vmatpush.bf16.msrb.mxu1 %v8946_v5  ;;  %7273 = vmatpush.bf16.msrb.mxu3 %v8938_v25  ;;  %v6985_v17 = vmul.f32 %v17016_v52, %v6703_v47  ;;  %vm6980_vm7 = vcmp.ge.f32.partialorder %v6703_v47, 0.0  ;;  %v8952_v5 = vld [vmem:[%s17114_s7 + $0x90] sm:$0xff] }
 0x64c   : > { %v6989_v40 = vsel %vm6980_vm7, %v6703_v47, %v6985_v17  ;;  %7300 = vmatpush.bf16.msrb.mxu2 %v8953_v23  ;;  %v8963_v47 = vld [vmem:[%s17114_s7 + $0xe8] sm:$0xff] }
 0x64d   : > { %v6691_v55 = vpop.f32.mrf.mxu1  ;;  %v7006_v11 = vpack.c.bf16 %v6989_v40, %v6989_v40 }
 0x64e   : > { %7287 = vmatpush.bf16.msrb.mxu1 %v8945_v16  ;;  %7274 = vmatpush.bf16.msrb.mxu3 %v8937_v45  ;;  %v6728_v29 = vpop.f32.mrf.mxu2  ;;  %v8961_v55 = vld [vmem:[%s17114_s7 + $0xd8] sm:$0xff] }
 0x650   : > { %v6715_v14 = vpop.f32.mrf.mxu3  ;;  %v6793_v2 = vpop.f32.mrf.mxu0  ;;  %7301 = vmatpush.bf16.msrb.mxu2 %v8952_v5 }
 0x651   : > { %v6716_v61 = vadd.f32 %v6715_v14, %v5605_v7 }
 0x652   : > { %7275 = vmatpush.bf16.msrb.mxu3 %v8936_v21  ;;  %7288 = vmatpush.bf16.msrb.mxu1 %v8944_v37  ;;  %v8964_v21 = vld [vmem:[%s17114_s7 + $0xf0] sm:$0xff] }
 0x653   : > { %v6729_v15 = vadd.f32 %v6728_v29, %v6716_v61 }
 0x654   : > { %7302 = vmatpush.bf16.msrb.mxu2 %v8951_v56 }
 0x655   : > { %v6754_v28 = vpop.f32.mrf.mxu1  ;;  %v6742_v44 = vadd.f32 %v6741_v0, %v6729_v15  ;;  %v8965_v0 = vld [vmem:[%s17114_s7 + $0xf8] sm:$0xff]  ;;  %v8960_v15 = vld [vmem:[%s17114_s7 + $0xd0] sm:$0xff] }
 0x656   : > { %7276 = vmatpush.bf16.msrb.mxu3 %v8935_v27  ;;  %7289 = vmatpush.bf16.msrb.mxu1 %v8943_v53  ;;  %v6730_v31 = vpop.f32.mrf.mxu2  ;;  %v8962_v27 = vld [vmem:[%s17114_s7 + $0xe0] sm:$0xff] }
 0x657   : > { %v6755_v62 = vadd.f32 %v6754_v28, %v6742_v44  ;;  %7309 = vmatpush.bf16.msra.mxu0 %v8965_v0  ;;  %v8958_v44 = vld [vmem:[%s17114_s7 + $0xc0] sm:$0xff] }
 0x658   : > { %v6717_v36 = vpop.f32.mrf.mxu3  ;;  %v6795_v18 = vpop.f32.mrf.mxu0  ;;  %7303 = vmatpush.bf16.msrb.mxu2 %v8950_v3 }
 0x659   : > { %v8959_v18 = vld [vmem:[%s17114_s7 + $0xc8] sm:$0xff] }
 0x65a   : > { %7277 = vmatpush.bf16.msrb.mxu3 %v8934_v39  ;;  %7290 = vmatpush.bf16.msrb.mxu1 %v8942_v43 }
 0x65b   : > { %7310 = vmatpush.bf16.msra.mxu0 %v8964_v21 }
 0x65d   : > { %7278 = vmatmul.bf16.vlgmr.msrb.gmra.mxu3 %v7006_v11  ;;  %v6756_v42 = vpop.f32.mrf.mxu1 }
 0x65e   : > { %v6780_v1 = vpop.f32.mrf.mxu2  ;;  %v5607_v42 = vperm.slane %v16980_v46, 3 }
 0x65f   : > { %7311 = vmatpush.bf16.msra.mxu0 %v8963_v47 }
 0x660   : > { %v6767_v12 = vpop.f32.mrf.mxu3  ;;  %v6832_v8 = vpop.f32.mrf.mxu0 }
 0x661   : > { %v6768_v4 = vadd.f32 %v6767_v12, %v6755_v62 }
 0x663   : > { %v6781_v41 = vadd.f32 %v6780_v1, %v6768_v4  ;;  %7312 = vmatpush.bf16.msra.mxu0 %v8962_v27 }
 0x665   : > { %v6794_v50 = vadd.f32 %v6793_v2, %v6781_v41 }
 0x666   : > { %v6782_v59 = vpop.f32.mrf.mxu2 }
 0x667   : > { %vm6981_vm15 = vcmp.ge.f32.partialorder %v6794_v50, 0.0  ;;  %v6986_v60 = vmul.f32 %v17016_v52, %v6794_v50  ;;  %7313 = vmatpush.bf16.msra.mxu0 %v8961_v55 }
 0x668   : > { %v6769_v48 = vpop.f32.mrf.mxu3  ;;  %v6834_v19 = vpop.f32.mrf.mxu0 }
 0x669   : > { %v6990_v58 = vsel %vm6981_vm15, %v6794_v50, %v6986_v60 }
 0x66a   : > { %v6997_v33 = vrot.slane %v6990_v58, 6  ;;  %v7007_v9 = vpack.c.bf16 %v6990_v58, %v6990_v58 }
 0x66b   : > { %7314 = vmatpush.bf16.msra.mxu0 %v8960_v15 }
 0x66c   : > { %v17043_v34 = vsel %vm18472_vm5, %v6989_v40, %v6997_v33  ;;  %7291 = vmatmul.bf16.vlgmr.msrb.gmra.mxu1 %v7007_v9 }
 0x66f   : > { %7315 = vmatpush.bf16.msra.mxu0 %v8959_v18 }
 0x670   : > { %v6884_v63 = vpop.f32.mrf.mxu0 }
 0x672   : > { %v6806_v24 = vpop.f32.mrf.mxu1 }
 0x673   : > { %v6807_v6 = vadd.f32 %v6806_v24, %v5606_v22  ;;  %7316 = vmatpush.bf16.msra.mxu0 %v8958_v44 }
 0x678   : > { %v6886_v54 = vpop.f32.mrf.mxu0 }
 0x67a   : > { %v6808_v26 = vpop.f32.mrf.mxu1 }
 0x67b   : > { %v10367_v26 = vld [vmem:[%s17115_s8] ss:$0 sm:$0xff] }
 0x67e   : > { %v6845_v25 = vpop.f32.mrf.mxu2 }
 0x680   : > { %v6819_v49 = vpop.f32.mrf.mxu3 }
 0x681   : > { %v6820_v32 = vadd.f32 %v6819_v49, %v6807_v6 }
 0x683   : > { %v6833_v30 = vadd.f32 %v6832_v8, %v6820_v32 }
 0x685   : > { %v6846_v39 = vadd.f32 %v6845_v25, %v6833_v30 }
 0x686   : > { %v6847_v13 = vpop.f32.mrf.mxu2 }
 0x688   : > { %v6910_v16 = vpop.f32.mrf.mxu0  ;;  %v6821_v45 = vpop.f32.mrf.mxu3 }
 0x690   : > { %v6912_v51 = vpop.f32.mrf.mxu0 }
 0x692   : > { %v6858_v57 = vpop.f32.mrf.mxu1 }
 0x693   : > { %v6859_v40 = vadd.f32 %v6858_v57, %v6846_v39 }
 0x69a   : > { %v6860_v17 = vpop.f32.mrf.mxu1 }
 0x69e   : > { %v6897_v37 = vpop.f32.mrf.mxu2 }
 0x69f   : > { %v6898_v62 = vadd.f32 %v6897_v37, %v5607_v42 }
 0x6a0   : > { %v6871_v29 = vpop.f32.mrf.mxu3 }
 0x6a1   : > { %v6872_v53 = vadd.f32 %v6871_v29, %v6859_v40  ;;  %v6911_v12 = vadd.f32 %v6910_v16, %v6898_v62 }
 0x6a3   : > { %v6885_v7 = vadd.f32 %v6884_v63, %v6872_v53 }
 0x6a5   : > { %vm6982_vm4 = vcmp.ge.f32.partialorder %v6885_v7, 0.0  ;;  %v6987_v11 = vmul.f32 %v17016_v52, %v6885_v7 }
 0x6a6   : > { %v6899_v14 = vpop.f32.mrf.mxu2 }
 0x6a7   : > { %v6991_v28 = vsel %vm6982_vm4, %v6885_v7, %v6987_v11 }
 0x6a8   : > { %v6962_v2 = vpop.f32.mrf.mxu0  ;;  %v7008_v43 = vpack.c.bf16 %v6991_v28, %v6991_v28  ;;  %v6873_v61 = vpop.f32.mrf.mxu3  ;;  %v6998_v9 = vrot.slane %v6991_v28, 4 }
 0x6aa   : > { %7304 = vmatmul.bf16.vlgmr.msrb.gmra.mxu2 %v7008_v43 }
 0x6b0   : > { %v6964_v31 = vpop.f32.mrf.mxu0 }
 0x6b2   : > { %v6923_v36 = vpop.f32.mrf.mxu1 }
 0x6b3   : > { %v6924_v8 = vadd.f32 %v6923_v36, %v6911_v12 }
 0x6ba   : > { %v6925_v1 = vpop.f32.mrf.mxu1 }
 0x6be   : > { %v6949_v4 = vpop.f32.mrf.mxu2 }
 0x6c0   : > { %v6936_v41 = vpop.f32.mrf.mxu3 }
 0x6c1   : > { %v6937_v50 = vadd.f32 %v6936_v41, %v6924_v8 }
 0x6c2   : > { %v6975_v10 = vpop.f32.mrf.mxu1 }
 0x6c3   : > { %v6950_v60 = vadd.f32 %v6949_v4, %v6937_v50 }
 0x6c5   : > { %v6963_v59 = vadd.f32 %v6962_v2, %v6950_v60 }
 0x6c6   : > { %v6951_v20 = vpop.f32.mrf.mxu2 }
 0x6c7   : > { %v6976_v48 = vadd.f32 %v6975_v10, %v6963_v59 }
 0x6c8   : > { %v6938_v46 = vpop.f32.mrf.mxu3 }
 0x6c9   : > { %vm6983_vm2 = vcmp.ge.f32.partialorder %v6976_v48, 0.0  ;;  %v6988_v58 = vmul.f32 %v17016_v52, %v6976_v48 }
 0x6ca   : > { %v6977_v19 = vpop.f32.mrf.mxu1 }
 0x6cb   : > { %v6992_v33 = vsel %vm6983_vm2, %v6976_v48, %v6988_v58 }
 0x6cc   : > { %v6999_v38 = vrot.slane %v6992_v33, 2  ;;  %v7009_v24 = vpack.c.bf16 %v6992_v33, %v6992_v33 }
 0x6ce   : > { %v7002_v35 = vsel %vm7001_vm10, %v6998_v9, %v6999_v38  ;;  %7317 = vmatmul.bf16.vlgmr.msra.gmra.mxu0 %v7009_v24 }
 0x6cf   : > { %v7003_v63 = vsel %vm18473_vm13, %v17043_v34, %v7002_v35 }
 0x6d0   : > { %7005 = vst [vmem:[%s428_s27] sm:$0xff] %v7003_v63 }
 0x6e0   : > { %v7279_v23 = vpop.f32.mrf.mxu3 }
 0x6e1   : > { %v7280_v54 = vadd.f32 %v10367_v26, %v7279_v23 }
 0x6e8   : > { %v7281_v52 = vpop.f32.mrf.mxu3 }
 0x6e9   : > { %v7292_v5 = vpop.f32.mrf.mxu1 }
 0x6ea   : > { %v7293_v25 = vadd.f32 %v7292_v5, %v7280_v54 }
 0x6f1   : > { %v7294_v49 = vpop.f32.mrf.mxu1 }
 0x72d   : > { %v7305_v13 = vpop.f32.mrf.mxu2 }
 0x72e   : > { %v7306_v56 = vadd.f32 %v7305_v13, %v7293_v25 }
 0x735   : > { %v7307_v16 = vpop.f32.mrf.mxu2 }
 0x74b   : > { %v7318_v34 = vpop.f32.mrf.mxu0 }
 0x74c   : > { %v7319_v45 = vadd.f32 %v7318_v34, %v7306_v56 }
 0x74e   : > { %7322 = vst [vmem:[%s432_s17] sm:$0x3] %v7319_v45 }
 0x753   : > { %v7320_v3 = vpop.f32.mrf.mxu0 }
 0x754 PF: > { %s23_s19 = sadd.s32 1, %s10380_s19  }
 0x755   : > { %p20_p4 = scmp.ge.s32.totalorder %s23_s19, 4  }
 0x757   :  { %22 = sbr.rel (!%p20_p4) target bundleno = 2 (0x2), region = 111 }

</bundles_post_ra>
